<compile_context>
chip_gen: v6e
topology: v6e:2x2x1
jax: 0.10.0
libtpu: 0.0.40
codegen_flags: <defaults>
</compile_context>

<pallas_src>
import functools

import jax
import jax.numpy as jnp
import numpy as np
from jax import lax
from jax.experimental import pallas as pl
from jax.experimental.pallas import tpu as pltpu

TAU = 2.0
V_TH = 1.0
BN_EPS = 1e-5


def _round_up(x, m):
  return (x + m - 1) // m * m


def _bf16_round(w):
  """Round to bf16-representable f32 so bf16 MXU kernels match the f32 ref."""
  return w.astype(jnp.bfloat16).astype(jnp.float32)


def _vmem_limit_bytes():
  """Per-generation scoped-VMEM limit (review: raise well past the defaults).
  v5e/v6e have 128 MiB physical VMEM -> ~96 MiB limit; v7x has 64 MiB ->
  40 MiB (leave double-buffer headroom)."""
  try:
    phys = pltpu.get_tpu_info().vmem_capacity_bytes
  except Exception:
    phys = 64 * 1024 * 1024
  return 96 * 1024 * 1024 if phys >= 128 * 1024 * 1024 else 40 * 1024 * 1024


def _lane_multiple(cout):
  """Output-channel lane padding: 128 everywhere; 256 on v6e/v7x (2x256x256
  MXU) when Cout itself exceeds 128 (v5e keeps 128: 4x128x128 MXU)."""
  if cout <= 128:
    return 128
  try:
    kind = jax.devices()[0].device_kind.lower()
  except Exception:
    kind = ""
  return 128 if "v5" in kind else 256


def _pick_rows_per_step(total_rows, max_rows=8):
  """Largest divisor of total_rows that is <= max_rows, preferring one that
  leaves >= 2 grid steps on this axis (v7x megacore / pipelining)."""
  divs = [d for d in range(1, min(total_rows, max_rows) + 1)
          if total_rows % d == 0]
  two_step = [d for d in divs if total_rows // d >= 2]
  return max(two_step) if two_step else max(divs)


# ----------------------------------------------------------------------------
# Pallas kernels
# ----------------------------------------------------------------------------
def _make_conv1_kernel(*, stride, tr, ho, wo, hxp, pad, c1p):
  """LIF(x) -> conv3x3(stride) -> BN1 -> LIF for `tr` rows of the ZERO-PADDED
  conv1-output map (rows -1 / Ho and cols -1 / Wo are written as zeros: they
  are exactly conv2's zero padding, so conv2 needs no wrapper-side pad).

  x_ref is the whole spatially pre-padded input, VMEM-resident (constant
  index_map); taps are gathered in-kernel with strided pl.ds windows, and the
  LIF threshold on x is applied on the loaded taps (no standalone LIF pass).
  Per-tap contraction (K = Cin) keeps the resident x at its natural channel
  width; padding Cin to a lane multiple is a further knob for large-Cin
  layers."""

  def kernel(x_ref, w_ref, s_ref, b_ref, o_ref):
    n = pl.program_id(0)
    rb = pl.program_id(1)
    # Zero the block first: provides conv2's zero-padding rows/columns.
    o_ref[...] = jnp.zeros(o_ref.shape, o_ref.dtype)
    for t in range(tr):
      p_row = rb * tr + t                 # row index in the padded output map
      j = p_row - 1                       # conv1 output row (-1 / ho = pad)
      valid = jnp.logical_and(j >= 0, j < ho).astype(jnp.float32)
      acc = jnp.zeros((wo, c1p), jnp.float32)
      for dy in range(3):
        # padded-x row index; >= 0 for j = -1 because the x pre-pad is s+1.
        a = n * hxp + pad + stride * j + dy - 1
        for dx in range(3):
          c0 = pad + dx - 1               # static column-window start
          col = pl.ds(c0, wo) if stride == 1 else pl.ds(c0, wo, stride)
          xt = x_ref[a, col, :]                                  # (wo, cin)
          spk = (xt * (1.0 / TAU) >= V_TH).astype(jnp.bfloat16)  # LIF on x
          acc += jnp.dot(spk, w_ref[3 * dy + dx],
                         preferred_element_type=jnp.float32)
      y = (acc * s_ref[...] + b_ref[...]) * valid   # zero the padding rows
      spk2 = (y * (1.0 / TAU) >= V_TH).astype(o_ref.dtype)       # second LIF
      o_ref[t, pl.ds(1, wo), :] = spk2
  return kernel


def _make_conv2_kernel(*, trb, wo, hop2, hxp, xpad, coutp, has_shortcut):
  """conv3x3(stride 1) over the zero-padded spike map -> BN2 -> + shortcut.
  Shortcut = BN(Conv1x1(MaxPool2x2(x))) fused in-kernel when present, else
  the identity residual (x itself, channel-padded by the wrapper)."""

  def kernel(*refs):
    if has_shortcut:
      (spk_ref, w2_ref, s2_ref, b2_ref, x_ref, ws_ref, ss_ref, bs_ref,
       o_ref) = refs
    else:
      spk_ref, w2_ref, s2_ref, b2_ref, x_ref, o_ref = refs
    n = pl.program_id(0)
    rb = pl.program_id(1)
    for t in range(trb):
      r = rb * trb + t                    # output row
      base = n * hop2 + r                 # padded spike-map row for tap dy=0
      acc = jnp.zeros((wo, coutp), jnp.float32)
      for dy in range(3):
        for dx in range(3):
          tap = spk_ref[base + dy, pl.ds(dx, wo), :]             # (wo, c1p)
          acc += jnp.dot(tap, w2_ref[3 * dy + dx],
                         preferred_element_type=jnp.float32)
      y = acc * s2_ref[...] + b2_ref[...]
      if has_shortcut:
        # MaxPool2x2(stride 2) over interior x, fused with the 1x1 conv + BN.
        m = None
        for p in range(2):
          a = n * hxp + xpad + 2 * r + p
          for q in range(2):
            v = x_ref[a, pl.ds(xpad + q, wo, 2), :]              # (wo, cin)
            m = v if m is None else jnp.maximum(m, v)
        accs = jnp.dot(m.astype(jnp.bfloat16), ws_ref[...],
                       preferred_element_type=jnp.float32)
        res = accs * ss_ref[...] + bs_ref[...]
      else:
        # Identity shortcut: x row (channels pre-padded to coutp, f32).
        res = x_ref[n * hxp + xpad + r, pl.ds(xpad, wo), :]
      # Residual add kept in f32 to hold the 1e-3 tolerance (bf16 is a knob).
      o_ref[t, :, :] = (y + res).astype(o_ref.dtype)
  return kernel


# ----------------------------------------------------------------------------
# Wrapper
# ----------------------------------------------------------------------------
def block_forward(x, params, *, stride):
  """Full Block forward.  x: (N, H, W, Cin) NHWC float32."""
  N, H, W, Cin = x.shape
  Cout = params["w2"].shape[-1]
  has_shortcut = (stride != 1) or (Cin != Cout)
  if has_shortcut:
    # The PyTorch module's shortcut always max-pools 2x2; it is only shape-
    # consistent with the residual branch when stride == 2 and H, W are even.
    assert stride == 2 and H % 2 == 0 and W % 2 == 0, (
        "shortcut path assumes stride 2 with even spatial dims")

  lane = _lane_multiple(Cout)
  C1P = _round_up(Cout, lane)         # conv1 output channels (lane padded)
  CoutP = _round_up(Cout, lane)       # final output channels (lane padded)
  Ho = (H + 2 - 3) // stride + 1
  Wo = (W + 2 - 3) // stride + 1
  pad = stride + 1                    # x spatial pre-pad (covers all taps)
  Hxp, Wxp = H + 2 * pad, W + 2 * pad
  Hop2, Wop2 = Ho + 2, Wo + 2

  cparams = pltpu.CompilerParams(
      dimension_semantics=("parallel", "parallel"),
      vmem_limit_bytes=_vmem_limit_bytes())

  # --- spatially pre-padded x, kept VMEM-resident by both kernels ----------
  cin_k = Cin if has_shortcut else CoutP
  xp = x if has_shortcut else jnp.pad(x, ((0, 0),) * 3 + ((0, CoutP - Cin),))
  xp = jnp.pad(xp, ((0, 0), (pad, pad), (pad, pad), (0, 0)))
  xp = xp.reshape(N * Hxp, Wxp, cin_k)

  # --- folded weights / BN vectors (lane padded, bf16 matmul operands) -----
  w1 = jnp.pad(params["w1"].reshape(9, Cin, Cout).astype(jnp.bfloat16),
               ((0, 0), (0, cin_k - Cin), (0, C1P - Cout)))
  s1 = jnp.pad(params["bn1_scale"].astype(jnp.float32), (0, C1P - Cout),
               constant_values=1.0).reshape(1, C1P)
  b1 = jnp.pad(params["bn1_shift"].astype(jnp.float32),
               (0, C1P - Cout)).reshape(1, C1P)
  w2 = jnp.pad(params["w2"].reshape(9, Cout, Cout).astype(jnp.bfloat16),
               ((0, 0), (0, C1P - Cout), (0, CoutP - Cout)))
  s2 = jnp.pad(params["bn2_scale"].astype(jnp.float32), (0, CoutP - Cout),
               constant_values=1.0).reshape(1, CoutP)
  b2 = jnp.pad(params["bn2_shift"].astype(jnp.float32),
               (0, CoutP - Cout)).reshape(1, CoutP)

  const3 = lambda n, rb: (0, 0, 0)
  const2 = lambda n, rb: (0, 0)

  # --- kernel A: LIF -> conv3x3(stride) -> BN1 -> LIF  (padded spike map) --
  tr_a = _pick_rows_per_step(Hop2)
  nrb_a = Hop2 // tr_a
  spk2 = pl.pallas_call(
      _make_conv1_kernel(stride=stride, tr=tr_a, ho=Ho, wo=Wo, hxp=Hxp,
                         pad=pad, c1p=C1P),
      out_shape=jax.ShapeDtypeStruct((N * Hop2, Wop2, C1P), jnp.bfloat16),
      grid=(N, nrb_a),
      in_specs=[
          pl.BlockSpec((N * Hxp, Wxp, cin_k), const3),   # x, VMEM-resident
          pl.BlockSpec((9, cin_k, C1P), const3),         # per-tap weights
          pl.BlockSpec((1, C1P), const2),                # BN1 scale
          pl.BlockSpec((1, C1P), const2),                # BN1 shift
      ],
      out_specs=pl.BlockSpec((tr_a, Wop2, C1P),
                             lambda n, rb: (n * nrb_a + rb, 0, 0)),
      compiler_params=cparams,
  )(xp, w1, s1, b1)

  # --- kernel B: conv3x3(s=1) -> BN2 -> + fused shortcut -------------------
  trb = _pick_rows_per_step(Ho)
  nrb_b = Ho // trb
  in_specs = [
      pl.BlockSpec((N * Hop2, Wop2, C1P), const3),       # padded spike map
      pl.BlockSpec((9, C1P, CoutP), const3),             # per-tap weights
      pl.BlockSpec((1, CoutP), const2),                  # BN2 scale
      pl.BlockSpec((1, CoutP), const2),                  # BN2 shift
      pl.BlockSpec((N * Hxp, Wxp, cin_k), const3),       # x (shortcut/ident)
  ]
  args = [spk2, w2, s2, b2, xp]
  if has_shortcut:
    ws = jnp.pad(params["ws"].reshape(Cin, Cout).astype(jnp.bfloat16),
                 ((0, 0), (0, CoutP - Cout)))
    ss = jnp.pad(params["bns_scale"].astype(jnp.float32), (0, CoutP - Cout),
                 constant_values=1.0).reshape(1, CoutP)
    bs = jnp.pad(params["bns_shift"].astype(jnp.float32),
                 (0, CoutP - Cout)).reshape(1, CoutP)
    in_specs += [pl.BlockSpec((Cin, CoutP), const2),
                 pl.BlockSpec((1, CoutP), const2),
                 pl.BlockSpec((1, CoutP), const2)]
    args += [ws, ss, bs]

  out = pl.pallas_call(
      _make_conv2_kernel(trb=trb, wo=Wo, hop2=Hop2, hxp=Hxp, xpad=pad,
                         coutp=CoutP, has_shortcut=has_shortcut),
      out_shape=jax.ShapeDtypeStruct((N * Ho, Wo, CoutP), jnp.float32),
      grid=(N, nrb_b),
      in_specs=in_specs,
      out_specs=pl.BlockSpec((trb, Wo, CoutP),
                             lambda n, rb: (n * nrb_b + rb, 0, 0)),
      compiler_params=cparams,
  )(*args)

  # Single un-pad / reshape at the very end (review item #2).
  return out.reshape(N, Ho, Wo, CoutP)[..., :Cout]


# ----------------------------------------------------------------------------
# Deterministic parameter construction (fresh synthetic weights)
# ----------------------------------------------------------------------------
def _bn_fold(key, c):
  k1, k2, k3, k4 = jax.random.split(key, 4)
  gamma = jax.random.uniform(k1, (c,), jnp.float32, 0.5, 1.5)
  beta = 0.1 * jax.random.normal(k2, (c,), jnp.float32)
  mean = 0.1 * jax.random.normal(k3, (c,), jnp.float32)
  var = jax.random.uniform(k4, (c,), jnp.float32, 0.5, 1.5)
  scale = gamma / jnp.sqrt(var + BN_EPS)
  shift = beta - mean * scale
  return scale, shift


def init_params(key, cin, cout, has_shortcut):
  ks = jax.random.split(key, 6)
  p = {}
  # Weights rounded to bf16-representable values so the bf16-MXU kernels and
  # the f32 reference compute identical products.
  p["w1"] = _bf16_round(
      jax.random.normal(ks[0], (3, 3, cin, cout), jnp.float32) / np.sqrt(9 * cin))
  p["bn1_scale"], p["bn1_shift"] = _bn_fold(ks[1], cout)
  p["w2"] = _bf16_round(
      jax.random.normal(ks[2], (3, 3, cout, cout), jnp.float32) / np.sqrt(9 * cout))
  p["bn2_scale"], p["bn2_shift"] = _bn_fold(ks[3], cout)
  if has_shortcut:
    p["ws"] = _bf16_round(
        jax.random.normal(ks[4], (1, 1, cin, cout), jnp.float32) / np.sqrt(cin))
    p["bns_scale"], p["bns_shift"] = _bn_fold(ks[5], cout)
  return p


# ----------------------------------------------------------------------------
# Pure-JAX reference (for correctness check)
# ----------------------------------------------------------------------------
def _lif_ref(x):
  return (x / TAU >= V_TH).astype(x.dtype)


def _conv_ref(x, w, stride, pad):
  return lax.conv_general_dilated(
      x, w, window_strides=(stride, stride), padding=((pad, pad), (pad, pad)),
      dimension_numbers=("NHWC", "HWIO", "NHWC"))


def block_ref(x, params, *, stride):
  Cin = x.shape[-1]
  Cout = params["w2"].shape[-1]
  h = _lif_ref(x)
  h = _conv_ref(h, params["w1"], stride, 1) * params["bn1_scale"] + params["bn1_shift"]
  h = _lif_ref(h)
  h = _conv_ref(h, params["w2"], 1, 1) * params["bn2_scale"] + params["bn2_shift"]
  if stride != 1 or Cin != Cout:
    N, H, W, C = x.shape
    sp = x.reshape(N, H // 2, 2, W // 2, 2, C).max(axis=(2, 4))
    sc = _conv_ref(sp, params["ws"], 1, 0) * params["bns_scale"] + params["bns_shift"]
  else:
    sc = x
  return h + sc


# ----------------------------------------------------------------------------
if __name__ == "__main__":
  N, H, W = 2, 16, 16
  in_channels, out_channels, stride = 4, 8, 2  # shortcut path exercised

  key = jax.random.PRNGKey(0)
  kx, kp = jax.random.split(key)
  # scale so a realistic fraction of LIF inputs cross the firing threshold;
  # rounded to bf16-representable values (see init_params comment).
  x = _bf16_round(3.0 * jax.random.normal(kx, (N, H, W, in_channels), jnp.float32))
  params = init_params(kp, in_channels, out_channels,
                       has_shortcut=(stride != 1 or in_channels != out_channels))

  fwd = jax.jit(functools.partial(block_forward, stride=stride))
  out = jax.block_until_ready(fwd(x, params))

  ref = block_ref(x, params, stride=stride)
  np.testing.assert_allclose(np.asarray(out), np.asarray(ref),
                             atol=1e-3, rtol=1e-3)

  assert out.shape == (N, H // stride, W // stride, out_channels)
  print("KERNEL_OK")
</pallas_src>

<mosaic_0001>
module attributes {stable_mosaic.version = 11 : i64} {
  func.func @kernel(%arg0: i32, %arg1: i32, %arg2: memref<44x22x4xf32, #tpu.memory_space<vmem>>, %arg3: memref<9x4x128xbf16, #tpu.memory_space<vmem>>, %arg4: memref<1x128xf32, #tpu.memory_space<vmem>>, %arg5: memref<1x128xf32, #tpu.memory_space<vmem>>, %arg6: memref<5x10x128xbf16, #tpu.memory_space<vmem>>) attributes {dimension_semantics = [#tpu.dimension_semantics<parallel>, #tpu.dimension_semantics<parallel>], iteration_bounds = array<i64: 2, 2>, scalar_prefetch = 0 : i64, scratch_operands = 0 : i64, tpu.core_type = #tpu.core_type<tc>, window_params = [{pipeline_mode = #tpu.pipeline_mode<synchronous>, transform_indices = @transform_0, window_bounds = array<i64: 44, 22, 4>}, {pipeline_mode = #tpu.pipeline_mode<synchronous>, transform_indices = @transform_1, window_bounds = array<i64: 9, 4, 128>}, {pipeline_mode = #tpu.pipeline_mode<synchronous>, transform_indices = @transform_2, window_bounds = array<i64: 1, 128>}, {pipeline_mode = #tpu.pipeline_mode<synchronous>, transform_indices = @transform_3, window_bounds = array<i64: 1, 128>}, {transform_indices = @transform_4, window_bounds = array<i64: 5, 10, 128>}]} {
    %cst = arith.constant 0.000000e+00 : bf16
    %0 = vector.broadcast %cst : bf16 to vector<5x10x128xbf16>
    %c0 = arith.constant 0 : index
    %c0_0 = arith.constant 0 : index
    %c0_1 = arith.constant 0 : index
    %1 = vector.load %arg6[%c0, %c0_0, %c0_1] : memref<5x10x128xbf16, #tpu.memory_space<vmem>>, vector<5x10x128xbf16>
    tpu.vector_store %arg6[%c0, %c0_0, %c0_1], %0 {strides = array<i32>} : memref<5x10x128xbf16, #tpu.memory_space<vmem>>, vector<5x10x128xbf16>,
    %c5_i32 = arith.constant 5 : i32
    %2 = arith.muli %arg1, %c5_i32 : i32
    %c0_i32 = arith.constant 0 : i32
    %3 = arith.addi %2, %c0_i32 : i32
    %c1_i32 = arith.constant 1 : i32
    %4 = arith.subi %3, %c1_i32 : i32
    %c0_i32_2 = arith.constant 0 : i32
    %5 = arith.cmpi sge, %4, %c0_i32_2 : i32
    %c8_i32 = arith.constant 8 : i32
    %6 = arith.cmpi slt, %4, %c8_i32 : i32
    %7 = arith.andi %5, %6 : i1
    %8 = arith.extui %7 : i1 to i32
    %9 = arith.sitofp %8 : i32 to f32
    %cst_3 = arith.constant 0.000000e+00 : f32
    %10 = vector.broadcast %cst_3 : f32 to vector<8x128xf32>
    %c22_i32 = arith.constant 22 : i32
    %11 = arith.muli %arg0, %c22_i32 : i32
    %c3_i32 = arith.constant 3 : i32
    %12 = arith.addi %11, %c3_i32 : i32
    %c2_i32 = arith.constant 2 : i32
    %13 = arith.muli %c2_i32, %4 : i32
    %14 = arith.addi %12, %13 : i32
    %c0_i32_4 = arith.constant 0 : i32
    %15 = arith.addi %14, %c0_i32_4 : i32
    %c1_i32_5 = arith.constant 1 : i32
    %16 = arith.subi %15, %c1_i32_5 : i32
    %17 = arith.index_cast %16 : i32 to index
    %c2 = arith.constant 2 : index
    %c0_6 = arith.constant 0 : index
    %18 = tpu.strided_load %arg2[%17, %c2, %c0_6] {strides = array<i32: 1, 2, 1>} : memref<44x22x4xf32, #tpu.memory_space<vmem>>, vector<1x8x4xf32>
    %19 = vector.shape_cast %18 : vector<1x8x4xf32> to vector<8x4xf32>
    %cst_7 = arith.constant 5.000000e-01 : f32
    %20 = vector.broadcast %cst_7 : f32 to vector<8x4xf32>
    %21 = arith.mulf %19, %20 : vector<8x4xf32>
    %cst_8 = arith.constant 1.000000e+00 : f32
    %22 = vector.broadcast %cst_8 : f32 to vector<8x4xf32>
    %23 = arith.cmpf oge, %21, %22 : vector<8x4xf32>
    %24 = arith.extui %23 : vector<8x4xi1> to vector<8x4xi32>
    %25 = arith.sitofp %24 : vector<8x4xi32> to vector<8x4xf32>
    %26 = arith.truncf %25 : vector<8x4xf32> to vector<8x4xbf16>
    %c0_9 = arith.constant 0 : index
    %c0_10 = arith.constant 0 : index
    %c0_11 = arith.constant 0 : index
    %27 = vector.load %arg3[%c0_9, %c0_10, %c0_11] : memref<9x4x128xbf16, #tpu.memory_space<vmem>>, vector<1x4x128xbf16>
    %28 = vector.shape_cast %27 : vector<1x4x128xbf16> to vector<4x128xbf16>
    %cst_12 = arith.constant dense<0.000000e+00> : vector<8x128xf32>
    %29 = tpu.matmul %26, %28, %cst_12 {dimension_numbers = #tpu.dot_dimension_numbers<[1], [0], [0], [1], [0, 0, 1, 1], [], []>} : vector<8x4xbf16>, vector<4x128xbf16>, vector<8x128xf32> -> vector<8x128xf32>
    %30 = arith.addf %10, %29 : vector<8x128xf32>
    %31 = arith.index_cast %16 : i32 to index
    %c3 = arith.constant 3 : index
    %c0_13 = arith.constant 0 : index
    %32 = tpu.strided_load %arg2[%31, %c3, %c0_13] {strides = array<i32: 1, 2, 1>} : memref<44x22x4xf32, #tpu.memory_space<vmem>>, vector<1x8x4xf32>
    %33 = vector.shape_cast %32 : vector<1x8x4xf32> to vector<8x4xf32>
    %cst_14 = arith.constant 5.000000e-01 : f32
    %34 = vector.broadcast %cst_14 : f32 to vector<8x4xf32>
    %35 = arith.mulf %33, %34 : vector<8x4xf32>
    %cst_15 = arith.constant 1.000000e+00 : f32
    %36 = vector.broadcast %cst_15 : f32 to vector<8x4xf32>
    %37 = arith.cmpf oge, %35, %36 : vector<8x4xf32>
    %38 = arith.extui %37 : vector<8x4xi1> to vector<8x4xi32>
    %39 = arith.sitofp %38 : vector<8x4xi32> to vector<8x4xf32>
    %40 = arith.truncf %39 : vector<8x4xf32> to vector<8x4xbf16>
    %c1 = arith.constant 1 : index
    %c0_16 = arith.constant 0 : index
    %c0_17 = arith.constant 0 : index
    %41 = vector.load %arg3[%c1, %c0_16, %c0_17] : memref<9x4x128xbf16, #tpu.memory_space<vmem>>, vector<1x4x128xbf16>
    %42 = vector.shape_cast %41 : vector<1x4x128xbf16> to vector<4x128xbf16>
    %cst_18 = arith.constant dense<0.000000e+00> : vector<8x128xf32>
    %43 = tpu.matmul %40, %42, %cst_18 {dimension_numbers = #tpu.dot_dimension_numbers<[1], [0], [0], [1], [0, 0, 1, 1], [], []>} : vector<8x4xbf16>, vector<4x128xbf16>, vector<8x128xf32> -> vector<8x128xf32>
    %44 = arith.addf %30, %43 : vector<8x128xf32>
    %45 = arith.index_cast %16 : i32 to index
    %c4 = arith.constant 4 : index
    %c0_19 = arith.constant 0 : index
    %46 = tpu.strided_load %arg2[%45, %c4, %c0_19] {strides = array<i32: 1, 2, 1>} : memref<44x22x4xf32, #tpu.memory_space<vmem>>, vector<1x8x4xf32>
    %47 = vector.shape_cast %46 : vector<1x8x4xf32> to vector<8x4xf32>
    %cst_20 = arith.constant 5.000000e-01 : f32
    %48 = vector.broadcast %cst_20 : f32 to vector<8x4xf32>
    %49 = arith.mulf %47, %48 : vector<8x4xf32>
    %cst_21 = arith.constant 1.000000e+00 : f32
    %50 = vector.broadcast %cst_21 : f32 to vector<8x4xf32>
    %51 = arith.cmpf oge, %49, %50 : vector<8x4xf32>
    %52 = arith.extui %51 : vector<8x4xi1> to vector<8x4xi32>
    %53 = arith.sitofp %52 : vector<8x4xi32> to vector<8x4xf32>
    %54 = arith.truncf %53 : vector<8x4xf32> to vector<8x4xbf16>
    %c2_22 = arith.constant 2 : index
    %c0_23 = arith.constant 0 : index
    %c0_24 = arith.constant 0 : index
    %55 = vector.load %arg3[%c2_22, %c0_23, %c0_24] : memref<9x4x128xbf16, #tpu.memory_space<vmem>>, vector<1x4x128xbf16>
    %56 = vector.shape_cast %55 : vector<1x4x128xbf16> to vector<4x128xbf16>
    %cst_25 = arith.constant dense<0.000000e+00> : vector<8x128xf32>
    %57 = tpu.matmul %54, %56, %cst_25 {dimension_numbers = #tpu.dot_dimension_numbers<[1], [0], [0], [1], [0, 0, 1, 1], [], []>} : vector<8x4xbf16>, vector<4x128xbf16>, vector<8x128xf32> -> vector<8x128xf32>
    %58 = arith.addf %44, %57 : vector<8x128xf32>
    %c22_i32_26 = arith.constant 22 : i32
    %59 = arith.muli %arg0, %c22_i32_26 : i32
    %c3_i32_27 = arith.constant 3 : i32
    %60 = arith.addi %59, %c3_i32_27 : i32
    %c2_i32_28 = arith.constant 2 : i32
    %61 = arith.muli %c2_i32_28, %4 : i32
    %62 = arith.addi %60, %61 : i32
    %c1_i32_29 = arith.constant 1 : i32
    %63 = arith.addi %62, %c1_i32_29 : i32
    %c1_i32_30 = arith.constant 1 : i32
    %64 = arith.subi %63, %c1_i32_30 : i32
    %65 = arith.index_cast %64 : i32 to index
    %c2_31 = arith.constant 2 : index
    %c0_32 = arith.constant 0 : index
    %66 = tpu.strided_load %arg2[%65, %c2_31, %c0_32] {strides = array<i32: 1, 2, 1>} : memref<44x22x4xf32, #tpu.memory_space<vmem>>, vector<1x8x4xf32>
    %67 = vector.shape_cast %66 : vector<1x8x4xf32> to vector<8x4xf32>
    %cst_33 = arith.constant 5.000000e-01 : f32
    %68 = vector.broadcast %cst_33 : f32 to vector<8x4xf32>
    %69 = arith.mulf %67, %68 : vector<8x4xf32>
    %cst_34 = arith.constant 1.000000e+00 : f32
    %70 = vector.broadcast %cst_34 : f32 to vector<8x4xf32>
    %71 = arith.cmpf oge, %69, %70 : vector<8x4xf32>
    %72 = arith.extui %71 : vector<8x4xi1> to vector<8x4xi32>
    %73 = arith.sitofp %72 : vector<8x4xi32> to vector<8x4xf32>
    %74 = arith.truncf %73 : vector<8x4xf32> to vector<8x4xbf16>
    %c3_35 = arith.constant 3 : index
    %c0_36 = arith.constant 0 : index
    %c0_37 = arith.constant 0 : index
    %75 = vector.load %arg3[%c3_35, %c0_36, %c0_37] : memref<9x4x128xbf16, #tpu.memory_space<vmem>>, vector<1x4x128xbf16>
    %76 = vector.shape_cast %75 : vector<1x4x128xbf16> to vector<4x128xbf16>
    %cst_38 = arith.constant dense<0.000000e+00> : vector<8x128xf32>
    %77 = tpu.matmul %74, %76, %cst_38 {dimension_numbers = #tpu.dot_dimension_numbers<[1], [0], [0], [1], [0, 0, 1, 1], [], []>} : vector<8x4xbf16>, vector<4x128xbf16>, vector<8x128xf32> -> vector<8x128xf32>
    %78 = arith.addf %58, %77 : vector<8x128xf32>
    %79 = arith.index_cast %64 : i32 to index
    %c3_39 = arith.constant 3 : index
    %c0_40 = arith.constant 0 : index
    %80 = tpu.strided_load %arg2[%79, %c3_39, %c0_40] {strides = array<i32: 1, 2, 1>} : memref<44x22x4xf32, #tpu.memory_space<vmem>>, vector<1x8x4xf32>
    %81 = vector.shape_cast %80 : vector<1x8x4xf32> to vector<8x4xf32>
    %cst_41 = arith.constant 5.000000e-01 : f32
    %82 = vector.broadcast %cst_41 : f32 to vector<8x4xf32>
    %83 = arith.mulf %81, %82 : vector<8x4xf32>
    %cst_42 = arith.constant 1.000000e+00 : f32
    %84 = vector.broadcast %cst_42 : f32 to vector<8x4xf32>
    %85 = arith.cmpf oge, %83, %84 : vector<8x4xf32>
    %86 = arith.extui %85 : vector<8x4xi1> to vector<8x4xi32>
    %87 = arith.sitofp %86 : vector<8x4xi32> to vector<8x4xf32>
    %88 = arith.truncf %87 : vector<8x4xf32> to vector<8x4xbf16>
    %c4_43 = arith.constant 4 : index
    %c0_44 = arith.constant 0 : index
    %c0_45 = arith.constant 0 : index
    %89 = vector.load %arg3[%c4_43, %c0_44, %c0_45] : memref<9x4x128xbf16, #tpu.memory_space<vmem>>, vector<1x4x128xbf16>
    %90 = vector.shape_cast %89 : vector<1x4x128xbf16> to vector<4x128xbf16>
    %cst_46 = arith.constant dense<0.000000e+00> : vector<8x128xf32>
    %91 = tpu.matmul %88, %90, %cst_46 {dimension_numbers = #tpu.dot_dimension_numbers<[1], [0], [0], [1], [0, 0, 1, 1], [], []>} : vector<8x4xbf16>, vector<4x128xbf16>, vector<8x128xf32> -> vector<8x128xf32>
    %92 = arith.addf %78, %91 : vector<8x128xf32>
    %93 = arith.index_cast %64 : i32 to index
    %c4_47 = arith.constant 4 : index
    %c0_48 = arith.constant 0 : index
    %94 = tpu.strided_load %arg2[%93, %c4_47, %c0_48] {strides = array<i32: 1, 2, 1>} : memref<44x22x4xf32, #tpu.memory_space<vmem>>, vector<1x8x4xf32>
    %95 = vector.shape_cast %94 : vector<1x8x4xf32> to vector<8x4xf32>
    %cst_49 = arith.constant 5.000000e-01 : f32
    %96 = vector.broadcast %cst_49 : f32 to vector<8x4xf32>
    %97 = arith.mulf %95, %96 : vector<8x4xf32>
    %cst_50 = arith.constant 1.000000e+00 : f32
    %98 = vector.broadcast %cst_50 : f32 to vector<8x4xf32>
    %99 = arith.cmpf oge, %97, %98 : vector<8x4xf32>
    %100 = arith.extui %99 : vector<8x4xi1> to vector<8x4xi32>
    %101 = arith.sitofp %100 : vector<8x4xi32> to vector<8x4xf32>
    %102 = arith.truncf %101 : vector<8x4xf32> to vector<8x4xbf16>
    %c5 = arith.constant 5 : index
    %c0_51 = arith.constant 0 : index
    %c0_52 = arith.constant 0 : index
    %103 = vector.load %arg3[%c5, %c0_51, %c0_52] : memref<9x4x128xbf16, #tpu.memory_space<vmem>>, vector<1x4x128xbf16>
    %104 = vector.shape_cast %103 : vector<1x4x128xbf16> to vector<4x128xbf16>
    %cst_53 = arith.constant dense<0.000000e+00> : vector<8x128xf32>
    %105 = tpu.matmul %102, %104, %cst_53 {dimension_numbers = #tpu.dot_dimension_numbers<[1], [0], [0], [1], [0, 0, 1, 1], [], []>} : vector<8x4xbf16>, vector<4x128xbf16>, vector<8x128xf32> -> vector<8x128xf32>
    %106 = arith.addf %92, %105 : vector<8x128xf32>
    %c22_i32_54 = arith.constant 22 : i32
    %107 = arith.muli %arg0, %c22_i32_54 : i32
    %c3_i32_55 = arith.constant 3 : i32
    %108 = arith.addi %107, %c3_i32_55 : i32
    %c2_i32_56 = arith.constant 2 : i32
    %109 = arith.muli %c2_i32_56, %4 : i32
    %110 = arith.addi %108, %109 : i32
    %c2_i32_57 = arith.constant 2 : i32
    %111 = arith.addi %110, %c2_i32_57 : i32
    %c1_i32_58 = arith.constant 1 : i32
    %112 = arith.subi %111, %c1_i32_58 : i32
    %113 = arith.index_cast %112 : i32 to index
    %c2_59 = arith.constant 2 : index
    %c0_60 = arith.constant 0 : index
    %114 = tpu.strided_load %arg2[%113, %c2_59, %c0_60] {strides = array<i32: 1, 2, 1>} : memref<44x22x4xf32, #tpu.memory_space<vmem>>, vector<1x8x4xf32>
    %115 = vector.shape_cast %114 : vector<1x8x4xf32> to vector<8x4xf32>
    %cst_61 = arith.constant 5.000000e-01 : f32
    %116 = vector.broadcast %cst_61 : f32 to vector<8x4xf32>
    %117 = arith.mulf %115, %116 : vector<8x4xf32>
    %cst_62 = arith.constant 1.000000e+00 : f32
    %118 = vector.broadcast %cst_62 : f32 to vector<8x4xf32>
    %119 = arith.cmpf oge, %117, %118 : vector<8x4xf32>
    %120 = arith.extui %119 : vector<8x4xi1> to vector<8x4xi32>
    %121 = arith.sitofp %120 : vector<8x4xi32> to vector<8x4xf32>
    %122 = arith.truncf %121 : vector<8x4xf32> to vector<8x4xbf16>
    %c6 = arith.constant 6 : index
    %c0_63 = arith.constant 0 : index
    %c0_64 = arith.constant 0 : index
    %123 = vector.load %arg3[%c6, %c0_63, %c0_64] : memref<9x4x128xbf16, #tpu.memory_space<vmem>>, vector<1x4x128xbf16>
    %124 = vector.shape_cast %123 : vector<1x4x128xbf16> to vector<4x128xbf16>
    %cst_65 = arith.constant dense<0.000000e+00> : vector<8x128xf32>
    %125 = tpu.matmul %122, %124, %cst_65 {dimension_numbers = #tpu.dot_dimension_numbers<[1], [0], [0], [1], [0, 0, 1, 1], [], []>} : vector<8x4xbf16>, vector<4x128xbf16>, vector<8x128xf32> -> vector<8x128xf32>
    %126 = arith.addf %106, %125 : vector<8x128xf32>
    %127 = arith.index_cast %112 : i32 to index
    %c3_66 = arith.constant 3 : index
    %c0_67 = arith.constant 0 : index
    %128 = tpu.strided_load %arg2[%127, %c3_66, %c0_67] {strides = array<i32: 1, 2, 1>} : memref<44x22x4xf32, #tpu.memory_space<vmem>>, vector<1x8x4xf32>
    %129 = vector.shape_cast %128 : vector<1x8x4xf32> to vector<8x4xf32>
    %cst_68 = arith.constant 5.000000e-01 : f32
    %130 = vector.broadcast %cst_68 : f32 to vector<8x4xf32>
    %131 = arith.mulf %129, %130 : vector<8x4xf32>
    %cst_69 = arith.constant 1.000000e+00 : f32
    %132 = vector.broadcast %cst_69 : f32 to vector<8x4xf32>
    %133 = arith.cmpf oge, %131, %132 : vector<8x4xf32>
    %134 = arith.extui %133 : vector<8x4xi1> to vector<8x4xi32>
    %135 = arith.sitofp %134 : vector<8x4xi32> to vector<8x4xf32>
    %136 = arith.truncf %135 : vector<8x4xf32> to vector<8x4xbf16>
    %c7 = arith.constant 7 : index
    %c0_70 = arith.constant 0 : index
    %c0_71 = arith.constant 0 : index
    %137 = vector.load %arg3[%c7, %c0_70, %c0_71] : memref<9x4x128xbf16, #tpu.memory_space<vmem>>, vector<1x4x128xbf16>
    %138 = vector.shape_cast %137 : vector<1x4x128xbf16> to vector<4x128xbf16>
    %cst_72 = arith.constant dense<0.000000e+00> : vector<8x128xf32>
    %139 = tpu.matmul %136, %138, %cst_72 {dimension_numbers = #tpu.dot_dimension_numbers<[1], [0], [0], [1], [0, 0, 1, 1], [], []>} : vector<8x4xbf16>, vector<4x128xbf16>, vector<8x128xf32> -> vector<8x128xf32>
    %140 = arith.addf %126, %139 : vector<8x128xf32>
    %141 = arith.index_cast %112 : i32 to index
    %c4_73 = arith.constant 4 : index
    %c0_74 = arith.constant 0 : index
    %142 = tpu.strided_load %arg2[%141, %c4_73, %c0_74] {strides = array<i32: 1, 2, 1>} : memref<44x22x4xf32, #tpu.memory_space<vmem>>, vector<1x8x4xf32>
    %143 = vector.shape_cast %142 : vector<1x8x4xf32> to vector<8x4xf32>
    %cst_75 = arith.constant 5.000000e-01 : f32
    %144 = vector.broadcast %cst_75 : f32 to vector<8x4xf32>
    %145 = arith.mulf %143, %144 : vector<8x4xf32>
    %cst_76 = arith.constant 1.000000e+00 : f32
    %146 = vector.broadcast %cst_76 : f32 to vector<8x4xf32>
    %147 = arith.cmpf oge, %145, %146 : vector<8x4xf32>
    %148 = arith.extui %147 : vector<8x4xi1> to vector<8x4xi32>
    %149 = arith.sitofp %148 : vector<8x4xi32> to vector<8x4xf32>
    %150 = arith.truncf %149 : vector<8x4xf32> to vector<8x4xbf16>
    %c8 = arith.constant 8 : index
    %c0_77 = arith.constant 0 : index
    %c0_78 = arith.constant 0 : index
    %151 = vector.load %arg3[%c8, %c0_77, %c0_78] : memref<9x4x128xbf16, #tpu.memory_space<vmem>>, vector<1x4x128xbf16>
    %152 = vector.shape_cast %151 : vector<1x4x128xbf16> to vector<4x128xbf16>
    %cst_79 = arith.constant dense<0.000000e+00> : vector<8x128xf32>
    %153 = tpu.matmul %150, %152, %cst_79 {dimension_numbers = #tpu.dot_dimension_numbers<[1], [0], [0], [1], [0, 0, 1, 1], [], []>} : vector<8x4xbf16>, vector<4x128xbf16>, vector<8x128xf32> -> vector<8x128xf32>
    %154 = arith.addf %140, %153 : vector<8x128xf32>
    %c0_80 = arith.constant 0 : index
    %c0_81 = arith.constant 0 : index
    %155 = vector.load %arg4[%c0_80, %c0_81] : memref<1x128xf32, #tpu.memory_space<vmem>>, vector<1x128xf32>
    %156 = vector.broadcast %155 : vector<1x128xf32> to vector<8x128xf32>
    %157 = arith.mulf %154, %156 : vector<8x128xf32>
    %c0_82 = arith.constant 0 : index
    %c0_83 = arith.constant 0 : index
    %158 = vector.load %arg5[%c0_82, %c0_83] : memref<1x128xf32, #tpu.memory_space<vmem>>, vector<1x128xf32>
    %159 = vector.broadcast %158 : vector<1x128xf32> to vector<8x128xf32>
    %160 = arith.addf %157, %159 : vector<8x128xf32>
    %161 = vector.broadcast %9 : f32 to vector<8x128xf32>
    %162 = arith.mulf %160, %161 : vector<8x128xf32>
    %cst_84 = arith.constant 5.000000e-01 : f32
    %163 = vector.broadcast %cst_84 : f32 to vector<8x128xf32>
    %164 = arith.mulf %162, %163 : vector<8x128xf32>
    %cst_85 = arith.constant 1.000000e+00 : f32
    %165 = vector.broadcast %cst_85 : f32 to vector<8x128xf32>
    %166 = arith.cmpf oge, %164, %165 : vector<8x128xf32>
    %167 = arith.extui %166 : vector<8x128xi1> to vector<8x128xi32>
    %168 = arith.sitofp %167 : vector<8x128xi32> to vector<8x128xf32>
    %169 = arith.truncf %168 : vector<8x128xf32> to vector<8x128xbf16>
    %c0_86 = arith.constant 0 : index
    %c1_87 = arith.constant 1 : index
    %c0_88 = arith.constant 0 : index
    %170 = vector.load %arg6[%c0_86, %c1_87, %c0_88] : memref<5x10x128xbf16, #tpu.memory_space<vmem>>, vector<1x8x128xbf16>
    %171 = vector.shape_cast %170 : vector<1x8x128xbf16> to vector<8x128xbf16>
    %172 = vector.shape_cast %169 : vector<8x128xbf16> to vector<1x8x128xbf16>
    tpu.vector_store %arg6[%c0_86, %c1_87, %c0_88], %172 {strides = array<i32>} : memref<5x10x128xbf16, #tpu.memory_space<vmem>>, vector<1x8x128xbf16>,
    %c5_i32_89 = arith.constant 5 : i32
    %173 = arith.muli %arg1, %c5_i32_89 : i32
    %c1_i32_90 = arith.constant 1 : i32
    %174 = arith.addi %173, %c1_i32_90 : i32
    %c1_i32_91 = arith.constant 1 : i32
    %175 = arith.subi %174, %c1_i32_91 : i32
    %c0_i32_92 = arith.constant 0 : i32
    %176 = arith.cmpi sge, %175, %c0_i32_92 : i32
    %c8_i32_93 = arith.constant 8 : i32
    %177 = arith.cmpi slt, %175, %c8_i32_93 : i32
    %178 = arith.andi %176, %177 : i1
    %179 = arith.extui %178 : i1 to i32
    %180 = arith.sitofp %179 : i32 to f32
    %cst_94 = arith.constant 0.000000e+00 : f32
    %181 = vector.broadcast %cst_94 : f32 to vector<8x128xf32>
    %c22_i32_95 = arith.constant 22 : i32
    %182 = arith.muli %arg0, %c22_i32_95 : i32
    %c3_i32_96 = arith.constant 3 : i32
    %183 = arith.addi %182, %c3_i32_96 : i32
    %c2_i32_97 = arith.constant 2 : i32
    %184 = arith.muli %c2_i32_97, %175 : i32
    %185 = arith.addi %183, %184 : i32
    %c0_i32_98 = arith.constant 0 : i32
    %186 = arith.addi %185, %c0_i32_98 : i32
    %c1_i32_99 = arith.constant 1 : i32
    %187 = arith.subi %186, %c1_i32_99 : i32
    %188 = arith.index_cast %187 : i32 to index
    %c2_100 = arith.constant 2 : index
    %c0_101 = arith.constant 0 : index
    %189 = tpu.strided_load %arg2[%188, %c2_100, %c0_101] {strides = array<i32: 1, 2, 1>} : memref<44x22x4xf32, #tpu.memory_space<vmem>>, vector<1x8x4xf32>
    %190 = vector.shape_cast %189 : vector<1x8x4xf32> to vector<8x4xf32>
    %cst_102 = arith.constant 5.000000e-01 : f32
    %191 = vector.broadcast %cst_102 : f32 to vector<8x4xf32>
    %192 = arith.mulf %190, %191 : vector<8x4xf32>
    %cst_103 = arith.constant 1.000000e+00 : f32
    %193 = vector.broadcast %cst_103 : f32 to vector<8x4xf32>
    %194 = arith.cmpf oge, %192, %193 : vector<8x4xf32>
    %195 = arith.extui %194 : vector<8x4xi1> to vector<8x4xi32>
    %196 = arith.sitofp %195 : vector<8x4xi32> to vector<8x4xf32>
    %197 = arith.truncf %196 : vector<8x4xf32> to vector<8x4xbf16>
    %c0_104 = arith.constant 0 : index
    %c0_105 = arith.constant 0 : index
    %c0_106 = arith.constant 0 : index
    %198 = vector.load %arg3[%c0_104, %c0_105, %c0_106] : memref<9x4x128xbf16, #tpu.memory_space<vmem>>, vector<1x4x128xbf16>
    %199 = vector.shape_cast %198 : vector<1x4x128xbf16> to vector<4x128xbf16>
    %cst_107 = arith.constant dense<0.000000e+00> : vector<8x128xf32>
    %200 = tpu.matmul %197, %199, %cst_107 {dimension_numbers = #tpu.dot_dimension_numbers<[1], [0], [0], [1], [0, 0, 1, 1], [], []>} : vector<8x4xbf16>, vector<4x128xbf16>, vector<8x128xf32> -> vector<8x128xf32>
    %201 = arith.addf %181, %200 : vector<8x128xf32>
    %202 = arith.index_cast %187 : i32 to index
    %c3_108 = arith.constant 3 : index
    %c0_109 = arith.constant 0 : index
    %203 = tpu.strided_load %arg2[%202, %c3_108, %c0_109] {strides = array<i32: 1, 2, 1>} : memref<44x22x4xf32, #tpu.memory_space<vmem>>, vector<1x8x4xf32>
    %204 = vector.shape_cast %203 : vector<1x8x4xf32> to vector<8x4xf32>
    %cst_110 = arith.constant 5.000000e-01 : f32
    %205 = vector.broadcast %cst_110 : f32 to vector<8x4xf32>
    %206 = arith.mulf %204, %205 : vector<8x4xf32>
    %cst_111 = arith.constant 1.000000e+00 : f32
    %207 = vector.broadcast %cst_111 : f32 to vector<8x4xf32>
    %208 = arith.cmpf oge, %206, %207 : vector<8x4xf32>
    %209 = arith.extui %208 : vector<8x4xi1> to vector<8x4xi32>
    %210 = arith.sitofp %209 : vector<8x4xi32> to vector<8x4xf32>
    %211 = arith.truncf %210 : vector<8x4xf32> to vector<8x4xbf16>
    %c1_112 = arith.constant 1 : index
    %c0_113 = arith.constant 0 : index
    %c0_114 = arith.constant 0 : index
    %212 = vector.load %arg3[%c1_112, %c0_113, %c0_114] : memref<9x4x128xbf16, #tpu.memory_space<vmem>>, vector<1x4x128xbf16>
    %213 = vector.shape_cast %212 : vector<1x4x128xbf16> to vector<4x128xbf16>
    %cst_115 = arith.constant dense<0.000000e+00> : vector<8x128xf32>
    %214 = tpu.matmul %211, %213, %cst_115 {dimension_numbers = #tpu.dot_dimension_numbers<[1], [0], [0], [1], [0, 0, 1, 1], [], []>} : vector<8x4xbf16>, vector<4x128xbf16>, vector<8x128xf32> -> vector<8x128xf32>
    %215 = arith.addf %201, %214 : vector<8x128xf32>
    %216 = arith.index_cast %187 : i32 to index
    %c4_116 = arith.constant 4 : index
    %c0_117 = arith.constant 0 : index
    %217 = tpu.strided_load %arg2[%216, %c4_116, %c0_117] {strides = array<i32: 1, 2, 1>} : memref<44x22x4xf32, #tpu.memory_space<vmem>>, vector<1x8x4xf32>
    %218 = vector.shape_cast %217 : vector<1x8x4xf32> to vector<8x4xf32>
    %cst_118 = arith.constant 5.000000e-01 : f32
    %219 = vector.broadcast %cst_118 : f32 to vector<8x4xf32>
    %220 = arith.mulf %218, %219 : vector<8x4xf32>
    %cst_119 = arith.constant 1.000000e+00 : f32
    %221 = vector.broadcast %cst_119 : f32 to vector<8x4xf32>
    %222 = arith.cmpf oge, %220, %221 : vector<8x4xf32>
    %223 = arith.extui %222 : vector<8x4xi1> to vector<8x4xi32>
    %224 = arith.sitofp %223 : vector<8x4xi32> to vector<8x4xf32>
    %225 = arith.truncf %224 : vector<8x4xf32> to vector<8x4xbf16>
    %c2_120 = arith.constant 2 : index
    %c0_121 = arith.constant 0 : index
    %c0_122 = arith.constant 0 : index
    %226 = vector.load %arg3[%c2_120, %c0_121, %c0_122] : memref<9x4x128xbf16, #tpu.memory_space<vmem>>, vector<1x4x128xbf16>
    %227 = vector.shape_cast %226 : vector<1x4x128xbf16> to vector<4x128xbf16>
    %cst_123 = arith.constant dense<0.000000e+00> : vector<8x128xf32>
    %228 = tpu.matmul %225, %227, %cst_123 {dimension_numbers = #tpu.dot_dimension_numbers<[1], [0], [0], [1], [0, 0, 1, 1], [], []>} : vector<8x4xbf16>, vector<4x128xbf16>, vector<8x128xf32> -> vector<8x128xf32>
    %229 = arith.addf %215, %228 : vector<8x128xf32>
    %c22_i32_124 = arith.constant 22 : i32
    %230 = arith.muli %arg0, %c22_i32_124 : i32
    %c3_i32_125 = arith.constant 3 : i32
    %231 = arith.addi %230, %c3_i32_125 : i32
    %c2_i32_126 = arith.constant 2 : i32
    %232 = arith.muli %c2_i32_126, %175 : i32
    %233 = arith.addi %231, %232 : i32
    %c1_i32_127 = arith.constant 1 : i32
    %234 = arith.addi %233, %c1_i32_127 : i32
    %c1_i32_128 = arith.constant 1 : i32
    %235 = arith.subi %234, %c1_i32_128 : i32
    %236 = arith.index_cast %235 : i32 to index
    %c2_129 = arith.constant 2 : index
    %c0_130 = arith.constant 0 : index
    %237 = tpu.strided_load %arg2[%236, %c2_129, %c0_130] {strides = array<i32: 1, 2, 1>} : memref<44x22x4xf32, #tpu.memory_space<vmem>>, vector<1x8x4xf32>
    %238 = vector.shape_cast %237 : vector<1x8x4xf32> to vector<8x4xf32>
    %cst_131 = arith.constant 5.000000e-01 : f32
    %239 = vector.broadcast %cst_131 : f32 to vector<8x4xf32>
    %240 = arith.mulf %238, %239 : vector<8x4xf32>
    %cst_132 = arith.constant 1.000000e+00 : f32
    %241 = vector.broadcast %cst_132 : f32 to vector<8x4xf32>
    %242 = arith.cmpf oge, %240, %241 : vector<8x4xf32>
    %243 = arith.extui %242 : vector<8x4xi1> to vector<8x4xi32>
    %244 = arith.sitofp %243 : vector<8x4xi32> to vector<8x4xf32>
    %245 = arith.truncf %244 : vector<8x4xf32> to vector<8x4xbf16>
    %c3_133 = arith.constant 3 : index
    %c0_134 = arith.constant 0 : index
    %c0_135 = arith.constant 0 : index
    %246 = vector.load %arg3[%c3_133, %c0_134, %c0_135] : memref<9x4x128xbf16, #tpu.memory_space<vmem>>, vector<1x4x128xbf16>
    %247 = vector.shape_cast %246 : vector<1x4x128xbf16> to vector<4x128xbf16>
    %cst_136 = arith.constant dense<0.000000e+00> : vector<8x128xf32>
    %248 = tpu.matmul %245, %247, %cst_136 {dimension_numbers = #tpu.dot_dimension_numbers<[1], [0], [0], [1], [0, 0, 1, 1], [], []>} : vector<8x4xbf16>, vector<4x128xbf16>, vector<8x128xf32> -> vector<8x128xf32>
    %249 = arith.addf %229, %248 : vector<8x128xf32>
    %250 = arith.index_cast %235 : i32 to index
    %c3_137 = arith.constant 3 : index
    %c0_138 = arith.constant 0 : index
    %251 = tpu.strided_load %arg2[%250, %c3_137, %c0_138] {strides = array<i32: 1, 2, 1>} : memref<44x22x4xf32, #tpu.memory_space<vmem>>, vector<1x8x4xf32>
    %252 = vector.shape_cast %251 : vector<1x8x4xf32> to vector<8x4xf32>
    %cst_139 = arith.constant 5.000000e-01 : f32
    %253 = vector.broadcast %cst_139 : f32 to vector<8x4xf32>
    %254 = arith.mulf %252, %253 : vector<8x4xf32>
    %cst_140 = arith.constant 1.000000e+00 : f32
    %255 = vector.broadcast %cst_140 : f32 to vector<8x4xf32>
    %256 = arith.cmpf oge, %254, %255 : vector<8x4xf32>
    %257 = arith.extui %256 : vector<8x4xi1> to vector<8x4xi32>
    %258 = arith.sitofp %257 : vector<8x4xi32> to vector<8x4xf32>
    %259 = arith.truncf %258 : vector<8x4xf32> to vector<8x4xbf16>
    %c4_141 = arith.constant 4 : index
    %c0_142 = arith.constant 0 : index
    %c0_143 = arith.constant 0 : index
    %260 = vector.load %arg3[%c4_141, %c0_142, %c0_143] : memref<9x4x128xbf16, #tpu.memory_space<vmem>>, vector<1x4x128xbf16>
    %261 = vector.shape_cast %260 : vector<1x4x128xbf16> to vector<4x128xbf16>
    %cst_144 = arith.constant dense<0.000000e+00> : vector<8x128xf32>
    %262 = tpu.matmul %259, %261, %cst_144 {dimension_numbers = #tpu.dot_dimension_numbers<[1], [0], [0], [1], [0, 0, 1, 1], [], []>} : vector<8x4xbf16>, vector<4x128xbf16>, vector<8x128xf32> -> vector<8x128xf32>
    %263 = arith.addf %249, %262 : vector<8x128xf32>
    %264 = arith.index_cast %235 : i32 to index
    %c4_145 = arith.constant 4 : index
    %c0_146 = arith.constant 0 : index
    %265 = tpu.strided_load %arg2[%264, %c4_145, %c0_146] {strides = array<i32: 1, 2, 1>} : memref<44x22x4xf32, #tpu.memory_space<vmem>>, vector<1x8x4xf32>
    %266 = vector.shape_cast %265 : vector<1x8x4xf32> to vector<8x4xf32>
    %cst_147 = arith.constant 5.000000e-01 : f32
    %267 = vector.broadcast %cst_147 : f32 to vector<8x4xf32>
    %268 = arith.mulf %266, %267 : vector<8x4xf32>
    %cst_148 = arith.constant 1.000000e+00 : f32
    %269 = vector.broadcast %cst_148 : f32 to vector<8x4xf32>
    %270 = arith.cmpf oge, %268, %269 : vector<8x4xf32>
    %271 = arith.extui %270 : vector<8x4xi1> to vector<8x4xi32>
    %272 = arith.sitofp %271 : vector<8x4xi32> to vector<8x4xf32>
    %273 = arith.truncf %272 : vector<8x4xf32> to vector<8x4xbf16>
    %c5_149 = arith.constant 5 : index
    %c0_150 = arith.constant 0 : index
    %c0_151 = arith.constant 0 : index
    %274 = vector.load %arg3[%c5_149, %c0_150, %c0_151] : memref<9x4x128xbf16, #tpu.memory_space<vmem>>, vector<1x4x128xbf16>
    %275 = vector.shape_cast %274 : vector<1x4x128xbf16> to vector<4x128xbf16>
    %cst_152 = arith.constant dense<0.000000e+00> : vector<8x128xf32>
    %276 = tpu.matmul %273, %275, %cst_152 {dimension_numbers = #tpu.dot_dimension_numbers<[1], [0], [0], [1], [0, 0, 1, 1], [], []>} : vector<8x4xbf16>, vector<4x128xbf16>, vector<8x128xf32> -> vector<8x128xf32>
    %277 = arith.addf %263, %276 : vector<8x128xf32>
    %c22_i32_153 = arith.constant 22 : i32
    %278 = arith.muli %arg0, %c22_i32_153 : i32
    %c3_i32_154 = arith.constant 3 : i32
    %279 = arith.addi %278, %c3_i32_154 : i32
    %c2_i32_155 = arith.constant 2 : i32
    %280 = arith.muli %c2_i32_155, %175 : i32
    %281 = arith.addi %279, %280 : i32
    %c2_i32_156 = arith.constant 2 : i32
    %282 = arith.addi %281, %c2_i32_156 : i32
    %c1_i32_157 = arith.constant 1 : i32
    %283 = arith.subi %282, %c1_i32_157 : i32
    %284 = arith.index_cast %283 : i32 to index
    %c2_158 = arith.constant 2 : index
    %c0_159 = arith.constant 0 : index
    %285 = tpu.strided_load %arg2[%284, %c2_158, %c0_159] {strides = array<i32: 1, 2, 1>} : memref<44x22x4xf32, #tpu.memory_space<vmem>>, vector<1x8x4xf32>
    %286 = vector.shape_cast %285 : vector<1x8x4xf32> to vector<8x4xf32>
    %cst_160 = arith.constant 5.000000e-01 : f32
    %287 = vector.broadcast %cst_160 : f32 to vector<8x4xf32>
    %288 = arith.mulf %286, %287 : vector<8x4xf32>
    %cst_161 = arith.constant 1.000000e+00 : f32
    %289 = vector.broadcast %cst_161 : f32 to vector<8x4xf32>
    %290 = arith.cmpf oge, %288, %289 : vector<8x4xf32>
    %291 = arith.extui %290 : vector<8x4xi1> to vector<8x4xi32>
    %292 = arith.sitofp %291 : vector<8x4xi32> to vector<8x4xf32>
    %293 = arith.truncf %292 : vector<8x4xf32> to vector<8x4xbf16>
    %c6_162 = arith.constant 6 : index
    %c0_163 = arith.constant 0 : index
    %c0_164 = arith.constant 0 : index
    %294 = vector.load %arg3[%c6_162, %c0_163, %c0_164] : memref<9x4x128xbf16, #tpu.memory_space<vmem>>, vector<1x4x128xbf16>
    %295 = vector.shape_cast %294 : vector<1x4x128xbf16> to vector<4x128xbf16>
    %cst_165 = arith.constant dense<0.000000e+00> : vector<8x128xf32>
    %296 = tpu.matmul %293, %295, %cst_165 {dimension_numbers = #tpu.dot_dimension_numbers<[1], [0], [0], [1], [0, 0, 1, 1], [], []>} : vector<8x4xbf16>, vector<4x128xbf16>, vector<8x128xf32> -> vector<8x128xf32>
    %297 = arith.addf %277, %296 : vector<8x128xf32>
    %298 = arith.index_cast %283 : i32 to index
    %c3_166 = arith.constant 3 : index
    %c0_167 = arith.constant 0 : index
    %299 = tpu.strided_load %arg2[%298, %c3_166, %c0_167] {strides = array<i32: 1, 2, 1>} : memref<44x22x4xf32, #tpu.memory_space<vmem>>, vector<1x8x4xf32>
    %300 = vector.shape_cast %299 : vector<1x8x4xf32> to vector<8x4xf32>
    %cst_168 = arith.constant 5.000000e-01 : f32
    %301 = vector.broadcast %cst_168 : f32 to vector<8x4xf32>
    %302 = arith.mulf %300, %301 : vector<8x4xf32>
    %cst_169 = arith.constant 1.000000e+00 : f32
    %303 = vector.broadcast %cst_169 : f32 to vector<8x4xf32>
    %304 = arith.cmpf oge, %302, %303 : vector<8x4xf32>
    %305 = arith.extui %304 : vector<8x4xi1> to vector<8x4xi32>
    %306 = arith.sitofp %305 : vector<8x4xi32> to vector<8x4xf32>
    %307 = arith.truncf %306 : vector<8x4xf32> to vector<8x4xbf16>
    %c7_170 = arith.constant 7 : index
    %c0_171 = arith.constant 0 : index
    %c0_172 = arith.constant 0 : index
    %308 = vector.load %arg3[%c7_170, %c0_171, %c0_172] : memref<9x4x128xbf16, #tpu.memory_space<vmem>>, vector<1x4x128xbf16>
    %309 = vector.shape_cast %308 : vector<1x4x128xbf16> to vector<4x128xbf16>
    %cst_173 = arith.constant dense<0.000000e+00> : vector<8x128xf32>
    %310 = tpu.matmul %307, %309, %cst_173 {dimension_numbers = #tpu.dot_dimension_numbers<[1], [0], [0], [1], [0, 0, 1, 1], [], []>} : vector<8x4xbf16>, vector<4x128xbf16>, vector<8x128xf32> -> vector<8x128xf32>
    %311 = arith.addf %297, %310 : vector<8x128xf32>
    %312 = arith.index_cast %283 : i32 to index
    %c4_174 = arith.constant 4 : index
    %c0_175 = arith.constant 0 : index
    %313 = tpu.strided_load %arg2[%312, %c4_174, %c0_175] {strides = array<i32: 1, 2, 1>} : memref<44x22x4xf32, #tpu.memory_space<vmem>>, vector<1x8x4xf32>
    %314 = vector.shape_cast %313 : vector<1x8x4xf32> to vector<8x4xf32>
    %cst_176 = arith.constant 5.000000e-01 : f32
    %315 = vector.broadcast %cst_176 : f32 to vector<8x4xf32>
    %316 = arith.mulf %314, %315 : vector<8x4xf32>
    %cst_177 = arith.constant 1.000000e+00 : f32
    %317 = vector.broadcast %cst_177 : f32 to vector<8x4xf32>
    %318 = arith.cmpf oge, %316, %317 : vector<8x4xf32>
    %319 = arith.extui %318 : vector<8x4xi1> to vector<8x4xi32>
    %320 = arith.sitofp %319 : vector<8x4xi32> to vector<8x4xf32>
    %321 = arith.truncf %320 : vector<8x4xf32> to vector<8x4xbf16>
    %c8_178 = arith.constant 8 : index
    %c0_179 = arith.constant 0 : index
    %c0_180 = arith.constant 0 : index
    %322 = vector.load %arg3[%c8_178, %c0_179, %c0_180] : memref<9x4x128xbf16, #tpu.memory_space<vmem>>, vector<1x4x128xbf16>
    %323 = vector.shape_cast %322 : vector<1x4x128xbf16> to vector<4x128xbf16>
    %cst_181 = arith.constant dense<0.000000e+00> : vector<8x128xf32>
    %324 = tpu.matmul %321, %323, %cst_181 {dimension_numbers = #tpu.dot_dimension_numbers<[1], [0], [0], [1], [0, 0, 1, 1], [], []>} : vector<8x4xbf16>, vector<4x128xbf16>, vector<8x128xf32> -> vector<8x128xf32>
    %325 = arith.addf %311, %324 : vector<8x128xf32>
    %c0_182 = arith.constant 0 : index
    %c0_183 = arith.constant 0 : index
    %326 = vector.load %arg4[%c0_182, %c0_183] : memref<1x128xf32, #tpu.memory_space<vmem>>, vector<1x128xf32>
    %327 = vector.broadcast %326 : vector<1x128xf32> to vector<8x128xf32>
    %328 = arith.mulf %325, %327 : vector<8x128xf32>
    %c0_184 = arith.constant 0 : index
    %c0_185 = arith.constant 0 : index
    %329 = vector.load %arg5[%c0_184, %c0_185] : memref<1x128xf32, #tpu.memory_space<vmem>>, vector<1x128xf32>
    %330 = vector.broadcast %329 : vector<1x128xf32> to vector<8x128xf32>
    %331 = arith.addf %328, %330 : vector<8x128xf32>
    %332 = vector.broadcast %180 : f32 to vector<8x128xf32>
    %333 = arith.mulf %331, %332 : vector<8x128xf32>
    %cst_186 = arith.constant 5.000000e-01 : f32
    %334 = vector.broadcast %cst_186 : f32 to vector<8x128xf32>
    %335 = arith.mulf %333, %334 : vector<8x128xf32>
    %cst_187 = arith.constant 1.000000e+00 : f32
    %336 = vector.broadcast %cst_187 : f32 to vector<8x128xf32>
    %337 = arith.cmpf oge, %335, %336 : vector<8x128xf32>
    %338 = arith.extui %337 : vector<8x128xi1> to vector<8x128xi32>
    %339 = arith.sitofp %338 : vector<8x128xi32> to vector<8x128xf32>
    %340 = arith.truncf %339 : vector<8x128xf32> to vector<8x128xbf16>
    %c1_188 = arith.constant 1 : index
    %c1_189 = arith.constant 1 : index
    %c0_190 = arith.constant 0 : index
    %341 = vector.load %arg6[%c1_188, %c1_189, %c0_190] : memref<5x10x128xbf16, #tpu.memory_space<vmem>>, vector<1x8x128xbf16>
    %342 = vector.shape_cast %341 : vector<1x8x128xbf16> to vector<8x128xbf16>
    %343 = vector.shape_cast %340 : vector<8x128xbf16> to vector<1x8x128xbf16>
    tpu.vector_store %arg6[%c1_188, %c1_189, %c0_190], %343 {strides = array<i32>} : memref<5x10x128xbf16, #tpu.memory_space<vmem>>, vector<1x8x128xbf16>,
    %c5_i32_191 = arith.constant 5 : i32
    %344 = arith.muli %arg1, %c5_i32_191 : i32
    %c2_i32_192 = arith.constant 2 : i32
    %345 = arith.addi %344, %c2_i32_192 : i32
    %c1_i32_193 = arith.constant 1 : i32
    %346 = arith.subi %345, %c1_i32_193 : i32
    %c0_i32_194 = arith.constant 0 : i32
    %347 = arith.cmpi sge, %346, %c0_i32_194 : i32
    %c8_i32_195 = arith.constant 8 : i32
    %348 = arith.cmpi slt, %346, %c8_i32_195 : i32
    %349 = arith.andi %347, %348 : i1
    %350 = arith.extui %349 : i1 to i32
    %351 = arith.sitofp %350 : i32 to f32
    %cst_196 = arith.constant 0.000000e+00 : f32
    %352 = vector.broadcast %cst_196 : f32 to vector<8x128xf32>
    %c22_i32_197 = arith.constant 22 : i32
    %353 = arith.muli %arg0, %c22_i32_197 : i32
    %c3_i32_198 = arith.constant 3 : i32
    %354 = arith.addi %353, %c3_i32_198 : i32
    %c2_i32_199 = arith.constant 2 : i32
    %355 = arith.muli %c2_i32_199, %346 : i32
    %356 = arith.addi %354, %355 : i32
    %c0_i32_200 = arith.constant 0 : i32
    %357 = arith.addi %356, %c0_i32_200 : i32
    %c1_i32_201 = arith.constant 1 : i32
    %358 = arith.subi %357, %c1_i32_201 : i32
    %359 = arith.index_cast %358 : i32 to index
    %c2_202 = arith.constant 2 : index
    %c0_203 = arith.constant 0 : index
    %360 = tpu.strided_load %arg2[%359, %c2_202, %c0_203] {strides = array<i32: 1, 2, 1>} : memref<44x22x4xf32, #tpu.memory_space<vmem>>, vector<1x8x4xf32>
    %361 = vector.shape_cast %360 : vector<1x8x4xf32> to vector<8x4xf32>
    %cst_204 = arith.constant 5.000000e-01 : f32
    %362 = vector.broadcast %cst_204 : f32 to vector<8x4xf32>
    %363 = arith.mulf %361, %362 : vector<8x4xf32>
    %cst_205 = arith.constant 1.000000e+00 : f32
    %364 = vector.broadcast %cst_205 : f32 to vector<8x4xf32>
    %365 = arith.cmpf oge, %363, %364 : vector<8x4xf32>
    %366 = arith.extui %365 : vector<8x4xi1> to vector<8x4xi32>
    %367 = arith.sitofp %366 : vector<8x4xi32> to vector<8x4xf32>
    %368 = arith.truncf %367 : vector<8x4xf32> to vector<8x4xbf16>
    %c0_206 = arith.constant 0 : index
    %c0_207 = arith.constant 0 : index
    %c0_208 = arith.constant 0 : index
    %369 = vector.load %arg3[%c0_206, %c0_207, %c0_208] : memref<9x4x128xbf16, #tpu.memory_space<vmem>>, vector<1x4x128xbf16>
    %370 = vector.shape_cast %369 : vector<1x4x128xbf16> to vector<4x128xbf16>
    %cst_209 = arith.constant dense<0.000000e+00> : vector<8x128xf32>
    %371 = tpu.matmul %368, %370, %cst_209 {dimension_numbers = #tpu.dot_dimension_numbers<[1], [0], [0], [1], [0, 0, 1, 1], [], []>} : vector<8x4xbf16>, vector<4x128xbf16>, vector<8x128xf32> -> vector<8x128xf32>
    %372 = arith.addf %352, %371 : vector<8x128xf32>
    %373 = arith.index_cast %358 : i32 to index
    %c3_210 = arith.constant 3 : index
    %c0_211 = arith.constant 0 : index
    %374 = tpu.strided_load %arg2[%373, %c3_210, %c0_211] {strides = array<i32: 1, 2, 1>} : memref<44x22x4xf32, #tpu.memory_space<vmem>>, vector<1x8x4xf32>
    %375 = vector.shape_cast %374 : vector<1x8x4xf32> to vector<8x4xf32>
    %cst_212 = arith.constant 5.000000e-01 : f32
    %376 = vector.broadcast %cst_212 : f32 to vector<8x4xf32>
    %377 = arith.mulf %375, %376 : vector<8x4xf32>
    %cst_213 = arith.constant 1.000000e+00 : f32
    %378 = vector.broadcast %cst_213 : f32 to vector<8x4xf32>
    %379 = arith.cmpf oge, %377, %378 : vector<8x4xf32>
    %380 = arith.extui %379 : vector<8x4xi1> to vector<8x4xi32>
    %381 = arith.sitofp %380 : vector<8x4xi32> to vector<8x4xf32>
    %382 = arith.truncf %381 : vector<8x4xf32> to vector<8x4xbf16>
    %c1_214 = arith.constant 1 : index
    %c0_215 = arith.constant 0 : index
    %c0_216 = arith.constant 0 : index
    %383 = vector.load %arg3[%c1_214, %c0_215, %c0_216] : memref<9x4x128xbf16, #tpu.memory_space<vmem>>, vector<1x4x128xbf16>
    %384 = vector.shape_cast %383 : vector<1x4x128xbf16> to vector<4x128xbf16>
    %cst_217 = arith.constant dense<0.000000e+00> : vector<8x128xf32>
    %385 = tpu.matmul %382, %384, %cst_217 {dimension_numbers = #tpu.dot_dimension_numbers<[1], [0], [0], [1], [0, 0, 1, 1], [], []>} : vector<8x4xbf16>, vector<4x128xbf16>, vector<8x128xf32> -> vector<8x128xf32>
    %386 = arith.addf %372, %385 : vector<8x128xf32>
    %387 = arith.index_cast %358 : i32 to index
    %c4_218 = arith.constant 4 : index
    %c0_219 = arith.constant 0 : index
    %388 = tpu.strided_load %arg2[%387, %c4_218, %c0_219] {strides = array<i32: 1, 2, 1>} : memref<44x22x4xf32, #tpu.memory_space<vmem>>, vector<1x8x4xf32>
    %389 = vector.shape_cast %388 : vector<1x8x4xf32> to vector<8x4xf32>
    %cst_220 = arith.constant 5.000000e-01 : f32
    %390 = vector.broadcast %cst_220 : f32 to vector<8x4xf32>
    %391 = arith.mulf %389, %390 : vector<8x4xf32>
    %cst_221 = arith.constant 1.000000e+00 : f32
    %392 = vector.broadcast %cst_221 : f32 to vector<8x4xf32>
    %393 = arith.cmpf oge, %391, %392 : vector<8x4xf32>
    %394 = arith.extui %393 : vector<8x4xi1> to vector<8x4xi32>
    %395 = arith.sitofp %394 : vector<8x4xi32> to vector<8x4xf32>
    %396 = arith.truncf %395 : vector<8x4xf32> to vector<8x4xbf16>
    %c2_222 = arith.constant 2 : index
    %c0_223 = arith.constant 0 : index
    %c0_224 = arith.constant 0 : index
    %397 = vector.load %arg3[%c2_222, %c0_223, %c0_224] : memref<9x4x128xbf16, #tpu.memory_space<vmem>>, vector<1x4x128xbf16>
    %398 = vector.shape_cast %397 : vector<1x4x128xbf16> to vector<4x128xbf16>
    %cst_225 = arith.constant dense<0.000000e+00> : vector<8x128xf32>
    %399 = tpu.matmul %396, %398, %cst_225 {dimension_numbers = #tpu.dot_dimension_numbers<[1], [0], [0], [1], [0, 0, 1, 1], [], []>} : vector<8x4xbf16>, vector<4x128xbf16>, vector<8x128xf32> -> vector<8x128xf32>
    %400 = arith.addf %386, %399 : vector<8x128xf32>
    %c22_i32_226 = arith.constant 22 : i32
    %401 = arith.muli %arg0, %c22_i32_226 : i32
    %c3_i32_227 = arith.constant 3 : i32
    %402 = arith.addi %401, %c3_i32_227 : i32
    %c2_i32_228 = arith.constant 2 : i32
    %403 = arith.muli %c2_i32_228, %346 : i32
    %404 = arith.addi %402, %403 : i32
    %c1_i32_229 = arith.constant 1 : i32
    %405 = arith.addi %404, %c1_i32_229 : i32
    %c1_i32_230 = arith.constant 1 : i32
    %406 = arith.subi %405, %c1_i32_230 : i32
    %407 = arith.index_cast %406 : i32 to index
    %c2_231 = arith.constant 2 : index
    %c0_232 = arith.constant 0 : index
    %408 = tpu.strided_load %arg2[%407, %c2_231, %c0_232] {strides = array<i32: 1, 2, 1>} : memref<44x22x4xf32, #tpu.memory_space<vmem>>, vector<1x8x4xf32>
    %409 = vector.shape_cast %408 : vector<1x8x4xf32> to vector<8x4xf32>
    %cst_233 = arith.constant 5.000000e-01 : f32
    %410 = vector.broadcast %cst_233 : f32 to vector<8x4xf32>
    %411 = arith.mulf %409, %410 : vector<8x4xf32>
    %cst_234 = arith.constant 1.000000e+00 : f32
    %412 = vector.broadcast %cst_234 : f32 to vector<8x4xf32>
    %413 = arith.cmpf oge, %411, %412 : vector<8x4xf32>
    %414 = arith.extui %413 : vector<8x4xi1> to vector<8x4xi32>
    %415 = arith.sitofp %414 : vector<8x4xi32> to vector<8x4xf32>
    %416 = arith.truncf %415 : vector<8x4xf32> to vector<8x4xbf16>
    %c3_235 = arith.constant 3 : index
    %c0_236 = arith.constant 0 : index
    %c0_237 = arith.constant 0 : index
    %417 = vector.load %arg3[%c3_235, %c0_236, %c0_237] : memref<9x4x128xbf16, #tpu.memory_space<vmem>>, vector<1x4x128xbf16>
    %418 = vector.shape_cast %417 : vector<1x4x128xbf16> to vector<4x128xbf16>
    %cst_238 = arith.constant dense<0.000000e+00> : vector<8x128xf32>
    %419 = tpu.matmul %416, %418, %cst_238 {dimension_numbers = #tpu.dot_dimension_numbers<[1], [0], [0], [1], [0, 0, 1, 1], [], []>} : vector<8x4xbf16>, vector<4x128xbf16>, vector<8x128xf32> -> vector<8x128xf32>
    %420 = arith.addf %400, %419 : vector<8x128xf32>
    %421 = arith.index_cast %406 : i32 to index
    %c3_239 = arith.constant 3 : index
    %c0_240 = arith.constant 0 : index
    %422 = tpu.strided_load %arg2[%421, %c3_239, %c0_240] {strides = array<i32: 1, 2, 1>} : memref<44x22x4xf32, #tpu.memory_space<vmem>>, vector<1x8x4xf32>
    %423 = vector.shape_cast %422 : vector<1x8x4xf32> to vector<8x4xf32>
    %cst_241 = arith.constant 5.000000e-01 : f32
    %424 = vector.broadcast %cst_241 : f32 to vector<8x4xf32>
    %425 = arith.mulf %423, %424 : vector<8x4xf32>
    %cst_242 = arith.constant 1.000000e+00 : f32
    %426 = vector.broadcast %cst_242 : f32 to vector<8x4xf32>
    %427 = arith.cmpf oge, %425, %426 : vector<8x4xf32>
    %428 = arith.extui %427 : vector<8x4xi1> to vector<8x4xi32>
    %429 = arith.sitofp %428 : vector<8x4xi32> to vector<8x4xf32>
    %430 = arith.truncf %429 : vector<8x4xf32> to vector<8x4xbf16>
    %c4_243 = arith.constant 4 : index
    %c0_244 = arith.constant 0 : index
    %c0_245 = arith.constant 0 : index
    %431 = vector.load %arg3[%c4_243, %c0_244, %c0_245] : memref<9x4x128xbf16, #tpu.memory_space<vmem>>, vector<1x4x128xbf16>
    %432 = vector.shape_cast %431 : vector<1x4x128xbf16> to vector<4x128xbf16>
    %cst_246 = arith.constant dense<0.000000e+00> : vector<8x128xf32>
    %433 = tpu.matmul %430, %432, %cst_246 {dimension_numbers = #tpu.dot_dimension_numbers<[1], [0], [0], [1], [0, 0, 1, 1], [], []>} : vector<8x4xbf16>, vector<4x128xbf16>, vector<8x128xf32> -> vector<8x128xf32>
    %434 = arith.addf %420, %433 : vector<8x128xf32>
    %435 = arith.index_cast %406 : i32 to index
    %c4_247 = arith.constant 4 : index
    %c0_248 = arith.constant 0 : index
    %436 = tpu.strided_load %arg2[%435, %c4_247, %c0_248] {strides = array<i32: 1, 2, 1>} : memref<44x22x4xf32, #tpu.memory_space<vmem>>, vector<1x8x4xf32>
    %437 = vector.shape_cast %436 : vector<1x8x4xf32> to vector<8x4xf32>
    %cst_249 = arith.constant 5.000000e-01 : f32
    %438 = vector.broadcast %cst_249 : f32 to vector<8x4xf32>
    %439 = arith.mulf %437, %438 : vector<8x4xf32>
    %cst_250 = arith.constant 1.000000e+00 : f32
    %440 = vector.broadcast %cst_250 : f32 to vector<8x4xf32>
    %441 = arith.cmpf oge, %439, %440 : vector<8x4xf32>
    %442 = arith.extui %441 : vector<8x4xi1> to vector<8x4xi32>
    %443 = arith.sitofp %442 : vector<8x4xi32> to vector<8x4xf32>
    %444 = arith.truncf %443 : vector<8x4xf32> to vector<8x4xbf16>
    %c5_251 = arith.constant 5 : index
    %c0_252 = arith.constant 0 : index
    %c0_253 = arith.constant 0 : index
    %445 = vector.load %arg3[%c5_251, %c0_252, %c0_253] : memref<9x4x128xbf16, #tpu.memory_space<vmem>>, vector<1x4x128xbf16>
    %446 = vector.shape_cast %445 : vector<1x4x128xbf16> to vector<4x128xbf16>
    %cst_254 = arith.constant dense<0.000000e+00> : vector<8x128xf32>
    %447 = tpu.matmul %444, %446, %cst_254 {dimension_numbers = #tpu.dot_dimension_numbers<[1], [0], [0], [1], [0, 0, 1, 1], [], []>} : vector<8x4xbf16>, vector<4x128xbf16>, vector<8x128xf32> -> vector<8x128xf32>
    %448 = arith.addf %434, %447 : vector<8x128xf32>
    %c22_i32_255 = arith.constant 22 : i32
    %449 = arith.muli %arg0, %c22_i32_255 : i32
    %c3_i32_256 = arith.constant 3 : i32
    %450 = arith.addi %449, %c3_i32_256 : i32
    %c2_i32_257 = arith.constant 2 : i32
    %451 = arith.muli %c2_i32_257, %346 : i32
    %452 = arith.addi %450, %451 : i32
    %c2_i32_258 = arith.constant 2 : i32
    %453 = arith.addi %452, %c2_i32_258 : i32
    %c1_i32_259 = arith.constant 1 : i32
    %454 = arith.subi %453, %c1_i32_259 : i32
    %455 = arith.index_cast %454 : i32 to index
    %c2_260 = arith.constant 2 : index
    %c0_261 = arith.constant 0 : index
    %456 = tpu.strided_load %arg2[%455, %c2_260, %c0_261] {strides = array<i32: 1, 2, 1>} : memref<44x22x4xf32, #tpu.memory_space<vmem>>, vector<1x8x4xf32>
    %457 = vector.shape_cast %456 : vector<1x8x4xf32> to vector<8x4xf32>
    %cst_262 = arith.constant 5.000000e-01 : f32
    %458 = vector.broadcast %cst_262 : f32 to vector<8x4xf32>
    %459 = arith.mulf %457, %458 : vector<8x4xf32>
    %cst_263 = arith.constant 1.000000e+00 : f32
    %460 = vector.broadcast %cst_263 : f32 to vector<8x4xf32>
    %461 = arith.cmpf oge, %459, %460 : vector<8x4xf32>
    %462 = arith.extui %461 : vector<8x4xi1> to vector<8x4xi32>
    %463 = arith.sitofp %462 : vector<8x4xi32> to vector<8x4xf32>
    %464 = arith.truncf %463 : vector<8x4xf32> to vector<8x4xbf16>
    %c6_264 = arith.constant 6 : index
    %c0_265 = arith.constant 0 : index
    %c0_266 = arith.constant 0 : index
    %465 = vector.load %arg3[%c6_264, %c0_265, %c0_266] : memref<9x4x128xbf16, #tpu.memory_space<vmem>>, vector<1x4x128xbf16>
    %466 = vector.shape_cast %465 : vector<1x4x128xbf16> to vector<4x128xbf16>
    %cst_267 = arith.constant dense<0.000000e+00> : vector<8x128xf32>
    %467 = tpu.matmul %464, %466, %cst_267 {dimension_numbers = #tpu.dot_dimension_numbers<[1], [0], [0], [1], [0, 0, 1, 1], [], []>} : vector<8x4xbf16>, vector<4x128xbf16>, vector<8x128xf32> -> vector<8x128xf32>
    %468 = arith.addf %448, %467 : vector<8x128xf32>
    %469 = arith.index_cast %454 : i32 to index
    %c3_268 = arith.constant 3 : index
    %c0_269 = arith.constant 0 : index
    %470 = tpu.strided_load %arg2[%469, %c3_268, %c0_269] {strides = array<i32: 1, 2, 1>} : memref<44x22x4xf32, #tpu.memory_space<vmem>>, vector<1x8x4xf32>
    %471 = vector.shape_cast %470 : vector<1x8x4xf32> to vector<8x4xf32>
    %cst_270 = arith.constant 5.000000e-01 : f32
    %472 = vector.broadcast %cst_270 : f32 to vector<8x4xf32>
    %473 = arith.mulf %471, %472 : vector<8x4xf32>
    %cst_271 = arith.constant 1.000000e+00 : f32
    %474 = vector.broadcast %cst_271 : f32 to vector<8x4xf32>
    %475 = arith.cmpf oge, %473, %474 : vector<8x4xf32>
    %476 = arith.extui %475 : vector<8x4xi1> to vector<8x4xi32>
    %477 = arith.sitofp %476 : vector<8x4xi32> to vector<8x4xf32>
    %478 = arith.truncf %477 : vector<8x4xf32> to vector<8x4xbf16>
    %c7_272 = arith.constant 7 : index
    %c0_273 = arith.constant 0 : index
    %c0_274 = arith.constant 0 : index
    %479 = vector.load %arg3[%c7_272, %c0_273, %c0_274] : memref<9x4x128xbf16, #tpu.memory_space<vmem>>, vector<1x4x128xbf16>
    %480 = vector.shape_cast %479 : vector<1x4x128xbf16> to vector<4x128xbf16>
    %cst_275 = arith.constant dense<0.000000e+00> : vector<8x128xf32>
    %481 = tpu.matmul %478, %480, %cst_275 {dimension_numbers = #tpu.dot_dimension_numbers<[1], [0], [0], [1], [0, 0, 1, 1], [], []>} : vector<8x4xbf16>, vector<4x128xbf16>, vector<8x128xf32> -> vector<8x128xf32>
    %482 = arith.addf %468, %481 : vector<8x128xf32>
    %483 = arith.index_cast %454 : i32 to index
    %c4_276 = arith.constant 4 : index
    %c0_277 = arith.constant 0 : index
    %484 = tpu.strided_load %arg2[%483, %c4_276, %c0_277] {strides = array<i32: 1, 2, 1>} : memref<44x22x4xf32, #tpu.memory_space<vmem>>, vector<1x8x4xf32>
    %485 = vector.shape_cast %484 : vector<1x8x4xf32> to vector<8x4xf32>
    %cst_278 = arith.constant 5.000000e-01 : f32
    %486 = vector.broadcast %cst_278 : f32 to vector<8x4xf32>
    %487 = arith.mulf %485, %486 : vector<8x4xf32>
    %cst_279 = arith.constant 1.000000e+00 : f32
    %488 = vector.broadcast %cst_279 : f32 to vector<8x4xf32>
    %489 = arith.cmpf oge, %487, %488 : vector<8x4xf32>
    %490 = arith.extui %489 : vector<8x4xi1> to vector<8x4xi32>
    %491 = arith.sitofp %490 : vector<8x4xi32> to vector<8x4xf32>
    %492 = arith.truncf %491 : vector<8x4xf32> to vector<8x4xbf16>
    %c8_280 = arith.constant 8 : index
    %c0_281 = arith.constant 0 : index
    %c0_282 = arith.constant 0 : index
    %493 = vector.load %arg3[%c8_280, %c0_281, %c0_282] : memref<9x4x128xbf16, #tpu.memory_space<vmem>>, vector<1x4x128xbf16>
    %494 = vector.shape_cast %493 : vector<1x4x128xbf16> to vector<4x128xbf16>
    %cst_283 = arith.constant dense<0.000000e+00> : vector<8x128xf32>
    %495 = tpu.matmul %492, %494, %cst_283 {dimension_numbers = #tpu.dot_dimension_numbers<[1], [0], [0], [1], [0, 0, 1, 1], [], []>} : vector<8x4xbf16>, vector<4x128xbf16>, vector<8x128xf32> -> vector<8x128xf32>
    %496 = arith.addf %482, %495 : vector<8x128xf32>
    %c0_284 = arith.constant 0 : index
    %c0_285 = arith.constant 0 : index
    %497 = vector.load %arg4[%c0_284, %c0_285] : memref<1x128xf32, #tpu.memory_space<vmem>>, vector<1x128xf32>
    %498 = vector.broadcast %497 : vector<1x128xf32> to vector<8x128xf32>
    %499 = arith.mulf %496, %498 : vector<8x128xf32>
    %c0_286 = arith.constant 0 : index
    %c0_287 = arith.constant 0 : index
    %500 = vector.load %arg5[%c0_286, %c0_287] : memref<1x128xf32, #tpu.memory_space<vmem>>, vector<1x128xf32>
    %501 = vector.broadcast %500 : vector<1x128xf32> to vector<8x128xf32>
    %502 = arith.addf %499, %501 : vector<8x128xf32>
    %503 = vector.broadcast %351 : f32 to vector<8x128xf32>
    %504 = arith.mulf %502, %503 : vector<8x128xf32>
    %cst_288 = arith.constant 5.000000e-01 : f32
    %505 = vector.broadcast %cst_288 : f32 to vector<8x128xf32>
    %506 = arith.mulf %504, %505 : vector<8x128xf32>
    %cst_289 = arith.constant 1.000000e+00 : f32
    %507 = vector.broadcast %cst_289 : f32 to vector<8x128xf32>
    %508 = arith.cmpf oge, %506, %507 : vector<8x128xf32>
    %509 = arith.extui %508 : vector<8x128xi1> to vector<8x128xi32>
    %510 = arith.sitofp %509 : vector<8x128xi32> to vector<8x128xf32>
    %511 = arith.truncf %510 : vector<8x128xf32> to vector<8x128xbf16>
    %c2_290 = arith.constant 2 : index
    %c1_291 = arith.constant 1 : index
    %c0_292 = arith.constant 0 : index
    %512 = vector.load %arg6[%c2_290, %c1_291, %c0_292] : memref<5x10x128xbf16, #tpu.memory_space<vmem>>, vector<1x8x128xbf16>
    %513 = vector.shape_cast %512 : vector<1x8x128xbf16> to vector<8x128xbf16>
    %514 = vector.shape_cast %511 : vector<8x128xbf16> to vector<1x8x128xbf16>
    tpu.vector_store %arg6[%c2_290, %c1_291, %c0_292], %514 {strides = array<i32>} : memref<5x10x128xbf16, #tpu.memory_space<vmem>>, vector<1x8x128xbf16>,
    %c5_i32_293 = arith.constant 5 : i32
    %515 = arith.muli %arg1, %c5_i32_293 : i32
    %c3_i32_294 = arith.constant 3 : i32
    %516 = arith.addi %515, %c3_i32_294 : i32
    %c1_i32_295 = arith.constant 1 : i32
    %517 = arith.subi %516, %c1_i32_295 : i32
    %c0_i32_296 = arith.constant 0 : i32
    %518 = arith.cmpi sge, %517, %c0_i32_296 : i32
    %c8_i32_297 = arith.constant 8 : i32
    %519 = arith.cmpi slt, %517, %c8_i32_297 : i32
    %520 = arith.andi %518, %519 : i1
    %521 = arith.extui %520 : i1 to i32
    %522 = arith.sitofp %521 : i32 to f32
    %cst_298 = arith.constant 0.000000e+00 : f32
    %523 = vector.broadcast %cst_298 : f32 to vector<8x128xf32>
    %c22_i32_299 = arith.constant 22 : i32
    %524 = arith.muli %arg0, %c22_i32_299 : i32
    %c3_i32_300 = arith.constant 3 : i32
    %525 = arith.addi %524, %c3_i32_300 : i32
    %c2_i32_301 = arith.constant 2 : i32
    %526 = arith.muli %c2_i32_301, %517 : i32
    %527 = arith.addi %525, %526 : i32
    %c0_i32_302 = arith.constant 0 : i32
    %528 = arith.addi %527, %c0_i32_302 : i32
    %c1_i32_303 = arith.constant 1 : i32
    %529 = arith.subi %528, %c1_i32_303 : i32
    %530 = arith.index_cast %529 : i32 to index
    %c2_304 = arith.constant 2 : index
    %c0_305 = arith.constant 0 : index
    %531 = tpu.strided_load %arg2[%530, %c2_304, %c0_305] {strides = array<i32: 1, 2, 1>} : memref<44x22x4xf32, #tpu.memory_space<vmem>>, vector<1x8x4xf32>
    %532 = vector.shape_cast %531 : vector<1x8x4xf32> to vector<8x4xf32>
    %cst_306 = arith.constant 5.000000e-01 : f32
    %533 = vector.broadcast %cst_306 : f32 to vector<8x4xf32>
    %534 = arith.mulf %532, %533 : vector<8x4xf32>
    %cst_307 = arith.constant 1.000000e+00 : f32
    %535 = vector.broadcast %cst_307 : f32 to vector<8x4xf32>
    %536 = arith.cmpf oge, %534, %535 : vector<8x4xf32>
    %537 = arith.extui %536 : vector<8x4xi1> to vector<8x4xi32>
    %538 = arith.sitofp %537 : vector<8x4xi32> to vector<8x4xf32>
    %539 = arith.truncf %538 : vector<8x4xf32> to vector<8x4xbf16>
    %c0_308 = arith.constant 0 : index
    %c0_309 = arith.constant 0 : index
    %c0_310 = arith.constant 0 : index
    %540 = vector.load %arg3[%c0_308, %c0_309, %c0_310] : memref<9x4x128xbf16, #tpu.memory_space<vmem>>, vector<1x4x128xbf16>
    %541 = vector.shape_cast %540 : vector<1x4x128xbf16> to vector<4x128xbf16>
    %cst_311 = arith.constant dense<0.000000e+00> : vector<8x128xf32>
    %542 = tpu.matmul %539, %541, %cst_311 {dimension_numbers = #tpu.dot_dimension_numbers<[1], [0], [0], [1], [0, 0, 1, 1], [], []>} : vector<8x4xbf16>, vector<4x128xbf16>, vector<8x128xf32> -> vector<8x128xf32>
    %543 = arith.addf %523, %542 : vector<8x128xf32>
    %544 = arith.index_cast %529 : i32 to index
    %c3_312 = arith.constant 3 : index
    %c0_313 = arith.constant 0 : index
    %545 = tpu.strided_load %arg2[%544, %c3_312, %c0_313] {strides = array<i32: 1, 2, 1>} : memref<44x22x4xf32, #tpu.memory_space<vmem>>, vector<1x8x4xf32>
    %546 = vector.shape_cast %545 : vector<1x8x4xf32> to vector<8x4xf32>
    %cst_314 = arith.constant 5.000000e-01 : f32
    %547 = vector.broadcast %cst_314 : f32 to vector<8x4xf32>
    %548 = arith.mulf %546, %547 : vector<8x4xf32>
    %cst_315 = arith.constant 1.000000e+00 : f32
    %549 = vector.broadcast %cst_315 : f32 to vector<8x4xf32>
    %550 = arith.cmpf oge, %548, %549 : vector<8x4xf32>
    %551 = arith.extui %550 : vector<8x4xi1> to vector<8x4xi32>
    %552 = arith.sitofp %551 : vector<8x4xi32> to vector<8x4xf32>
    %553 = arith.truncf %552 : vector<8x4xf32> to vector<8x4xbf16>
    %c1_316 = arith.constant 1 : index
    %c0_317 = arith.constant 0 : index
    %c0_318 = arith.constant 0 : index
    %554 = vector.load %arg3[%c1_316, %c0_317, %c0_318] : memref<9x4x128xbf16, #tpu.memory_space<vmem>>, vector<1x4x128xbf16>
    %555 = vector.shape_cast %554 : vector<1x4x128xbf16> to vector<4x128xbf16>
    %cst_319 = arith.constant dense<0.000000e+00> : vector<8x128xf32>
    %556 = tpu.matmul %553, %555, %cst_319 {dimension_numbers = #tpu.dot_dimension_numbers<[1], [0], [0], [1], [0, 0, 1, 1], [], []>} : vector<8x4xbf16>, vector<4x128xbf16>, vector<8x128xf32> -> vector<8x128xf32>
    %557 = arith.addf %543, %556 : vector<8x128xf32>
    %558 = arith.index_cast %529 : i32 to index
    %c4_320 = arith.constant 4 : index
    %c0_321 = arith.constant 0 : index
    %559 = tpu.strided_load %arg2[%558, %c4_320, %c0_321] {strides = array<i32: 1, 2, 1>} : memref<44x22x4xf32, #tpu.memory_space<vmem>>, vector<1x8x4xf32>
    %560 = vector.shape_cast %559 : vector<1x8x4xf32> to vector<8x4xf32>
    %cst_322 = arith.constant 5.000000e-01 : f32
    %561 = vector.broadcast %cst_322 : f32 to vector<8x4xf32>
    %562 = arith.mulf %560, %561 : vector<8x4xf32>
    %cst_323 = arith.constant 1.000000e+00 : f32
    %563 = vector.broadcast %cst_323 : f32 to vector<8x4xf32>
    %564 = arith.cmpf oge, %562, %563 : vector<8x4xf32>
    %565 = arith.extui %564 : vector<8x4xi1> to vector<8x4xi32>
    %566 = arith.sitofp %565 : vector<8x4xi32> to vector<8x4xf32>
    %567 = arith.truncf %566 : vector<8x4xf32> to vector<8x4xbf16>
    %c2_324 = arith.constant 2 : index
    %c0_325 = arith.constant 0 : index
    %c0_326 = arith.constant 0 : index
    %568 = vector.load %arg3[%c2_324, %c0_325, %c0_326] : memref<9x4x128xbf16, #tpu.memory_space<vmem>>, vector<1x4x128xbf16>
    %569 = vector.shape_cast %568 : vector<1x4x128xbf16> to vector<4x128xbf16>
    %cst_327 = arith.constant dense<0.000000e+00> : vector<8x128xf32>
    %570 = tpu.matmul %567, %569, %cst_327 {dimension_numbers = #tpu.dot_dimension_numbers<[1], [0], [0], [1], [0, 0, 1, 1], [], []>} : vector<8x4xbf16>, vector<4x128xbf16>, vector<8x128xf32> -> vector<8x128xf32>
    %571 = arith.addf %557, %570 : vector<8x128xf32>
    %c22_i32_328 = arith.constant 22 : i32
    %572 = arith.muli %arg0, %c22_i32_328 : i32
    %c3_i32_329 = arith.constant 3 : i32
    %573 = arith.addi %572, %c3_i32_329 : i32
    %c2_i32_330 = arith.constant 2 : i32
    %574 = arith.muli %c2_i32_330, %517 : i32
    %575 = arith.addi %573, %574 : i32
    %c1_i32_331 = arith.constant 1 : i32
    %576 = arith.addi %575, %c1_i32_331 : i32
    %c1_i32_332 = arith.constant 1 : i32
    %577 = arith.subi %576, %c1_i32_332 : i32
    %578 = arith.index_cast %577 : i32 to index
    %c2_333 = arith.constant 2 : index
    %c0_334 = arith.constant 0 : index
    %579 = tpu.strided_load %arg2[%578, %c2_333, %c0_334] {strides = array<i32: 1, 2, 1>} : memref<44x22x4xf32, #tpu.memory_space<vmem>>, vector<1x8x4xf32>
    %580 = vector.shape_cast %579 : vector<1x8x4xf32> to vector<8x4xf32>
    %cst_335 = arith.constant 5.000000e-01 : f32
    %581 = vector.broadcast %cst_335 : f32 to vector<8x4xf32>
    %582 = arith.mulf %580, %581 : vector<8x4xf32>
    %cst_336 = arith.constant 1.000000e+00 : f32
    %583 = vector.broadcast %cst_336 : f32 to vector<8x4xf32>
    %584 = arith.cmpf oge, %582, %583 : vector<8x4xf32>
    %585 = arith.extui %584 : vector<8x4xi1> to vector<8x4xi32>
    %586 = arith.sitofp %585 : vector<8x4xi32> to vector<8x4xf32>
    %587 = arith.truncf %586 : vector<8x4xf32> to vector<8x4xbf16>
    %c3_337 = arith.constant 3 : index
    %c0_338 = arith.constant 0 : index
    %c0_339 = arith.constant 0 : index
    %588 = vector.load %arg3[%c3_337, %c0_338, %c0_339] : memref<9x4x128xbf16, #tpu.memory_space<vmem>>, vector<1x4x128xbf16>
    %589 = vector.shape_cast %588 : vector<1x4x128xbf16> to vector<4x128xbf16>
    %cst_340 = arith.constant dense<0.000000e+00> : vector<8x128xf32>
    %590 = tpu.matmul %587, %589, %cst_340 {dimension_numbers = #tpu.dot_dimension_numbers<[1], [0], [0], [1], [0, 0, 1, 1], [], []>} : vector<8x4xbf16>, vector<4x128xbf16>, vector<8x128xf32> -> vector<8x128xf32>
    %591 = arith.addf %571, %590 : vector<8x128xf32>
    %592 = arith.index_cast %577 : i32 to index
    %c3_341 = arith.constant 3 : index
    %c0_342 = arith.constant 0 : index
    %593 = tpu.strided_load %arg2[%592, %c3_341, %c0_342] {strides = array<i32: 1, 2, 1>} : memref<44x22x4xf32, #tpu.memory_space<vmem>>, vector<1x8x4xf32>
    %594 = vector.shape_cast %593 : vector<1x8x4xf32> to vector<8x4xf32>
    %cst_343 = arith.constant 5.000000e-01 : f32
    %595 = vector.broadcast %cst_343 : f32 to vector<8x4xf32>
    %596 = arith.mulf %594, %595 : vector<8x4xf32>
    %cst_344 = arith.constant 1.000000e+00 : f32
    %597 = vector.broadcast %cst_344 : f32 to vector<8x4xf32>
    %598 = arith.cmpf oge, %596, %597 : vector<8x4xf32>
    %599 = arith.extui %598 : vector<8x4xi1> to vector<8x4xi32>
    %600 = arith.sitofp %599 : vector<8x4xi32> to vector<8x4xf32>
    %601 = arith.truncf %600 : vector<8x4xf32> to vector<8x4xbf16>
    %c4_345 = arith.constant 4 : index
    %c0_346 = arith.constant 0 : index
    %c0_347 = arith.constant 0 : index
    %602 = vector.load %arg3[%c4_345, %c0_346, %c0_347] : memref<9x4x128xbf16, #tpu.memory_space<vmem>>, vector<1x4x128xbf16>
    %603 = vector.shape_cast %602 : vector<1x4x128xbf16> to vector<4x128xbf16>
    %cst_348 = arith.constant dense<0.000000e+00> : vector<8x128xf32>
    %604 = tpu.matmul %601, %603, %cst_348 {dimension_numbers = #tpu.dot_dimension_numbers<[1], [0], [0], [1], [0, 0, 1, 1], [], []>} : vector<8x4xbf16>, vector<4x128xbf16>, vector<8x128xf32> -> vector<8x128xf32>
    %605 = arith.addf %591, %604 : vector<8x128xf32>
    %606 = arith.index_cast %577 : i32 to index
    %c4_349 = arith.constant 4 : index
    %c0_350 = arith.constant 0 : index
    %607 = tpu.strided_load %arg2[%606, %c4_349, %c0_350] {strides = array<i32: 1, 2, 1>} : memref<44x22x4xf32, #tpu.memory_space<vmem>>, vector<1x8x4xf32>
    %608 = vector.shape_cast %607 : vector<1x8x4xf32> to vector<8x4xf32>
    %cst_351 = arith.constant 5.000000e-01 : f32
    %609 = vector.broadcast %cst_351 : f32 to vector<8x4xf32>
    %610 = arith.mulf %608, %609 : vector<8x4xf32>
    %cst_352 = arith.constant 1.000000e+00 : f32
    %611 = vector.broadcast %cst_352 : f32 to vector<8x4xf32>
    %612 = arith.cmpf oge, %610, %611 : vector<8x4xf32>
    %613 = arith.extui %612 : vector<8x4xi1> to vector<8x4xi32>
    %614 = arith.sitofp %613 : vector<8x4xi32> to vector<8x4xf32>
    %615 = arith.truncf %614 : vector<8x4xf32> to vector<8x4xbf16>
    %c5_353 = arith.constant 5 : index
    %c0_354 = arith.constant 0 : index
    %c0_355 = arith.constant 0 : index
    %616 = vector.load %arg3[%c5_353, %c0_354, %c0_355] : memref<9x4x128xbf16, #tpu.memory_space<vmem>>, vector<1x4x128xbf16>
    %617 = vector.shape_cast %616 : vector<1x4x128xbf16> to vector<4x128xbf16>
    %cst_356 = arith.constant dense<0.000000e+00> : vector<8x128xf32>
    %618 = tpu.matmul %615, %617, %cst_356 {dimension_numbers = #tpu.dot_dimension_numbers<[1], [0], [0], [1], [0, 0, 1, 1], [], []>} : vector<8x4xbf16>, vector<4x128xbf16>, vector<8x128xf32> -> vector<8x128xf32>
    %619 = arith.addf %605, %618 : vector<8x128xf32>
    %c22_i32_357 = arith.constant 22 : i32
    %620 = arith.muli %arg0, %c22_i32_357 : i32
    %c3_i32_358 = arith.constant 3 : i32
    %621 = arith.addi %620, %c3_i32_358 : i32
    %c2_i32_359 = arith.constant 2 : i32
    %622 = arith.muli %c2_i32_359, %517 : i32
    %623 = arith.addi %621, %622 : i32
    %c2_i32_360 = arith.constant 2 : i32
    %624 = arith.addi %623, %c2_i32_360 : i32
    %c1_i32_361 = arith.constant 1 : i32
    %625 = arith.subi %624, %c1_i32_361 : i32
    %626 = arith.index_cast %625 : i32 to index
    %c2_362 = arith.constant 2 : index
    %c0_363 = arith.constant 0 : index
    %627 = tpu.strided_load %arg2[%626, %c2_362, %c0_363] {strides = array<i32: 1, 2, 1>} : memref<44x22x4xf32, #tpu.memory_space<vmem>>, vector<1x8x4xf32>
    %628 = vector.shape_cast %627 : vector<1x8x4xf32> to vector<8x4xf32>
    %cst_364 = arith.constant 5.000000e-01 : f32
    %629 = vector.broadcast %cst_364 : f32 to vector<8x4xf32>
    %630 = arith.mulf %628, %629 : vector<8x4xf32>
    %cst_365 = arith.constant 1.000000e+00 : f32
    %631 = vector.broadcast %cst_365 : f32 to vector<8x4xf32>
    %632 = arith.cmpf oge, %630, %631 : vector<8x4xf32>
    %633 = arith.extui %632 : vector<8x4xi1> to vector<8x4xi32>
    %634 = arith.sitofp %633 : vector<8x4xi32> to vector<8x4xf32>
    %635 = arith.truncf %634 : vector<8x4xf32> to vector<8x4xbf16>
    %c6_366 = arith.constant 6 : index
    %c0_367 = arith.constant 0 : index
    %c0_368 = arith.constant 0 : index
    %636 = vector.load %arg3[%c6_366, %c0_367, %c0_368] : memref<9x4x128xbf16, #tpu.memory_space<vmem>>, vector<1x4x128xbf16>
    %637 = vector.shape_cast %636 : vector<1x4x128xbf16> to vector<4x128xbf16>
    %cst_369 = arith.constant dense<0.000000e+00> : vector<8x128xf32>
    %638 = tpu.matmul %635, %637, %cst_369 {dimension_numbers = #tpu.dot_dimension_numbers<[1], [0], [0], [1], [0, 0, 1, 1], [], []>} : vector<8x4xbf16>, vector<4x128xbf16>, vector<8x128xf32> -> vector<8x128xf32>
    %639 = arith.addf %619, %638 : vector<8x128xf32>
    %640 = arith.index_cast %625 : i32 to index
    %c3_370 = arith.constant 3 : index
    %c0_371 = arith.constant 0 : index
    %641 = tpu.strided_load %arg2[%640, %c3_370, %c0_371] {strides = array<i32: 1, 2, 1>} : memref<44x22x4xf32, #tpu.memory_space<vmem>>, vector<1x8x4xf32>
    %642 = vector.shape_cast %641 : vector<1x8x4xf32> to vector<8x4xf32>
    %cst_372 = arith.constant 5.000000e-01 : f32
    %643 = vector.broadcast %cst_372 : f32 to vector<8x4xf32>
    %644 = arith.mulf %642, %643 : vector<8x4xf32>
    %cst_373 = arith.constant 1.000000e+00 : f32
    %645 = vector.broadcast %cst_373 : f32 to vector<8x4xf32>
    %646 = arith.cmpf oge, %644, %645 : vector<8x4xf32>
    %647 = arith.extui %646 : vector<8x4xi1> to vector<8x4xi32>
    %648 = arith.sitofp %647 : vector<8x4xi32> to vector<8x4xf32>
    %649 = arith.truncf %648 : vector<8x4xf32> to vector<8x4xbf16>
    %c7_374 = arith.constant 7 : index
    %c0_375 = arith.constant 0 : index
    %c0_376 = arith.constant 0 : index
    %650 = vector.load %arg3[%c7_374, %c0_375, %c0_376] : memref<9x4x128xbf16, #tpu.memory_space<vmem>>, vector<1x4x128xbf16>
    %651 = vector.shape_cast %650 : vector<1x4x128xbf16> to vector<4x128xbf16>
    %cst_377 = arith.constant dense<0.000000e+00> : vector<8x128xf32>
    %652 = tpu.matmul %649, %651, %cst_377 {dimension_numbers = #tpu.dot_dimension_numbers<[1], [0], [0], [1], [0, 0, 1, 1], [], []>} : vector<8x4xbf16>, vector<4x128xbf16>, vector<8x128xf32> -> vector<8x128xf32>
    %653 = arith.addf %639, %652 : vector<8x128xf32>
    %654 = arith.index_cast %625 : i32 to index
    %c4_378 = arith.constant 4 : index
    %c0_379 = arith.constant 0 : index
    %655 = tpu.strided_load %arg2[%654, %c4_378, %c0_379] {strides = array<i32: 1, 2, 1>} : memref<44x22x4xf32, #tpu.memory_space<vmem>>, vector<1x8x4xf32>
    %656 = vector.shape_cast %655 : vector<1x8x4xf32> to vector<8x4xf32>
    %cst_380 = arith.constant 5.000000e-01 : f32
    %657 = vector.broadcast %cst_380 : f32 to vector<8x4xf32>
    %658 = arith.mulf %656, %657 : vector<8x4xf32>
    %cst_381 = arith.constant 1.000000e+00 : f32
    %659 = vector.broadcast %cst_381 : f32 to vector<8x4xf32>
    %660 = arith.cmpf oge, %658, %659 : vector<8x4xf32>
    %661 = arith.extui %660 : vector<8x4xi1> to vector<8x4xi32>
    %662 = arith.sitofp %661 : vector<8x4xi32> to vector<8x4xf32>
    %663 = arith.truncf %662 : vector<8x4xf32> to vector<8x4xbf16>
    %c8_382 = arith.constant 8 : index
    %c0_383 = arith.constant 0 : index
    %c0_384 = arith.constant 0 : index
    %664 = vector.load %arg3[%c8_382, %c0_383, %c0_384] : memref<9x4x128xbf16, #tpu.memory_space<vmem>>, vector<1x4x128xbf16>
    %665 = vector.shape_cast %664 : vector<1x4x128xbf16> to vector<4x128xbf16>
    %cst_385 = arith.constant dense<0.000000e+00> : vector<8x128xf32>
    %666 = tpu.matmul %663, %665, %cst_385 {dimension_numbers = #tpu.dot_dimension_numbers<[1], [0], [0], [1], [0, 0, 1, 1], [], []>} : vector<8x4xbf16>, vector<4x128xbf16>, vector<8x128xf32> -> vector<8x128xf32>
    %667 = arith.addf %653, %666 : vector<8x128xf32>
    %c0_386 = arith.constant 0 : index
    %c0_387 = arith.constant 0 : index
    %668 = vector.load %arg4[%c0_386, %c0_387] : memref<1x128xf32, #tpu.memory_space<vmem>>, vector<1x128xf32>
    %669 = vector.broadcast %668 : vector<1x128xf32> to vector<8x128xf32>
    %670 = arith.mulf %667, %669 : vector<8x128xf32>
    %c0_388 = arith.constant 0 : index
    %c0_389 = arith.constant 0 : index
    %671 = vector.load %arg5[%c0_388, %c0_389] : memref<1x128xf32, #tpu.memory_space<vmem>>, vector<1x128xf32>
    %672 = vector.broadcast %671 : vector<1x128xf32> to vector<8x128xf32>
    %673 = arith.addf %670, %672 : vector<8x128xf32>
    %674 = vector.broadcast %522 : f32 to vector<8x128xf32>
    %675 = arith.mulf %673, %674 : vector<8x128xf32>
    %cst_390 = arith.constant 5.000000e-01 : f32
    %676 = vector.broadcast %cst_390 : f32 to vector<8x128xf32>
    %677 = arith.mulf %675, %676 : vector<8x128xf32>
    %cst_391 = arith.constant 1.000000e+00 : f32
    %678 = vector.broadcast %cst_391 : f32 to vector<8x128xf32>
    %679 = arith.cmpf oge, %677, %678 : vector<8x128xf32>
    %680 = arith.extui %679 : vector<8x128xi1> to vector<8x128xi32>
    %681 = arith.sitofp %680 : vector<8x128xi32> to vector<8x128xf32>
    %682 = arith.truncf %681 : vector<8x128xf32> to vector<8x128xbf16>
    %c3_392 = arith.constant 3 : index
    %c1_393 = arith.constant 1 : index
    %c0_394 = arith.constant 0 : index
    %683 = vector.load %arg6[%c3_392, %c1_393, %c0_394] : memref<5x10x128xbf16, #tpu.memory_space<vmem>>, vector<1x8x128xbf16>
    %684 = vector.shape_cast %683 : vector<1x8x128xbf16> to vector<8x128xbf16>
    %685 = vector.shape_cast %682 : vector<8x128xbf16> to vector<1x8x128xbf16>
    tpu.vector_store %arg6[%c3_392, %c1_393, %c0_394], %685 {strides = array<i32>} : memref<5x10x128xbf16, #tpu.memory_space<vmem>>, vector<1x8x128xbf16>,
    %c5_i32_395 = arith.constant 5 : i32
    %686 = arith.muli %arg1, %c5_i32_395 : i32
    %c4_i32 = arith.constant 4 : i32
    %687 = arith.addi %686, %c4_i32 : i32
    %c1_i32_396 = arith.constant 1 : i32
    %688 = arith.subi %687, %c1_i32_396 : i32
    %c0_i32_397 = arith.constant 0 : i32
    %689 = arith.cmpi sge, %688, %c0_i32_397 : i32
    %c8_i32_398 = arith.constant 8 : i32
    %690 = arith.cmpi slt, %688, %c8_i32_398 : i32
    %691 = arith.andi %689, %690 : i1
    %692 = arith.extui %691 : i1 to i32
    %693 = arith.sitofp %692 : i32 to f32
    %cst_399 = arith.constant 0.000000e+00 : f32
    %694 = vector.broadcast %cst_399 : f32 to vector<8x128xf32>
    %c22_i32_400 = arith.constant 22 : i32
    %695 = arith.muli %arg0, %c22_i32_400 : i32
    %c3_i32_401 = arith.constant 3 : i32
    %696 = arith.addi %695, %c3_i32_401 : i32
    %c2_i32_402 = arith.constant 2 : i32
    %697 = arith.muli %c2_i32_402, %688 : i32
    %698 = arith.addi %696, %697 : i32
    %c0_i32_403 = arith.constant 0 : i32
    %699 = arith.addi %698, %c0_i32_403 : i32
    %c1_i32_404 = arith.constant 1 : i32
    %700 = arith.subi %699, %c1_i32_404 : i32
    %701 = arith.index_cast %700 : i32 to index
    %c2_405 = arith.constant 2 : index
    %c0_406 = arith.constant 0 : index
    %702 = tpu.strided_load %arg2[%701, %c2_405, %c0_406] {strides = array<i32: 1, 2, 1>} : memref<44x22x4xf32, #tpu.memory_space<vmem>>, vector<1x8x4xf32>
    %703 = vector.shape_cast %702 : vector<1x8x4xf32> to vector<8x4xf32>
    %cst_407 = arith.constant 5.000000e-01 : f32
    %704 = vector.broadcast %cst_407 : f32 to vector<8x4xf32>
    %705 = arith.mulf %703, %704 : vector<8x4xf32>
    %cst_408 = arith.constant 1.000000e+00 : f32
    %706 = vector.broadcast %cst_408 : f32 to vector<8x4xf32>
    %707 = arith.cmpf oge, %705, %706 : vector<8x4xf32>
    %708 = arith.extui %707 : vector<8x4xi1> to vector<8x4xi32>
    %709 = arith.sitofp %708 : vector<8x4xi32> to vector<8x4xf32>
    %710 = arith.truncf %709 : vector<8x4xf32> to vector<8x4xbf16>
    %c0_409 = arith.constant 0 : index
    %c0_410 = arith.constant 0 : index
    %c0_411 = arith.constant 0 : index
    %711 = vector.load %arg3[%c0_409, %c0_410, %c0_411] : memref<9x4x128xbf16, #tpu.memory_space<vmem>>, vector<1x4x128xbf16>
    %712 = vector.shape_cast %711 : vector<1x4x128xbf16> to vector<4x128xbf16>
    %cst_412 = arith.constant dense<0.000000e+00> : vector<8x128xf32>
    %713 = tpu.matmul %710, %712, %cst_412 {dimension_numbers = #tpu.dot_dimension_numbers<[1], [0], [0], [1], [0, 0, 1, 1], [], []>} : vector<8x4xbf16>, vector<4x128xbf16>, vector<8x128xf32> -> vector<8x128xf32>
    %714 = arith.addf %694, %713 : vector<8x128xf32>
    %715 = arith.index_cast %700 : i32 to index
    %c3_413 = arith.constant 3 : index
    %c0_414 = arith.constant 0 : index
    %716 = tpu.strided_load %arg2[%715, %c3_413, %c0_414] {strides = array<i32: 1, 2, 1>} : memref<44x22x4xf32, #tpu.memory_space<vmem>>, vector<1x8x4xf32>
    %717 = vector.shape_cast %716 : vector<1x8x4xf32> to vector<8x4xf32>
    %cst_415 = arith.constant 5.000000e-01 : f32
    %718 = vector.broadcast %cst_415 : f32 to vector<8x4xf32>
    %719 = arith.mulf %717, %718 : vector<8x4xf32>
    %cst_416 = arith.constant 1.000000e+00 : f32
    %720 = vector.broadcast %cst_416 : f32 to vector<8x4xf32>
    %721 = arith.cmpf oge, %719, %720 : vector<8x4xf32>
    %722 = arith.extui %721 : vector<8x4xi1> to vector<8x4xi32>
    %723 = arith.sitofp %722 : vector<8x4xi32> to vector<8x4xf32>
    %724 = arith.truncf %723 : vector<8x4xf32> to vector<8x4xbf16>
    %c1_417 = arith.constant 1 : index
    %c0_418 = arith.constant 0 : index
    %c0_419 = arith.constant 0 : index
    %725 = vector.load %arg3[%c1_417, %c0_418, %c0_419] : memref<9x4x128xbf16, #tpu.memory_space<vmem>>, vector<1x4x128xbf16>
    %726 = vector.shape_cast %725 : vector<1x4x128xbf16> to vector<4x128xbf16>
    %cst_420 = arith.constant dense<0.000000e+00> : vector<8x128xf32>
    %727 = tpu.matmul %724, %726, %cst_420 {dimension_numbers = #tpu.dot_dimension_numbers<[1], [0], [0], [1], [0, 0, 1, 1], [], []>} : vector<8x4xbf16>, vector<4x128xbf16>, vector<8x128xf32> -> vector<8x128xf32>
    %728 = arith.addf %714, %727 : vector<8x128xf32>
    %729 = arith.index_cast %700 : i32 to index
    %c4_421 = arith.constant 4 : index
    %c0_422 = arith.constant 0 : index
    %730 = tpu.strided_load %arg2[%729, %c4_421, %c0_422] {strides = array<i32: 1, 2, 1>} : memref<44x22x4xf32, #tpu.memory_space<vmem>>, vector<1x8x4xf32>
    %731 = vector.shape_cast %730 : vector<1x8x4xf32> to vector<8x4xf32>
    %cst_423 = arith.constant 5.000000e-01 : f32
    %732 = vector.broadcast %cst_423 : f32 to vector<8x4xf32>
    %733 = arith.mulf %731, %732 : vector<8x4xf32>
    %cst_424 = arith.constant 1.000000e+00 : f32
    %734 = vector.broadcast %cst_424 : f32 to vector<8x4xf32>
    %735 = arith.cmpf oge, %733, %734 : vector<8x4xf32>
    %736 = arith.extui %735 : vector<8x4xi1> to vector<8x4xi32>
    %737 = arith.sitofp %736 : vector<8x4xi32> to vector<8x4xf32>
    %738 = arith.truncf %737 : vector<8x4xf32> to vector<8x4xbf16>
    %c2_425 = arith.constant 2 : index
    %c0_426 = arith.constant 0 : index
    %c0_427 = arith.constant 0 : index
    %739 = vector.load %arg3[%c2_425, %c0_426, %c0_427] : memref<9x4x128xbf16, #tpu.memory_space<vmem>>, vector<1x4x128xbf16>
    %740 = vector.shape_cast %739 : vector<1x4x128xbf16> to vector<4x128xbf16>
    %cst_428 = arith.constant dense<0.000000e+00> : vector<8x128xf32>
    %741 = tpu.matmul %738, %740, %cst_428 {dimension_numbers = #tpu.dot_dimension_numbers<[1], [0], [0], [1], [0, 0, 1, 1], [], []>} : vector<8x4xbf16>, vector<4x128xbf16>, vector<8x128xf32> -> vector<8x128xf32>
    %742 = arith.addf %728, %741 : vector<8x128xf32>
    %c22_i32_429 = arith.constant 22 : i32
    %743 = arith.muli %arg0, %c22_i32_429 : i32
    %c3_i32_430 = arith.constant 3 : i32
    %744 = arith.addi %743, %c3_i32_430 : i32
    %c2_i32_431 = arith.constant 2 : i32
    %745 = arith.muli %c2_i32_431, %688 : i32
    %746 = arith.addi %744, %745 : i32
    %c1_i32_432 = arith.constant 1 : i32
    %747 = arith.addi %746, %c1_i32_432 : i32
    %c1_i32_433 = arith.constant 1 : i32
    %748 = arith.subi %747, %c1_i32_433 : i32
    %749 = arith.index_cast %748 : i32 to index
    %c2_434 = arith.constant 2 : index
    %c0_435 = arith.constant 0 : index
    %750 = tpu.strided_load %arg2[%749, %c2_434, %c0_435] {strides = array<i32: 1, 2, 1>} : memref<44x22x4xf32, #tpu.memory_space<vmem>>, vector<1x8x4xf32>
    %751 = vector.shape_cast %750 : vector<1x8x4xf32> to vector<8x4xf32>
    %cst_436 = arith.constant 5.000000e-01 : f32
    %752 = vector.broadcast %cst_436 : f32 to vector<8x4xf32>
    %753 = arith.mulf %751, %752 : vector<8x4xf32>
    %cst_437 = arith.constant 1.000000e+00 : f32
    %754 = vector.broadcast %cst_437 : f32 to vector<8x4xf32>
    %755 = arith.cmpf oge, %753, %754 : vector<8x4xf32>
    %756 = arith.extui %755 : vector<8x4xi1> to vector<8x4xi32>
    %757 = arith.sitofp %756 : vector<8x4xi32> to vector<8x4xf32>
    %758 = arith.truncf %757 : vector<8x4xf32> to vector<8x4xbf16>
    %c3_438 = arith.constant 3 : index
    %c0_439 = arith.constant 0 : index
    %c0_440 = arith.constant 0 : index
    %759 = vector.load %arg3[%c3_438, %c0_439, %c0_440] : memref<9x4x128xbf16, #tpu.memory_space<vmem>>, vector<1x4x128xbf16>
    %760 = vector.shape_cast %759 : vector<1x4x128xbf16> to vector<4x128xbf16>
    %cst_441 = arith.constant dense<0.000000e+00> : vector<8x128xf32>
    %761 = tpu.matmul %758, %760, %cst_441 {dimension_numbers = #tpu.dot_dimension_numbers<[1], [0], [0], [1], [0, 0, 1, 1], [], []>} : vector<8x4xbf16>, vector<4x128xbf16>, vector<8x128xf32> -> vector<8x128xf32>
    %762 = arith.addf %742, %761 : vector<8x128xf32>
    %763 = arith.index_cast %748 : i32 to index
    %c3_442 = arith.constant 3 : index
    %c0_443 = arith.constant 0 : index
    %764 = tpu.strided_load %arg2[%763, %c3_442, %c0_443] {strides = array<i32: 1, 2, 1>} : memref<44x22x4xf32, #tpu.memory_space<vmem>>, vector<1x8x4xf32>
    %765 = vector.shape_cast %764 : vector<1x8x4xf32> to vector<8x4xf32>
    %cst_444 = arith.constant 5.000000e-01 : f32
    %766 = vector.broadcast %cst_444 : f32 to vector<8x4xf32>
    %767 = arith.mulf %765, %766 : vector<8x4xf32>
    %cst_445 = arith.constant 1.000000e+00 : f32
    %768 = vector.broadcast %cst_445 : f32 to vector<8x4xf32>
    %769 = arith.cmpf oge, %767, %768 : vector<8x4xf32>
    %770 = arith.extui %769 : vector<8x4xi1> to vector<8x4xi32>
    %771 = arith.sitofp %770 : vector<8x4xi32> to vector<8x4xf32>
    %772 = arith.truncf %771 : vector<8x4xf32> to vector<8x4xbf16>
    %c4_446 = arith.constant 4 : index
    %c0_447 = arith.constant 0 : index
    %c0_448 = arith.constant 0 : index
    %773 = vector.load %arg3[%c4_446, %c0_447, %c0_448] : memref<9x4x128xbf16, #tpu.memory_space<vmem>>, vector<1x4x128xbf16>
    %774 = vector.shape_cast %773 : vector<1x4x128xbf16> to vector<4x128xbf16>
    %cst_449 = arith.constant dense<0.000000e+00> : vector<8x128xf32>
    %775 = tpu.matmul %772, %774, %cst_449 {dimension_numbers = #tpu.dot_dimension_numbers<[1], [0], [0], [1], [0, 0, 1, 1], [], []>} : vector<8x4xbf16>, vector<4x128xbf16>, vector<8x128xf32> -> vector<8x128xf32>
    %776 = arith.addf %762, %775 : vector<8x128xf32>
    %777 = arith.index_cast %748 : i32 to index
    %c4_450 = arith.constant 4 : index
    %c0_451 = arith.constant 0 : index
    %778 = tpu.strided_load %arg2[%777, %c4_450, %c0_451] {strides = array<i32: 1, 2, 1>} : memref<44x22x4xf32, #tpu.memory_space<vmem>>, vector<1x8x4xf32>
    %779 = vector.shape_cast %778 : vector<1x8x4xf32> to vector<8x4xf32>
    %cst_452 = arith.constant 5.000000e-01 : f32
    %780 = vector.broadcast %cst_452 : f32 to vector<8x4xf32>
    %781 = arith.mulf %779, %780 : vector<8x4xf32>
    %cst_453 = arith.constant 1.000000e+00 : f32
    %782 = vector.broadcast %cst_453 : f32 to vector<8x4xf32>
    %783 = arith.cmpf oge, %781, %782 : vector<8x4xf32>
    %784 = arith.extui %783 : vector<8x4xi1> to vector<8x4xi32>
    %785 = arith.sitofp %784 : vector<8x4xi32> to vector<8x4xf32>
    %786 = arith.truncf %785 : vector<8x4xf32> to vector<8x4xbf16>
    %c5_454 = arith.constant 5 : index
    %c0_455 = arith.constant 0 : index
    %c0_456 = arith.constant 0 : index
    %787 = vector.load %arg3[%c5_454, %c0_455, %c0_456] : memref<9x4x128xbf16, #tpu.memory_space<vmem>>, vector<1x4x128xbf16>
    %788 = vector.shape_cast %787 : vector<1x4x128xbf16> to vector<4x128xbf16>
    %cst_457 = arith.constant dense<0.000000e+00> : vector<8x128xf32>
    %789 = tpu.matmul %786, %788, %cst_457 {dimension_numbers = #tpu.dot_dimension_numbers<[1], [0], [0], [1], [0, 0, 1, 1], [], []>} : vector<8x4xbf16>, vector<4x128xbf16>, vector<8x128xf32> -> vector<8x128xf32>
    %790 = arith.addf %776, %789 : vector<8x128xf32>
    %c22_i32_458 = arith.constant 22 : i32
    %791 = arith.muli %arg0, %c22_i32_458 : i32
    %c3_i32_459 = arith.constant 3 : i32
    %792 = arith.addi %791, %c3_i32_459 : i32
    %c2_i32_460 = arith.constant 2 : i32
    %793 = arith.muli %c2_i32_460, %688 : i32
    %794 = arith.addi %792, %793 : i32
    %c2_i32_461 = arith.constant 2 : i32
    %795 = arith.addi %794, %c2_i32_461 : i32
    %c1_i32_462 = arith.constant 1 : i32
    %796 = arith.subi %795, %c1_i32_462 : i32
    %797 = arith.index_cast %796 : i32 to index
    %c2_463 = arith.constant 2 : index
    %c0_464 = arith.constant 0 : index
    %798 = tpu.strided_load %arg2[%797, %c2_463, %c0_464] {strides = array<i32: 1, 2, 1>} : memref<44x22x4xf32, #tpu.memory_space<vmem>>, vector<1x8x4xf32>
    %799 = vector.shape_cast %798 : vector<1x8x4xf32> to vector<8x4xf32>
    %cst_465 = arith.constant 5.000000e-01 : f32
    %800 = vector.broadcast %cst_465 : f32 to vector<8x4xf32>
    %801 = arith.mulf %799, %800 : vector<8x4xf32>
    %cst_466 = arith.constant 1.000000e+00 : f32
    %802 = vector.broadcast %cst_466 : f32 to vector<8x4xf32>
    %803 = arith.cmpf oge, %801, %802 : vector<8x4xf32>
    %804 = arith.extui %803 : vector<8x4xi1> to vector<8x4xi32>
    %805 = arith.sitofp %804 : vector<8x4xi32> to vector<8x4xf32>
    %806 = arith.truncf %805 : vector<8x4xf32> to vector<8x4xbf16>
    %c6_467 = arith.constant 6 : index
    %c0_468 = arith.constant 0 : index
    %c0_469 = arith.constant 0 : index
    %807 = vector.load %arg3[%c6_467, %c0_468, %c0_469] : memref<9x4x128xbf16, #tpu.memory_space<vmem>>, vector<1x4x128xbf16>
    %808 = vector.shape_cast %807 : vector<1x4x128xbf16> to vector<4x128xbf16>
    %cst_470 = arith.constant dense<0.000000e+00> : vector<8x128xf32>
    %809 = tpu.matmul %806, %808, %cst_470 {dimension_numbers = #tpu.dot_dimension_numbers<[1], [0], [0], [1], [0, 0, 1, 1], [], []>} : vector<8x4xbf16>, vector<4x128xbf16>, vector<8x128xf32> -> vector<8x128xf32>
    %810 = arith.addf %790, %809 : vector<8x128xf32>
    %811 = arith.index_cast %796 : i32 to index
    %c3_471 = arith.constant 3 : index
    %c0_472 = arith.constant 0 : index
    %812 = tpu.strided_load %arg2[%811, %c3_471, %c0_472] {strides = array<i32: 1, 2, 1>} : memref<44x22x4xf32, #tpu.memory_space<vmem>>, vector<1x8x4xf32>
    %813 = vector.shape_cast %812 : vector<1x8x4xf32> to vector<8x4xf32>
    %cst_473 = arith.constant 5.000000e-01 : f32
    %814 = vector.broadcast %cst_473 : f32 to vector<8x4xf32>
    %815 = arith.mulf %813, %814 : vector<8x4xf32>
    %cst_474 = arith.constant 1.000000e+00 : f32
    %816 = vector.broadcast %cst_474 : f32 to vector<8x4xf32>
    %817 = arith.cmpf oge, %815, %816 : vector<8x4xf32>
    %818 = arith.extui %817 : vector<8x4xi1> to vector<8x4xi32>
    %819 = arith.sitofp %818 : vector<8x4xi32> to vector<8x4xf32>
    %820 = arith.truncf %819 : vector<8x4xf32> to vector<8x4xbf16>
    %c7_475 = arith.constant 7 : index
    %c0_476 = arith.constant 0 : index
    %c0_477 = arith.constant 0 : index
    %821 = vector.load %arg3[%c7_475, %c0_476, %c0_477] : memref<9x4x128xbf16, #tpu.memory_space<vmem>>, vector<1x4x128xbf16>
    %822 = vector.shape_cast %821 : vector<1x4x128xbf16> to vector<4x128xbf16>
    %cst_478 = arith.constant dense<0.000000e+00> : vector<8x128xf32>
    %823 = tpu.matmul %820, %822, %cst_478 {dimension_numbers = #tpu.dot_dimension_numbers<[1], [0], [0], [1], [0, 0, 1, 1], [], []>} : vector<8x4xbf16>, vector<4x128xbf16>, vector<8x128xf32> -> vector<8x128xf32>
    %824 = arith.addf %810, %823 : vector<8x128xf32>
    %825 = arith.index_cast %796 : i32 to index
    %c4_479 = arith.constant 4 : index
    %c0_480 = arith.constant 0 : index
    %826 = tpu.strided_load %arg2[%825, %c4_479, %c0_480] {strides = array<i32: 1, 2, 1>} : memref<44x22x4xf32, #tpu.memory_space<vmem>>, vector<1x8x4xf32>
    %827 = vector.shape_cast %826 : vector<1x8x4xf32> to vector<8x4xf32>
    %cst_481 = arith.constant 5.000000e-01 : f32
    %828 = vector.broadcast %cst_481 : f32 to vector<8x4xf32>
    %829 = arith.mulf %827, %828 : vector<8x4xf32>
    %cst_482 = arith.constant 1.000000e+00 : f32
    %830 = vector.broadcast %cst_482 : f32 to vector<8x4xf32>
    %831 = arith.cmpf oge, %829, %830 : vector<8x4xf32>
    %832 = arith.extui %831 : vector<8x4xi1> to vector<8x4xi32>
    %833 = arith.sitofp %832 : vector<8x4xi32> to vector<8x4xf32>
    %834 = arith.truncf %833 : vector<8x4xf32> to vector<8x4xbf16>
    %c8_483 = arith.constant 8 : index
    %c0_484 = arith.constant 0 : index
    %c0_485 = arith.constant 0 : index
    %835 = vector.load %arg3[%c8_483, %c0_484, %c0_485] : memref<9x4x128xbf16, #tpu.memory_space<vmem>>, vector<1x4x128xbf16>
    %836 = vector.shape_cast %835 : vector<1x4x128xbf16> to vector<4x128xbf16>
    %cst_486 = arith.constant dense<0.000000e+00> : vector<8x128xf32>
    %837 = tpu.matmul %834, %836, %cst_486 {dimension_numbers = #tpu.dot_dimension_numbers<[1], [0], [0], [1], [0, 0, 1, 1], [], []>} : vector<8x4xbf16>, vector<4x128xbf16>, vector<8x128xf32> -> vector<8x128xf32>
    %838 = arith.addf %824, %837 : vector<8x128xf32>
    %c0_487 = arith.constant 0 : index
    %c0_488 = arith.constant 0 : index
    %839 = vector.load %arg4[%c0_487, %c0_488] : memref<1x128xf32, #tpu.memory_space<vmem>>, vector<1x128xf32>
    %840 = vector.broadcast %839 : vector<1x128xf32> to vector<8x128xf32>
    %841 = arith.mulf %838, %840 : vector<8x128xf32>
    %c0_489 = arith.constant 0 : index
    %c0_490 = arith.constant 0 : index
    %842 = vector.load %arg5[%c0_489, %c0_490] : memref<1x128xf32, #tpu.memory_space<vmem>>, vector<1x128xf32>
    %843 = vector.broadcast %842 : vector<1x128xf32> to vector<8x128xf32>
    %844 = arith.addf %841, %843 : vector<8x128xf32>
    %845 = vector.broadcast %693 : f32 to vector<8x128xf32>
    %846 = arith.mulf %844, %845 : vector<8x128xf32>
    %cst_491 = arith.constant 5.000000e-01 : f32
    %847 = vector.broadcast %cst_491 : f32 to vector<8x128xf32>
    %848 = arith.mulf %846, %847 : vector<8x128xf32>
    %cst_492 = arith.constant 1.000000e+00 : f32
    %849 = vector.broadcast %cst_492 : f32 to vector<8x128xf32>
    %850 = arith.cmpf oge, %848, %849 : vector<8x128xf32>
    %851 = arith.extui %850 : vector<8x128xi1> to vector<8x128xi32>
    %852 = arith.sitofp %851 : vector<8x128xi32> to vector<8x128xf32>
    %853 = arith.truncf %852 : vector<8x128xf32> to vector<8x128xbf16>
    %c4_493 = arith.constant 4 : index
    %c1_494 = arith.constant 1 : index
    %c0_495 = arith.constant 0 : index
    %854 = vector.load %arg6[%c4_493, %c1_494, %c0_495] : memref<5x10x128xbf16, #tpu.memory_space<vmem>>, vector<1x8x128xbf16>
    %855 = vector.shape_cast %854 : vector<1x8x128xbf16> to vector<8x128xbf16>
    %856 = vector.shape_cast %853 : vector<8x128xbf16> to vector<1x8x128xbf16>
    tpu.vector_store %arg6[%c4_493, %c1_494, %c0_495], %856 {strides = array<i32>} : memref<5x10x128xbf16, #tpu.memory_space<vmem>>, vector<1x8x128xbf16>,
    return
  }
  func.func @transform_0(%arg0: i32, %arg1: i32) -> (i32, i32, i32) {
    %c0_i32 = arith.constant 0 : i32
    %c0_i32_0 = arith.constant 0 : i32
    %c0_i32_1 = arith.constant 0 : i32
    %c0_i32_2 = arith.constant 0 : i32
    return %c0_i32, %c0_i32_0, %c0_i32_1 : i32, i32, i32
  }
  func.func @transform_1(%arg0: i32, %arg1: i32) -> (i32, i32, i32) {
    %c0_i32 = arith.constant 0 : i32
    %c0_i32_0 = arith.constant 0 : i32
    %c0_i32_1 = arith.constant 0 : i32
    %c0_i32_2 = arith.constant 0 : i32
    return %c0_i32, %c0_i32_0, %c0_i32_1 : i32, i32, i32
  }
  func.func @transform_2(%arg0: i32, %arg1: i32) -> (i32, i32) {
    %c0_i32 = arith.constant 0 : i32
    %c0_i32_0 = arith.constant 0 : i32
    %c0_i32_1 = arith.constant 0 : i32
    return %c0_i32, %c0_i32_0 : i32, i32
  }
  func.func @transform_3(%arg0: i32, %arg1: i32) -> (i32, i32) {
    %c0_i32 = arith.constant 0 : i32
    %c0_i32_0 = arith.constant 0 : i32
    %c0_i32_1 = arith.constant 0 : i32
    return %c0_i32, %c0_i32_0 : i32, i32
  }
  func.func @transform_4(%arg0: i32, %arg1: i32) -> (i32, i32, i32) {
    %c2_i32 = arith.constant 2 : i32
    %0 = arith.muli %arg0, %c2_i32 : i32
    %1 = arith.addi %0, %arg1 : i32
    %c0_i32 = arith.constant 0 : i32
    %c0_i32_0 = arith.constant 0 : i32
    %c0_i32_1 = arith.constant 0 : i32
    return %1, %c0_i32, %c0_i32_0 : i32, i32, i32
  }
}

module attributes {stable_mosaic.version = 11 : i64} {
  func.func @kernel(%arg0: i32, %arg1: i32, %arg2: memref<20x10x128xbf16, #tpu.memory_space<vmem>>, %arg3: memref<9x128x128xbf16, #tpu.memory_space<vmem>>, %arg4: memref<1x128xf32, #tpu.memory_space<vmem>>, %arg5: memref<1x128xf32, #tpu.memory_space<vmem>>, %arg6: memref<44x22x4xf32, #tpu.memory_space<vmem>>, %arg7: memref<4x128xbf16, #tpu.memory_space<vmem>>, %arg8: memref<1x128xf32, #tpu.memory_space<vmem>>, %arg9: memref<1x128xf32, #tpu.memory_space<vmem>>, %arg10: memref<4x8x128xf32, #tpu.memory_space<vmem>>) attributes {dimension_semantics = [#tpu.dimension_semantics<parallel>, #tpu.dimension_semantics<parallel>], iteration_bounds = array<i64: 2, 2>, scalar_prefetch = 0 : i64, scratch_operands = 0 : i64, tpu.core_type = #tpu.core_type<tc>, window_params = [{pipeline_mode = #tpu.pipeline_mode<synchronous>, transform_indices = @transform_0, window_bounds = array<i64: 20, 10, 128>}, {pipeline_mode = #tpu.pipeline_mode<synchronous>, transform_indices = @transform_1, window_bounds = array<i64: 9, 128, 128>}, {pipeline_mode = #tpu.pipeline_mode<synchronous>, transform_indices = @transform_2, window_bounds = array<i64: 1, 128>}, {pipeline_mode = #tpu.pipeline_mode<synchronous>, transform_indices = @transform_3, window_bounds = array<i64: 1, 128>}, {pipeline_mode = #tpu.pipeline_mode<synchronous>, transform_indices = @transform_4, window_bounds = array<i64: 44, 22, 4>}, {pipeline_mode = #tpu.pipeline_mode<synchronous>, transform_indices = @transform_5, window_bounds = array<i64: 4, 128>}, {pipeline_mode = #tpu.pipeline_mode<synchronous>, transform_indices = @transform_6, window_bounds = array<i64: 1, 128>}, {pipeline_mode = #tpu.pipeline_mode<synchronous>, transform_indices = @transform_7, window_bounds = array<i64: 1, 128>}, {transform_indices = @transform_8, window_bounds = array<i64: 4, 8, 128>}]} {
    %c4_i32 = arith.constant 4 : i32
    %0 = arith.muli %arg1, %c4_i32 : i32
    %c0_i32 = arith.constant 0 : i32
    %1 = arith.addi %0, %c0_i32 : i32
    %c10_i32 = arith.constant 10 : i32
    %2 = arith.muli %arg0, %c10_i32 : i32
    %3 = arith.addi %2, %1 : i32
    %cst = arith.constant 0.000000e+00 : f32
    %4 = vector.broadcast %cst : f32 to vector<8x128xf32>
    %c0_i32_0 = arith.constant 0 : i32
    %5 = arith.addi %3, %c0_i32_0 : i32
    %6 = arith.index_cast %5 : i32 to index
    %c0 = arith.constant 0 : index
    %c0_1 = arith.constant 0 : index
    %7 = vector.load %arg2[%6, %c0, %c0_1] : memref<20x10x128xbf16, #tpu.memory_space<vmem>>, vector<1x8x128xbf16>
    %8 = vector.shape_cast %7 : vector<1x8x128xbf16> to vector<8x128xbf16>
    %c0_2 = arith.constant 0 : index
    %c0_3 = arith.constant 0 : index
    %c0_4 = arith.constant 0 : index
    %9 = vector.load %arg3[%c0_2, %c0_3, %c0_4] : memref<9x128x128xbf16, #tpu.memory_space<vmem>>, vector<1x128x128xbf16>
    %10 = vector.shape_cast %9 : vector<1x128x128xbf16> to vector<128x128xbf16>
    %cst_5 = arith.constant dense<0.000000e+00> : vector<8x128xf32>
    %11 = tpu.matmul %8, %10, %cst_5 {dimension_numbers = #tpu.dot_dimension_numbers<[1], [0], [0], [1], [0, 0, 1, 1], [], []>} : vector<8x128xbf16>, vector<128x128xbf16>, vector<8x128xf32> -> vector<8x128xf32>
    %12 = arith.addf %4, %11 : vector<8x128xf32>
    %c0_i32_6 = arith.constant 0 : i32
    %13 = arith.addi %3, %c0_i32_6 : i32
    %14 = arith.index_cast %13 : i32 to index
    %c1 = arith.constant 1 : index
    %c0_7 = arith.constant 0 : index
    %15 = vector.load %arg2[%14, %c1, %c0_7] : memref<20x10x128xbf16, #tpu.memory_space<vmem>>, vector<1x8x128xbf16>
    %16 = vector.shape_cast %15 : vector<1x8x128xbf16> to vector<8x128xbf16>
    %c1_8 = arith.constant 1 : index
    %c0_9 = arith.constant 0 : index
    %c0_10 = arith.constant 0 : index
    %17 = vector.load %arg3[%c1_8, %c0_9, %c0_10] : memref<9x128x128xbf16, #tpu.memory_space<vmem>>, vector<1x128x128xbf16>
    %18 = vector.shape_cast %17 : vector<1x128x128xbf16> to vector<128x128xbf16>
    %cst_11 = arith.constant dense<0.000000e+00> : vector<8x128xf32>
    %19 = tpu.matmul %16, %18, %cst_11 {dimension_numbers = #tpu.dot_dimension_numbers<[1], [0], [0], [1], [0, 0, 1, 1], [], []>} : vector<8x128xbf16>, vector<128x128xbf16>, vector<8x128xf32> -> vector<8x128xf32>
    %20 = arith.addf %12, %19 : vector<8x128xf32>
    %c0_i32_12 = arith.constant 0 : i32
    %21 = arith.addi %3, %c0_i32_12 : i32
    %22 = arith.index_cast %21 : i32 to index
    %c2 = arith.constant 2 : index
    %c0_13 = arith.constant 0 : index
    %23 = vector.load %arg2[%22, %c2, %c0_13] : memref<20x10x128xbf16, #tpu.memory_space<vmem>>, vector<1x8x128xbf16>
    %24 = vector.shape_cast %23 : vector<1x8x128xbf16> to vector<8x128xbf16>
    %c2_14 = arith.constant 2 : index
    %c0_15 = arith.constant 0 : index
    %c0_16 = arith.constant 0 : index
    %25 = vector.load %arg3[%c2_14, %c0_15, %c0_16] : memref<9x128x128xbf16, #tpu.memory_space<vmem>>, vector<1x128x128xbf16>
    %26 = vector.shape_cast %25 : vector<1x128x128xbf16> to vector<128x128xbf16>
    %cst_17 = arith.constant dense<0.000000e+00> : vector<8x128xf32>
    %27 = tpu.matmul %24, %26, %cst_17 {dimension_numbers = #tpu.dot_dimension_numbers<[1], [0], [0], [1], [0, 0, 1, 1], [], []>} : vector<8x128xbf16>, vector<128x128xbf16>, vector<8x128xf32> -> vector<8x128xf32>
    %28 = arith.addf %20, %27 : vector<8x128xf32>
    %c1_i32 = arith.constant 1 : i32
    %29 = arith.addi %3, %c1_i32 : i32
    %30 = arith.index_cast %29 : i32 to index
    %c0_18 = arith.constant 0 : index
    %c0_19 = arith.constant 0 : index
    %31 = vector.load %arg2[%30, %c0_18, %c0_19] : memref<20x10x128xbf16, #tpu.memory_space<vmem>>, vector<1x8x128xbf16>
    %32 = vector.shape_cast %31 : vector<1x8x128xbf16> to vector<8x128xbf16>
    %c3 = arith.constant 3 : index
    %c0_20 = arith.constant 0 : index
    %c0_21 = arith.constant 0 : index
    %33 = vector.load %arg3[%c3, %c0_20, %c0_21] : memref<9x128x128xbf16, #tpu.memory_space<vmem>>, vector<1x128x128xbf16>
    %34 = vector.shape_cast %33 : vector<1x128x128xbf16> to vector<128x128xbf16>
    %cst_22 = arith.constant dense<0.000000e+00> : vector<8x128xf32>
    %35 = tpu.matmul %32, %34, %cst_22 {dimension_numbers = #tpu.dot_dimension_numbers<[1], [0], [0], [1], [0, 0, 1, 1], [], []>} : vector<8x128xbf16>, vector<128x128xbf16>, vector<8x128xf32> -> vector<8x128xf32>
    %36 = arith.addf %28, %35 : vector<8x128xf32>
    %c1_i32_23 = arith.constant 1 : i32
    %37 = arith.addi %3, %c1_i32_23 : i32
    %38 = arith.index_cast %37 : i32 to index
    %c1_24 = arith.constant 1 : index
    %c0_25 = arith.constant 0 : index
    %39 = vector.load %arg2[%38, %c1_24, %c0_25] : memref<20x10x128xbf16, #tpu.memory_space<vmem>>, vector<1x8x128xbf16>
    %40 = vector.shape_cast %39 : vector<1x8x128xbf16> to vector<8x128xbf16>
    %c4 = arith.constant 4 : index
    %c0_26 = arith.constant 0 : index
    %c0_27 = arith.constant 0 : index
    %41 = vector.load %arg3[%c4, %c0_26, %c0_27] : memref<9x128x128xbf16, #tpu.memory_space<vmem>>, vector<1x128x128xbf16>
    %42 = vector.shape_cast %41 : vector<1x128x128xbf16> to vector<128x128xbf16>
    %cst_28 = arith.constant dense<0.000000e+00> : vector<8x128xf32>
    %43 = tpu.matmul %40, %42, %cst_28 {dimension_numbers = #tpu.dot_dimension_numbers<[1], [0], [0], [1], [0, 0, 1, 1], [], []>} : vector<8x128xbf16>, vector<128x128xbf16>, vector<8x128xf32> -> vector<8x128xf32>
    %44 = arith.addf %36, %43 : vector<8x128xf32>
    %c1_i32_29 = arith.constant 1 : i32
    %45 = arith.addi %3, %c1_i32_29 : i32
    %46 = arith.index_cast %45 : i32 to index
    %c2_30 = arith.constant 2 : index
    %c0_31 = arith.constant 0 : index
    %47 = vector.load %arg2[%46, %c2_30, %c0_31] : memref<20x10x128xbf16, #tpu.memory_space<vmem>>, vector<1x8x128xbf16>
    %48 = vector.shape_cast %47 : vector<1x8x128xbf16> to vector<8x128xbf16>
    %c5 = arith.constant 5 : index
    %c0_32 = arith.constant 0 : index
    %c0_33 = arith.constant 0 : index
    %49 = vector.load %arg3[%c5, %c0_32, %c0_33] : memref<9x128x128xbf16, #tpu.memory_space<vmem>>, vector<1x128x128xbf16>
    %50 = vector.shape_cast %49 : vector<1x128x128xbf16> to vector<128x128xbf16>
    %cst_34 = arith.constant dense<0.000000e+00> : vector<8x128xf32>
    %51 = tpu.matmul %48, %50, %cst_34 {dimension_numbers = #tpu.dot_dimension_numbers<[1], [0], [0], [1], [0, 0, 1, 1], [], []>} : vector<8x128xbf16>, vector<128x128xbf16>, vector<8x128xf32> -> vector<8x128xf32>
    %52 = arith.addf %44, %51 : vector<8x128xf32>
    %c2_i32 = arith.constant 2 : i32
    %53 = arith.addi %3, %c2_i32 : i32
    %54 = arith.index_cast %53 : i32 to index
    %c0_35 = arith.constant 0 : index
    %c0_36 = arith.constant 0 : index
    %55 = vector.load %arg2[%54, %c0_35, %c0_36] : memref<20x10x128xbf16, #tpu.memory_space<vmem>>, vector<1x8x128xbf16>
    %56 = vector.shape_cast %55 : vector<1x8x128xbf16> to vector<8x128xbf16>
    %c6 = arith.constant 6 : index
    %c0_37 = arith.constant 0 : index
    %c0_38 = arith.constant 0 : index
    %57 = vector.load %arg3[%c6, %c0_37, %c0_38] : memref<9x128x128xbf16, #tpu.memory_space<vmem>>, vector<1x128x128xbf16>
    %58 = vector.shape_cast %57 : vector<1x128x128xbf16> to vector<128x128xbf16>
    %cst_39 = arith.constant dense<0.000000e+00> : vector<8x128xf32>
    %59 = tpu.matmul %56, %58, %cst_39 {dimension_numbers = #tpu.dot_dimension_numbers<[1], [0], [0], [1], [0, 0, 1, 1], [], []>} : vector<8x128xbf16>, vector<128x128xbf16>, vector<8x128xf32> -> vector<8x128xf32>
    %60 = arith.addf %52, %59 : vector<8x128xf32>
    %c2_i32_40 = arith.constant 2 : i32
    %61 = arith.addi %3, %c2_i32_40 : i32
    %62 = arith.index_cast %61 : i32 to index
    %c1_41 = arith.constant 1 : index
    %c0_42 = arith.constant 0 : index
    %63 = vector.load %arg2[%62, %c1_41, %c0_42] : memref<20x10x128xbf16, #tpu.memory_space<vmem>>, vector<1x8x128xbf16>
    %64 = vector.shape_cast %63 : vector<1x8x128xbf16> to vector<8x128xbf16>
    %c7 = arith.constant 7 : index
    %c0_43 = arith.constant 0 : index
    %c0_44 = arith.constant 0 : index
    %65 = vector.load %arg3[%c7, %c0_43, %c0_44] : memref<9x128x128xbf16, #tpu.memory_space<vmem>>, vector<1x128x128xbf16>
    %66 = vector.shape_cast %65 : vector<1x128x128xbf16> to vector<128x128xbf16>
    %cst_45 = arith.constant dense<0.000000e+00> : vector<8x128xf32>
    %67 = tpu.matmul %64, %66, %cst_45 {dimension_numbers = #tpu.dot_dimension_numbers<[1], [0], [0], [1], [0, 0, 1, 1], [], []>} : vector<8x128xbf16>, vector<128x128xbf16>, vector<8x128xf32> -> vector<8x128xf32>
    %68 = arith.addf %60, %67 : vector<8x128xf32>
    %c2_i32_46 = arith.constant 2 : i32
    %69 = arith.addi %3, %c2_i32_46 : i32
    %70 = arith.index_cast %69 : i32 to index
    %c2_47 = arith.constant 2 : index
    %c0_48 = arith.constant 0 : index
    %71 = vector.load %arg2[%70, %c2_47, %c0_48] : memref<20x10x128xbf16, #tpu.memory_space<vmem>>, vector<1x8x128xbf16>
    %72 = vector.shape_cast %71 : vector<1x8x128xbf16> to vector<8x128xbf16>
    %c8 = arith.constant 8 : index
    %c0_49 = arith.constant 0 : index
    %c0_50 = arith.constant 0 : index
    %73 = vector.load %arg3[%c8, %c0_49, %c0_50] : memref<9x128x128xbf16, #tpu.memory_space<vmem>>, vector<1x128x128xbf16>
    %74 = vector.shape_cast %73 : vector<1x128x128xbf16> to vector<128x128xbf16>
    %cst_51 = arith.constant dense<0.000000e+00> : vector<8x128xf32>
    %75 = tpu.matmul %72, %74, %cst_51 {dimension_numbers = #tpu.dot_dimension_numbers<[1], [0], [0], [1], [0, 0, 1, 1], [], []>} : vector<8x128xbf16>, vector<128x128xbf16>, vector<8x128xf32> -> vector<8x128xf32>
    %76 = arith.addf %68, %75 : vector<8x128xf32>
    %c0_52 = arith.constant 0 : index
    %c0_53 = arith.constant 0 : index
    %77 = vector.load %arg4[%c0_52, %c0_53] : memref<1x128xf32, #tpu.memory_space<vmem>>, vector<1x128xf32>
    %78 = vector.broadcast %77 : vector<1x128xf32> to vector<8x128xf32>
    %79 = arith.mulf %76, %78 : vector<8x128xf32>
    %c0_54 = arith.constant 0 : index
    %c0_55 = arith.constant 0 : index
    %80 = vector.load %arg5[%c0_54, %c0_55] : memref<1x128xf32, #tpu.memory_space<vmem>>, vector<1x128xf32>
    %81 = vector.broadcast %80 : vector<1x128xf32> to vector<8x128xf32>
    %82 = arith.addf %79, %81 : vector<8x128xf32>
    %c22_i32 = arith.constant 22 : i32
    %83 = arith.muli %arg0, %c22_i32 : i32
    %c3_i32 = arith.constant 3 : i32
    %84 = arith.addi %83, %c3_i32 : i32
    %c2_i32_56 = arith.constant 2 : i32
    %85 = arith.muli %c2_i32_56, %1 : i32
    %86 = arith.addi %84, %85 : i32
    %c0_i32_57 = arith.constant 0 : i32
    %87 = arith.addi %86, %c0_i32_57 : i32
    %88 = arith.index_cast %87 : i32 to index
    %c3_58 = arith.constant 3 : index
    %c0_59 = arith.constant 0 : index
    %89 = tpu.strided_load %arg6[%88, %c3_58, %c0_59] {strides = array<i32: 1, 2, 1>} : memref<44x22x4xf32, #tpu.memory_space<vmem>>, vector<1x8x4xf32>
    %90 = vector.shape_cast %89 : vector<1x8x4xf32> to vector<8x4xf32>
    %91 = arith.index_cast %87 : i32 to index
    %c4_60 = arith.constant 4 : index
    %c0_61 = arith.constant 0 : index
    %92 = tpu.strided_load %arg6[%91, %c4_60, %c0_61] {strides = array<i32: 1, 2, 1>} : memref<44x22x4xf32, #tpu.memory_space<vmem>>, vector<1x8x4xf32>
    %93 = vector.shape_cast %92 : vector<1x8x4xf32> to vector<8x4xf32>
    %94 = arith.maximumf %90, %93 : vector<8x4xf32>
    %c22_i32_62 = arith.constant 22 : i32
    %95 = arith.muli %arg0, %c22_i32_62 : i32
    %c3_i32_63 = arith.constant 3 : i32
    %96 = arith.addi %95, %c3_i32_63 : i32
    %c2_i32_64 = arith.constant 2 : i32
    %97 = arith.muli %c2_i32_64, %1 : i32
    %98 = arith.addi %96, %97 : i32
    %c1_i32_65 = arith.constant 1 : i32
    %99 = arith.addi %98, %c1_i32_65 : i32
    %100 = arith.index_cast %99 : i32 to index
    %c3_66 = arith.constant 3 : index
    %c0_67 = arith.constant 0 : index
    %101 = tpu.strided_load %arg6[%100, %c3_66, %c0_67] {strides = array<i32: 1, 2, 1>} : memref<44x22x4xf32, #tpu.memory_space<vmem>>, vector<1x8x4xf32>
    %102 = vector.shape_cast %101 : vector<1x8x4xf32> to vector<8x4xf32>
    %103 = arith.maximumf %94, %102 : vector<8x4xf32>
    %104 = arith.index_cast %99 : i32 to index
    %c4_68 = arith.constant 4 : index
    %c0_69 = arith.constant 0 : index
    %105 = tpu.strided_load %arg6[%104, %c4_68, %c0_69] {strides = array<i32: 1, 2, 1>} : memref<44x22x4xf32, #tpu.memory_space<vmem>>, vector<1x8x4xf32>
    %106 = vector.shape_cast %105 : vector<1x8x4xf32> to vector<8x4xf32>
    %107 = arith.maximumf %103, %106 : vector<8x4xf32>
    %108 = arith.truncf %107 : vector<8x4xf32> to vector<8x4xbf16>
    %c0_70 = arith.constant 0 : index
    %c0_71 = arith.constant 0 : index
    %109 = vector.load %arg7[%c0_70, %c0_71] : memref<4x128xbf16, #tpu.memory_space<vmem>>, vector<4x128xbf16>
    %cst_72 = arith.constant dense<0.000000e+00> : vector<8x128xf32>
    %110 = tpu.matmul %108, %109, %cst_72 {dimension_numbers = #tpu.dot_dimension_numbers<[1], [0], [0], [1], [0, 0, 1, 1], [], []>} : vector<8x4xbf16>, vector<4x128xbf16>, vector<8x128xf32> -> vector<8x128xf32>
    %c0_73 = arith.constant 0 : index
    %c0_74 = arith.constant 0 : index
    %111 = vector.load %arg8[%c0_73, %c0_74] : memref<1x128xf32, #tpu.memory_space<vmem>>, vector<1x128xf32>
    %112 = vector.broadcast %111 : vector<1x128xf32> to vector<8x128xf32>
    %113 = arith.mulf %110, %112 : vector<8x128xf32>
    %c0_75 = arith.constant 0 : index
    %c0_76 = arith.constant 0 : index
    %114 = vector.load %arg9[%c0_75, %c0_76] : memref<1x128xf32, #tpu.memory_space<vmem>>, vector<1x128xf32>
    %115 = vector.broadcast %114 : vector<1x128xf32> to vector<8x128xf32>
    %116 = arith.addf %113, %115 : vector<8x128xf32>
    %117 = arith.addf %82, %116 : vector<8x128xf32>
    %c0_77 = arith.constant 0 : index
    %c0_78 = arith.constant 0 : index
    %c0_79 = arith.constant 0 : index
    %118 = vector.load %arg10[%c0_77, %c0_78, %c0_79] : memref<4x8x128xf32, #tpu.memory_space<vmem>>, vector<1x8x128xf32>
    %119 = vector.shape_cast %118 : vector<1x8x128xf32> to vector<8x128xf32>
    %120 = vector.shape_cast %117 : vector<8x128xf32> to vector<1x8x128xf32>
    tpu.vector_store %arg10[%c0_77, %c0_78, %c0_79], %120 {strides = array<i32>} : memref<4x8x128xf32, #tpu.memory_space<vmem>>, vector<1x8x128xf32>,
    %c4_i32_80 = arith.constant 4 : i32
    %121 = arith.muli %arg1, %c4_i32_80 : i32
    %c1_i32_81 = arith.constant 1 : i32
    %122 = arith.addi %121, %c1_i32_81 : i32
    %c10_i32_82 = arith.constant 10 : i32
    %123 = arith.muli %arg0, %c10_i32_82 : i32
    %124 = arith.addi %123, %122 : i32
    %cst_83 = arith.constant 0.000000e+00 : f32
    %125 = vector.broadcast %cst_83 : f32 to vector<8x128xf32>
    %c0_i32_84 = arith.constant 0 : i32
    %126 = arith.addi %124, %c0_i32_84 : i32
    %127 = arith.index_cast %126 : i32 to index
    %c0_85 = arith.constant 0 : index
    %c0_86 = arith.constant 0 : index
    %128 = vector.load %arg2[%127, %c0_85, %c0_86] : memref<20x10x128xbf16, #tpu.memory_space<vmem>>, vector<1x8x128xbf16>
    %129 = vector.shape_cast %128 : vector<1x8x128xbf16> to vector<8x128xbf16>
    %c0_87 = arith.constant 0 : index
    %c0_88 = arith.constant 0 : index
    %c0_89 = arith.constant 0 : index
    %130 = vector.load %arg3[%c0_87, %c0_88, %c0_89] : memref<9x128x128xbf16, #tpu.memory_space<vmem>>, vector<1x128x128xbf16>
    %131 = vector.shape_cast %130 : vector<1x128x128xbf16> to vector<128x128xbf16>
    %cst_90 = arith.constant dense<0.000000e+00> : vector<8x128xf32>
    %132 = tpu.matmul %129, %131, %cst_90 {dimension_numbers = #tpu.dot_dimension_numbers<[1], [0], [0], [1], [0, 0, 1, 1], [], []>} : vector<8x128xbf16>, vector<128x128xbf16>, vector<8x128xf32> -> vector<8x128xf32>
    %133 = arith.addf %125, %132 : vector<8x128xf32>
    %c0_i32_91 = arith.constant 0 : i32
    %134 = arith.addi %124, %c0_i32_91 : i32
    %135 = arith.index_cast %134 : i32 to index
    %c1_92 = arith.constant 1 : index
    %c0_93 = arith.constant 0 : index
    %136 = vector.load %arg2[%135, %c1_92, %c0_93] : memref<20x10x128xbf16, #tpu.memory_space<vmem>>, vector<1x8x128xbf16>
    %137 = vector.shape_cast %136 : vector<1x8x128xbf16> to vector<8x128xbf16>
    %c1_94 = arith.constant 1 : index
    %c0_95 = arith.constant 0 : index
    %c0_96 = arith.constant 0 : index
    %138 = vector.load %arg3[%c1_94, %c0_95, %c0_96] : memref<9x128x128xbf16, #tpu.memory_space<vmem>>, vector<1x128x128xbf16>
    %139 = vector.shape_cast %138 : vector<1x128x128xbf16> to vector<128x128xbf16>
    %cst_97 = arith.constant dense<0.000000e+00> : vector<8x128xf32>
    %140 = tpu.matmul %137, %139, %cst_97 {dimension_numbers = #tpu.dot_dimension_numbers<[1], [0], [0], [1], [0, 0, 1, 1], [], []>} : vector<8x128xbf16>, vector<128x128xbf16>, vector<8x128xf32> -> vector<8x128xf32>
    %141 = arith.addf %133, %140 : vector<8x128xf32>
    %c0_i32_98 = arith.constant 0 : i32
    %142 = arith.addi %124, %c0_i32_98 : i32
    %143 = arith.index_cast %142 : i32 to index
    %c2_99 = arith.constant 2 : index
    %c0_100 = arith.constant 0 : index
    %144 = vector.load %arg2[%143, %c2_99, %c0_100] : memref<20x10x128xbf16, #tpu.memory_space<vmem>>, vector<1x8x128xbf16>
    %145 = vector.shape_cast %144 : vector<1x8x128xbf16> to vector<8x128xbf16>
    %c2_101 = arith.constant 2 : index
    %c0_102 = arith.constant 0 : index
    %c0_103 = arith.constant 0 : index
    %146 = vector.load %arg3[%c2_101, %c0_102, %c0_103] : memref<9x128x128xbf16, #tpu.memory_space<vmem>>, vector<1x128x128xbf16>
    %147 = vector.shape_cast %146 : vector<1x128x128xbf16> to vector<128x128xbf16>
    %cst_104 = arith.constant dense<0.000000e+00> : vector<8x128xf32>
    %148 = tpu.matmul %145, %147, %cst_104 {dimension_numbers = #tpu.dot_dimension_numbers<[1], [0], [0], [1], [0, 0, 1, 1], [], []>} : vector<8x128xbf16>, vector<128x128xbf16>, vector<8x128xf32> -> vector<8x128xf32>
    %149 = arith.addf %141, %148 : vector<8x128xf32>
    %c1_i32_105 = arith.constant 1 : i32
    %150 = arith.addi %124, %c1_i32_105 : i32
    %151 = arith.index_cast %150 : i32 to index
    %c0_106 = arith.constant 0 : index
    %c0_107 = arith.constant 0 : index
    %152 = vector.load %arg2[%151, %c0_106, %c0_107] : memref<20x10x128xbf16, #tpu.memory_space<vmem>>, vector<1x8x128xbf16>
    %153 = vector.shape_cast %152 : vector<1x8x128xbf16> to vector<8x128xbf16>
    %c3_108 = arith.constant 3 : index
    %c0_109 = arith.constant 0 : index
    %c0_110 = arith.constant 0 : index
    %154 = vector.load %arg3[%c3_108, %c0_109, %c0_110] : memref<9x128x128xbf16, #tpu.memory_space<vmem>>, vector<1x128x128xbf16>
    %155 = vector.shape_cast %154 : vector<1x128x128xbf16> to vector<128x128xbf16>
    %cst_111 = arith.constant dense<0.000000e+00> : vector<8x128xf32>
    %156 = tpu.matmul %153, %155, %cst_111 {dimension_numbers = #tpu.dot_dimension_numbers<[1], [0], [0], [1], [0, 0, 1, 1], [], []>} : vector<8x128xbf16>, vector<128x128xbf16>, vector<8x128xf32> -> vector<8x128xf32>
    %157 = arith.addf %149, %156 : vector<8x128xf32>
    %c1_i32_112 = arith.constant 1 : i32
    %158 = arith.addi %124, %c1_i32_112 : i32
    %159 = arith.index_cast %158 : i32 to index
    %c1_113 = arith.constant 1 : index
    %c0_114 = arith.constant 0 : index
    %160 = vector.load %arg2[%159, %c1_113, %c0_114] : memref<20x10x128xbf16, #tpu.memory_space<vmem>>, vector<1x8x128xbf16>
    %161 = vector.shape_cast %160 : vector<1x8x128xbf16> to vector<8x128xbf16>
    %c4_115 = arith.constant 4 : index
    %c0_116 = arith.constant 0 : index
    %c0_117 = arith.constant 0 : index
    %162 = vector.load %arg3[%c4_115, %c0_116, %c0_117] : memref<9x128x128xbf16, #tpu.memory_space<vmem>>, vector<1x128x128xbf16>
    %163 = vector.shape_cast %162 : vector<1x128x128xbf16> to vector<128x128xbf16>
    %cst_118 = arith.constant dense<0.000000e+00> : vector<8x128xf32>
    %164 = tpu.matmul %161, %163, %cst_118 {dimension_numbers = #tpu.dot_dimension_numbers<[1], [0], [0], [1], [0, 0, 1, 1], [], []>} : vector<8x128xbf16>, vector<128x128xbf16>, vector<8x128xf32> -> vector<8x128xf32>
    %165 = arith.addf %157, %164 : vector<8x128xf32>
    %c1_i32_119 = arith.constant 1 : i32
    %166 = arith.addi %124, %c1_i32_119 : i32
    %167 = arith.index_cast %166 : i32 to index
    %c2_120 = arith.constant 2 : index
    %c0_121 = arith.constant 0 : index
    %168 = vector.load %arg2[%167, %c2_120, %c0_121] : memref<20x10x128xbf16, #tpu.memory_space<vmem>>, vector<1x8x128xbf16>
    %169 = vector.shape_cast %168 : vector<1x8x128xbf16> to vector<8x128xbf16>
    %c5_122 = arith.constant 5 : index
    %c0_123 = arith.constant 0 : index
    %c0_124 = arith.constant 0 : index
    %170 = vector.load %arg3[%c5_122, %c0_123, %c0_124] : memref<9x128x128xbf16, #tpu.memory_space<vmem>>, vector<1x128x128xbf16>
    %171 = vector.shape_cast %170 : vector<1x128x128xbf16> to vector<128x128xbf16>
    %cst_125 = arith.constant dense<0.000000e+00> : vector<8x128xf32>
    %172 = tpu.matmul %169, %171, %cst_125 {dimension_numbers = #tpu.dot_dimension_numbers<[1], [0], [0], [1], [0, 0, 1, 1], [], []>} : vector<8x128xbf16>, vector<128x128xbf16>, vector<8x128xf32> -> vector<8x128xf32>
    %173 = arith.addf %165, %172 : vector<8x128xf32>
    %c2_i32_126 = arith.constant 2 : i32
    %174 = arith.addi %124, %c2_i32_126 : i32
    %175 = arith.index_cast %174 : i32 to index
    %c0_127 = arith.constant 0 : index
    %c0_128 = arith.constant 0 : index
    %176 = vector.load %arg2[%175, %c0_127, %c0_128] : memref<20x10x128xbf16, #tpu.memory_space<vmem>>, vector<1x8x128xbf16>
    %177 = vector.shape_cast %176 : vector<1x8x128xbf16> to vector<8x128xbf16>
    %c6_129 = arith.constant 6 : index
    %c0_130 = arith.constant 0 : index
    %c0_131 = arith.constant 0 : index
    %178 = vector.load %arg3[%c6_129, %c0_130, %c0_131] : memref<9x128x128xbf16, #tpu.memory_space<vmem>>, vector<1x128x128xbf16>
    %179 = vector.shape_cast %178 : vector<1x128x128xbf16> to vector<128x128xbf16>
    %cst_132 = arith.constant dense<0.000000e+00> : vector<8x128xf32>
    %180 = tpu.matmul %177, %179, %cst_132 {dimension_numbers = #tpu.dot_dimension_numbers<[1], [0], [0], [1], [0, 0, 1, 1], [], []>} : vector<8x128xbf16>, vector<128x128xbf16>, vector<8x128xf32> -> vector<8x128xf32>
    %181 = arith.addf %173, %180 : vector<8x128xf32>
    %c2_i32_133 = arith.constant 2 : i32
    %182 = arith.addi %124, %c2_i32_133 : i32
    %183 = arith.index_cast %182 : i32 to index
    %c1_134 = arith.constant 1 : index
    %c0_135 = arith.constant 0 : index
    %184 = vector.load %arg2[%183, %c1_134, %c0_135] : memref<20x10x128xbf16, #tpu.memory_space<vmem>>, vector<1x8x128xbf16>
    %185 = vector.shape_cast %184 : vector<1x8x128xbf16> to vector<8x128xbf16>
    %c7_136 = arith.constant 7 : index
    %c0_137 = arith.constant 0 : index
    %c0_138 = arith.constant 0 : index
    %186 = vector.load %arg3[%c7_136, %c0_137, %c0_138] : memref<9x128x128xbf16, #tpu.memory_space<vmem>>, vector<1x128x128xbf16>
    %187 = vector.shape_cast %186 : vector<1x128x128xbf16> to vector<128x128xbf16>
    %cst_139 = arith.constant dense<0.000000e+00> : vector<8x128xf32>
    %188 = tpu.matmul %185, %187, %cst_139 {dimension_numbers = #tpu.dot_dimension_numbers<[1], [0], [0], [1], [0, 0, 1, 1], [], []>} : vector<8x128xbf16>, vector<128x128xbf16>, vector<8x128xf32> -> vector<8x128xf32>
    %189 = arith.addf %181, %188 : vector<8x128xf32>
    %c2_i32_140 = arith.constant 2 : i32
    %190 = arith.addi %124, %c2_i32_140 : i32
    %191 = arith.index_cast %190 : i32 to index
    %c2_141 = arith.constant 2 : index
    %c0_142 = arith.constant 0 : index
    %192 = vector.load %arg2[%191, %c2_141, %c0_142] : memref<20x10x128xbf16, #tpu.memory_space<vmem>>, vector<1x8x128xbf16>
    %193 = vector.shape_cast %192 : vector<1x8x128xbf16> to vector<8x128xbf16>
    %c8_143 = arith.constant 8 : index
    %c0_144 = arith.constant 0 : index
    %c0_145 = arith.constant 0 : index
    %194 = vector.load %arg3[%c8_143, %c0_144, %c0_145] : memref<9x128x128xbf16, #tpu.memory_space<vmem>>, vector<1x128x128xbf16>
    %195 = vector.shape_cast %194 : vector<1x128x128xbf16> to vector<128x128xbf16>
    %cst_146 = arith.constant dense<0.000000e+00> : vector<8x128xf32>
    %196 = tpu.matmul %193, %195, %cst_146 {dimension_numbers = #tpu.dot_dimension_numbers<[1], [0], [0], [1], [0, 0, 1, 1], [], []>} : vector<8x128xbf16>, vector<128x128xbf16>, vector<8x128xf32> -> vector<8x128xf32>
    %197 = arith.addf %189, %196 : vector<8x128xf32>
    %c0_147 = arith.constant 0 : index
    %c0_148 = arith.constant 0 : index
    %198 = vector.load %arg4[%c0_147, %c0_148] : memref<1x128xf32, #tpu.memory_space<vmem>>, vector<1x128xf32>
    %199 = vector.broadcast %198 : vector<1x128xf32> to vector<8x128xf32>
    %200 = arith.mulf %197, %199 : vector<8x128xf32>
    %c0_149 = arith.constant 0 : index
    %c0_150 = arith.constant 0 : index
    %201 = vector.load %arg5[%c0_149, %c0_150] : memref<1x128xf32, #tpu.memory_space<vmem>>, vector<1x128xf32>
    %202 = vector.broadcast %201 : vector<1x128xf32> to vector<8x128xf32>
    %203 = arith.addf %200, %202 : vector<8x128xf32>
    %c22_i32_151 = arith.constant 22 : i32
    %204 = arith.muli %arg0, %c22_i32_151 : i32
    %c3_i32_152 = arith.constant 3 : i32
    %205 = arith.addi %204, %c3_i32_152 : i32
    %c2_i32_153 = arith.constant 2 : i32
    %206 = arith.muli %c2_i32_153, %122 : i32
    %207 = arith.addi %205, %206 : i32
    %c0_i32_154 = arith.constant 0 : i32
    %208 = arith.addi %207, %c0_i32_154 : i32
    %209 = arith.index_cast %208 : i32 to index
    %c3_155 = arith.constant 3 : index
    %c0_156 = arith.constant 0 : index
    %210 = tpu.strided_load %arg6[%209, %c3_155, %c0_156] {strides = array<i32: 1, 2, 1>} : memref<44x22x4xf32, #tpu.memory_space<vmem>>, vector<1x8x4xf32>
    %211 = vector.shape_cast %210 : vector<1x8x4xf32> to vector<8x4xf32>
    %212 = arith.index_cast %208 : i32 to index
    %c4_157 = arith.constant 4 : index
    %c0_158 = arith.constant 0 : index
    %213 = tpu.strided_load %arg6[%212, %c4_157, %c0_158] {strides = array<i32: 1, 2, 1>} : memref<44x22x4xf32, #tpu.memory_space<vmem>>, vector<1x8x4xf32>
    %214 = vector.shape_cast %213 : vector<1x8x4xf32> to vector<8x4xf32>
    %215 = arith.maximumf %211, %214 : vector<8x4xf32>
    %c22_i32_159 = arith.constant 22 : i32
    %216 = arith.muli %arg0, %c22_i32_159 : i32
    %c3_i32_160 = arith.constant 3 : i32
    %217 = arith.addi %216, %c3_i32_160 : i32
    %c2_i32_161 = arith.constant 2 : i32
    %218 = arith.muli %c2_i32_161, %122 : i32
    %219 = arith.addi %217, %218 : i32
    %c1_i32_162 = arith.constant 1 : i32
    %220 = arith.addi %219, %c1_i32_162 : i32
    %221 = arith.index_cast %220 : i32 to index
    %c3_163 = arith.constant 3 : index
    %c0_164 = arith.constant 0 : index
    %222 = tpu.strided_load %arg6[%221, %c3_163, %c0_164] {strides = array<i32: 1, 2, 1>} : memref<44x22x4xf32, #tpu.memory_space<vmem>>, vector<1x8x4xf32>
    %223 = vector.shape_cast %222 : vector<1x8x4xf32> to vector<8x4xf32>
    %224 = arith.maximumf %215, %223 : vector<8x4xf32>
    %225 = arith.index_cast %220 : i32 to index
    %c4_165 = arith.constant 4 : index
    %c0_166 = arith.constant 0 : index
    %226 = tpu.strided_load %arg6[%225, %c4_165, %c0_166] {strides = array<i32: 1, 2, 1>} : memref<44x22x4xf32, #tpu.memory_space<vmem>>, vector<1x8x4xf32>
    %227 = vector.shape_cast %226 : vector<1x8x4xf32> to vector<8x4xf32>
    %228 = arith.maximumf %224, %227 : vector<8x4xf32>
    %229 = arith.truncf %228 : vector<8x4xf32> to vector<8x4xbf16>
    %c0_167 = arith.constant 0 : index
    %c0_168 = arith.constant 0 : index
    %230 = vector.load %arg7[%c0_167, %c0_168] : memref<4x128xbf16, #tpu.memory_space<vmem>>, vector<4x128xbf16>
    %cst_169 = arith.constant dense<0.000000e+00> : vector<8x128xf32>
    %231 = tpu.matmul %229, %230, %cst_169 {dimension_numbers = #tpu.dot_dimension_numbers<[1], [0], [0], [1], [0, 0, 1, 1], [], []>} : vector<8x4xbf16>, vector<4x128xbf16>, vector<8x128xf32> -> vector<8x128xf32>
    %c0_170 = arith.constant 0 : index
    %c0_171 = arith.constant 0 : index
    %232 = vector.load %arg8[%c0_170, %c0_171] : memref<1x128xf32, #tpu.memory_space<vmem>>, vector<1x128xf32>
    %233 = vector.broadcast %232 : vector<1x128xf32> to vector<8x128xf32>
    %234 = arith.mulf %231, %233 : vector<8x128xf32>
    %c0_172 = arith.constant 0 : index
    %c0_173 = arith.constant 0 : index
    %235 = vector.load %arg9[%c0_172, %c0_173] : memref<1x128xf32, #tpu.memory_space<vmem>>, vector<1x128xf32>
    %236 = vector.broadcast %235 : vector<1x128xf32> to vector<8x128xf32>
    %237 = arith.addf %234, %236 : vector<8x128xf32>
    %238 = arith.addf %203, %237 : vector<8x128xf32>
    %c1_174 = arith.constant 1 : index
    %c0_175 = arith.constant 0 : index
    %c0_176 = arith.constant 0 : index
    %239 = vector.load %arg10[%c1_174, %c0_175, %c0_176] : memref<4x8x128xf32, #tpu.memory_space<vmem>>, vector<1x8x128xf32>
    %240 = vector.shape_cast %239 : vector<1x8x128xf32> to vector<8x128xf32>
    %241 = vector.shape_cast %238 : vector<8x128xf32> to vector<1x8x128xf32>
    tpu.vector_store %arg10[%c1_174, %c0_175, %c0_176], %241 {strides = array<i32>} : memref<4x8x128xf32, #tpu.memory_space<vmem>>, vector<1x8x128xf32>,
    %c4_i32_177 = arith.constant 4 : i32
    %242 = arith.muli %arg1, %c4_i32_177 : i32
    %c2_i32_178 = arith.constant 2 : i32
    %243 = arith.addi %242, %c2_i32_178 : i32
    %c10_i32_179 = arith.constant 10 : i32
    %244 = arith.muli %arg0, %c10_i32_179 : i32
    %245 = arith.addi %244, %243 : i32
    %cst_180 = arith.constant 0.000000e+00 : f32
    %246 = vector.broadcast %cst_180 : f32 to vector<8x128xf32>
    %c0_i32_181 = arith.constant 0 : i32
    %247 = arith.addi %245, %c0_i32_181 : i32
    %248 = arith.index_cast %247 : i32 to index
    %c0_182 = arith.constant 0 : index
    %c0_183 = arith.constant 0 : index
    %249 = vector.load %arg2[%248, %c0_182, %c0_183] : memref<20x10x128xbf16, #tpu.memory_space<vmem>>, vector<1x8x128xbf16>
    %250 = vector.shape_cast %249 : vector<1x8x128xbf16> to vector<8x128xbf16>
    %c0_184 = arith.constant 0 : index
    %c0_185 = arith.constant 0 : index
    %c0_186 = arith.constant 0 : index
    %251 = vector.load %arg3[%c0_184, %c0_185, %c0_186] : memref<9x128x128xbf16, #tpu.memory_space<vmem>>, vector<1x128x128xbf16>
    %252 = vector.shape_cast %251 : vector<1x128x128xbf16> to vector<128x128xbf16>
    %cst_187 = arith.constant dense<0.000000e+00> : vector<8x128xf32>
    %253 = tpu.matmul %250, %252, %cst_187 {dimension_numbers = #tpu.dot_dimension_numbers<[1], [0], [0], [1], [0, 0, 1, 1], [], []>} : vector<8x128xbf16>, vector<128x128xbf16>, vector<8x128xf32> -> vector<8x128xf32>
    %254 = arith.addf %246, %253 : vector<8x128xf32>
    %c0_i32_188 = arith.constant 0 : i32
    %255 = arith.addi %245, %c0_i32_188 : i32
    %256 = arith.index_cast %255 : i32 to index
    %c1_189 = arith.constant 1 : index
    %c0_190 = arith.constant 0 : index
    %257 = vector.load %arg2[%256, %c1_189, %c0_190] : memref<20x10x128xbf16, #tpu.memory_space<vmem>>, vector<1x8x128xbf16>
    %258 = vector.shape_cast %257 : vector<1x8x128xbf16> to vector<8x128xbf16>
    %c1_191 = arith.constant 1 : index
    %c0_192 = arith.constant 0 : index
    %c0_193 = arith.constant 0 : index
    %259 = vector.load %arg3[%c1_191, %c0_192, %c0_193] : memref<9x128x128xbf16, #tpu.memory_space<vmem>>, vector<1x128x128xbf16>
    %260 = vector.shape_cast %259 : vector<1x128x128xbf16> to vector<128x128xbf16>
    %cst_194 = arith.constant dense<0.000000e+00> : vector<8x128xf32>
    %261 = tpu.matmul %258, %260, %cst_194 {dimension_numbers = #tpu.dot_dimension_numbers<[1], [0], [0], [1], [0, 0, 1, 1], [], []>} : vector<8x128xbf16>, vector<128x128xbf16>, vector<8x128xf32> -> vector<8x128xf32>
    %262 = arith.addf %254, %261 : vector<8x128xf32>
    %c0_i32_195 = arith.constant 0 : i32
    %263 = arith.addi %245, %c0_i32_195 : i32
    %264 = arith.index_cast %263 : i32 to index
    %c2_196 = arith.constant 2 : index
    %c0_197 = arith.constant 0 : index
    %265 = vector.load %arg2[%264, %c2_196, %c0_197] : memref<20x10x128xbf16, #tpu.memory_space<vmem>>, vector<1x8x128xbf16>
    %266 = vector.shape_cast %265 : vector<1x8x128xbf16> to vector<8x128xbf16>
    %c2_198 = arith.constant 2 : index
    %c0_199 = arith.constant 0 : index
    %c0_200 = arith.constant 0 : index
    %267 = vector.load %arg3[%c2_198, %c0_199, %c0_200] : memref<9x128x128xbf16, #tpu.memory_space<vmem>>, vector<1x128x128xbf16>
    %268 = vector.shape_cast %267 : vector<1x128x128xbf16> to vector<128x128xbf16>
    %cst_201 = arith.constant dense<0.000000e+00> : vector<8x128xf32>
    %269 = tpu.matmul %266, %268, %cst_201 {dimension_numbers = #tpu.dot_dimension_numbers<[1], [0], [0], [1], [0, 0, 1, 1], [], []>} : vector<8x128xbf16>, vector<128x128xbf16>, vector<8x128xf32> -> vector<8x128xf32>
    %270 = arith.addf %262, %269 : vector<8x128xf32>
    %c1_i32_202 = arith.constant 1 : i32
    %271 = arith.addi %245, %c1_i32_202 : i32
    %272 = arith.index_cast %271 : i32 to index
    %c0_203 = arith.constant 0 : index
    %c0_204 = arith.constant 0 : index
    %273 = vector.load %arg2[%272, %c0_203, %c0_204] : memref<20x10x128xbf16, #tpu.memory_space<vmem>>, vector<1x8x128xbf16>
    %274 = vector.shape_cast %273 : vector<1x8x128xbf16> to vector<8x128xbf16>
    %c3_205 = arith.constant 3 : index
    %c0_206 = arith.constant 0 : index
    %c0_207 = arith.constant 0 : index
    %275 = vector.load %arg3[%c3_205, %c0_206, %c0_207] : memref<9x128x128xbf16, #tpu.memory_space<vmem>>, vector<1x128x128xbf16>
    %276 = vector.shape_cast %275 : vector<1x128x128xbf16> to vector<128x128xbf16>
    %cst_208 = arith.constant dense<0.000000e+00> : vector<8x128xf32>
    %277 = tpu.matmul %274, %276, %cst_208 {dimension_numbers = #tpu.dot_dimension_numbers<[1], [0], [0], [1], [0, 0, 1, 1], [], []>} : vector<8x128xbf16>, vector<128x128xbf16>, vector<8x128xf32> -> vector<8x128xf32>
    %278 = arith.addf %270, %277 : vector<8x128xf32>
    %c1_i32_209 = arith.constant 1 : i32
    %279 = arith.addi %245, %c1_i32_209 : i32
    %280 = arith.index_cast %279 : i32 to index
    %c1_210 = arith.constant 1 : index
    %c0_211 = arith.constant 0 : index
    %281 = vector.load %arg2[%280, %c1_210, %c0_211] : memref<20x10x128xbf16, #tpu.memory_space<vmem>>, vector<1x8x128xbf16>
    %282 = vector.shape_cast %281 : vector<1x8x128xbf16> to vector<8x128xbf16>
    %c4_212 = arith.constant 4 : index
    %c0_213 = arith.constant 0 : index
    %c0_214 = arith.constant 0 : index
    %283 = vector.load %arg3[%c4_212, %c0_213, %c0_214] : memref<9x128x128xbf16, #tpu.memory_space<vmem>>, vector<1x128x128xbf16>
    %284 = vector.shape_cast %283 : vector<1x128x128xbf16> to vector<128x128xbf16>
    %cst_215 = arith.constant dense<0.000000e+00> : vector<8x128xf32>
    %285 = tpu.matmul %282, %284, %cst_215 {dimension_numbers = #tpu.dot_dimension_numbers<[1], [0], [0], [1], [0, 0, 1, 1], [], []>} : vector<8x128xbf16>, vector<128x128xbf16>, vector<8x128xf32> -> vector<8x128xf32>
    %286 = arith.addf %278, %285 : vector<8x128xf32>
    %c1_i32_216 = arith.constant 1 : i32
    %287 = arith.addi %245, %c1_i32_216 : i32
    %288 = arith.index_cast %287 : i32 to index
    %c2_217 = arith.constant 2 : index
    %c0_218 = arith.constant 0 : index
    %289 = vector.load %arg2[%288, %c2_217, %c0_218] : memref<20x10x128xbf16, #tpu.memory_space<vmem>>, vector<1x8x128xbf16>
    %290 = vector.shape_cast %289 : vector<1x8x128xbf16> to vector<8x128xbf16>
    %c5_219 = arith.constant 5 : index
    %c0_220 = arith.constant 0 : index
    %c0_221 = arith.constant 0 : index
    %291 = vector.load %arg3[%c5_219, %c0_220, %c0_221] : memref<9x128x128xbf16, #tpu.memory_space<vmem>>, vector<1x128x128xbf16>
    %292 = vector.shape_cast %291 : vector<1x128x128xbf16> to vector<128x128xbf16>
    %cst_222 = arith.constant dense<0.000000e+00> : vector<8x128xf32>
    %293 = tpu.matmul %290, %292, %cst_222 {dimension_numbers = #tpu.dot_dimension_numbers<[1], [0], [0], [1], [0, 0, 1, 1], [], []>} : vector<8x128xbf16>, vector<128x128xbf16>, vector<8x128xf32> -> vector<8x128xf32>
    %294 = arith.addf %286, %293 : vector<8x128xf32>
    %c2_i32_223 = arith.constant 2 : i32
    %295 = arith.addi %245, %c2_i32_223 : i32
    %296 = arith.index_cast %295 : i32 to index
    %c0_224 = arith.constant 0 : index
    %c0_225 = arith.constant 0 : index
    %297 = vector.load %arg2[%296, %c0_224, %c0_225] : memref<20x10x128xbf16, #tpu.memory_space<vmem>>, vector<1x8x128xbf16>
    %298 = vector.shape_cast %297 : vector<1x8x128xbf16> to vector<8x128xbf16>
    %c6_226 = arith.constant 6 : index
    %c0_227 = arith.constant 0 : index
    %c0_228 = arith.constant 0 : index
    %299 = vector.load %arg3[%c6_226, %c0_227, %c0_228] : memref<9x128x128xbf16, #tpu.memory_space<vmem>>, vector<1x128x128xbf16>
    %300 = vector.shape_cast %299 : vector<1x128x128xbf16> to vector<128x128xbf16>
    %cst_229 = arith.constant dense<0.000000e+00> : vector<8x128xf32>
    %301 = tpu.matmul %298, %300, %cst_229 {dimension_numbers = #tpu.dot_dimension_numbers<[1], [0], [0], [1], [0, 0, 1, 1], [], []>} : vector<8x128xbf16>, vector<128x128xbf16>, vector<8x128xf32> -> vector<8x128xf32>
    %302 = arith.addf %294, %301 : vector<8x128xf32>
    %c2_i32_230 = arith.constant 2 : i32
    %303 = arith.addi %245, %c2_i32_230 : i32
    %304 = arith.index_cast %303 : i32 to index
    %c1_231 = arith.constant 1 : index
    %c0_232 = arith.constant 0 : index
    %305 = vector.load %arg2[%304, %c1_231, %c0_232] : memref<20x10x128xbf16, #tpu.memory_space<vmem>>, vector<1x8x128xbf16>
    %306 = vector.shape_cast %305 : vector<1x8x128xbf16> to vector<8x128xbf16>
    %c7_233 = arith.constant 7 : index
    %c0_234 = arith.constant 0 : index
    %c0_235 = arith.constant 0 : index
    %307 = vector.load %arg3[%c7_233, %c0_234, %c0_235] : memref<9x128x128xbf16, #tpu.memory_space<vmem>>, vector<1x128x128xbf16>
    %308 = vector.shape_cast %307 : vector<1x128x128xbf16> to vector<128x128xbf16>
    %cst_236 = arith.constant dense<0.000000e+00> : vector<8x128xf32>
    %309 = tpu.matmul %306, %308, %cst_236 {dimension_numbers = #tpu.dot_dimension_numbers<[1], [0], [0], [1], [0, 0, 1, 1], [], []>} : vector<8x128xbf16>, vector<128x128xbf16>, vector<8x128xf32> -> vector<8x128xf32>
    %310 = arith.addf %302, %309 : vector<8x128xf32>
    %c2_i32_237 = arith.constant 2 : i32
    %311 = arith.addi %245, %c2_i32_237 : i32
    %312 = arith.index_cast %311 : i32 to index
    %c2_238 = arith.constant 2 : index
    %c0_239 = arith.constant 0 : index
    %313 = vector.load %arg2[%312, %c2_238, %c0_239] : memref<20x10x128xbf16, #tpu.memory_space<vmem>>, vector<1x8x128xbf16>
    %314 = vector.shape_cast %313 : vector<1x8x128xbf16> to vector<8x128xbf16>
    %c8_240 = arith.constant 8 : index
    %c0_241 = arith.constant 0 : index
    %c0_242 = arith.constant 0 : index
    %315 = vector.load %arg3[%c8_240, %c0_241, %c0_242] : memref<9x128x128xbf16, #tpu.memory_space<vmem>>, vector<1x128x128xbf16>
    %316 = vector.shape_cast %315 : vector<1x128x128xbf16> to vector<128x128xbf16>
    %cst_243 = arith.constant dense<0.000000e+00> : vector<8x128xf32>
    %317 = tpu.matmul %314, %316, %cst_243 {dimension_numbers = #tpu.dot_dimension_numbers<[1], [0], [0], [1], [0, 0, 1, 1], [], []>} : vector<8x128xbf16>, vector<128x128xbf16>, vector<8x128xf32> -> vector<8x128xf32>
    %318 = arith.addf %310, %317 : vector<8x128xf32>
    %c0_244 = arith.constant 0 : index
    %c0_245 = arith.constant 0 : index
    %319 = vector.load %arg4[%c0_244, %c0_245] : memref<1x128xf32, #tpu.memory_space<vmem>>, vector<1x128xf32>
    %320 = vector.broadcast %319 : vector<1x128xf32> to vector<8x128xf32>
    %321 = arith.mulf %318, %320 : vector<8x128xf32>
    %c0_246 = arith.constant 0 : index
    %c0_247 = arith.constant 0 : index
    %322 = vector.load %arg5[%c0_246, %c0_247] : memref<1x128xf32, #tpu.memory_space<vmem>>, vector<1x128xf32>
    %323 = vector.broadcast %322 : vector<1x128xf32> to vector<8x128xf32>
    %324 = arith.addf %321, %323 : vector<8x128xf32>
    %c22_i32_248 = arith.constant 22 : i32
    %325 = arith.muli %arg0, %c22_i32_248 : i32
    %c3_i32_249 = arith.constant 3 : i32
    %326 = arith.addi %325, %c3_i32_249 : i32
    %c2_i32_250 = arith.constant 2 : i32
    %327 = arith.muli %c2_i32_250, %243 : i32
    %328 = arith.addi %326, %327 : i32
    %c0_i32_251 = arith.constant 0 : i32
    %329 = arith.addi %328, %c0_i32_251 : i32
    %330 = arith.index_cast %329 : i32 to index
    %c3_252 = arith.constant 3 : index
    %c0_253 = arith.constant 0 : index
    %331 = tpu.strided_load %arg6[%330, %c3_252, %c0_253] {strides = array<i32: 1, 2, 1>} : memref<44x22x4xf32, #tpu.memory_space<vmem>>, vector<1x8x4xf32>
    %332 = vector.shape_cast %331 : vector<1x8x4xf32> to vector<8x4xf32>
    %333 = arith.index_cast %329 : i32 to index
    %c4_254 = arith.constant 4 : index
    %c0_255 = arith.constant 0 : index
    %334 = tpu.strided_load %arg6[%333, %c4_254, %c0_255] {strides = array<i32: 1, 2, 1>} : memref<44x22x4xf32, #tpu.memory_space<vmem>>, vector<1x8x4xf32>
    %335 = vector.shape_cast %334 : vector<1x8x4xf32> to vector<8x4xf32>
    %336 = arith.maximumf %332, %335 : vector<8x4xf32>
    %c22_i32_256 = arith.constant 22 : i32
    %337 = arith.muli %arg0, %c22_i32_256 : i32
    %c3_i32_257 = arith.constant 3 : i32
    %338 = arith.addi %337, %c3_i32_257 : i32
    %c2_i32_258 = arith.constant 2 : i32
    %339 = arith.muli %c2_i32_258, %243 : i32
    %340 = arith.addi %338, %339 : i32
    %c1_i32_259 = arith.constant 1 : i32
    %341 = arith.addi %340, %c1_i32_259 : i32
    %342 = arith.index_cast %341 : i32 to index
    %c3_260 = arith.constant 3 : index
    %c0_261 = arith.constant 0 : index
    %343 = tpu.strided_load %arg6[%342, %c3_260, %c0_261] {strides = array<i32: 1, 2, 1>} : memref<44x22x4xf32, #tpu.memory_space<vmem>>, vector<1x8x4xf32>
    %344 = vector.shape_cast %343 : vector<1x8x4xf32> to vector<8x4xf32>
    %345 = arith.maximumf %336, %344 : vector<8x4xf32>
    %346 = arith.index_cast %341 : i32 to index
    %c4_262 = arith.constant 4 : index
    %c0_263 = arith.constant 0 : index
    %347 = tpu.strided_load %arg6[%346, %c4_262, %c0_263] {strides = array<i32: 1, 2, 1>} : memref<44x22x4xf32, #tpu.memory_space<vmem>>, vector<1x8x4xf32>
    %348 = vector.shape_cast %347 : vector<1x8x4xf32> to vector<8x4xf32>
    %349 = arith.maximumf %345, %348 : vector<8x4xf32>
    %350 = arith.truncf %349 : vector<8x4xf32> to vector<8x4xbf16>
    %c0_264 = arith.constant 0 : index
    %c0_265 = arith.constant 0 : index
    %351 = vector.load %arg7[%c0_264, %c0_265] : memref<4x128xbf16, #tpu.memory_space<vmem>>, vector<4x128xbf16>
    %cst_266 = arith.constant dense<0.000000e+00> : vector<8x128xf32>
    %352 = tpu.matmul %350, %351, %cst_266 {dimension_numbers = #tpu.dot_dimension_numbers<[1], [0], [0], [1], [0, 0, 1, 1], [], []>} : vector<8x4xbf16>, vector<4x128xbf16>, vector<8x128xf32> -> vector<8x128xf32>
    %c0_267 = arith.constant 0 : index
    %c0_268 = arith.constant 0 : index
    %353 = vector.load %arg8[%c0_267, %c0_268] : memref<1x128xf32, #tpu.memory_space<vmem>>, vector<1x128xf32>
    %354 = vector.broadcast %353 : vector<1x128xf32> to vector<8x128xf32>
    %355 = arith.mulf %352, %354 : vector<8x128xf32>
    %c0_269 = arith.constant 0 : index
    %c0_270 = arith.constant 0 : index
    %356 = vector.load %arg9[%c0_269, %c0_270] : memref<1x128xf32, #tpu.memory_space<vmem>>, vector<1x128xf32>
    %357 = vector.broadcast %356 : vector<1x128xf32> to vector<8x128xf32>
    %358 = arith.addf %355, %357 : vector<8x128xf32>
    %359 = arith.addf %324, %358 : vector<8x128xf32>
    %c2_271 = arith.constant 2 : index
    %c0_272 = arith.constant 0 : index
    %c0_273 = arith.constant 0 : index
    %360 = vector.load %arg10[%c2_271, %c0_272, %c0_273] : memref<4x8x128xf32, #tpu.memory_space<vmem>>, vector<1x8x128xf32>
    %361 = vector.shape_cast %360 : vector<1x8x128xf32> to vector<8x128xf32>
    %362 = vector.shape_cast %359 : vector<8x128xf32> to vector<1x8x128xf32>
    tpu.vector_store %arg10[%c2_271, %c0_272, %c0_273], %362 {strides = array<i32>} : memref<4x8x128xf32, #tpu.memory_space<vmem>>, vector<1x8x128xf32>,
    %c4_i32_274 = arith.constant 4 : i32
    %363 = arith.muli %arg1, %c4_i32_274 : i32
    %c3_i32_275 = arith.constant 3 : i32
    %364 = arith.addi %363, %c3_i32_275 : i32
    %c10_i32_276 = arith.constant 10 : i32
    %365 = arith.muli %arg0, %c10_i32_276 : i32
    %366 = arith.addi %365, %364 : i32
    %cst_277 = arith.constant 0.000000e+00 : f32
    %367 = vector.broadcast %cst_277 : f32 to vector<8x128xf32>
    %c0_i32_278 = arith.constant 0 : i32
    %368 = arith.addi %366, %c0_i32_278 : i32
    %369 = arith.index_cast %368 : i32 to index
    %c0_279 = arith.constant 0 : index
    %c0_280 = arith.constant 0 : index
    %370 = vector.load %arg2[%369, %c0_279, %c0_280] : memref<20x10x128xbf16, #tpu.memory_space<vmem>>, vector<1x8x128xbf16>
    %371 = vector.shape_cast %370 : vector<1x8x128xbf16> to vector<8x128xbf16>
    %c0_281 = arith.constant 0 : index
    %c0_282 = arith.constant 0 : index
    %c0_283 = arith.constant 0 : index
    %372 = vector.load %arg3[%c0_281, %c0_282, %c0_283] : memref<9x128x128xbf16, #tpu.memory_space<vmem>>, vector<1x128x128xbf16>
    %373 = vector.shape_cast %372 : vector<1x128x128xbf16> to vector<128x128xbf16>
    %cst_284 = arith.constant dense<0.000000e+00> : vector<8x128xf32>
    %374 = tpu.matmul %371, %373, %cst_284 {dimension_numbers = #tpu.dot_dimension_numbers<[1], [0], [0], [1], [0, 0, 1, 1], [], []>} : vector<8x128xbf16>, vector<128x128xbf16>, vector<8x128xf32> -> vector<8x128xf32>
    %375 = arith.addf %367, %374 : vector<8x128xf32>
    %c0_i32_285 = arith.constant 0 : i32
    %376 = arith.addi %366, %c0_i32_285 : i32
    %377 = arith.index_cast %376 : i32 to index
    %c1_286 = arith.constant 1 : index
    %c0_287 = arith.constant 0 : index
    %378 = vector.load %arg2[%377, %c1_286, %c0_287] : memref<20x10x128xbf16, #tpu.memory_space<vmem>>, vector<1x8x128xbf16>
    %379 = vector.shape_cast %378 : vector<1x8x128xbf16> to vector<8x128xbf16>
    %c1_288 = arith.constant 1 : index
    %c0_289 = arith.constant 0 : index
    %c0_290 = arith.constant 0 : index
    %380 = vector.load %arg3[%c1_288, %c0_289, %c0_290] : memref<9x128x128xbf16, #tpu.memory_space<vmem>>, vector<1x128x128xbf16>
    %381 = vector.shape_cast %380 : vector<1x128x128xbf16> to vector<128x128xbf16>
    %cst_291 = arith.constant dense<0.000000e+00> : vector<8x128xf32>
    %382 = tpu.matmul %379, %381, %cst_291 {dimension_numbers = #tpu.dot_dimension_numbers<[1], [0], [0], [1], [0, 0, 1, 1], [], []>} : vector<8x128xbf16>, vector<128x128xbf16>, vector<8x128xf32> -> vector<8x128xf32>
    %383 = arith.addf %375, %382 : vector<8x128xf32>
    %c0_i32_292 = arith.constant 0 : i32
    %384 = arith.addi %366, %c0_i32_292 : i32
    %385 = arith.index_cast %384 : i32 to index
    %c2_293 = arith.constant 2 : index
    %c0_294 = arith.constant 0 : index
    %386 = vector.load %arg2[%385, %c2_293, %c0_294] : memref<20x10x128xbf16, #tpu.memory_space<vmem>>, vector<1x8x128xbf16>
    %387 = vector.shape_cast %386 : vector<1x8x128xbf16> to vector<8x128xbf16>
    %c2_295 = arith.constant 2 : index
    %c0_296 = arith.constant 0 : index
    %c0_297 = arith.constant 0 : index
    %388 = vector.load %arg3[%c2_295, %c0_296, %c0_297] : memref<9x128x128xbf16, #tpu.memory_space<vmem>>, vector<1x128x128xbf16>
    %389 = vector.shape_cast %388 : vector<1x128x128xbf16> to vector<128x128xbf16>
    %cst_298 = arith.constant dense<0.000000e+00> : vector<8x128xf32>
    %390 = tpu.matmul %387, %389, %cst_298 {dimension_numbers = #tpu.dot_dimension_numbers<[1], [0], [0], [1], [0, 0, 1, 1], [], []>} : vector<8x128xbf16>, vector<128x128xbf16>, vector<8x128xf32> -> vector<8x128xf32>
    %391 = arith.addf %383, %390 : vector<8x128xf32>
    %c1_i32_299 = arith.constant 1 : i32
    %392 = arith.addi %366, %c1_i32_299 : i32
    %393 = arith.index_cast %392 : i32 to index
    %c0_300 = arith.constant 0 : index
    %c0_301 = arith.constant 0 : index
    %394 = vector.load %arg2[%393, %c0_300, %c0_301] : memref<20x10x128xbf16, #tpu.memory_space<vmem>>, vector<1x8x128xbf16>
    %395 = vector.shape_cast %394 : vector<1x8x128xbf16> to vector<8x128xbf16>
    %c3_302 = arith.constant 3 : index
    %c0_303 = arith.constant 0 : index
    %c0_304 = arith.constant 0 : index
    %396 = vector.load %arg3[%c3_302, %c0_303, %c0_304] : memref<9x128x128xbf16, #tpu.memory_space<vmem>>, vector<1x128x128xbf16>
    %397 = vector.shape_cast %396 : vector<1x128x128xbf16> to vector<128x128xbf16>
    %cst_305 = arith.constant dense<0.000000e+00> : vector<8x128xf32>
    %398 = tpu.matmul %395, %397, %cst_305 {dimension_numbers = #tpu.dot_dimension_numbers<[1], [0], [0], [1], [0, 0, 1, 1], [], []>} : vector<8x128xbf16>, vector<128x128xbf16>, vector<8x128xf32> -> vector<8x128xf32>
    %399 = arith.addf %391, %398 : vector<8x128xf32>
    %c1_i32_306 = arith.constant 1 : i32
    %400 = arith.addi %366, %c1_i32_306 : i32
    %401 = arith.index_cast %400 : i32 to index
    %c1_307 = arith.constant 1 : index
    %c0_308 = arith.constant 0 : index
    %402 = vector.load %arg2[%401, %c1_307, %c0_308] : memref<20x10x128xbf16, #tpu.memory_space<vmem>>, vector<1x8x128xbf16>
    %403 = vector.shape_cast %402 : vector<1x8x128xbf16> to vector<8x128xbf16>
    %c4_309 = arith.constant 4 : index
    %c0_310 = arith.constant 0 : index
    %c0_311 = arith.constant 0 : index
    %404 = vector.load %arg3[%c4_309, %c0_310, %c0_311] : memref<9x128x128xbf16, #tpu.memory_space<vmem>>, vector<1x128x128xbf16>
    %405 = vector.shape_cast %404 : vector<1x128x128xbf16> to vector<128x128xbf16>
    %cst_312 = arith.constant dense<0.000000e+00> : vector<8x128xf32>
    %406 = tpu.matmul %403, %405, %cst_312 {dimension_numbers = #tpu.dot_dimension_numbers<[1], [0], [0], [1], [0, 0, 1, 1], [], []>} : vector<8x128xbf16>, vector<128x128xbf16>, vector<8x128xf32> -> vector<8x128xf32>
    %407 = arith.addf %399, %406 : vector<8x128xf32>
    %c1_i32_313 = arith.constant 1 : i32
    %408 = arith.addi %366, %c1_i32_313 : i32
    %409 = arith.index_cast %408 : i32 to index
    %c2_314 = arith.constant 2 : index
    %c0_315 = arith.constant 0 : index
    %410 = vector.load %arg2[%409, %c2_314, %c0_315] : memref<20x10x128xbf16, #tpu.memory_space<vmem>>, vector<1x8x128xbf16>
    %411 = vector.shape_cast %410 : vector<1x8x128xbf16> to vector<8x128xbf16>
    %c5_316 = arith.constant 5 : index
    %c0_317 = arith.constant 0 : index
    %c0_318 = arith.constant 0 : index
    %412 = vector.load %arg3[%c5_316, %c0_317, %c0_318] : memref<9x128x128xbf16, #tpu.memory_space<vmem>>, vector<1x128x128xbf16>
    %413 = vector.shape_cast %412 : vector<1x128x128xbf16> to vector<128x128xbf16>
    %cst_319 = arith.constant dense<0.000000e+00> : vector<8x128xf32>
    %414 = tpu.matmul %411, %413, %cst_319 {dimension_numbers = #tpu.dot_dimension_numbers<[1], [0], [0], [1], [0, 0, 1, 1], [], []>} : vector<8x128xbf16>, vector<128x128xbf16>, vector<8x128xf32> -> vector<8x128xf32>
    %415 = arith.addf %407, %414 : vector<8x128xf32>
    %c2_i32_320 = arith.constant 2 : i32
    %416 = arith.addi %366, %c2_i32_320 : i32
    %417 = arith.index_cast %416 : i32 to index
    %c0_321 = arith.constant 0 : index
    %c0_322 = arith.constant 0 : index
    %418 = vector.load %arg2[%417, %c0_321, %c0_322] : memref<20x10x128xbf16, #tpu.memory_space<vmem>>, vector<1x8x128xbf16>
    %419 = vector.shape_cast %418 : vector<1x8x128xbf16> to vector<8x128xbf16>
    %c6_323 = arith.constant 6 : index
    %c0_324 = arith.constant 0 : index
    %c0_325 = arith.constant 0 : index
    %420 = vector.load %arg3[%c6_323, %c0_324, %c0_325] : memref<9x128x128xbf16, #tpu.memory_space<vmem>>, vector<1x128x128xbf16>
    %421 = vector.shape_cast %420 : vector<1x128x128xbf16> to vector<128x128xbf16>
    %cst_326 = arith.constant dense<0.000000e+00> : vector<8x128xf32>
    %422 = tpu.matmul %419, %421, %cst_326 {dimension_numbers = #tpu.dot_dimension_numbers<[1], [0], [0], [1], [0, 0, 1, 1], [], []>} : vector<8x128xbf16>, vector<128x128xbf16>, vector<8x128xf32> -> vector<8x128xf32>
    %423 = arith.addf %415, %422 : vector<8x128xf32>
    %c2_i32_327 = arith.constant 2 : i32
    %424 = arith.addi %366, %c2_i32_327 : i32
    %425 = arith.index_cast %424 : i32 to index
    %c1_328 = arith.constant 1 : index
    %c0_329 = arith.constant 0 : index
    %426 = vector.load %arg2[%425, %c1_328, %c0_329] : memref<20x10x128xbf16, #tpu.memory_space<vmem>>, vector<1x8x128xbf16>
    %427 = vector.shape_cast %426 : vector<1x8x128xbf16> to vector<8x128xbf16>
    %c7_330 = arith.constant 7 : index
    %c0_331 = arith.constant 0 : index
    %c0_332 = arith.constant 0 : index
    %428 = vector.load %arg3[%c7_330, %c0_331, %c0_332] : memref<9x128x128xbf16, #tpu.memory_space<vmem>>, vector<1x128x128xbf16>
    %429 = vector.shape_cast %428 : vector<1x128x128xbf16> to vector<128x128xbf16>
    %cst_333 = arith.constant dense<0.000000e+00> : vector<8x128xf32>
    %430 = tpu.matmul %427, %429, %cst_333 {dimension_numbers = #tpu.dot_dimension_numbers<[1], [0], [0], [1], [0, 0, 1, 1], [], []>} : vector<8x128xbf16>, vector<128x128xbf16>, vector<8x128xf32> -> vector<8x128xf32>
    %431 = arith.addf %423, %430 : vector<8x128xf32>
    %c2_i32_334 = arith.constant 2 : i32
    %432 = arith.addi %366, %c2_i32_334 : i32
    %433 = arith.index_cast %432 : i32 to index
    %c2_335 = arith.constant 2 : index
    %c0_336 = arith.constant 0 : index
    %434 = vector.load %arg2[%433, %c2_335, %c0_336] : memref<20x10x128xbf16, #tpu.memory_space<vmem>>, vector<1x8x128xbf16>
    %435 = vector.shape_cast %434 : vector<1x8x128xbf16> to vector<8x128xbf16>
    %c8_337 = arith.constant 8 : index
    %c0_338 = arith.constant 0 : index
    %c0_339 = arith.constant 0 : index
    %436 = vector.load %arg3[%c8_337, %c0_338, %c0_339] : memref<9x128x128xbf16, #tpu.memory_space<vmem>>, vector<1x128x128xbf16>
    %437 = vector.shape_cast %436 : vector<1x128x128xbf16> to vector<128x128xbf16>
    %cst_340 = arith.constant dense<0.000000e+00> : vector<8x128xf32>
    %438 = tpu.matmul %435, %437, %cst_340 {dimension_numbers = #tpu.dot_dimension_numbers<[1], [0], [0], [1], [0, 0, 1, 1], [], []>} : vector<8x128xbf16>, vector<128x128xbf16>, vector<8x128xf32> -> vector<8x128xf32>
    %439 = arith.addf %431, %438 : vector<8x128xf32>
    %c0_341 = arith.constant 0 : index
    %c0_342 = arith.constant 0 : index
    %440 = vector.load %arg4[%c0_341, %c0_342] : memref<1x128xf32, #tpu.memory_space<vmem>>, vector<1x128xf32>
    %441 = vector.broadcast %440 : vector<1x128xf32> to vector<8x128xf32>
    %442 = arith.mulf %439, %441 : vector<8x128xf32>
    %c0_343 = arith.constant 0 : index
    %c0_344 = arith.constant 0 : index
    %443 = vector.load %arg5[%c0_343, %c0_344] : memref<1x128xf32, #tpu.memory_space<vmem>>, vector<1x128xf32>
    %444 = vector.broadcast %443 : vector<1x128xf32> to vector<8x128xf32>
    %445 = arith.addf %442, %444 : vector<8x128xf32>
    %c22_i32_345 = arith.constant 22 : i32
    %446 = arith.muli %arg0, %c22_i32_345 : i32
    %c3_i32_346 = arith.constant 3 : i32
    %447 = arith.addi %446, %c3_i32_346 : i32
    %c2_i32_347 = arith.constant 2 : i32
    %448 = arith.muli %c2_i32_347, %364 : i32
    %449 = arith.addi %447, %448 : i32
    %c0_i32_348 = arith.constant 0 : i32
    %450 = arith.addi %449, %c0_i32_348 : i32
    %451 = arith.index_cast %450 : i32 to index
    %c3_349 = arith.constant 3 : index
    %c0_350 = arith.constant 0 : index
    %452 = tpu.strided_load %arg6[%451, %c3_349, %c0_350] {strides = array<i32: 1, 2, 1>} : memref<44x22x4xf32, #tpu.memory_space<vmem>>, vector<1x8x4xf32>
    %453 = vector.shape_cast %452 : vector<1x8x4xf32> to vector<8x4xf32>
    %454 = arith.index_cast %450 : i32 to index
    %c4_351 = arith.constant 4 : index
    %c0_352 = arith.constant 0 : index
    %455 = tpu.strided_load %arg6[%454, %c4_351, %c0_352] {strides = array<i32: 1, 2, 1>} : memref<44x22x4xf32, #tpu.memory_space<vmem>>, vector<1x8x4xf32>
    %456 = vector.shape_cast %455 : vector<1x8x4xf32> to vector<8x4xf32>
    %457 = arith.maximumf %453, %456 : vector<8x4xf32>
    %c22_i32_353 = arith.constant 22 : i32
    %458 = arith.muli %arg0, %c22_i32_353 : i32
    %c3_i32_354 = arith.constant 3 : i32
    %459 = arith.addi %458, %c3_i32_354 : i32
    %c2_i32_355 = arith.constant 2 : i32
    %460 = arith.muli %c2_i32_355, %364 : i32
    %461 = arith.addi %459, %460 : i32
    %c1_i32_356 = arith.constant 1 : i32
    %462 = arith.addi %461, %c1_i32_356 : i32
    %463 = arith.index_cast %462 : i32 to index
    %c3_357 = arith.constant 3 : index
    %c0_358 = arith.constant 0 : index
    %464 = tpu.strided_load %arg6[%463, %c3_357, %c0_358] {strides = array<i32: 1, 2, 1>} : memref<44x22x4xf32, #tpu.memory_space<vmem>>, vector<1x8x4xf32>
    %465 = vector.shape_cast %464 : vector<1x8x4xf32> to vector<8x4xf32>
    %466 = arith.maximumf %457, %465 : vector<8x4xf32>
    %467 = arith.index_cast %462 : i32 to index
    %c4_359 = arith.constant 4 : index
    %c0_360 = arith.constant 0 : index
    %468 = tpu.strided_load %arg6[%467, %c4_359, %c0_360] {strides = array<i32: 1, 2, 1>} : memref<44x22x4xf32, #tpu.memory_space<vmem>>, vector<1x8x4xf32>
    %469 = vector.shape_cast %468 : vector<1x8x4xf32> to vector<8x4xf32>
    %470 = arith.maximumf %466, %469 : vector<8x4xf32>
    %471 = arith.truncf %470 : vector<8x4xf32> to vector<8x4xbf16>
    %c0_361 = arith.constant 0 : index
    %c0_362 = arith.constant 0 : index
    %472 = vector.load %arg7[%c0_361, %c0_362] : memref<4x128xbf16, #tpu.memory_space<vmem>>, vector<4x128xbf16>
    %cst_363 = arith.constant dense<0.000000e+00> : vector<8x128xf32>
    %473 = tpu.matmul %471, %472, %cst_363 {dimension_numbers = #tpu.dot_dimension_numbers<[1], [0], [0], [1], [0, 0, 1, 1], [], []>} : vector<8x4xbf16>, vector<4x128xbf16>, vector<8x128xf32> -> vector<8x128xf32>
    %c0_364 = arith.constant 0 : index
    %c0_365 = arith.constant 0 : index
    %474 = vector.load %arg8[%c0_364, %c0_365] : memref<1x128xf32, #tpu.memory_space<vmem>>, vector<1x128xf32>
    %475 = vector.broadcast %474 : vector<1x128xf32> to vector<8x128xf32>
    %476 = arith.mulf %473, %475 : vector<8x128xf32>
    %c0_366 = arith.constant 0 : index
    %c0_367 = arith.constant 0 : index
    %477 = vector.load %arg9[%c0_366, %c0_367] : memref<1x128xf32, #tpu.memory_space<vmem>>, vector<1x128xf32>
    %478 = vector.broadcast %477 : vector<1x128xf32> to vector<8x128xf32>
    %479 = arith.addf %476, %478 : vector<8x128xf32>
    %480 = arith.addf %445, %479 : vector<8x128xf32>
    %c3_368 = arith.constant 3 : index
    %c0_369 = arith.constant 0 : index
    %c0_370 = arith.constant 0 : index
    %481 = vector.load %arg10[%c3_368, %c0_369, %c0_370] : memref<4x8x128xf32, #tpu.memory_space<vmem>>, vector<1x8x128xf32>
    %482 = vector.shape_cast %481 : vector<1x8x128xf32> to vector<8x128xf32>
    %483 = vector.shape_cast %480 : vector<8x128xf32> to vector<1x8x128xf32>
    tpu.vector_store %arg10[%c3_368, %c0_369, %c0_370], %483 {strides = array<i32>} : memref<4x8x128xf32, #tpu.memory_space<vmem>>, vector<1x8x128xf32>,
    return
  }
  func.func @transform_0(%arg0: i32, %arg1: i32) -> (i32, i32, i32) {
    %c0_i32 = arith.constant 0 : i32
    %c0_i32_0 = arith.constant 0 : i32
    %c0_i32_1 = arith.constant 0 : i32
    %c0_i32_2 = arith.constant 0 : i32
    return %c0_i32, %c0_i32_0, %c0_i32_1 : i32, i32, i32
  }
  func.func @transform_1(%arg0: i32, %arg1: i32) -> (i32, i32, i32) {
    %c0_i32 = arith.constant 0 : i32
    %c0_i32_0 = arith.constant 0 : i32
    %c0_i32_1 = arith.constant 0 : i32
    %c0_i32_2 = arith.constant 0 : i32
    return %c0_i32, %c0_i32_0, %c0_i32_1 : i32, i32, i32
  }
  func.func @transform_2(%arg0: i32, %arg1: i32) -> (i32, i32) {
    %c0_i32 = arith.constant 0 : i32
    %c0_i32_0 = arith.constant 0 : i32
    %c0_i32_1 = arith.constant 0 : i32
    return %c0_i32, %c0_i32_0 : i32, i32
  }
  func.func @transform_3(%arg0: i32, %arg1: i32) -> (i32, i32) {
    %c0_i32 = arith.constant 0 : i32
    %c0_i32_0 = arith.constant 0 : i32
    %c0_i32_1 = arith.constant 0 : i32
    return %c0_i32, %c0_i32_0 : i32, i32
  }
  func.func @transform_4(%arg0: i32, %arg1: i32) -> (i32, i32, i32) {
    %c0_i32 = arith.constant 0 : i32
    %c0_i32_0 = arith.constant 0 : i32
    %c0_i32_1 = arith.constant 0 : i32
    %c0_i32_2 = arith.constant 0 : i32
    return %c0_i32, %c0_i32_0, %c0_i32_1 : i32, i32, i32
  }
  func.func @transform_5(%arg0: i32, %arg1: i32) -> (i32, i32) {
    %c0_i32 = arith.constant 0 : i32
    %c0_i32_0 = arith.constant 0 : i32
    %c0_i32_1 = arith.constant 0 : i32
    return %c0_i32, %c0_i32_0 : i32, i32
  }
  func.func @transform_6(%arg0: i32, %arg1: i32) -> (i32, i32) {
    %c0_i32 = arith.constant 0 : i32
    %c0_i32_0 = arith.constant 0 : i32
    %c0_i32_1 = arith.constant 0 : i32
    return %c0_i32, %c0_i32_0 : i32, i32
  }
  func.func @transform_7(%arg0: i32, %arg1: i32) -> (i32, i32) {
    %c0_i32 = arith.constant 0 : i32
    %c0_i32_0 = arith.constant 0 : i32
    %c0_i32_1 = arith.constant 0 : i32
    return %c0_i32, %c0_i32_0 : i32, i32
  }
  func.func @transform_8(%arg0: i32, %arg1: i32) -> (i32, i32, i32) {
    %c2_i32 = arith.constant 2 : i32
    %0 = arith.muli %arg0, %c2_i32 : i32
    %1 = arith.addi %0, %arg1 : i32
    %c0_i32 = arith.constant 0 : i32
    %c0_i32_0 = arith.constant 0 : i32
    %c0_i32_1 = arith.constant 0 : i32
    return %1, %c0_i32, %c0_i32_0 : i32, i32, i32
  }
}

</mosaic_0001>

<bundles_post_ra>
// kernel: block_forward.2
= control target key start
LH: loop header
LB: loop body
LE: loop exit
PB: predicated region body
PF: predicated region fallthrough
CT: control target
= control target key end

     0   :  { %s3919_s15 = smov 0   ;;  %s3921_s16 = smov 0   ;;  %s4561_s0 = inlined_call_operand.vmem [shape: f32[44,22,4], index: 0, kind: input, shape index: {}]   ;;  %s4562_s1 = inlined_call_operand.vmem [shape: bf16[9,4,128], index: 1, kind: input, shape index: {}]   ;;  %s4563_s2 = inlined_call_operand.vmem [shape: f32[1,128], index: 2, kind: input, shape index: {}]   ;;  %s4564_s3 = inlined_call_operand.vmem [shape: f32[1,128], index: 3, kind: input, shape index: {}]   ;;  %s4565_s4 = inlined_call_operand.vmem [shape: bf16[20,10,128], index: 4, kind: output, shape index: {}]  }
   0x1   :  { %s3923_s17 = smov 0   ;;  %s3925_s18 = smov 0  }
   0x2   :  { %s3927_s19 = smov 0  }
   0x3 LB: > { %s23_s20 = sadd.s32 1, %s3881_s17  ;;  %s26_s21 = sadd.s32 1, %s3885_s18  ;;  %s3889_s19 = sphi %s3927_s19, %s14_s19   ;;  %s3885_s18 = sphi %s3925_s18, %s4578_s18   ;;  %s3881_s17 = sphi %s3923_s17, %s4577_s17   ;;  %s3877_s16 = sphi %s3921_s16, %s4576_s16   ;;  %s3873_s15 = sphi %s3919_s15, %s4575_s15  }
   0x4   : > { %p24_p0 = scmp.ge.s32.totalorder %s23_s20, 2  ;;  %p3208_p1 = scmp.ge.s32.totalorder %s3889_s19, 1 }
   0x5   : > { %p168_p2 = scmp.lt.s32.totalorder %s3889_s19, 5 }
   0x6   : > { %s4580_s20 = smov (%p24_p0, %s23_s20), 0  ;;  %s4582_s21 = smov (!%p24_p0, %s26_s21), %s3885_s18 }
   0x7   : > { %p169_p3 = pnand %p3208_p1, %p168_p2  ;;  %p28_p4 = scmp.ge.s32.totalorder %s4582_s21, 2 }
   0x8   : > { %s3964_s26 = smul.u32 (!%p169_p3), 5, %s3873_s15 }
   0x9   : > { %s4584_s21 = smov (%p28_p4, %s4582_s21), 0  ;;  %172 = sbr.rel (%p169_p3) target bundleno = 417 (0x1a1), region = 36 }
   0xa   : > { %s222_s27 = smul.u32 (!%p169_p3), 22, %s3877_s16  ;;  %s3972_s28 = sadd.s32 (!%p169_p3), 4294967295, %s3964_s26 }
   0xb   : > { %s3225_s29 = smul.u32 (!%p169_p3), 10, %s3873_s15  ;;  %s3213_s5 = sshll.u32 (!%p169_p3), %s3972_s28, 1 }
   0xc   : > { %s223_s30 = sadd.s32 (!%p169_p3), 3, %s222_s27  ;;  %p216_p6 = scmp.ge.s32.totalorder (!%p169_p3), %s3972_s28, 0 }
   0xd   : > { %s225_s6 = sadd.s32 (!%p169_p3), %s3213_s5, %s223_s30  ;;  %s3039_s7 = sadd.s32 (!%p169_p3), %s3225_s29, %s222_s27 }
   0xe   : > { %v3218_v0 = vld [vmem:[%s4562_s1 + $0x2] sm:$0x3]  ;;  %vm250_vm0 = vcmask 1041408   ;;  %v236_v1 = vld [vmem:[%s4562_s1] sm:$0x3]  ;;  %v3891_v2 = vmov 0.0  }
   0xf   : > { %3538 = vmatprep.subr.bf16.mxu0 %v3891_v2  ;;  %v252_v3 = vsel %vm250_vm0, %v3218_v0, 0  ;;  %3544 = vmatprep.subr.bf16.mxu1 %v3891_v2  ;;  %v298_v4 = vsel %vm250_vm0, %v236_v1, 0  ;;  %vm3892_vm1 = vmmov 0   ;;  %s226_s8 = sadd.s32 4294967295, %s225_s6  ;;  %s3040_s9 = smul.u32 24, %s3039_s7  ;;  %vm246_vm3 = vcmask 31744  }
  0x10   : > { %3539 = vmatpush3.bf16.msra.mxu0 %v252_v3  ;;  %3545 = vmatpush3.bf16.msra.mxu1 %v298_v4  ;;  %s227_s10 = smul.u32 24, %s226_s8  ;;  %v3223_v5 = vld [vmem:[%s4562_s1 + $0x4] sm:$0x3]  ;;  %v3228_v12 = vld [vmem:[%s4562_s1 + $0x6] sm:$0x3]  ;;  %s3209_s30 = sshll.u32 %s3877_s16, 1 }
  0x11   : > { %3540 = vmatprep.mubr.msk.bf16.mxu0 %vm3892_vm1, %v3891_v2  ;;  %3546 = vmatprep.mubr.msk.bf16.mxu1 %vm3892_vm1, %v3891_v2  ;;  %s3981_s13 = scalar_lea.vmem %s4561_s0, %s3040_s9  ;;  %v353_v17 = vsel %vm250_vm0, %v3223_v5, 0  ;;  %v411_v18 = vsel %vm250_vm0, %v3228_v12, 0  ;;  %v3232_v27 = vld [vmem:[%s4562_s1 + $0x8] sm:$0x3]  ;;  %v3236_v28 = vld [vmem:[%s4562_s1 + $0xa] sm:$0x3]  ;;  %s193_s5 = sadd.s32 %s3873_s15, %s3209_s30 }
  0x12   : > { %3550 = vmatprep.subr.bf16.mxu0 %v3891_v2  ;;  %3556 = vmatprep.subr.bf16.mxu1 %v3891_v2  ;;  %s228_s23 = scalar_lea.vmem %s4561_s0, %s227_s10  ;;  %v3226_v6 = vld [vmem:[%s3981_s13 + $0x1a] ss:$2 sm:$0xff]  ;;  %v3230_v21 = vld [vmem:[%s3981_s13 + $0x1b] ss:$2 sm:$0xff]  ;;  %v467_v31 = vsel %vm250_vm0, %v3232_v27, 0  ;;  %v523_v32 = vsel %vm250_vm0, %v3236_v28, 0 }
  0x13   : > { %v3216_v7 = vld [vmem:[%s228_s23 + $0x3] ss:$2 sm:$0xff]  ;;  %v3214_v8 = vld [vmem:[%s228_s23 + $0x2] ss:$2 sm:$0xff]  ;;  %v400_v14 = vmul.f32 0.5, %v3226_v6  ;;  %v456_v25 = vmul.f32 0.5, %v3230_v21 }
  0x14   : > { %v3221_v9 = vld [vmem:[%s228_s23 + $0x4] ss:$2 sm:$0xff]  ;;  %v239_v10 = vmul.f32 0.5, %v3216_v7  ;;  %v231_v11 = vmul.f32 0.5, %v3214_v8  ;;  %v3243_v34 = vld [vmem:[%s3981_s13 + $0x33] ss:$2 sm:$0xff] }
  0x15   : > { %v342_v13 = vmul.f32 0.5, %v3221_v9  ;;  %vm401_vm6 = vcmp.ge.f32.partialorder %v400_v14, 1.0  ;;  %v3234_v22 = vld [vmem:[%s3981_s13 + $0x1c] ss:$2 sm:$0xff]  ;;  %vm457_vm7 = vcmp.ge.f32.partialorder %v456_v25, 1.0  ;;  %v627_v38 = vmul.f32 0.5, %v3243_v34 }
  0x16   : > { %vm240_vm2 = vcmp.ge.f32.partialorder %v239_v10, 1.0  ;;  %vm232_vm4 = vcmp.ge.f32.partialorder %v231_v11, 1.0  ;;  %v3227_v24 = vsel %vm401_vm6, 1.0, %v3891_v2  ;;  %v512_v26 = vmul.f32 0.5, %v3234_v22  ;;  %v3239_v33 = vld [vmem:[%s3981_s13 + $0x32] ss:$2 sm:$0xff] }
  0x17   : > { %v3217_v15 = vsel %vm240_vm2, 1.0, %v3891_v2  ;;  %v3215_v16 = vsel %vm232_vm4, 1.0, %v3891_v2  ;;  %vm343_vm5 = vcmp.ge.f32.partialorder %v342_v13, 1.0  ;;  %v404_v30 = vpack.c.bf16 %v3227_v24, %v3227_v24  ;;  %v3241_v39 = vld [vmem:[%s4562_s1 + $0xc] sm:$0x3]  ;;  %s194_s6 = smul.u32 5, %s193_s5 }
  0x18   : > { %v243_v19 = vpack.c.bf16 %v3217_v15, %v3217_v15  ;;  %v235_v20 = vpack.c.bf16 %v3215_v16, %v3215_v16  ;;  %v3222_v23 = vsel %vm343_vm5, 1.0, %v3891_v2  ;;  %vm513_vm8 = vcmp.ge.f32.partialorder %v512_v26, 1.0  ;;  %v3245_v40 = vld [vmem:[%s4562_s1 + $0xe] sm:$0x3]  ;;  %v3247_v45 = vld [vmem:[%s3981_s13 + $0x34] ss:$2 sm:$0xff] }
  0x19   : > { %v346_v29 = vpack.c.bf16 %v3222_v23, %v3222_v23  ;;  %v3231_v35 = vsel %vm457_vm7, 1.0, %v3891_v2  ;;  %v3235_v36 = vsel %vm513_vm8, 1.0, %v3891_v2  ;;  %v571_v37 = vmul.f32 0.5, %v3239_v33  ;;  %v3258_v46 = vld [vmem:[%s3981_s13 + $0x33] ss:$2 sm:$0xff]  ;;  %p195_p5 = scmp.lt.s32.totalorder %s194_s6, 19 }
  0x1a   : > { %3541 = vmatmul.mubr.msk.bf16.vlgmr.msra.gmra.mxu0 %vm246_vm3, %v243_v19  ;;  %3547 = vmatmul.mubr.msk.bf16.vlgmr.msra.gmra.mxu1 %vm246_vm3, %v235_v20  ;;  %v460_v41 = vpack.c.bf16 %v3231_v35, %v3231_v35  ;;  %v516_v42 = vpack.c.bf16 %v3235_v36, %v3235_v36  ;;  %v582_v43 = vsel %vm250_vm0, %v3241_v39, 0  ;;  %v638_v44 = vsel %vm250_vm0, %v3245_v40, 0  ;;  %v3249_v51 = vld [vmem:[%s4562_s1 + $0x10] sm:$0x3]  ;;  %v3260_v52 = vld [vmem:[%s4562_s1 + $0x2] sm:$0x3] }
  0x1b   : > { %3551 = vmatpush3.bf16.msra.mxu0 %v353_v17  ;;  %3557 = vmatpush3.bf16.msra.mxu1 %v411_v18  ;;  %vm572_vm9 = vcmp.ge.f32.partialorder %v571_v37, 1.0  ;;  %vm628_vm10 = vcmp.ge.f32.partialorder %v627_v38, 1.0  ;;  %v683_v49 = vmul.f32 0.5, %v3247_v45  ;;  %v806_v50 = vmul.f32 0.5, %v3258_v46  ;;  %v3256_v57 = vld [vmem:[%s3981_s13 + $0x32] ss:$2 sm:$0xff] }
  0x1c   : > { %3552 = vmatprep.mubr.msk.bf16.mxu0 %vm3892_vm1, %v3891_v2  ;;  %3558 = vmatprep.mubr.msk.bf16.mxu1 %vm3892_vm1, %v3891_v2  ;;  %v3240_v47 = vsel %vm572_vm9, 1.0, %v3891_v2  ;;  %v3244_v48 = vsel %vm628_vm10, 1.0, %v3891_v2  ;;  %v694_v55 = vsel %vm250_vm0, %v3249_v51, 0  ;;  %v816_v56 = vsel %vm250_vm0, %v3260_v52, 0  ;;  %v3263_v58 = vld [vmem:[%s3981_s13 + $0x34] ss:$2 sm:$0xff] }
  0x1d   : > { %3562 = vmatprep.subr.bf16.mxu0 %v3891_v2  ;;  %3568 = vmatprep.subr.bf16.mxu1 %v3891_v2  ;;  %v575_v53 = vpack.c.bf16 %v3240_v47, %v3240_v47  ;;  %v631_v54 = vpack.c.bf16 %v3244_v48, %v3244_v48  ;;  %vm684_vm11 = vcmp.ge.f32.partialorder %v683_v49, 1.0  ;;  %vm807_vm12 = vcmp.ge.f32.partialorder %v806_v50, 1.0  ;;  %v803_v63 = vld [vmem:[%s4562_s1] sm:$0x3]  ;;  %v3265_v0 = vld [vmem:[%s4562_s1 + $0x4] sm:$0x3] }
  0x1e   : > { %v3248_v59 = vsel %vm684_vm11, 1.0, %v3891_v2  ;;  %v3259_v60 = vsel %vm807_vm12, 1.0, %v3891_v2  ;;  %v798_v61 = vmul.f32 0.5, %v3256_v57  ;;  %v906_v62 = vmul.f32 0.5, %v3263_v58  ;;  %v3267_v6 = vld [vmem:[%s3981_s13 + $0x4a] ss:$2 sm:$0xff] }
  0x1f   : > { %v687_v1 = vpack.c.bf16 %v3248_v59, %v3248_v59  ;;  %v810_v3 = vpack.c.bf16 %v3259_v60, %v3259_v60  ;;  %v862_v4 = vsel %vm250_vm0, %v803_v63, 0  ;;  %v916_v5 = vsel %vm250_vm0, %v3265_v0, 0  ;;  %v3271_v7 = vld [vmem:[%s3981_s13 + $0x4b] ss:$2 sm:$0xff]  ;;  %v3269_v12 = vld [vmem:[%s4562_s1 + $0x6] sm:$0x3] }
  0x20   : > { %vm799_vm13 = vcmp.ge.f32.partialorder %v798_v61, 1.0  ;;  %vm907_vm14 = vcmp.ge.f32.partialorder %v906_v62, 1.0  ;;  %v963_v10 = vmul.f32 0.5, %v3267_v6  ;;  %v1018_v11 = vmul.f32 0.5, %v3271_v7  ;;  %v3273_v13 = vld [vmem:[%s4562_s1 + $0x8] sm:$0x3] }
  0x21   : > { %v3257_v8 = vsel %vm799_vm13, 1.0, %v3891_v2  ;;  %v3264_v9 = vsel %vm907_vm14, 1.0, %v3891_v2  ;;  %v973_v16 = vsel %vm250_vm0, %v3269_v12, 0  ;;  %v1028_v17 = vsel %vm250_vm0, %v3273_v13, 0  ;;  %v3275_v18 = vld [vmem:[%s3981_s13 + $0x4c] ss:$2 sm:$0xff] }
  0x22   : > { %3553 = vmatmul.mubr.msk.bf16.vlgmr.msra.gmra.mxu0 %vm246_vm3, %v346_v29  ;;  %3559 = vmatmul.mubr.msk.bf16.vlgmr.msra.gmra.mxu1 %vm246_vm3, %v404_v30  ;;  %v802_v14 = vpack.c.bf16 %v3257_v8, %v3257_v8  ;;  %v910_v15 = vpack.c.bf16 %v3264_v9, %v3264_v9  ;;  %vm964_vm15 = vcmp.ge.f32.partialorder %v963_v10, 1.0  ;;  %vm1019_vm2 = vcmp.ge.f32.partialorder %v1018_v11, 1.0  ;;  %v3279_v19 = vld [vmem:[%s3981_s13 + $0x62] ss:$2 sm:$0xff]  ;;  %v3283_v30 = vld [vmem:[%s3981_s13 + $0x63] ss:$2 sm:$0xff] }
  0x23   : > { %3563 = vmatpush3.bf16.msra.mxu0 %v467_v31  ;;  %3569 = vmatpush3.bf16.msra.mxu1 %v523_v32  ;;  %v3268_v20 = vsel %vm964_vm15, 1.0, %v3891_v2  ;;  %v3272_v21 = vsel %vm1019_vm2, 1.0, %v3891_v2  ;;  %v1073_v22 = vmul.f32 0.5, %v3275_v18  ;;  %v1131_v23 = vmul.f32 0.5, %v3279_v19  ;;  %v3277_v24 = vld [vmem:[%s4562_s1 + $0xa] sm:$0x3] }
  0x24   : > { %3564 = vmatprep.mubr.msk.bf16.mxu0 %vm3892_vm1, %v3891_v2  ;;  %3570 = vmatprep.mubr.msk.bf16.mxu1 %vm3892_vm1, %v3891_v2  ;;  %v3281_v25 = vld [vmem:[%s4562_s1 + $0xc] sm:$0x3]  ;;  %v967_v26 = vpack.c.bf16 %v3268_v20, %v3268_v20  ;;  %v1022_v27 = vpack.c.bf16 %v3272_v21, %v3272_v21  ;;  %v1083_v28 = vsel %vm250_vm0, %v3277_v24, 0  ;;  %v1186_v34 = vmul.f32 0.5, %v3283_v30  ;;  %v3285_v36 = vld [vmem:[%s4562_s1 + $0xe] sm:$0x3] }
  0x25   : > { %3574 = vmatprep.subr.bf16.mxu0 %v3891_v2  ;;  %3580 = vmatprep.subr.bf16.mxu1 %v3891_v2  ;;  %v1141_v29 = vsel %vm250_vm0, %v3281_v25, 0  ;;  %vm1074_vm4 = vcmp.ge.f32.partialorder %v1073_v22, 1.0  ;;  %vm1132_vm5 = vcmp.ge.f32.partialorder %v1131_v23, 1.0  ;;  %v3287_v31 = vld [vmem:[%s3981_s13 + $0x64] ss:$2 sm:$0xff]  ;;  %v1196_v40 = vsel %vm250_vm0, %v3285_v36, 0 }
  0x26   : > { %v3276_v32 = vsel %vm1074_vm4, 1.0, %v3891_v2  ;;  %v3280_v33 = vsel %vm1132_vm5, 1.0, %v3891_v2  ;;  %v1241_v35 = vmul.f32 0.5, %v3287_v31  ;;  %v3289_v37 = vld [vmem:[%s4562_s1 + $0x10] sm:$0x3]  ;;  %vm1187_vm6 = vcmp.ge.f32.partialorder %v1186_v34, 1.0 }
  0x27   : > { %v1077_v38 = vpack.c.bf16 %v3276_v32, %v3276_v32  ;;  %v1135_v39 = vpack.c.bf16 %v3280_v33, %v3280_v33  ;;  %v3305_v48 = vld [vmem:[%s4562_s1 + $0x2] sm:$0x3]  ;;  %v1356_v49 = vld [vmem:[%s4562_s1] sm:$0x3]  ;;  %v3310_v60 = vld [vmem:[%s4562_s1 + $0x4] sm:$0x3] }
  0x28   : > { %vm1242_vm7 = vcmp.ge.f32.partialorder %v1241_v35, 1.0  ;;  %v1369_v52 = vsel %vm250_vm0, %v3305_v48, 0  ;;  %v3315_v61 = vld [vmem:[%s4562_s1 + $0x6] sm:$0x3]  ;;  %v1469_v0 = vsel %vm250_vm0, %v3310_v60, 0  ;;  %s4586_s6 = smov (!%p195_p5, %s194_s6), 19 }
  0x29   : > { %v3288_v45 = vsel %vm1242_vm7, 1.0, %v3891_v2  ;;  %v3319_v9 = vld [vmem:[%s4562_s1 + $0x8] sm:$0x3]  ;;  %v3323_v10 = vld [vmem:[%s4562_s1 + $0xa] sm:$0x3]  ;;  %s3442_s9 = sshll.u32 %s4586_s6, 3 }
  0x2a   : > { %3565 = vmatmul.mubr.msk.bf16.vlgmr.msra.gmra.mxu0 %vm246_vm3, %v460_v41  ;;  %3571 = vmatmul.mubr.msk.bf16.vlgmr.msra.gmra.mxu1 %vm246_vm3, %v516_v42  ;;  %v1251_v41 = vsel %vm250_vm0, %v3289_v37, 0  ;;  %v3303_v42 = vld [vmem:[%s3981_s13 + $0x63] ss:$2 sm:$0xff]  ;;  %v1245_v51 = vpack.c.bf16 %v3288_v45, %v3288_v45  ;;  %v1581_v13 = vsel %vm250_vm0, %v3319_v9, 0  ;;  %v1909_v45 = vld [vmem:[%s4562_s1] sm:$0x3]  ;;  %s4264_s12 = scalar_lea.vmem %s4565_s4, %s3442_s9 }
  0x2b   : > { %3575 = vmatpush3.bf16.msra.mxu0 %v582_v43  ;;  %3581 = vmatpush3.bf16.msra.mxu1 %v638_v44  ;;  %v3301_v43 = vld [vmem:[%s3981_s13 + $0x62] ss:$2 sm:$0xff]  ;;  %v3284_v44 = vsel %vm1187_vm6, 1.0, %v3891_v2  ;;  %v1359_v46 = vmul.f32 0.5, %v3303_v42  ;;  %p217_p7 = scmp.lt.s32.totalorder %s3972_s28, 8  ;;  %p785_p9 = scmp.ge.s32.totalorder %s3964_s26, 0 }
  0x2c   : > { %3576 = vmatprep.mubr.msk.bf16.mxu0 %vm3892_vm1, %v3891_v2  ;;  %3582 = vmatprep.mubr.msk.bf16.mxu1 %vm3892_vm1, %v3891_v2  ;;  %v1351_v47 = vmul.f32 0.5, %v3301_v43  ;;  %v1190_v50 = vpack.c.bf16 %v3284_v44, %v3284_v44  ;;  %v3328_v21 = vld [vmem:[%s4562_s1 + $0xc] sm:$0x3]  ;;  %v3332_v22 = vld [vmem:[%s4562_s1 + $0xe] sm:$0x3]  ;;  %p786_p10 = scmp.lt.s32.totalorder %s3964_s26, 8 }
  0x2d   : > { %3586 = vmatprep.subr.bf16.mxu0 %v3891_v2  ;;  %3592 = vmatprep.subr.bf16.mxu1 %v3891_v2  ;;  %vm1360_vm8 = vcmp.ge.f32.partialorder %v1359_v46, 1.0  ;;  %v1694_v25 = vsel %vm250_vm0, %v3328_v21, 0  ;;  %v3336_v33 = vld [vmem:[%s4562_s1 + $0x10] sm:$0x3]  ;;  %v3352_v34 = vld [vmem:[%s4562_s1 + $0x2] sm:$0x3]  ;;  %p218_p8 = pnand %p217_p7, %p216_p6 }
  0x2e   : > { %vm1352_vm9 = vcmp.ge.f32.partialorder %v1351_v47, 1.0  ;;  %v1804_v37 = vsel %vm250_vm0, %v3336_v33, 0  ;;  %v3357_v46 = vld [vmem:[%s4562_s1 + $0x4] sm:$0x3]  ;;  %p787_p11 = pnand %p786_p10, %p785_p9  ;;  %s1337_s23 = sadd.s32 1, %s3964_s26 }
  0x2f   : > { %v3302_v57 = vsel %vm1352_vm9, 1.0, %v3891_v2  ;;  %s3212_s7 = scalar_select %p218_p8, 0, 1 }
  0x30   : > { %v1355_v63 = vpack.c.bf16 %v3302_v57, %v3302_v57  ;;  %s3255_s14 = scalar_select %p787_p11, 0, 1 }
  0x31   : > { %s221_s8 = scvt.s32.f32 %s3212_s7  ;;  %p4481_p12 = scmp.ge.s32.totalorder %s1337_s23, 0 }
  0x32   : > { %3577 = vmatmul.mubr.msk.bf16.vlgmr.msra.gmra.mxu0 %vm246_vm3, %v575_v53  ;;  %3583 = vmatmul.mubr.msk.bf16.vlgmr.msra.gmra.mxu1 %vm246_vm3, %v631_v54  ;;  %v1415_v53 = vsel %vm250_vm0, %v1356_v49, 0  ;;  %v3308_v54 = vld [vmem:[%s3981_s13 + $0x64] ss:$2 sm:$0xff]  ;;  %v1968_v49 = vsel %vm250_vm0, %v1909_v45, 0  ;;  %s790_s22 = scvt.s32.f32 %s3255_s14  ;;  %p4485_p13 = scmp.lt.s32.totalorder %s1337_s23, 8 }
  0x33   : > { %3587 = vmatpush3.bf16.msra.mxu0 %v694_v55  ;;  %3593 = vmatpush3.bf16.msra.mxu1 %v816_v56  ;;  %v3313_v55 = vld [vmem:[%s3981_s13 + $0x7a] ss:$2 sm:$0xff]  ;;  %v3304_v56 = vsel %vm1360_vm8, 1.0, %v3891_v2  ;;  %v1459_v58 = vmul.f32 0.5, %v3308_v54  ;;  %s1890_s30 = sadd.s32 2, %s3964_s26 }
  0x34   : > { %3588 = vmatprep.mubr.msk.bf16.mxu0 %vm3892_vm1, %v3891_v2  ;;  %3594 = vmatprep.mubr.msk.bf16.mxu1 %vm3892_vm1, %v3891_v2  ;;  %v1516_v59 = vmul.f32 0.5, %v3313_v55  ;;  %v1363_v62 = vpack.c.bf16 %v3304_v56, %v3304_v56  ;;  %p1340_p0 = pnand %p4485_p13, %p4481_p12  ;;  %p4505_p1 = scmp.ge.s32.totalorder %s1890_s30, 0 }
  0x35   : > { %3598 = vmatprep.subr.bf16.mxu0 %v3891_v2  ;;  %3604 = vmatprep.subr.bf16.mxu1 %v3891_v2  ;;  %vm1460_vm10 = vcmp.ge.f32.partialorder %v1459_v58, 1.0  ;;  %v3362_v58 = vld [vmem:[%s4562_s1 + $0x6] sm:$0x3]  ;;  %p1892_p2 = scmp.lt.s32.totalorder %s1890_s30, 8 }
  0x36   : > { %vm1517_vm11 = vcmp.ge.f32.partialorder %v1516_v59, 1.0  ;;  %v3366_v59 = vld [vmem:[%s4562_s1 + $0x8] sm:$0x3]  ;;  %s3299_s27 = scalar_select %p1340_p0, 0, 1 }
  0x37   : > { %v3314_v6 = vsel %vm1517_vm11, 1.0, %v3891_v2  ;;  %p1893_p3 = pnand %p1892_p2, %p4505_p1 }
  0x38   : > { %v1520_v12 = vpack.c.bf16 %v3314_v6, %v3314_v6  ;;  %s1343_s29 = scvt.s32.f32 %s3299_s27 }
  0x39   : > { %s3346_s6 = scalar_select %p1893_p3, 0, 1 }
  0x3a   : > { %3589 = vmatmul.mubr.msk.bf16.vlgmr.msra.gmra.mxu0 %vm246_vm3, %v687_v1  ;;  %3595 = vmatmul.mubr.msk.bf16.vlgmr.msra.gmra.mxu1 %vm246_vm3, %v810_v3  ;;  %v1526_v1 = vsel %vm250_vm0, %v3315_v61, 0  ;;  %v3317_v3 = vld [vmem:[%s3981_s13 + $0x7b] ss:$2 sm:$0xff] }
  0x3b   : > { %3599 = vmatpush3.bf16.msra.mxu0 %v862_v4  ;;  %3605 = vmatpush3.bf16.msra.mxu1 %v916_v5  ;;  %v3321_v4 = vld [vmem:[%s3981_s13 + $0x7c] ss:$2 sm:$0xff]  ;;  %v3309_v5 = vsel %vm1460_vm10, 1.0, %v3891_v2  ;;  %v1571_v7 = vmul.f32 0.5, %v3317_v3  ;;  %s1896_s15 = scvt.s32.f32 %s3346_s6 }
  0x3c   : > { %3600 = vmatprep.mubr.msk.bf16.mxu0 %vm3892_vm1, %v3891_v2  ;;  %3606 = vmatprep.mubr.msk.bf16.mxu1 %vm3892_vm1, %v3891_v2  ;;  %v1626_v8 = vmul.f32 0.5, %v3321_v4  ;;  %v1463_v11 = vpack.c.bf16 %v3309_v5, %v3309_v5 }
  0x3d   : > { %3610 = vmatprep.subr.bf16.mxu0 %v3891_v2  ;;  %3616 = vmatprep.subr.bf16.mxu1 %v3891_v2  ;;  %vm1572_vm12 = vcmp.ge.f32.partialorder %v1571_v7, 1.0  ;;  %v3370_v7 = vld [vmem:[%s4562_s1 + $0xa] sm:$0x3] }
  0x3e   : > { %vm1627_vm13 = vcmp.ge.f32.partialorder %v1626_v8, 1.0  ;;  %v3375_v8 = vld [vmem:[%s4562_s1 + $0xc] sm:$0x3] }
  0x3f   : > { %v3322_v18 = vsel %vm1627_vm13, 1.0, %v3891_v2 }
  0x40   : > { %v1630_v24 = vpack.c.bf16 %v3322_v18, %v3322_v18 }
  0x42   : > { %3601 = vmatmul.mubr.msk.bf16.vlgmr.msra.gmra.mxu0 %vm246_vm3, %v802_v14  ;;  %3607 = vmatmul.mubr.msk.bf16.vlgmr.msra.gmra.mxu1 %vm246_vm3, %v910_v15  ;;  %v1636_v14 = vsel %vm250_vm0, %v3323_v10, 0  ;;  %v3326_v15 = vld [vmem:[%s3981_s13 + $0x92] ss:$2 sm:$0xff] }
  0x43   : > { %3611 = vmatpush3.bf16.msra.mxu0 %v973_v16  ;;  %3617 = vmatpush3.bf16.msra.mxu1 %v1028_v17  ;;  %v3330_v16 = vld [vmem:[%s3981_s13 + $0x93] ss:$2 sm:$0xff]  ;;  %v3318_v17 = vsel %vm1572_vm12, 1.0, %v3891_v2  ;;  %v1684_v19 = vmul.f32 0.5, %v3326_v15 }
  0x44   : > { %3612 = vmatprep.mubr.msk.bf16.mxu0 %vm3892_vm1, %v3891_v2  ;;  %3618 = vmatprep.mubr.msk.bf16.mxu1 %vm3892_vm1, %v3891_v2  ;;  %v1739_v20 = vmul.f32 0.5, %v3330_v16  ;;  %v1575_v23 = vpack.c.bf16 %v3318_v17, %v3318_v17 }
  0x45   : > { %3622 = vmatprep.subr.bf16.mxu0 %v3891_v2  ;;  %3628 = vmatprep.subr.bf16.mxu1 %v3891_v2  ;;  %vm1685_vm14 = vcmp.ge.f32.partialorder %v1684_v19, 1.0  ;;  %v3379_v19 = vld [vmem:[%s4562_s1 + $0xe] sm:$0x3] }
  0x46   : > { %vm1740_vm15 = vcmp.ge.f32.partialorder %v1739_v20, 1.0  ;;  %v3383_v20 = vld [vmem:[%s4562_s1 + $0x10] sm:$0x3] }
  0x47   : > { %v3331_v30 = vsel %vm1740_vm15, 1.0, %v3891_v2 }
  0x48   : > { %v1743_v36 = vpack.c.bf16 %v3331_v30, %v3331_v30 }
  0x4a   : > { %3613 = vmatmul.mubr.msk.bf16.vlgmr.msra.gmra.mxu0 %vm246_vm3, %v967_v26  ;;  %3619 = vmatmul.mubr.msk.bf16.vlgmr.msra.gmra.mxu1 %vm246_vm3, %v1022_v27  ;;  %v1749_v26 = vsel %vm250_vm0, %v3332_v22, 0  ;;  %v3334_v27 = vld [vmem:[%s3981_s13 + $0x94] ss:$2 sm:$0xff] }
  0x4b   : > { %3623 = vmatpush3.bf16.msra.mxu0 %v1083_v28  ;;  %3629 = vmatpush3.bf16.msra.mxu1 %v1141_v29  ;;  %v3350_v28 = vld [vmem:[%s3981_s13 + $0x93] ss:$2 sm:$0xff]  ;;  %v3327_v29 = vsel %vm1685_vm14, 1.0, %v3891_v2  ;;  %v1794_v31 = vmul.f32 0.5, %v3334_v27 }
  0x4c   : > { %3624 = vmatprep.mubr.msk.bf16.mxu0 %vm3892_vm1, %v3891_v2  ;;  %3630 = vmatprep.mubr.msk.bf16.mxu1 %vm3892_vm1, %v3891_v2  ;;  %v1912_v32 = vmul.f32 0.5, %v3350_v28  ;;  %v1688_v35 = vpack.c.bf16 %v3327_v29, %v3327_v29 }
  0x4d   : > { %3634 = vmatprep.subr.bf16.mxu0 %v3891_v2  ;;  %3640 = vmatprep.subr.bf16.mxu1 %v3891_v2  ;;  %vm1795_vm2 = vcmp.ge.f32.partialorder %v1794_v31, 1.0  ;;  %v3399_v31 = vld [vmem:[%s4562_s1 + $0x2] sm:$0x3] }
  0x4e   : > { %vm1913_vm4 = vcmp.ge.f32.partialorder %v1912_v32, 1.0  ;;  %v2462_v32 = vld [vmem:[%s4562_s1] sm:$0x3] }
  0x4f   : > { %v3351_v42 = vsel %vm1913_vm4, 1.0, %v3891_v2 }
  0x50   : > { %v1916_v48 = vpack.c.bf16 %v3351_v42, %v3351_v42 }
  0x52   : > { %3625 = vmatmul.mubr.msk.bf16.vlgmr.msra.gmra.mxu0 %vm246_vm3, %v1077_v38  ;;  %3631 = vmatmul.mubr.msk.bf16.vlgmr.msra.gmra.mxu1 %vm246_vm3, %v1135_v39  ;;  %v1922_v38 = vsel %vm250_vm0, %v3352_v34, 0  ;;  %v3348_v39 = vld [vmem:[%s3981_s13 + $0x92] ss:$2 sm:$0xff] }
  0x53   : > { %3635 = vmatpush3.bf16.msra.mxu0 %v1196_v40  ;;  %3641 = vmatpush3.bf16.msra.mxu1 %v1251_v41  ;;  %v3355_v40 = vld [vmem:[%s3981_s13 + $0x94] ss:$2 sm:$0xff]  ;;  %v3335_v41 = vsel %vm1795_vm2, 1.0, %v3891_v2  ;;  %v1904_v43 = vmul.f32 0.5, %v3348_v39 }
  0x54   : > { %3636 = vmatprep.mubr.msk.bf16.mxu0 %vm3892_vm1, %v3891_v2  ;;  %3642 = vmatprep.mubr.msk.bf16.mxu1 %vm3892_vm1, %v3891_v2  ;;  %v2012_v44 = vmul.f32 0.5, %v3355_v40  ;;  %v1798_v47 = vpack.c.bf16 %v3335_v41, %v3335_v41 }
  0x55   : > { %3646 = vmatprep.subr.bf16.mxu0 %v3891_v2  ;;  %3652 = vmatprep.subr.bf16.mxu1 %v3891_v2  ;;  %vm1905_vm5 = vcmp.ge.f32.partialorder %v1904_v43, 1.0  ;;  %v3404_v43 = vld [vmem:[%s4562_s1 + $0x4] sm:$0x3] }
  0x56   : > { %vm2013_vm6 = vcmp.ge.f32.partialorder %v2012_v44, 1.0  ;;  %v3349_v54 = vsel %vm1905_vm5, 1.0, %v3891_v2  ;;  %v3409_v44 = vld [vmem:[%s4562_s1 + $0x6] sm:$0x3] }
  0x57   : > { %v3356_v55 = vsel %vm2013_vm6, 1.0, %v3891_v2  ;;  %v1908_v60 = vpack.c.bf16 %v3349_v54, %v3349_v54 }
  0x58   : > { %v2016_v61 = vpack.c.bf16 %v3356_v55, %v3356_v55  ;;  %v3413_v55 = vld [vmem:[%s4562_s1 + $0x8] sm:$0x3] }
  0x5a   : > { %3637 = vmatmul.mubr.msk.bf16.vlgmr.msra.gmra.mxu0 %vm246_vm3, %v1190_v50  ;;  %3643 = vmatmul.mubr.msk.bf16.vlgmr.msra.gmra.mxu1 %vm246_vm3, %v1245_v51  ;;  %v2022_v50 = vsel %vm250_vm0, %v3357_v46, 0  ;;  %v3360_v51 = vld [vmem:[%s3981_s13 + $0xaa] ss:$2 sm:$0xff] }
  0x5b   : > { %3647 = vmatpush3.bf16.msra.mxu0 %v1369_v52  ;;  %3653 = vmatpush3.bf16.msra.mxu1 %v1415_v53  ;;  %v3364_v52 = vld [vmem:[%s3981_s13 + $0xab] ss:$2 sm:$0xff]  ;;  %v3893_v53 = vmov 0   ;;  %v2069_v56 = vmul.f32 0.5, %v3360_v51 }
  0x5c   : > { %3648 = vmatprep.mubr.msk.bf16.mxu0 %vm3892_vm1, %v3891_v2  ;;  %3654 = vmatprep.mubr.msk.bf16.mxu1 %vm3892_vm1, %v3891_v2  ;;  %204 = vst [vmem:[%s4264_s12] sm:$0xf] %v3893_v53  ;;  %205 = vst [vmem:[%s4264_s12 + $0x4] sm:$0x1] %v3893_v53  ;;  %v2124_v57 = vmul.f32 0.5, %v3364_v52 }
  0x5d   : > { %3658 = vmatprep.subr.bf16.mxu0 %v3891_v2  ;;  %3664 = vmatprep.subr.bf16.mxu1 %v3891_v2  ;;  %206 = vst [vmem:[%s4264_s12 + $0x8] sm:$0xf] %v3893_v53  ;;  %207 = vst [vmem:[%s4264_s12 + $0xc] sm:$0x1] %v3893_v53  ;;  %vm2070_vm7 = vcmp.ge.f32.partialorder %v2069_v56, 1.0 }
  0x5e   : > { %208 = vst [vmem:[%s4264_s12 + $0x10] sm:$0xf] %v3893_v53  ;;  %209 = vst [vmem:[%s4264_s12 + $0x14] sm:$0x1] %v3893_v53  ;;  %vm2125_vm8 = vcmp.ge.f32.partialorder %v2124_v57, 1.0  ;;  %v3361_v3 = vsel %vm2070_vm7, 1.0, %v3891_v2 }
  0x5f   : > { %210 = vst [vmem:[%s4264_s12 + $0x18] sm:$0xf] %v3893_v53  ;;  %211 = vst [vmem:[%s4264_s12 + $0x1c] sm:$0x1] %v3893_v53  ;;  %v3365_v4 = vsel %vm2125_vm8, 1.0, %v3891_v2  ;;  %v2073_v9 = vpack.c.bf16 %v3361_v3, %v3361_v3 }
  0x60   : > { %212 = vst [vmem:[%s4264_s12 + $0x20] sm:$0xf] %v3893_v53  ;;  %213 = vst [vmem:[%s4264_s12 + $0x24] sm:$0x1] %v3893_v53  ;;  %v2128_v10 = vpack.c.bf16 %v3365_v4, %v3365_v4  ;;  %v3417_v56 = vld [vmem:[%s4562_s1 + $0xa] sm:$0x3] }
  0x61   : > { %v3422_v4 = vld [vmem:[%s4562_s1 + $0xc] sm:$0x3] }
  0x62   : > { %3649 = vmatmul.mubr.msk.bf16.vlgmr.msra.gmra.mxu0 %vm246_vm3, %v1363_v62  ;;  %3655 = vmatmul.mubr.msk.bf16.vlgmr.msra.gmra.mxu1 %vm246_vm3, %v1355_v63  ;;  %v2079_v62 = vsel %vm250_vm0, %v3362_v58, 0  ;;  %v2134_v63 = vsel %vm250_vm0, %v3366_v59, 0  ;;  %v2687_v59 = vsel %vm250_vm0, %v3413_v55, 0 }
  0x63   : > { %3659 = vmatpush3.bf16.msra.mxu0 %v1469_v0  ;;  %3665 = vmatpush3.bf16.msra.mxu1 %v1526_v1  ;;  %v3368_v0 = vld [vmem:[%s3981_s13 + $0xac] ss:$2 sm:$0xff] }
  0x64   : > { %3660 = vmatprep.mubr.msk.bf16.mxu0 %vm3892_vm1, %v3891_v2  ;;  %3666 = vmatprep.mubr.msk.bf16.mxu1 %vm3892_vm1, %v3891_v2  ;;  %v3373_v1 = vld [vmem:[%s3981_s13 + $0xc2] ss:$2 sm:$0xff]  ;;  %v2179_v5 = vmul.f32 0.5, %v3368_v0 }
  0x65   : > { %3670 = vmatprep.subr.bf16.mxu0 %v3891_v2  ;;  %3676 = vmatprep.subr.bf16.mxu1 %v3891_v2  ;;  %v2237_v6 = vmul.f32 0.5, %v3373_v1 }
  0x66   : > { %vm2180_vm9 = vcmp.ge.f32.partialorder %v2179_v5, 1.0  ;;  %v3426_v5 = vld [vmem:[%s4562_s1 + $0xe] sm:$0x3] }
  0x67   : > { %vm2238_vm10 = vcmp.ge.f32.partialorder %v2237_v6, 1.0  ;;  %v3369_v15 = vsel %vm2180_vm9, 1.0, %v3891_v2  ;;  %vm779_vm9 = vcmask 1040384  }
  0x68   : > { %v3374_v16 = vsel %vm2238_vm10, 1.0, %v3891_v2  ;;  %v2183_v21 = vpack.c.bf16 %v3369_v15, %v3369_v15  ;;  %vm780_vm10 = vsmask.f32 256 }
  0x69   : > { %v2241_v22 = vpack.c.bf16 %v3374_v16, %v3374_v16 }
  0x6a   : > { %3661 = vmatmul.mubr.msk.bf16.vlgmr.msra.gmra.mxu0 %vm246_vm3, %v1463_v11  ;;  %3667 = vmatmul.mubr.msk.bf16.vlgmr.msra.gmra.mxu1 %vm246_vm3, %v1520_v12  ;;  %v2189_v11 = vsel %vm250_vm0, %v3370_v7, 0  ;;  %v2247_v12 = vsel %vm250_vm0, %v3375_v8, 0  ;;  %v2800_v8 = vsel %vm250_vm0, %v3422_v4, 0  ;;  %v753_v4 = vstv %s221_s8 }
  0x6b   : > { %3671 = vmatpush3.bf16.msra.mxu0 %v1581_v13  ;;  %3677 = vmatpush3.bf16.msra.mxu1 %v1636_v14  ;;  %v3377_v13 = vld [vmem:[%s3981_s13 + $0xc3] ss:$2 sm:$0xff]  ;;  %v3381_v14 = vld [vmem:[%s3981_s13 + $0xc4] ss:$2 sm:$0xff] }
  0x6c   : > { %3672 = vmatprep.mubr.msk.bf16.mxu0 %vm3892_vm1, %v3891_v2  ;;  %3678 = vmatprep.mubr.msk.bf16.mxu1 %vm3892_vm1, %v3891_v2  ;;  %v2292_v17 = vmul.f32 0.5, %v3377_v13  ;;  %v2347_v18 = vmul.f32 0.5, %v3381_v14  ;;  %v3430_v14 = vld [vmem:[%s4562_s1 + $0x10] sm:$0x3] }
  0x6d   : > { %3682 = vmatprep.subr.bf16.mxu0 %v3891_v2  ;;  %3688 = vmatprep.subr.bf16.mxu1 %v3891_v2 }
  0x6e   : > { %vm2293_vm11 = vcmp.ge.f32.partialorder %v2292_v17, 1.0  ;;  %vm2348_vm12 = vcmp.ge.f32.partialorder %v2347_v18, 1.0  ;;  %v2910_v17 = vsel %vm250_vm0, %v3430_v14, 0 }
  0x6f   : > { %v3378_v27 = vsel %vm2293_vm11, 1.0, %v3891_v2  ;;  %v3382_v28 = vsel %vm2348_vm12, 1.0, %v3891_v2  ;;  %vm4456_vm12 = vmand %vm779_vm9, %vm780_vm10 }
  0x70   : > { %v2296_v33 = vpack.c.bf16 %v3378_v27, %v3378_v27  ;;  %v2351_v34 = vpack.c.bf16 %v3382_v28, %v3382_v28 }
  0x72   : > { %3673 = vmatmul.mubr.msk.bf16.vlgmr.msra.gmra.mxu0 %vm246_vm3, %v1575_v23  ;;  %3679 = vmatmul.mubr.msk.bf16.vlgmr.msra.gmra.mxu1 %vm246_vm3, %v1630_v24  ;;  %v2302_v23 = vsel %vm250_vm0, %v3379_v19, 0  ;;  %v2357_v24 = vsel %vm250_vm0, %v3383_v20, 0 }
  0x73   : > { %3683 = vmatpush3.bf16.msra.mxu0 %v1694_v25  ;;  %3689 = vmatpush3.bf16.msra.mxu1 %v1749_v26  ;;  %v3397_v25 = vld [vmem:[%s3981_s13 + $0xc3] ss:$2 sm:$0xff]  ;;  %v3395_v26 = vld [vmem:[%s3981_s13 + $0xc2] ss:$2 sm:$0xff] }
  0x74   : > { %3684 = vmatprep.mubr.msk.bf16.mxu0 %vm3892_vm1, %v3891_v2  ;;  %3690 = vmatprep.mubr.msk.bf16.mxu1 %vm3892_vm1, %v3891_v2  ;;  %v2465_v29 = vmul.f32 0.5, %v3397_v25  ;;  %v2457_v30 = vmul.f32 0.5, %v3395_v26 }
  0x75   : > { %3694 = vmatprep.subr.bf16.mxu0 %v3891_v2  ;;  %3700 = vmatprep.subr.bf16.mxu1 %v3891_v2 }
  0x76   : > { %vm2466_vm13 = vcmp.ge.f32.partialorder %v2465_v29, 1.0  ;;  %vm2458_vm14 = vcmp.ge.f32.partialorder %v2457_v30, 1.0 }
  0x77   : > { %v3398_v39 = vsel %vm2466_vm13, 1.0, %v3891_v2  ;;  %v3396_v40 = vsel %vm2458_vm14, 1.0, %v3891_v2 }
  0x78   : > { %v2469_v45 = vpack.c.bf16 %v3398_v39, %v3398_v39  ;;  %v2461_v46 = vpack.c.bf16 %v3396_v40, %v3396_v40 }
  0x7a   : > { %3685 = vmatmul.mubr.msk.bf16.vlgmr.msra.gmra.mxu0 %vm246_vm3, %v1688_v35  ;;  %3691 = vmatmul.mubr.msk.bf16.vlgmr.msra.gmra.mxu1 %vm246_vm3, %v1743_v36  ;;  %v2475_v35 = vsel %vm250_vm0, %v3399_v31, 0  ;;  %v2521_v36 = vsel %vm250_vm0, %v2462_v32, 0 }
  0x7b   : > { %3695 = vmatpush3.bf16.msra.mxu0 %v1804_v37  ;;  %3701 = vmatpush3.bf16.msra.mxu1 %v1922_v38  ;;  %v3402_v37 = vld [vmem:[%s3981_s13 + $0xc4] ss:$2 sm:$0xff] }
  0x7c   : > { %3696 = vmatprep.mubr.msk.bf16.mxu0 %vm3892_vm1, %v3891_v2  ;;  %3702 = vmatprep.mubr.msk.bf16.mxu1 %vm3892_vm1, %v3891_v2  ;;  %v3407_v38 = vld [vmem:[%s3981_s13 + $0xda] ss:$2 sm:$0xff]  ;;  %v2565_v41 = vmul.f32 0.5, %v3402_v37 }
  0x7d   : > { %3706 = vmatprep.subr.bf16.mxu0 %v3891_v2  ;;  %3712 = vmatprep.subr.bf16.mxu1 %v3891_v2  ;;  %v2622_v42 = vmul.f32 0.5, %v3407_v38 }
  0x7e   : > { %vm2566_vm15 = vcmp.ge.f32.partialorder %v2565_v41, 1.0 }
  0x7f   : > { %vm2623_vm2 = vcmp.ge.f32.partialorder %v2622_v42, 1.0  ;;  %v3403_v51 = vsel %vm2566_vm15, 1.0, %v3891_v2 }
  0x80   : > { %v3408_v52 = vsel %vm2623_vm2, 1.0, %v3891_v2  ;;  %v2569_v57 = vpack.c.bf16 %v3403_v51, %v3403_v51 }
  0x81   : > { %v2626_v58 = vpack.c.bf16 %v3408_v52, %v3408_v52 }
  0x82   : > { %3697 = vmatmul.mubr.msk.bf16.vlgmr.msra.gmra.mxu0 %vm246_vm3, %v1798_v47  ;;  %3703 = vmatmul.mubr.msk.bf16.vlgmr.msra.gmra.mxu1 %vm246_vm3, %v1916_v48  ;;  %v2575_v47 = vsel %vm250_vm0, %v3404_v43, 0  ;;  %v2632_v48 = vsel %vm250_vm0, %v3409_v44, 0 }
  0x83   : > { %3707 = vmatpush3.bf16.msra.mxu0 %v1968_v49  ;;  %3713 = vmatpush3.bf16.msra.mxu1 %v2022_v50  ;;  %v3411_v49 = vld [vmem:[%s3981_s13 + $0xdb] ss:$2 sm:$0xff]  ;;  %v3415_v50 = vld [vmem:[%s3981_s13 + $0xdc] ss:$2 sm:$0xff] }
  0x84   : > { %3708 = vmatprep.mubr.msk.bf16.mxu0 %vm3892_vm1, %v3891_v2  ;;  %3714 = vmatprep.mubr.msk.bf16.mxu1 %vm3892_vm1, %v3891_v2  ;;  %v2677_v53 = vmul.f32 0.5, %v3411_v49  ;;  %v2732_v54 = vmul.f32 0.5, %v3415_v50 }
  0x85   : > { %3718 = vmatprep.subr.bf16.mxu0 %v3891_v2  ;;  %3724 = vmatprep.subr.bf16.mxu1 %v3891_v2 }
  0x86   : > { %vm2678_vm4 = vcmp.ge.f32.partialorder %v2677_v53, 1.0  ;;  %vm2733_vm5 = vcmp.ge.f32.partialorder %v2732_v54, 1.0 }
  0x87   : > { %v3416_v0 = vsel %vm2733_vm5, 1.0, %v3891_v2 }
  0x88   : > { %v2736_v7 = vpack.c.bf16 %v3416_v0, %v3416_v0 }
  0x8a   : > { %3709 = vmatmul.mubr.msk.bf16.vlgmr.msra.gmra.mxu0 %vm246_vm3, %v1908_v60  ;;  %3715 = vmatmul.mubr.msk.bf16.vlgmr.msra.gmra.mxu1 %vm246_vm3, %v2016_v61  ;;  %v2742_v60 = vsel %vm250_vm0, %v3417_v56, 0  ;;  %v3420_v61 = vld [vmem:[%s3981_s13 + $0xf2] ss:$2 sm:$0xff] }
  0x8b   : > { %3719 = vmatpush3.bf16.msra.mxu0 %v2079_v62  ;;  %3725 = vmatpush3.bf16.msra.mxu1 %v2134_v63  ;;  %v3424_v62 = vld [vmem:[%s3981_s13 + $0xf3] ss:$2 sm:$0xff]  ;;  %v3412_v63 = vsel %vm2678_vm4, 1.0, %v3891_v2  ;;  %v2790_v1 = vmul.f32 0.5, %v3420_v61 }
  0x8c   : > { %3720 = vmatprep.mubr.msk.bf16.mxu0 %vm3892_vm1, %v3891_v2  ;;  %3726 = vmatprep.mubr.msk.bf16.mxu1 %vm3892_vm1, %v3891_v2  ;;  %v2845_v3 = vmul.f32 0.5, %v3424_v62  ;;  %v2681_v6 = vpack.c.bf16 %v3412_v63, %v3412_v63  ;;  %v4446_v63 = vld [vmem:[%s4564_s3] ss:$0 sm:$0xff] }
  0x8d   : > { %3730 = vmatprep.subr.bf16.mxu0 %v3891_v2  ;;  %3736 = vmatprep.subr.bf16.mxu1 %v3891_v2  ;;  %vm2791_vm6 = vcmp.ge.f32.partialorder %v2790_v1, 1.0 }
  0x8e   : > { %vm2846_vm7 = vcmp.ge.f32.partialorder %v2845_v3, 1.0 }
  0x92   : > { %3721 = vmatmul.mubr.msk.bf16.vlgmr.msra.gmra.mxu0 %vm246_vm3, %v2073_v9  ;;  %3727 = vmatmul.mubr.msk.bf16.vlgmr.msra.gmra.mxu1 %vm246_vm3, %v2128_v10  ;;  %v2855_v9 = vsel %vm250_vm0, %v3426_v5, 0  ;;  %v3428_v10 = vld [vmem:[%s3981_s13 + $0xf4] ss:$2 sm:$0xff]  ;;  %s2443_s13 = sadd.s32 3, %s3964_s26 }
  0x93   : > { %3731 = vmatpush3.bf16.msra.mxu0 %v2189_v11  ;;  %3737 = vmatpush3.bf16.msra.mxu1 %v2247_v12  ;;  %v3421_v11 = vsel %vm2791_vm6, 1.0, %v3891_v2  ;;  %v3425_v12 = vsel %vm2846_vm7, 1.0, %v3891_v2  ;;  %v2900_v13 = vmul.f32 0.5, %v3428_v10  ;;  %p4523_p4 = scmp.ge.s32.totalorder %s2443_s13, 0  ;;  %p4527_p5 = scmp.lt.s32.totalorder %s2443_s13, 8 }
  0x94   : > { %3732 = vmatprep.mubr.msk.bf16.mxu0 %vm3892_vm1, %v3891_v2  ;;  %3738 = vmatprep.mubr.msk.bf16.mxu1 %vm3892_vm1, %v3891_v2  ;;  %v2794_v15 = vpack.c.bf16 %v3421_v11, %v3421_v11  ;;  %v2849_v16 = vpack.c.bf16 %v3425_v12, %v3425_v12 }
  0x95   : > { %3742 = vmatprep.subr.bf16.mxu0 %v3891_v2  ;;  %3748 = vmatprep.subr.bf16.mxu1 %v3891_v2  ;;  %vm2901_vm8 = vcmp.ge.f32.partialorder %v2900_v13, 1.0  ;;  %p2446_p6 = pnand %p4527_p5, %p4523_p4 }
  0x96   : > { %v3429_v18 = vsel %vm2901_vm8, 1.0, %v3891_v2 }
  0x97   : > { %v2904_v19 = vpack.c.bf16 %v3429_v18, %v3429_v18  ;;  %s3393_s26 = scalar_select %p2446_p6, 0, 1 }
  0x99   : > { %s2449_s8 = scvt.s32.f32 %s3393_s26 }
  0x9a   : > { %3733 = vmatmul.mubr.msk.bf16.vlgmr.msra.gmra.mxu0 %vm246_vm3, %v2183_v21  ;;  %3739 = vmatmul.mubr.msk.bf16.vlgmr.msra.gmra.mxu1 %vm246_vm3, %v2241_v22 }
  0x9b   : > { %3743 = vmatpush3.bf16.msra.mxu0 %v2302_v23  ;;  %3749 = vmatpush3.bf16.msra.mxu1 %v2357_v24 }
  0x9c   : > { %3744 = vmatprep.mubr.msk.bf16.mxu0 %vm3892_vm1, %v3891_v2  ;;  %3750 = vmatprep.mubr.msk.bf16.mxu1 %vm3892_vm1, %v3891_v2 }
  0x9d   : > { %3754 = vmatprep.subr.bf16.mxu0 %v3891_v2  ;;  %3760 = vmatprep.subr.bf16.mxu1 %v3891_v2 }
  0xa2   : > { %3745 = vmatmul.mubr.msk.bf16.vlgmr.msra.gmra.mxu0 %vm246_vm3, %v2296_v33  ;;  %3751 = vmatmul.mubr.msk.bf16.vlgmr.msra.gmra.mxu1 %vm246_vm3, %v2351_v34 }
  0xa3   : > { %3755 = vmatpush3.bf16.msra.mxu0 %v2475_v35  ;;  %3761 = vmatpush3.bf16.msra.mxu1 %v2521_v36 }
  0xa4   : > { %3756 = vmatprep.mubr.msk.bf16.mxu0 %vm3892_vm1, %v3891_v2  ;;  %3762 = vmatprep.mubr.msk.bf16.mxu1 %vm3892_vm1, %v3891_v2 }
  0xa5   : > { %3766 = vmatprep.subr.bf16.mxu0 %v3891_v2  ;;  %3772 = vmatprep.subr.bf16.mxu1 %v3891_v2 }
  0xaa   : > { %3757 = vmatmul.mubr.msk.bf16.vlgmr.msra.gmra.mxu0 %vm246_vm3, %v2469_v45  ;;  %3763 = vmatmul.mubr.msk.bf16.vlgmr.msra.gmra.mxu1 %vm246_vm3, %v2461_v46 }
  0xab   : > { %3767 = vmatpush3.bf16.msra.mxu0 %v2575_v47  ;;  %3773 = vmatpush3.bf16.msra.mxu1 %v2632_v48 }
  0xac   : > { %3768 = vmatprep.mubr.msk.bf16.mxu0 %vm3892_vm1, %v3891_v2  ;;  %3774 = vmatprep.mubr.msk.bf16.mxu1 %vm3892_vm1, %v3891_v2 }
  0xad   : > { %3778 = vmatprep.subr.bf16.mxu0 %v3891_v2  ;;  %3784 = vmatprep.subr.bf16.mxu1 %v3891_v2 }
  0xb2   : > { %3769 = vmatmul.mubr.msk.bf16.vlgmr.msra.gmra.mxu0 %vm246_vm3, %v2569_v57  ;;  %3775 = vmatmul.mubr.msk.bf16.vlgmr.msra.gmra.mxu1 %vm246_vm3, %v2626_v58 }
  0xb3   : > { %3779 = vmatpush3.bf16.msra.mxu0 %v2687_v59  ;;  %3785 = vmatpush3.bf16.msra.mxu1 %v2742_v60  ;;  %v4441_v60 = vld [vmem:[%s4563_s2] ss:$0 sm:$0xff] }
  0xb4   : > { %3780 = vmatprep.mubr.msk.bf16.mxu0 %vm3892_vm1, %v3891_v2  ;;  %3786 = vmatprep.mubr.msk.bf16.mxu1 %vm3892_vm1, %v3891_v2 }
  0xb5   : > { %3790 = vmatprep.subr.bf16.mxu0 %v3891_v2  ;;  %3796 = vmatprep.subr.bf16.mxu1 %v3891_v2 }
  0xba   : > { %3781 = vmatmul.mubr.msk.bf16.vlgmr.msra.gmra.mxu0 %vm246_vm3, %v2681_v6  ;;  %3787 = vmatmul.mubr.msk.bf16.vlgmr.msra.gmra.mxu1 %vm246_vm3, %v2736_v7 }
  0xbb   : > { %3791 = vmatpush3.bf16.msra.mxu0 %v2800_v8  ;;  %3797 = vmatpush3.bf16.msra.mxu1 %v2855_v9 }
  0xbc   : > { %3792 = vmatprep.mubr.msk.bf16.mxu0 %vm3892_vm1, %v3891_v2  ;;  %3798 = vmatprep.mubr.msk.bf16.mxu1 %vm3892_vm1, %v3891_v2 }
  0xbd   : > { %3802 = vmatprep.subr.bf16.mxu0 %v3891_v2 }
  0xc2   : > { %3793 = vmatmul.mubr.msk.bf16.vlgmr.msra.gmra.mxu0 %vm246_vm3, %v2794_v15  ;;  %3799 = vmatmul.mubr.msk.bf16.vlgmr.msra.gmra.mxu1 %vm246_vm3, %v2849_v16 }
  0xc3   : > { %3803 = vmatpush3.bf16.msra.mxu0 %v2910_v17  ;;  %3804 = vmatprep.mubr.msk.bf16.mxu0 %vm3892_vm1, %v3891_v2  ;;  %vm773_vm1 = vcmask 1043456  }
  0xca   : > { %3805 = vmatmul.mubr.msk.bf16.vlgmr.msra.gmra.mxu0 %vm246_vm3, %v2904_v19  ;;  %vm774_vm3 = vsmask.f32 7938 }
  0xcb   : > { %vm4451_vm11 = vmand %vm773_vm1, %vm774_vm3 }
  0xda   : > { %v288_v20 = vpop.f32.mrf.mxu0  ;;  %v334_v21 = vpop.f32.mrf.mxu1 }
  0xdb   : > { %v335_v34 = vadd.f32 %v334_v21, %v288_v20 }
  0xdc   : > { %v3542_v22 = vpop.f32.mrf.mxu0  ;;  %v3548_v23 = vpop.f32.mrf.mxu1 }
  0xde   : > { %v291_v24 = vpop.f32.mrf.mxu0  ;;  %v337_v25 = vpop.f32.mrf.mxu1 }
  0xe0   : > { %v3543_v26 = vpop.f32.mrf.mxu0  ;;  %v3549_v27 = vpop.f32.mrf.mxu1 }
  0xe2   : > { %v389_v28 = vpop.f32.mrf.mxu0  ;;  %v447_v29 = vpop.f32.mrf.mxu1 }
  0xe3   : > { %v395_v37 = vadd.f32 %v389_v28, %v335_v34 }
  0xe4   : > { %v3554_v30 = vpop.f32.mrf.mxu0  ;;  %v3560_v31 = vpop.f32.mrf.mxu1 }
  0xe5   : > { %v453_v42 = vadd.f32 %v447_v29, %v395_v37  ;;  %v776_v29 = vld [vmem:[%s4264_s12] sm:$0xf]  ;;  %v782_v31 = vld [vmem:[%s4264_s12 + $0x4] sm:$0x1] }
  0xe6   : > { %v392_v32 = vpop.f32.mrf.mxu0  ;;  %v450_v33 = vpop.f32.mrf.mxu1 }
  0xe8   : > { %v3555_v35 = vpop.f32.mrf.mxu0  ;;  %v3561_v36 = vpop.f32.mrf.mxu1 }
  0xea   : > { %v503_v38 = vpop.f32.mrf.mxu0  ;;  %v559_v39 = vpop.f32.mrf.mxu1 }
  0xeb   : > { %v509_v45 = vadd.f32 %v503_v38, %v453_v42 }
  0xec   : > { %v3566_v40 = vpop.f32.mrf.mxu0  ;;  %v3572_v41 = vpop.f32.mrf.mxu1 }
  0xed   : > { %v565_v50 = vadd.f32 %v559_v39, %v509_v45 }
  0xee   : > { %v506_v43 = vpop.f32.mrf.mxu0  ;;  %v562_v44 = vpop.f32.mrf.mxu1 }
  0xf0   : > { %v3567_v46 = vpop.f32.mrf.mxu0  ;;  %v3573_v47 = vpop.f32.mrf.mxu1 }
  0xf2   : > { %v618_v48 = vpop.f32.mrf.mxu0  ;;  %v674_v49 = vpop.f32.mrf.mxu1 }
  0xf3   : > { %v624_v53 = vadd.f32 %v618_v48, %v565_v50 }
  0xf4   : > { %v3578_v51 = vpop.f32.mrf.mxu0  ;;  %v3584_v52 = vpop.f32.mrf.mxu1 }
  0xf5   : > { %v680_v58 = vadd.f32 %v674_v49, %v624_v53 }
  0xf6   : > { %v621_v54 = vpop.f32.mrf.mxu0  ;;  %v677_v55 = vpop.f32.mrf.mxu1 }
  0xf8   : > { %v3579_v56 = vpop.f32.mrf.mxu0  ;;  %v3585_v57 = vpop.f32.mrf.mxu1 }
  0xfa   : > { %v730_v59 = vpop.f32.mrf.mxu0  ;;  %v852_v61 = vpop.f32.mrf.mxu1 }
  0xfb   : > { %v736_v62 = vadd.f32 %v730_v59, %v680_v58 }
  0xfc   : > { %v3590_v0 = vpop.f32.mrf.mxu0  ;;  %v3596_v1 = vpop.f32.mrf.mxu1 }
  0xfd   : > { %v744_v3 = vmul.f32 %v4441_v60, %v736_v62 }
  0xfe   : > { %v733_v5 = vpop.f32.mrf.mxu0  ;;  %v855_v6 = vpop.f32.mrf.mxu1 }
  0xff   : > { %v752_v7 = vadd.f32 %v4446_v63, %v744_v3  ;;  %v1310_v3 = vstv %s790_s22 }
 0x100   : > { %v3591_v8 = vpop.f32.mrf.mxu0  ;;  %v3597_v9 = vpop.f32.mrf.mxu1 }
 0x101   : > { %v754_v10 = vmul.f32 %v753_v4, %v752_v7 }
 0x102   : > { %v898_v11 = vpop.f32.mrf.mxu0  ;;  %v952_v12 = vpop.f32.mrf.mxu1 }
 0x103   : > { %v755_v13 = vmul.f32 0.5, %v754_v10  ;;  %v899_v23 = vadd.f32 %v898_v11, %v852_v61 }
 0x104   : > { %v3602_v14 = vpop.f32.mrf.mxu0  ;;  %v3608_v15 = vpop.f32.mrf.mxu1 }
 0x105   : > { %vm756_vm0 = vcmp.ge.f32.partialorder %v755_v13, 1.0  ;;  %v958_v36 = vadd.f32 %v952_v12, %v899_v23 }
 0x106   : > { %v3253_v16 = vsel %vm756_vm0, 1.0, %v3891_v2  ;;  %v901_v17 = vpop.f32.mrf.mxu0  ;;  %v955_v18 = vpop.f32.mrf.mxu1 }
 0x107   : > { %v3443_v19 = vpack.c.bf16 %v3253_v16, %v3253_v16 }
 0x108   : > { %v3603_v20 = vpop.f32.mrf.mxu0  ;;  %v3609_v21 = vpop.f32.mrf.mxu1 }
 0x109   : > { %v764_v22 = vshrl.u32 %v3443_v19, 16  ;;  %v767_v27 = vshll.u32 %v3443_v19, 16 }
 0x10a   : > { %v1009_v24 = vpop.f32.mrf.mxu0  ;;  %v1064_v25 = vpop.f32.mrf.mxu1 }
 0x10b   : > { %v766_v26 = vrot.slane %v764_v22, 7  ;;  %v1015_v41 = vadd.f32 %v1009_v24, %v958_v36 }
 0x10c   : > { %v3614_v32 = vpop.f32.mrf.mxu0  ;;  %v3620_v33 = vpop.f32.mrf.mxu1 }
 0x10d   : > { %v769_v34 = vor.u32 %v767_v27, %v766_v26  ;;  %v770_v35 = vrot.slane %v766_v26, 4  ;;  %v1070_v46 = vadd.f32 %v1064_v25, %v1015_v41  ;;  %v3295_v26 = vld [vmem:[%s4264_s12 + $0x8] sm:$0xf]  ;;  %v3297_v27 = vld [vmem:[%s4264_s12 + $0xc] sm:$0x1] }
 0x10e   : > { %v1012_v37 = vpop.f32.mrf.mxu0  ;;  %v1067_v38 = vpop.f32.mrf.mxu1 }
 0x10f   : > { %v777_v39 = vsel %vm4451_vm11, %v769_v34, %v776_v29  ;;  %v783_v40 = vsel %vm4456_vm12, %v770_v35, %v782_v31 }
 0x110   : > { %778 = vst [vmem:[%s4264_s12] sm:$0xf] %v777_v39  ;;  %784 = vst [vmem:[%s4264_s12 + $0x4] sm:$0x1] %v783_v40  ;;  %v3615_v42 = vpop.f32.mrf.mxu0  ;;  %v3621_v43 = vpop.f32.mrf.mxu1 }
 0x112   : > { %v1119_v44 = vpop.f32.mrf.mxu0  ;;  %v1177_v45 = vpop.f32.mrf.mxu1 }
 0x113   : > { %v1125_v49 = vadd.f32 %v1119_v44, %v1070_v46 }
 0x114   : > { %v3626_v47 = vpop.f32.mrf.mxu0  ;;  %v3632_v48 = vpop.f32.mrf.mxu1 }
 0x115   : > { %v1183_v54 = vadd.f32 %v1177_v45, %v1125_v49 }
 0x116   : > { %v1122_v50 = vpop.f32.mrf.mxu0  ;;  %v1180_v51 = vpop.f32.mrf.mxu1 }
 0x118   : > { %v3627_v52 = vpop.f32.mrf.mxu0  ;;  %v3633_v53 = vpop.f32.mrf.mxu1 }
 0x11a   : > { %v1232_v55 = vpop.f32.mrf.mxu0  ;;  %v1287_v56 = vpop.f32.mrf.mxu1 }
 0x11b   : > { %v1238_v57 = vadd.f32 %v1232_v55, %v1183_v54 }
 0x11c   : > { %v3638_v58 = vpop.f32.mrf.mxu0  ;;  %v3644_v59 = vpop.f32.mrf.mxu1 }
 0x11d   : > { %v1293_v61 = vadd.f32 %v1287_v56, %v1238_v57 }
 0x11e   : > { %v1235_v62 = vpop.f32.mrf.mxu0  ;;  %v1290_v0 = vpop.f32.mrf.mxu1 }
 0x11f   : > { %v1301_v1 = vmul.f32 %v4441_v60, %v1293_v61 }
 0x120   : > { %v3639_v4 = vpop.f32.mrf.mxu0  ;;  %v3645_v5 = vpop.f32.mrf.mxu1 }
 0x121   : > { %v1309_v6 = vadd.f32 %v4446_v63, %v1301_v1 }
 0x122   : > { %v1405_v7 = vpop.f32.mrf.mxu0  ;;  %v1451_v8 = vpop.f32.mrf.mxu1 }
 0x123   : > { %v1311_v9 = vmul.f32 %v1310_v3, %v1309_v6  ;;  %v1452_v34 = vadd.f32 %v1451_v8, %v1405_v7  ;;  %v1863_v6 = vstv %s1343_s29 }
 0x124   : > { %v3650_v10 = vpop.f32.mrf.mxu0  ;;  %v3656_v11 = vpop.f32.mrf.mxu1 }
 0x125   : > { %v1312_v12 = vmul.f32 0.5, %v1311_v9 }
 0x126   : > { %v1408_v13 = vpop.f32.mrf.mxu0  ;;  %v1454_v14 = vpop.f32.mrf.mxu1 }
 0x127   : > { %vm1313_vm13 = vcmp.ge.f32.partialorder %v1312_v12, 1.0 }
 0x128   : > { %v3293_v15 = vsel %vm1313_vm13, 1.0, %v3891_v2  ;;  %v3651_v16 = vpop.f32.mrf.mxu0  ;;  %v3657_v17 = vpop.f32.mrf.mxu1 }
 0x129   : > { %v3444_v18 = vpack.c.bf16 %v3293_v15, %v3293_v15 }
 0x12a   : > { %v1505_v19 = vpop.f32.mrf.mxu0  ;;  %v1562_v20 = vpop.f32.mrf.mxu1 }
 0x12b   : > { %v1321_v21 = vshrl.u32 %v3444_v18, 16  ;;  %v1324_v25 = vshll.u32 %v3444_v18, 16  ;;  %v1511_v39 = vadd.f32 %v1505_v19, %v1452_v34 }
 0x12c   : > { %v3662_v22 = vpop.f32.mrf.mxu0  ;;  %v3668_v23 = vpop.f32.mrf.mxu1 }
 0x12d   : > { %v1323_v24 = vrot.slane %v1321_v21, 7  ;;  %v1568_v44 = vadd.f32 %v1562_v20, %v1511_v39 }
 0x12e   : > { %v1508_v29 = vpop.f32.mrf.mxu0  ;;  %v1565_v31 = vpop.f32.mrf.mxu1 }
 0x12f   : > { %v1326_v32 = vor.u32 %v1324_v25, %v1323_v24  ;;  %v1327_v33 = vrot.slane %v1323_v24, 4 }
 0x130   : > { %v3663_v35 = vpop.f32.mrf.mxu0  ;;  %v3669_v36 = vpop.f32.mrf.mxu1 }
 0x131   : > { %v1332_v37 = vsel %vm4451_vm11, %v1326_v32, %v3295_v26  ;;  %v1335_v38 = vsel %vm4456_vm12, %v1327_v33, %v3297_v27  ;;  %v3342_v32 = vld [vmem:[%s4264_s12 + $0x10] sm:$0xf]  ;;  %v3344_v33 = vld [vmem:[%s4264_s12 + $0x14] sm:$0x1] }
 0x132   : > { %3296 = vst [vmem:[%s4264_s12 + $0x8] sm:$0xf] %v1332_v37  ;;  %3298 = vst [vmem:[%s4264_s12 + $0xc] sm:$0x1] %v1335_v38  ;;  %v1617_v40 = vpop.f32.mrf.mxu0  ;;  %v1672_v41 = vpop.f32.mrf.mxu1 }
 0x133   : > { %v1623_v47 = vadd.f32 %v1617_v40, %v1568_v44 }
 0x134   : > { %v3674_v42 = vpop.f32.mrf.mxu0  ;;  %v3680_v43 = vpop.f32.mrf.mxu1 }
 0x135   : > { %v1678_v52 = vadd.f32 %v1672_v41, %v1623_v47 }
 0x136   : > { %v1620_v45 = vpop.f32.mrf.mxu0  ;;  %v1675_v46 = vpop.f32.mrf.mxu1 }
 0x138   : > { %v3675_v48 = vpop.f32.mrf.mxu0  ;;  %v3681_v49 = vpop.f32.mrf.mxu1 }
 0x13a   : > { %v1730_v50 = vpop.f32.mrf.mxu0  ;;  %v1785_v51 = vpop.f32.mrf.mxu1 }
 0x13b   : > { %v1736_v55 = vadd.f32 %v1730_v50, %v1678_v52 }
 0x13c   : > { %v3686_v53 = vpop.f32.mrf.mxu0  ;;  %v3692_v54 = vpop.f32.mrf.mxu1 }
 0x13d   : > { %v1791_v61 = vadd.f32 %v1785_v51, %v1736_v55 }
 0x13e   : > { %v1733_v56 = vpop.f32.mrf.mxu0  ;;  %v1788_v57 = vpop.f32.mrf.mxu1 }
 0x140   : > { %v3687_v58 = vpop.f32.mrf.mxu0  ;;  %v3693_v59 = vpop.f32.mrf.mxu1 }
 0x142   : > { %v1840_v62 = vpop.f32.mrf.mxu0  ;;  %v1958_v0 = vpop.f32.mrf.mxu1 }
 0x143   : > { %v1846_v1 = vadd.f32 %v1840_v62, %v1791_v61 }
 0x144   : > { %v3698_v3 = vpop.f32.mrf.mxu0  ;;  %v3704_v4 = vpop.f32.mrf.mxu1 }
 0x145   : > { %v1854_v5 = vmul.f32 %v4441_v60, %v1846_v1 }
 0x146   : > { %v1843_v7 = vpop.f32.mrf.mxu0  ;;  %v1961_v8 = vpop.f32.mrf.mxu1 }
 0x147   : > { %v1862_v9 = vadd.f32 %v4446_v63, %v1854_v5  ;;  %v2416_v5 = vstv %s1896_s15 }
 0x148   : > { %v3699_v10 = vpop.f32.mrf.mxu0  ;;  %v3705_v11 = vpop.f32.mrf.mxu1 }
 0x149   : > { %v1864_v12 = vmul.f32 %v1863_v6, %v1862_v9 }
 0x14a   : > { %v2004_v13 = vpop.f32.mrf.mxu0  ;;  %v2058_v14 = vpop.f32.mrf.mxu1 }
 0x14b   : > { %v1865_v15 = vmul.f32 0.5, %v1864_v12  ;;  %v2005_v25 = vadd.f32 %v2004_v13, %v1958_v0 }
 0x14c   : > { %v3710_v16 = vpop.f32.mrf.mxu0  ;;  %v3716_v17 = vpop.f32.mrf.mxu1 }
 0x14d   : > { %vm1866_vm14 = vcmp.ge.f32.partialorder %v1865_v15, 1.0  ;;  %v2064_v38 = vadd.f32 %v2058_v14, %v2005_v25 }
 0x14e   : > { %v3340_v18 = vsel %vm1866_vm14, 1.0, %v3891_v2  ;;  %v2007_v19 = vpop.f32.mrf.mxu0  ;;  %v2061_v20 = vpop.f32.mrf.mxu1 }
 0x14f   : > { %v3445_v21 = vpack.c.bf16 %v3340_v18, %v3340_v18 }
 0x150   : > { %v3711_v22 = vpop.f32.mrf.mxu0  ;;  %v3717_v23 = vpop.f32.mrf.mxu1 }
 0x151   : > { %v1874_v24 = vshrl.u32 %v3445_v21, 16  ;;  %v1877_v31 = vshll.u32 %v3445_v21, 16 }
 0x152   : > { %v2115_v26 = vpop.f32.mrf.mxu0  ;;  %v2170_v27 = vpop.f32.mrf.mxu1 }
 0x153   : > { %v1876_v29 = vrot.slane %v1874_v24, 7  ;;  %v2121_v43 = vadd.f32 %v2115_v26, %v2064_v38 }
 0x154   : > { %v3722_v34 = vpop.f32.mrf.mxu0  ;;  %v3728_v35 = vpop.f32.mrf.mxu1 }
 0x155   : > { %v1879_v36 = vor.u32 %v1877_v31, %v1876_v29  ;;  %v1880_v37 = vrot.slane %v1876_v29, 4  ;;  %v2176_v48 = vadd.f32 %v2170_v27, %v2121_v43  ;;  %v3389_v29 = vld [vmem:[%s4264_s12 + $0x18] sm:$0xf]  ;;  %v3391_v31 = vld [vmem:[%s4264_s12 + $0x1c] sm:$0x1] }
 0x156   : > { %v2118_v39 = vpop.f32.mrf.mxu0  ;;  %v2173_v40 = vpop.f32.mrf.mxu1 }
 0x157   : > { %v1885_v41 = vsel %vm4451_vm11, %v1879_v36, %v3342_v32  ;;  %v1888_v42 = vsel %vm4456_vm12, %v1880_v37, %v3344_v33 }
 0x158   : > { %3343 = vst [vmem:[%s4264_s12 + $0x10] sm:$0xf] %v1885_v41  ;;  %3345 = vst [vmem:[%s4264_s12 + $0x14] sm:$0x1] %v1888_v42  ;;  %v3723_v44 = vpop.f32.mrf.mxu0  ;;  %v3729_v45 = vpop.f32.mrf.mxu1 }
 0x15a   : > { %v2225_v46 = vpop.f32.mrf.mxu0  ;;  %v2283_v47 = vpop.f32.mrf.mxu1 }
 0x15b   : > { %v2231_v51 = vadd.f32 %v2225_v46, %v2176_v48 }
 0x15c   : > { %v3734_v49 = vpop.f32.mrf.mxu0  ;;  %v3740_v50 = vpop.f32.mrf.mxu1 }
 0x15d   : > { %v2289_v56 = vadd.f32 %v2283_v47, %v2231_v51 }
 0x15e   : > { %v2228_v52 = vpop.f32.mrf.mxu0  ;;  %v2286_v53 = vpop.f32.mrf.mxu1 }
 0x160   : > { %v3735_v54 = vpop.f32.mrf.mxu0  ;;  %v3741_v55 = vpop.f32.mrf.mxu1 }
 0x162   : > { %v2338_v57 = vpop.f32.mrf.mxu0  ;;  %v2393_v58 = vpop.f32.mrf.mxu1 }
 0x163   : > { %v2344_v59 = vadd.f32 %v2338_v57, %v2289_v56 }
 0x164   : > { %v3746_v61 = vpop.f32.mrf.mxu0  ;;  %v3752_v62 = vpop.f32.mrf.mxu1 }
 0x165   : > { %v2399_v0 = vadd.f32 %v2393_v58, %v2344_v59 }
 0x166   : > { %v2341_v1 = vpop.f32.mrf.mxu0  ;;  %v2396_v3 = vpop.f32.mrf.mxu1 }
 0x167   : > { %v2407_v4 = vmul.f32 %v4441_v60, %v2399_v0 }
 0x168   : > { %v3747_v6 = vpop.f32.mrf.mxu0  ;;  %v3753_v7 = vpop.f32.mrf.mxu1 }
 0x169   : > { %v2415_v8 = vadd.f32 %v4446_v63, %v2407_v4  ;;  %v2969_v6 = vstv %s2449_s8 }
 0x16a   : > { %v2511_v9 = vpop.f32.mrf.mxu0  ;;  %v2557_v10 = vpop.f32.mrf.mxu1 }
 0x16b   : > { %v2417_v11 = vmul.f32 %v2416_v5, %v2415_v8  ;;  %v2558_v36 = vadd.f32 %v2557_v10, %v2511_v9 }
 0x16c   : > { %v3758_v12 = vpop.f32.mrf.mxu0  ;;  %v3764_v13 = vpop.f32.mrf.mxu1 }
 0x16d   : > { %v2418_v14 = vmul.f32 0.5, %v2417_v11 }
 0x16e   : > { %v2514_v15 = vpop.f32.mrf.mxu0  ;;  %v2560_v16 = vpop.f32.mrf.mxu1 }
 0x16f   : > { %vm2419_vm15 = vcmp.ge.f32.partialorder %v2418_v14, 1.0 }
 0x170   : > { %v3387_v17 = vsel %vm2419_vm15, 1.0, %v3891_v2  ;;  %v3759_v18 = vpop.f32.mrf.mxu0  ;;  %v3765_v19 = vpop.f32.mrf.mxu1 }
 0x171   : > { %v3446_v20 = vpack.c.bf16 %v3387_v17, %v3387_v17  ;;  %v3436_v17 = vld [vmem:[%s4264_s12 + $0x20] sm:$0xf]  ;;  %v3438_v18 = vld [vmem:[%s4264_s12 + $0x24] sm:$0x1] }
 0x172   : > { %v2611_v21 = vpop.f32.mrf.mxu0  ;;  %v2668_v22 = vpop.f32.mrf.mxu1 }
 0x173   : > { %v2427_v23 = vshrl.u32 %v3446_v20, 16  ;;  %v2430_v27 = vshll.u32 %v3446_v20, 16  ;;  %v2617_v41 = vadd.f32 %v2611_v21, %v2558_v36 }
 0x174   : > { %v3770_v24 = vpop.f32.mrf.mxu0  ;;  %v3776_v25 = vpop.f32.mrf.mxu1 }
 0x175   : > { %v2429_v26 = vrot.slane %v2427_v23, 7  ;;  %v2674_v46 = vadd.f32 %v2668_v22, %v2617_v41 }
 0x176   : > { %v2614_v32 = vpop.f32.mrf.mxu0  ;;  %v2671_v33 = vpop.f32.mrf.mxu1 }
 0x177   : > { %v2432_v34 = vor.u32 %v2430_v27, %v2429_v26  ;;  %v2433_v35 = vrot.slane %v2429_v26, 4 }
 0x178   : > { %v3771_v37 = vpop.f32.mrf.mxu0  ;;  %v3777_v38 = vpop.f32.mrf.mxu1 }
 0x179   : > { %v2438_v39 = vsel %vm4451_vm11, %v2432_v34, %v3389_v29  ;;  %v2441_v40 = vsel %vm4456_vm12, %v2433_v35, %v3391_v31 }
 0x17a   : > { %3390 = vst [vmem:[%s4264_s12 + $0x18] sm:$0xf] %v2438_v39  ;;  %3392 = vst [vmem:[%s4264_s12 + $0x1c] sm:$0x1] %v2441_v40  ;;  %v2723_v42 = vpop.f32.mrf.mxu0  ;;  %v2778_v43 = vpop.f32.mrf.mxu1 }
 0x17b   : > { %v2729_v49 = vadd.f32 %v2723_v42, %v2674_v46 }
 0x17c   : > { %v3782_v44 = vpop.f32.mrf.mxu0  ;;  %v3788_v45 = vpop.f32.mrf.mxu1 }
 0x17d   : > { %v2784_v54 = vadd.f32 %v2778_v43, %v2729_v49 }
 0x17e   : > { %v2726_v47 = vpop.f32.mrf.mxu0  ;;  %v2781_v48 = vpop.f32.mrf.mxu1 }
 0x180   : > { %v3783_v50 = vpop.f32.mrf.mxu0  ;;  %v3789_v51 = vpop.f32.mrf.mxu1 }
 0x182   : > { %v2836_v52 = vpop.f32.mrf.mxu0  ;;  %v2891_v53 = vpop.f32.mrf.mxu1 }
 0x183   : > { %v2842_v57 = vadd.f32 %v2836_v52, %v2784_v54 }
 0x184   : > { %v3794_v55 = vpop.f32.mrf.mxu0  ;;  %v3800_v56 = vpop.f32.mrf.mxu1 }
 0x185   : > { %v2897_v0 = vadd.f32 %v2891_v53, %v2842_v57 }
 0x186   : > { %v2839_v58 = vpop.f32.mrf.mxu0  ;;  %v2894_v59 = vpop.f32.mrf.mxu1 }
 0x188   : > { %v3795_v61 = vpop.f32.mrf.mxu0  ;;  %v3801_v62 = vpop.f32.mrf.mxu1 }
 0x18a   : > { %v2946_v1 = vpop.f32.mrf.mxu0 }
 0x18b   : > { %v2952_v3 = vadd.f32 %v2946_v1, %v2897_v0 }
 0x18c   : > { %v3806_v4 = vpop.f32.mrf.mxu0 }
 0x18d   : > { %v2960_v5 = vmul.f32 %v4441_v60, %v2952_v3 }
 0x18e   : > { %v2949_v7 = vpop.f32.mrf.mxu0 }
 0x18f   : > { %v2968_v8 = vadd.f32 %v4446_v63, %v2960_v5 }
 0x190   : > { %v3807_v9 = vpop.f32.mrf.mxu0 }
 0x191   : > { %v2970_v10 = vmul.f32 %v2969_v6, %v2968_v8 }
 0x193   : > { %v2971_v11 = vmul.f32 0.5, %v2970_v10 }
 0x195   : > { %vm2972_vm2 = vcmp.ge.f32.partialorder %v2971_v11, 1.0 }
 0x196   : > { %v3434_v12 = vsel %vm2972_vm2, 1.0, %v3891_v2 }
 0x197   : > { %v3447_v13 = vpack.c.bf16 %v3434_v12, %v3434_v12 }
 0x199   : > { %v2980_v14 = vshrl.u32 %v3447_v13, 16  ;;  %v2983_v16 = vshll.u32 %v3447_v13, 16 }
 0x19b   : > { %v2982_v15 = vrot.slane %v2980_v14, 7 }
 0x19d   : > { %v2985_v19 = vor.u32 %v2983_v16, %v2982_v15  ;;  %v2986_v60 = vrot.slane %v2982_v15, 4 }
 0x19f   : > { %v2991_v20 = vsel %vm4451_vm11, %v2985_v19, %v3436_v17  ;;  %v2994_v63 = vsel %vm4456_vm12, %v2986_v60, %v3438_v18 }
 0x1a0   : > { %3437 = vst [vmem:[%s4264_s12 + $0x20] sm:$0xf] %v2991_v20  ;;  %3439 = vst [vmem:[%s4264_s12 + $0x24] sm:$0x1] %v2994_v63 }
 0x1a1 PF: > { %s14_s19 = sadd.s32 1, %s3889_s19   ;;  %s4575_s15 = smov %s3881_s17 }
 0x1a2   : > { %p11_p7 = scmp.ge.s32.totalorder %s14_s19, 6   ;;  %s4576_s16 = smov %s3885_s18 }
 0x1a3   : > { %s4577_s17 = smov %s4580_s20  ;;  %s4578_s18 = smov %s4584_s21 }
 0x1a4   :  { %13 = sbr.rel (!%p11_p7) target bundleno = 3 (0x3), region = 135 }

// kernel: block_forward.3
= control target key start
LH: loop header
LB: loop body
LE: loop exit
PB: predicated region body
PF: predicated region fallthrough
CT: control target
= control target key end

     0   :  { %s9177_s0 = inlined_call_operand.vmem [shape: bf16[20,10,128], index: 0, kind: input, shape index: {}]   ;;  %s9178_s1 = inlined_call_operand.vmem [shape: bf16[9,128,128], index: 1, kind: input, shape index: {}]   ;;  %s9179_s2 = inlined_call_operand.vmem [shape: f32[1,128], index: 2, kind: input, shape index: {}]   ;;  %s9180_s3 = inlined_call_operand.vmem [shape: f32[1,128], index: 3, kind: input, shape index: {}]   ;;  %s9181_s4 = inlined_call_operand.vmem [shape: f32[44,22,4], index: 4, kind: input, shape index: {}]   ;;  %s9182_s5 = inlined_call_operand.vmem [shape: bf16[4,128], index: 5, kind: input, shape index: {}]   ;;  %s9183_s6 = inlined_call_operand.vmem [shape: f32[1,128], index: 6, kind: input, shape index: {}]   ;;  %s9184_s7 = inlined_call_operand.vmem [shape: f32[1,128], index: 7, kind: input, shape index: {}]   ;;  %s9185_s8 = inlined_call_operand.hbm [shape: f32[16,8,128], index: 8, kind: output, shape index: {}]  }
   0x1   :  { %9188 = sst [smem:[#allocation7_spill]] %s9177_s0 }
   0x2   :  { %13 = vsyncpa [#allocation3], 0 }
   0x3   :  { %15 = vsyncpa [#allocation3 + $0x1], 0  ;;  %s7595_s27 = smov 0   ;;  %s7597_s28 = smov 0  }
   0x4   :  { %s7599_s29 = smov 0   ;;  %s7601_s30 = smov 0  }
   0x5   :  { %s7603_s9 = smov 0   ;;  %s7605_s10 = smov 0  }
   0x6   :  { %s7607_s11 = smov 0   ;;  %s7609_s12 = smov 0  }
   0x7 LB: > { %s5024_s13 = sadd.s32 4294967295, %s7543_s12   ;;  %s30_s14 = sadd.s32 1, %s7535_s10  ;;  %s7543_s12 = sphi %s7609_s12, %s21_s12   ;;  %s7539_s11 = sphi %s7607_s11, %s9202_s11   ;;  %s7535_s10 = sphi %s7605_s10, %s9201_s10   ;;  %s7531_s9 = sphi %s7603_s9, %s9200_s9   ;;  %s7527_s30 = sphi %s7601_s30, %s9199_s30   ;;  %s7523_s29 = sphi %s7599_s29, %s9198_s29   ;;  %s7519_s28 = sphi %s7597_s28, %s9197_s28   ;;  %s7515_s27 = sphi %s7595_s27, %s9196_s27  }
   0x8   : > { %s33_s15 = sadd.s32 1, %s7539_s11  ;;  %p31_p0 = scmp.ge.s32.totalorder %s30_s14, 2 }
   0x9   : > { %s5026_s16 = sshll.u32 %s7539_s11, 1  ;;  %s5025_s17 = sadd.s32 4294967294, %s7543_s12  }
   0xa   : > { %s206_s18 = sadd.s32 %s7535_s10, %s5026_s16  ;;  %s9204_s14 = smov (%p31_p0, %s30_s14), 0 }
   0xb   : > { %9189 = sst [smem:[#allocation5_spill]] %s9204_s14  ;;  %s9206_s15 = smov (!%p31_p0, %s33_s15), %s7539_s11 }
   0xc   : > { %p222_p1 = scmp.ne.s32.totalorder %s7523_s29, %s7519_s28  ;;  %p223_p2 = scmp.eq.s32.totalorder %s5024_s13, 3 }
   0xd   : > { %p35_p3 = scmp.ge.s32.totalorder %s9206_s15, 2  ;;  %p228_p4 = scmp.ne.s32.totalorder %s7519_s28, %s7515_s27 }
   0xe   : > { %p7648_p5 = por %p223_p2, %p222_p1  ;;  %p229_p6 = scmp.eq.s32.totalorder %s5025_s17, 3 }
   0xf   : > { %s9208_s15 = smov (%p35_p3, %s9206_s15), 0  ;;  %p5029_p8 = scmp.ge.s32.totalorder %s7543_s12, 1 }
  0x10   : > { %9191 = sst [smem:[#allocation6_spill]] %s9208_s15  ;;  %p7654_p7 = por %p229_p6, %p228_p4 }
  0x11   : > { %s5027_s21 = sshll.u32 %s9208_s15, 1  ;;  %p271_p9 = scmp.lt.s32.totalorder %s7543_s12, 5 }
  0x12   : > { %s208_s22 = sadd.s32 %s5027_s21, %s9204_s14  ;;  %s212_s23 = sadd.s32 1, %s7523_s29 }
  0x13   : > { %s209_s24 = ssub.s32 %s206_s18, %s208_s22  ;;  %p272_p10 = pnand %p5029_p8, %p271_p9 }
  0x14   : > { %p210_p11 = scmp.eq.s32.totalorder %s209_s24, 0  ;;  %s305_s24 = smul.u32 (!%p272_p10), 10, %s7531_s9 }
  0x15   : > { %275 = sbr.rel (%p272_p10) target bundleno = 835 (0x343), region = 52  ;;  %s5031_s26 = sshll.u32 (!%p272_p10), %s7527_s30, 2 }
  0x16   : > { %s7664_s25 = scalar_select %p210_p11, %s7523_s29, %s212_s23  }
  0x17   : > { %s306_s21 = sadd.s32 (!%p272_p10), %s5031_s26, %s305_s24  ;;  %s9193_s0 = sld [smem:[#allocation7_spill]] (!%p272_p10) }
  0x18   : > { %s5980_s15 = sshll.u32 (!%p272_p10), %s306_s21, 3  ;;  %s4864_s26 = smul.u32 (!%p272_p10), 22, %s7531_s9 }
  0x19   : > { %s5254_s23 = sshll.u32 (!%p272_p10), %s7527_s30, 3  ;;  %s5975_s17 = sshll.u32 (!%p272_p10), %s7531_s9, 1 }
  0x1a   : > { %v7139_v0 = vld [vmem:[%s9178_s1 + $0x78] sm:$0xff]   ;;  %v7545_v1 = vmov 0.0   ;;  %v7141_v3 = vld [vmem:[%s9178_s1 + $0x70] sm:$0xff]   ;;  %vm7546_vm0 = vmmov 0   ;;  %v7143_v5 = vld [vmem:[%s9178_s1 + $0x68] sm:$0xff]   ;;  %s4866_s16 = sadd.s32 %s5254_s23, %s4864_s26  ;;  %vm1376_vm1 = vcmask 1041408   ;;  %s4813_s18 = sadd.s32 %s7527_s30, %s5975_s17 }
  0x1b   : > { %6320 = vmatprep.subr.bf16.mxu0 %v7545_v1  ;;  %6340 = vmatprep.subr.bf16.mxu1 %v7545_v1  ;;  %v7140_v2 = vld [vmem:[%s9178_s1 + $0x38] sm:$0xff]   ;;  %v7142_v4 = vld [vmem:[%s9178_s1 + $0x30] sm:$0xff]   ;;  %v7144_v6 = vld [vmem:[%s9178_s1 + $0x28] sm:$0xff]   ;;  %vm1372_vm2 = vcmask 31744   ;;  %s297_s26 = sand.u32 1, %s7519_s28   ;;  %s5987_s21 = sshll.u32 %s4813_s18, 9 }
  0x1c   : > { %6321 = vmatpush3.bf16.msra.mxu0 %v7139_v0  ;;  %6336 = vmatprep.mubr.msk.bf16.mxu0 %vm7546_vm0, %v7545_v1  ;;  %v7145_v7 = vld [vmem:[%s9178_s1 + $0x60] sm:$0xff]   ;;  %v7147_v9 = vld [vmem:[%s9178_s1 + $0x58] sm:$0xff]   ;;  %v7149_v14 = vld [vmem:[%s9178_s1 + $0x50] sm:$0xff]   ;;  %s5030_s13 = sshll.u32 %s297_s26, 5  ;;  %s9119_s30 = scalar_lea.hbm %s9185_s8, %s5987_s21 }
  0x1d   : > { %6341 = vmatpush3.bf16.msra.mxu1 %v7140_v2  ;;  %6322 = vmatprep.subr.bf16.mxu0 %v7545_v1  ;;  %v7146_v8 = vld [vmem:[%s9178_s1 + $0x20] sm:$0xff]   ;;  %s7707_s24 = scalar_lea.vmem %s9193_s0, %s5980_s15  ;;  %v7148_v10 = vld [vmem:[%s9178_s1 + $0x18] sm:$0xff]   ;;  %v7150_v15 = vld [vmem:[%s9178_s1 + $0x10] sm:$0xff]   ;;  %s4867_s15 = smul.u32 24, %s4866_s16 }
  0x1e   : > { %6342 = vmatprep.subr.bf16.mxu1 %v7545_v1  ;;  %6356 = vmatprep.mubr.msk.bf16.mxu1 %vm7546_vm0, %v7545_v1  ;;  %v310_v11 = vld [vmem:[%s7707_s24] sm:$0xf]  ;;  %v7719_v12 = vld [vmem:[%s7707_s24 + $0x4] sm:$0x1]  ;;  %v7151_v17 = vld [vmem:[%s9178_s1 + $0x48] sm:$0xff]   ;;  %s8543_s22 = scalar_lea.vmem [#allocation2], %s5030_s13 }
  0x1f   : > { %v5050_v13 = vcombine.low %v310_v11, %v7719_v12  ;;  %v7152_v18 = vld [vmem:[%s9178_s1 + $0x8] sm:$0xff]   ;;  %v7153_v21 = vld [vmem:[%s9178_s1 + $0x40] sm:$0xff]   ;;  %v7156_v24 = vld [vmem:[%s9178_s1 + $0xb8] sm:$0xff]   ;;  %s7945_s14 = scalar_lea.vmem %s9181_s4, %s4867_s15  ;;  %s4820_s15 = sshll.u32 %s8543_s22, 4  ;;  %s9121_s15 = int_to_ptr.vmem [resolvable:$true] %s4820_s15 }
  0x20   : > { %6323 = vmatpush3.bf16.msra.mxu0 %v7141_v3  ;;  %v7154_v22 = vld [vmem:[%s9178_s1] sm:$0xff]   ;;  %v7157_v25 = vld [vmem:[%s9178_s1 + $0xf8] sm:$0xff]   ;;  %v7158_v26 = vld [vmem:[%s9178_s1 + $0xb0] sm:$0xff]   ;;  %s9126_s23 = scalar_lea.sflag [#allocation3], %s297_s26  ;;  %s7547_s0 = smov [#allocation2]  }
  0x21   : > { %6343 = vmatpush3.bf16.msra.mxu1 %v7142_v4  ;;  %6324 = vmatprep.subr.bf16.mxu0 %v7545_v1  ;;  %v353_v16 = vshll.u32 %v5050_v13, 16  ;;  %v351_v19 = vshrl.u32 %v5050_v13, 16  ;;  %v7159_v27 = vld [vmem:[%s9178_s1 + $0xf0] sm:$0xff]   ;;  %v7160_v28 = vld [vmem:[%s9178_s1 + $0xa8] sm:$0xff]   ;;  %v7162_v30 = vld [vmem:[%s9178_s1 + $0xa0] sm:$0xff]   ;;  %s7455_s13 = sshll.u32 %s7547_s0, 4  ;;  %s7456_s13 = int_to_ptr.vmem [resolvable:$false] %s7455_s13 }
  0x22   : > { %6344 = vmatprep.subr.bf16.mxu1 %v7545_v1  ;;  %v7161_v29 = vld [vmem:[%s9178_s1 + $0xe8] sm:$0xff]   ;;  %v7163_v31 = vld [vmem:[%s9178_s1 + $0xe0] sm:$0xff]   ;;  %v7164_v32 = vld [vmem:[%s9178_s1 + $0x98] sm:$0xff]   ;;  %s7457_s16 = scalar_lea.vmem %s7456_s13, 1024  ;;  %p7458_p1 = scmp.lt.s32.totalorder %s9121_s15, %s7456_s13 }
  0x23   : > { %v355_v20 = vrot.slane %v353_v16, 1  ;;  %v7165_v33 = vld [vmem:[%s9178_s1 + $0xd8] sm:$0xff]   ;;  %v7166_v34 = vld [vmem:[%s9178_s1 + $0x90] sm:$0xff]   ;;  %v7168_v36 = vld [vmem:[%s9178_s1 + $0x88] sm:$0xff]  }
  0x24   : > { %6325 = vmatpush3.bf16.msra.mxu0 %v7143_v5  ;;  %v7167_v35 = vld [vmem:[%s9178_s1 + $0xd0] sm:$0xff]   ;;  %v7169_v37 = vld [vmem:[%s9178_s1 + $0xc8] sm:$0xff]   ;;  %v534_v38 = vld [vmem:[%s7707_s24] sm:$0xe] }
  0x25   : > { %6345 = vmatpush3.bf16.msra.mxu1 %v7144_v6  ;;  %6326 = vmatprep.subr.bf16.mxu0 %v7545_v1  ;;  %v356_v23 = vor.u32 %v355_v20, %v351_v19  ;;  %v5083_v39 = vcombine.low %v534_v38, %v7719_v12  ;;  %v7170_v40 = vld [vmem:[%s9178_s1 + $0x80] sm:$0xff]   ;;  %v5094_v43 = vld [vmem:[%s7707_s24 + $0x8] sm:$0xf]  ;;  %v7173_v44 = vld [vmem:[%s9178_s1 + $0x138] sm:$0xff]  }
  0x26   : > { %6346 = vmatprep.subr.bf16.mxu1 %v7545_v1  ;;  %v7171_v41 = vld [vmem:[%s9178_s1 + $0xc0] sm:$0xff]   ;;  %v7174_v45 = vld [vmem:[%s9178_s1 + $0x178] sm:$0xff]   ;;  %v7175_v46 = vld [vmem:[%s9178_s1 + $0x130] sm:$0xff]  }
  0x27   : > { %v555_v42 = vrot.slane %v5083_v39, 1  ;;  %v7176_v47 = vld [vmem:[%s9178_s1 + $0x170] sm:$0xff]   ;;  %v7177_v48 = vld [vmem:[%s9178_s1 + $0x128] sm:$0xff]   ;;  %v7179_v50 = vld [vmem:[%s9178_s1 + $0x120] sm:$0xff]  }
  0x28   : > { %6327 = vmatpush3.bf16.msra.mxu0 %v7145_v7  ;;  %v7178_v49 = vld [vmem:[%s9178_s1 + $0x168] sm:$0xff]   ;;  %v7180_v51 = vld [vmem:[%s9178_s1 + $0x160] sm:$0xff]   ;;  %v7181_v52 = vld [vmem:[%s9178_s1 + $0x118] sm:$0xff]  }
  0x29   : > { %6347 = vmatpush3.bf16.msra.mxu1 %v7146_v8  ;;  %6328 = vmatprep.subr.bf16.mxu0 %v7545_v1  ;;  %v5119_v53 = vld [vmem:[%s7707_s24 + $0x8] sm:$0xf]  ;;  %v5120_v54 = vld [vmem:[%s7707_s24 + $0xc] sm:$0x1]  ;;  %v7182_v55 = vld [vmem:[%s9178_s1 + $0x158] sm:$0xff]  }
  0x2a   : > { %6348 = vmatprep.subr.bf16.mxu1 %v7545_v1  ;;  %v5137_v56 = vcombine.low %v5119_v53, %v5120_v54  ;;  %v7183_v57 = vld [vmem:[%s9178_s1 + $0x110] sm:$0xff]   ;;  %v7185_v60 = vld [vmem:[%s9178_s1 + $0x108] sm:$0xff]   ;;  %v7187_v2 = vld [vmem:[%s9178_s1 + $0x100] sm:$0xff]  }
  0x2b   : > { %v7184_v58 = vld [vmem:[%s9178_s1 + $0x150] sm:$0xff]   ;;  %v7186_v61 = vld [vmem:[%s9178_s1 + $0x148] sm:$0xff]   ;;  %v7188_v4 = vld [vmem:[%s9178_s1 + $0x140] sm:$0xff]  }
  0x2c   : > { %6329 = vmatpush3.bf16.msra.mxu0 %v7147_v9  ;;  %v784_v59 = vshll.u32 %v5137_v56, 16  ;;  %v5146_v62 = vld [vmem:[%s7707_s24 + $0x8] sm:$0xe]  ;;  %v782_v63 = vshrl.u32 %v5137_v56, 16  ;;  %v7191_v7 = vld [vmem:[%s9178_s1 + $0x1b8] sm:$0xff]   ;;  %v7193_v9 = vld [vmem:[%s9178_s1 + $0x1b0] sm:$0xff]  }
  0x2d   : > { %6349 = vmatpush3.bf16.msra.mxu1 %v7148_v10  ;;  %6330 = vmatprep.subr.bf16.mxu0 %v7545_v1  ;;  %v5163_v3 = vcombine.low %v5146_v62, %v5120_v54  ;;  %v7192_v8 = vld [vmem:[%s9178_s1 + $0x1f8] sm:$0xff]   ;;  %v7194_v10 = vld [vmem:[%s9178_s1 + $0x1f0] sm:$0xff]   ;;  %v7196_v12 = vld [vmem:[%s9178_s1 + $0x1e8] sm:$0xff]  }
  0x2e   : > { %6350 = vmatprep.subr.bf16.mxu1 %v7545_v1  ;;  %v786_v0 = vrot.slane %v784_v59, 1  ;;  %v7197_v13 = vld [vmem:[%s9178_s1 + $0x1a0] sm:$0xff]   ;;  %v7200_v16 = vld [vmem:[%s9178_s1 + $0x1d8] sm:$0xff]   ;;  %v7201_v19 = vld [vmem:[%s9178_s1 + $0x190] sm:$0xff]  }
  0x2f   : > { %v899_v6 = vrot.slane %v5163_v3, 1  ;;  %v5259_v38 = vld [vmem:[%s7945_s14 + $0x64] ss:$2 sm:$0xff]  ;;  %v7218_v53 = vld [vmem:[%s9178_s1 + $0x58] sm:$0xff]  }
  0x30   : > { %6331 = vmatpush3.bf16.msra.mxu0 %v7149_v14  ;;  %v787_v5 = vor.u32 %v786_v0, %v782_v63  ;;  %v7198_v14 = vld [vmem:[%s9178_s1 + $0x1e0] sm:$0xff]   ;;  %v8033_v54 = vld [vmem:[%s7707_s24 + $0x8] sm:$0xf] }
  0x31   : > { %6351 = vmatpush3.bf16.msra.mxu1 %v7150_v15  ;;  %6332 = vmatprep.subr.bf16.mxu0 %v7545_v1  ;;  %v7199_v15 = vld [vmem:[%s9178_s1 + $0x198] sm:$0xff]   ;;  %v7223_v63 = vld [vmem:[%s9178_s1 + $0x48] sm:$0xff]   ;;  %v7225_v0 = vld [vmem:[%s9178_s1 + $0x40] sm:$0xff]  }
  0x32   : > { %6352 = vmatprep.subr.bf16.mxu1 %v7545_v1 }
  0x34   : > { %6333 = vmatpush3.bf16.msra.mxu0 %v7151_v17  ;;  %v5199_v17 = vld [vmem:[%s7707_s24 + $0x10] sm:$0xf] }
  0x35   : > { %6353 = vmatpush3.bf16.msra.mxu1 %v7152_v18  ;;  %6334 = vmatprep.subr.bf16.mxu0 %v7545_v1  ;;  %v7935_v18 = vld [vmem:[%s7707_s24 + $0x14] sm:$0x1] }
  0x36   : > { %6354 = vmatprep.subr.bf16.mxu1 %v7545_v1  ;;  %v5217_v20 = vcombine.low %v5199_v17, %v7935_v18  ;;  %v7239_v17 = vld [vmem:[%s9178_s1] sm:$0xff]  }
  0x38   : > { %6335 = vmatpush3.bf16.msra.mxu0 %v7153_v21  ;;  %v7202_v21 = vld [vmem:[%s9178_s1 + $0x1d0] sm:$0xff]  }
  0x39   : > { %6355 = vmatpush3.bf16.msra.mxu1 %v7154_v22  ;;  %6360 = vmatprep.subr.bf16.mxu0 %v7545_v1  ;;  %v7203_v22 = vld [vmem:[%s9178_s1 + $0x188] sm:$0xff]  }
  0x3a   : > { %6380 = vmatprep.subr.bf16.mxu1 %v7545_v1 }
  0x3b   : > { %6337 = vmatmul.mubr.bf16.vlgmr.msra.gmra.mxu0 %v356_v23  ;;  %v5255_v23 = vld [vmem:[%s7945_s14 + $0x4b] ss:$2 sm:$0xff] }
  0x3c   : > { %6357 = vmatmul.mubr.bf16.vlgmr.msra.gmra.mxu1 %v310_v11  ;;  %6361 = vmatpush3.bf16.msra.mxu0 %v7156_v24  ;;  %v7195_v11 = vld [vmem:[%s9178_s1 + $0x1a8] sm:$0xff]  }
  0x3d   : > { %6381 = vmatpush3.bf16.msra.mxu1 %v7157_v25  ;;  %6362 = vmatprep.subr.bf16.mxu0 %v7545_v1  ;;  %v7204_v24 = vld [vmem:[%s9178_s1 + $0x1c8] sm:$0xff]   ;;  %v1128_v25 = vshll.u32 %v5217_v20, 16 }
  0x3e   : > { %6382 = vmatprep.subr.bf16.mxu1 %v7545_v1  ;;  %6376 = vmatprep.mubr.msk.bf16.mxu0 %vm7546_vm0, %v7545_v1 }
  0x3f   : > { %6396 = vmatprep.mubr.msk.bf16.mxu1 %vm7546_vm0, %v7545_v1 }
  0x40   : > { %6363 = vmatpush3.bf16.msra.mxu0 %v7158_v26  ;;  %v5256_v26 = vld [vmem:[%s7945_s14 + $0x4c] ss:$2 sm:$0xff] }
  0x41   : > { %6383 = vmatpush3.bf16.msra.mxu1 %v7159_v27  ;;  %6364 = vmatprep.subr.bf16.mxu0 %v7545_v1  ;;  %v7205_v27 = vld [vmem:[%s9178_s1 + $0x180] sm:$0xff]  }
  0x42   : > { %6384 = vmatprep.subr.bf16.mxu1 %v7545_v1 }
  0x44   : > { %6365 = vmatpush3.bf16.msra.mxu0 %v7160_v28  ;;  %v7206_v28 = vld [vmem:[%s9178_s1 + $0x1c0] sm:$0xff]  }
  0x45   : > { %6385 = vmatpush3.bf16.msra.mxu1 %v7161_v29  ;;  %6366 = vmatprep.subr.bf16.mxu0 %v7545_v1  ;;  %v1126_v29 = vshrl.u32 %v5217_v20, 16  ;;  %v5300_v20 = vld [vmem:[%s7707_s24 + $0x8] sm:$0xe] }
  0x46   : > { %6386 = vmatprep.subr.bf16.mxu1 %v7545_v1 }
  0x48   : > { %6367 = vmatpush3.bf16.msra.mxu0 %v7162_v30  ;;  %v1130_v30 = vrot.slane %v1128_v25, 1  ;;  %v7246_v25 = vld [vmem:[%s9178_s1 + $0xe8] sm:$0xff]  }
  0x49   : > { %6387 = vmatpush3.bf16.msra.mxu1 %v7163_v31  ;;  %6368 = vmatprep.subr.bf16.mxu0 %v7545_v1  ;;  %v1360_v31 = vmax.f32 %v5255_v23, %v5256_v26  ;;  %v7245_v26 = vld [vmem:[%s9178_s1 + $0x138] sm:$0xff]  }
  0x4a   : > { %6388 = vmatprep.subr.bf16.mxu1 %v7545_v1 }
  0x4c   : > { %6369 = vmatpush3.bf16.msra.mxu0 %v7164_v32  ;;  %v5258_v32 = vld [vmem:[%s7945_s14 + $0x63] ss:$2 sm:$0xff] }
  0x4d   : > { %6389 = vmatpush3.bf16.msra.mxu1 %v7165_v33  ;;  %6370 = vmatprep.subr.bf16.mxu0 %v7545_v1  ;;  %v5174_v33 = vld [vmem:[%s7707_s24 + $0x10] sm:$0xf] }
  0x4e   : > { %6390 = vmatprep.subr.bf16.mxu1 %v7545_v1 }
  0x50   : > { %6371 = vmatpush3.bf16.msra.mxu0 %v7166_v34  ;;  %v1371_v34 = vld [vmem:[%s9182_s5] sm:$0x3] }
  0x51   : > { %6391 = vmatpush3.bf16.msra.mxu1 %v7167_v35  ;;  %6372 = vmatprep.subr.bf16.mxu0 %v7545_v1  ;;  %v1131_v35 = vor.u32 %v1130_v30, %v1126_v29  ;;  %v1378_v39 = vsel %vm1376_vm1, %v1371_v34, 0  ;;  %v7249_v29 = vld [vmem:[%s9178_s1 + $0x128] sm:$0xff]   ;;  %v7250_v30 = vld [vmem:[%s9178_s1 + $0xd8] sm:$0xff]   ;;  %v5353_v34 = vld [vmem:[%s7707_s24 + $0x10] sm:$0xf] }
  0x52   : > { %6392 = vmatprep.subr.bf16.mxu1 %v7545_v1 }
  0x54   : > { %6373 = vmatpush3.bf16.msra.mxu0 %v7168_v36  ;;  %v7208_v36 = vld [vmem:[%s9178_s1 + $0x238] sm:$0xff]  }
  0x55   : > { %6393 = vmatpush3.bf16.msra.mxu1 %v7169_v37  ;;  %6374 = vmatprep.subr.bf16.mxu0 %v7545_v1  ;;  %v1366_v37 = vmax.f32 %v1360_v31, %v5258_v32  ;;  %v7251_v31 = vld [vmem:[%s9178_s1 + $0x120] sm:$0xff]   ;;  %v7252_v32 = vld [vmem:[%s9178_s1 + $0xd0] sm:$0xff]  }
  0x56   : > { %6394 = vmatprep.subr.bf16.mxu1 %v7545_v1 }
  0x58   : > { %6375 = vmatpush3.bf16.msra.mxu0 %v7170_v40  ;;  %v7209_v40 = vld [vmem:[%s9178_s1 + $0x230] sm:$0xff]  }
  0x59   : > { %6395 = vmatpush3.bf16.msra.mxu1 %v7171_v41  ;;  %6400 = vmatprep.subr.bf16.mxu0 %v7545_v1  ;;  %v1369_v41 = vmax.f32 %v1366_v37, %v5259_v38  ;;  %v7255_v37 = vld [vmem:[%s9178_s1 + $0x110] sm:$0xff]   ;;  %v7256_v38 = vld [vmem:[%s9178_s1 + $0xc0] sm:$0xff]  }
  0x5a   : > { %6420 = vmatprep.subr.bf16.mxu1 %v7545_v1 }
  0x5b   : > { %6377 = vmatmul.mubr.bf16.vlgmr.msra.gmra.mxu0 %v555_v42  ;;  %v1370_v42 = vpack.c.bf16 %v1369_v41, %v1369_v41  ;;  %v7257_v41 = vld [vmem:[%s9178_s1 + $0x108] sm:$0xff]  }
  0x5c   : > { %6397 = vmatmul.mubr.bf16.vlgmr.msra.gmra.mxu1 %v5094_v43  ;;  %6401 = vmatpush3.bf16.msra.mxu0 %v7173_v44  ;;  %v7211_v43 = vld [vmem:[%s9178_s1 + $0x228] sm:$0xff]   ;;  %v7210_v44 = vld [vmem:[%s9178_s1 + $0x78] sm:$0xff]  }
  0x5d   : > { %6421 = vmatpush3.bf16.msra.mxu1 %v7174_v45  ;;  %6402 = vmatprep.subr.bf16.mxu0 %v7545_v1  ;;  %v7213_v45 = vld [vmem:[%s9178_s1 + $0x220] sm:$0xff]  }
  0x5e   : > { %6422 = vmatprep.subr.bf16.mxu1 %v7545_v1  ;;  %6416 = vmatprep.mubr.msk.bf16.mxu0 %vm7546_vm0, %v7545_v1 }
  0x5f   : > { %6436 = vmatprep.mubr.msk.bf16.mxu1 %vm7546_vm0, %v7545_v1 }
  0x60   : > { %6403 = vmatpush3.bf16.msra.mxu0 %v7175_v46  ;;  %v7212_v46 = vld [vmem:[%s9178_s1 + $0x70] sm:$0xff]  }
  0x61   : > { %6423 = vmatpush3.bf16.msra.mxu1 %v7176_v47  ;;  %6404 = vmatprep.subr.bf16.mxu0 %v7545_v1  ;;  %v7214_v47 = vld [vmem:[%s9178_s1 + $0x68] sm:$0xff]  }
  0x62   : > { %6424 = vmatprep.subr.bf16.mxu1 %v7545_v1 }
  0x64   : > { %6405 = vmatpush3.bf16.msra.mxu0 %v7177_v48  ;;  %v7215_v48 = vld [vmem:[%s9178_s1 + $0x218] sm:$0xff]  }
  0x65   : > { %6425 = vmatpush3.bf16.msra.mxu1 %v7178_v49  ;;  %6406 = vmatprep.subr.bf16.mxu0 %v7545_v1  ;;  %v7216_v49 = vld [vmem:[%s9178_s1 + $0x60] sm:$0xff]  }
  0x66   : > { %6426 = vmatprep.subr.bf16.mxu1 %v7545_v1 }
  0x68   : > { %6407 = vmatpush3.bf16.msra.mxu0 %v7179_v50  ;;  %v7217_v50 = vld [vmem:[%s9178_s1 + $0x210] sm:$0xff]  }
  0x69   : > { %6427 = vmatpush3.bf16.msra.mxu1 %v7180_v51  ;;  %6408 = vmatprep.subr.bf16.mxu0 %v7545_v1  ;;  %v7219_v51 = vld [vmem:[%s9178_s1 + $0x208] sm:$0xff]  }
  0x6a   : > { %6428 = vmatprep.subr.bf16.mxu1 %v7545_v1 }
  0x6c   : > { %6409 = vmatpush3.bf16.msra.mxu0 %v7181_v52  ;;  %v5226_v52 = vld [vmem:[%s7707_s24 + $0x10] sm:$0xe] }
  0x6d   : > { %6429 = vmatpush3.bf16.msra.mxu1 %v7182_v55  ;;  %6410 = vmatprep.subr.bf16.mxu0 %v7545_v1  ;;  %v8036_v55 = vld [vmem:[%s7707_s24 + $0xc] sm:$0x1]  ;;  %v5243_v56 = vcombine.low %v5226_v52, %v7935_v18  ;;  %v7241_v18 = vld [vmem:[%s9178_s1 + $0xf8] sm:$0xff]  }
  0x6e   : > { %6430 = vmatprep.subr.bf16.mxu1 %v7545_v1  ;;  %v5283_v59 = vcombine.low %v8033_v54, %v8036_v55  ;;  %v5317_v23 = vcombine.low %v5300_v20, %v8036_v55  ;;  %v7263_v55 = vld [vmem:[%s9178_s1 + $0x168] sm:$0xff]  }
  0x70   : > { %6411 = vmatpush3.bf16.msra.mxu0 %v7183_v57  ;;  %v7220_v57 = vld [vmem:[%s9178_s1 + $0x50] sm:$0xff]   ;;  %v1485_v62 = vshll.u32 %v5283_v59, 16  ;;  %v1483_v3 = vshrl.u32 %v5283_v59, 16 }
  0x71   : > { %6431 = vmatpush3.bf16.msra.mxu1 %v7184_v58  ;;  %6412 = vmatprep.subr.bf16.mxu0 %v7545_v1  ;;  %v7221_v58 = vld [vmem:[%s9178_s1 + $0x200] sm:$0xff]  }
  0x72   : > { %6432 = vmatprep.subr.bf16.mxu1 %v7545_v1 }
  0x74   : > { %6413 = vmatpush3.bf16.msra.mxu0 %v7185_v60  ;;  %v1243_v60 = vrot.slane %v5243_v56, 1 }
  0x75   : > { %6433 = vmatpush3.bf16.msra.mxu1 %v7186_v61  ;;  %6414 = vmatprep.subr.bf16.mxu0 %v7545_v1  ;;  %v7224_v61 = vld [vmem:[%s9178_s1 + $0x38] sm:$0xff]  }
  0x76   : > { %6434 = vmatprep.subr.bf16.mxu1 %v7545_v1 }
  0x78   : > { %6415 = vmatpush3.bf16.msra.mxu0 %v7187_v2  ;;  %v7226_v2 = vld [vmem:[%s9178_s1 + $0x30] sm:$0xff]  }
  0x79   : > { %6435 = vmatpush3.bf16.msra.mxu1 %v7188_v4  ;;  %6440 = vmatprep.subr.bf16.mxu0 %v7545_v1  ;;  %v1487_v4 = vrot.slane %v1485_v62, 1  ;;  %v7266_v62 = vld [vmem:[%s9178_s1 + $0x1a8] sm:$0xff]  }
  0x7a   : > { %6460 = vmatprep.subr.bf16.mxu1 %v7545_v1 }
  0x7b   : > { %6417 = vmatmul.mubr.bf16.vlgmr.msra.gmra.mxu0 %v787_v5  ;;  %v7228_v5 = vld [vmem:[%s9178_s1 + $0xb8] sm:$0xff]  }
  0x7c   : > { %6437 = vmatmul.mubr.bf16.vlgmr.msra.gmra.mxu1 %v899_v6  ;;  %6441 = vmatpush3.bf16.msra.mxu0 %v7191_v7  ;;  %v1488_v6 = vor.u32 %v1487_v4, %v1483_v3  ;;  %v7229_v7 = vld [vmem:[%s9178_s1 + $0x28] sm:$0xff]   ;;  %v7270_v4 = vld [vmem:[%s9178_s1 + $0x198] sm:$0xff]  }
  0x7d   : > { %6461 = vmatpush3.bf16.msra.mxu1 %v7192_v8  ;;  %6442 = vmatprep.subr.bf16.mxu0 %v7545_v1  ;;  %v7230_v8 = vld [vmem:[%s9178_s1 + $0xb0] sm:$0xff]   ;;  %v7271_v3 = vld [vmem:[%s9178_s1 + $0x148] sm:$0xff]  }
  0x7e   : > { %6462 = vmatprep.subr.bf16.mxu1 %v7545_v1  ;;  %6456 = vmatprep.mubr.msk.bf16.mxu0 %vm7546_vm0, %v7545_v1 }
  0x7f   : > { %6476 = vmatprep.mubr.msk.bf16.mxu1 %vm7546_vm0, %v7545_v1 }
  0x80   : > { %6443 = vmatpush3.bf16.msra.mxu0 %v7193_v9  ;;  %v7231_v9 = vld [vmem:[%s9178_s1 + $0x20] sm:$0xff]  }
  0x81   : > { %6463 = vmatpush3.bf16.msra.mxu1 %v7194_v10  ;;  %6444 = vmatprep.subr.bf16.mxu0 %v7545_v1  ;;  %v7232_v10 = vld [vmem:[%s9178_s1 + $0xa8] sm:$0xff]  }
  0x82   : > { %6464 = vmatprep.subr.bf16.mxu1 %v7545_v1 }
  0x84   : > { %6445 = vmatpush3.bf16.msra.mxu0 %v7195_v11  ;;  %v7233_v11 = vld [vmem:[%s9178_s1 + $0x18] sm:$0xff]  }
  0x85   : > { %6465 = vmatpush3.bf16.msra.mxu1 %v7196_v12  ;;  %6446 = vmatprep.subr.bf16.mxu0 %v7545_v1  ;;  %v7234_v12 = vld [vmem:[%s9178_s1 + $0xa0] sm:$0xff]  }
  0x86   : > { %6466 = vmatprep.subr.bf16.mxu1 %v7545_v1 }
  0x88   : > { %6447 = vmatpush3.bf16.msra.mxu0 %v7197_v13  ;;  %v7235_v13 = vld [vmem:[%s9178_s1 + $0x10] sm:$0xff]  }
  0x89   : > { %6467 = vmatpush3.bf16.msra.mxu1 %v7198_v14  ;;  %6448 = vmatprep.subr.bf16.mxu0 %v7545_v1  ;;  %v7236_v14 = vld [vmem:[%s9178_s1 + $0x98] sm:$0xff]  }
  0x8a   : > { %6468 = vmatprep.subr.bf16.mxu1 %v7545_v1 }
  0x8c   : > { %6449 = vmatpush3.bf16.msra.mxu0 %v7199_v15  ;;  %v7237_v15 = vld [vmem:[%s9178_s1 + $0x8] sm:$0xff]  }
  0x8d   : > { %6469 = vmatpush3.bf16.msra.mxu1 %v7200_v16  ;;  %6450 = vmatprep.subr.bf16.mxu0 %v7545_v1  ;;  %v7238_v16 = vld [vmem:[%s9178_s1 + $0x90] sm:$0xff]  }
  0x8e   : > { %6470 = vmatprep.subr.bf16.mxu1 %v7545_v1 }
  0x90   : > { %6451 = vmatpush3.bf16.msra.mxu0 %v7201_v19  ;;  %v7240_v19 = vld [vmem:[%s9178_s1 + $0x88] sm:$0xff]  }
  0x91   : > { %6471 = vmatpush3.bf16.msra.mxu1 %v7202_v21  ;;  %6452 = vmatprep.subr.bf16.mxu0 %v7545_v1  ;;  %v7242_v21 = vld [vmem:[%s9178_s1 + $0x80] sm:$0xff]  }
  0x92   : > { %6472 = vmatprep.subr.bf16.mxu1 %v7545_v1 }
  0x94   : > { %6453 = vmatpush3.bf16.msra.mxu0 %v7203_v22  ;;  %v7243_v22 = vld [vmem:[%s9178_s1 + $0xf0] sm:$0xff]  }
  0x95   : > { %6473 = vmatpush3.bf16.msra.mxu1 %v7204_v24  ;;  %6454 = vmatprep.subr.bf16.mxu0 %v7545_v1  ;;  %v1686_v24 = vrot.slane %v5317_v23, 1  ;;  %v7280_v23 = vld [vmem:[%s9178_s1 + $0x1e8] sm:$0xff]  }
  0x96   : > { %6474 = vmatprep.subr.bf16.mxu1 %v7545_v1 }
  0x98   : > { %6455 = vmatpush3.bf16.msra.mxu0 %v7205_v27  ;;  %v7248_v27 = vld [vmem:[%s9178_s1 + $0xe0] sm:$0xff]  }
  0x99   : > { %6475 = vmatpush3.bf16.msra.mxu1 %v7206_v28  ;;  %6480 = vmatprep.subr.bf16.mxu0 %v7545_v1  ;;  %v7247_v28 = vld [vmem:[%s9178_s1 + $0x130] sm:$0xff]  }
  0x9a   : > { %6500 = vmatprep.subr.bf16.mxu1 %v7545_v1 }
  0x9b   : > { %6457 = vmatmul.mubr.bf16.vlgmr.msra.gmra.mxu0 %v5174_v33  ;;  %v7254_v33 = vld [vmem:[%s9178_s1 + $0xc8] sm:$0xff]  }
  0x9c   : > { %6477 = vmatmul.mubr.bf16.vlgmr.msra.gmra.mxu1 %v1131_v35  ;;  %6481 = vmatpush3.bf16.msra.mxu0 %v7208_v36  ;;  %v7253_v35 = vld [vmem:[%s9178_s1 + $0x118] sm:$0xff]   ;;  %v8182_v36 = vld [vmem:[%s7707_s24 + $0x14] sm:$0x1] }
  0x9d   : > { %6501 = vmatpush3.bf16.msra.mxu1 %v1378_v39  ;;  %6482 = vmatprep.subr.bf16.mxu0 %v7545_v1  ;;  %v5371_v39 = vcombine.low %v5353_v34, %v8182_v36  ;;  %v7286_v34 = vld [vmem:[%s9178_s1 + $0x1d0] sm:$0xff]  }
  0x9e   : > { %6502 = vmatprep.mubr.msk.bf16.mxu1 %vm7546_vm0, %v7545_v1  ;;  %6506 = vmatprep.subr.bf16.mxu1 %v7545_v1 }
  0x9f   : > { %6496 = vmatprep.mubr.msk.bf16.mxu0 %vm7546_vm0, %v7545_v1 }
  0xa0   : > { %6483 = vmatpush3.bf16.msra.mxu0 %v7209_v40  ;;  %v5328_v40 = vld [vmem:[%s7707_s24 + $0x10] sm:$0xf] }
  0xa1   : > { %6484 = vmatprep.subr.bf16.mxu0 %v7545_v1 }
  0xa4   : > { %6503 = vmatmul.mubr.msk.bf16.vlgmr.msra.gmra.mxu1 %vm1372_vm2, %v1370_v42  ;;  %6485 = vmatpush3.bf16.msra.mxu0 %v7211_v43  ;;  %v7258_v42 = vld [vmem:[%s9178_s1 + $0x178] sm:$0xff]   ;;  %v1913_v43 = vshll.u32 %v5371_v39, 16 }
  0xa5   : > { %6507 = vmatpush3.bf16.msra.mxu1 %v7210_v44  ;;  %6486 = vmatprep.subr.bf16.mxu0 %v7545_v1 }
  0xa6   : > { %6508 = vmatprep.subr.bf16.mxu1 %v7545_v1  ;;  %6522 = vmatprep.mubr.msk.bf16.mxu1 %vm7546_vm0, %v7545_v1 }
  0xa8   : > { %6487 = vmatpush3.bf16.msra.mxu0 %v7213_v45 }
  0xa9   : > { %6509 = vmatpush3.bf16.msra.mxu1 %v7212_v46  ;;  %6488 = vmatprep.subr.bf16.mxu0 %v7545_v1  ;;  %v7259_v46 = vld [vmem:[%s9178_s1 + $0x100] sm:$0xff]  }
  0xaa   : > { %6510 = vmatprep.subr.bf16.mxu1 %v7545_v1 }
  0xac   : > { %6489 = vmatpush3.bf16.msra.mxu0 %v7215_v48  ;;  %v1911_v48 = vshrl.u32 %v5371_v39, 16  ;;  %v5491_v39 = vld [vmem:[%s7945_s14 + $0x7c] ss:$2 sm:$0xff] }
  0xad   : > { %6511 = vmatpush3.bf16.msra.mxu1 %v7214_v47  ;;  %6490 = vmatprep.subr.bf16.mxu0 %v7545_v1  ;;  %v7260_v47 = vld [vmem:[%s9178_s1 + $0x170] sm:$0xff]  }
  0xae   : > { %6512 = vmatprep.subr.bf16.mxu1 %v7545_v1 }
  0xb0   : > { %6491 = vmatpush3.bf16.msra.mxu0 %v7217_v50 }
  0xb1   : > { %6513 = vmatpush3.bf16.msra.mxu1 %v7216_v49  ;;  %6492 = vmatprep.subr.bf16.mxu0 %v7545_v1  ;;  %v1915_v49 = vrot.slane %v1913_v43, 1 }
  0xb2   : > { %6514 = vmatprep.subr.bf16.mxu1 %v7545_v1 }
  0xb4   : > { %6493 = vmatpush3.bf16.msra.mxu0 %v7219_v51 }
  0xb5   : > { %6515 = vmatpush3.bf16.msra.mxu1 %v7218_v53  ;;  %6494 = vmatprep.subr.bf16.mxu0 %v7545_v1 }
  0xb6   : > { %6516 = vmatprep.subr.bf16.mxu1 %v7545_v1 }
  0xb8   : > { %6495 = vmatpush3.bf16.msra.mxu0 %v7221_v58 }
  0xb9   : > { %6517 = vmatpush3.bf16.msra.mxu1 %v7220_v57  ;;  %6526 = vmatprep.subr.bf16.mxu0 %v7545_v1  ;;  %v1916_v57 = vor.u32 %v1915_v49, %v1911_v48 }
  0xba   : > { %6518 = vmatprep.subr.bf16.mxu1 %v7545_v1 }
  0xbb   : > { %6497 = vmatmul.mubr.bf16.vlgmr.msra.gmra.mxu0 %v1243_v60  ;;  %v7264_v60 = vld [vmem:[%s9178_s1 + $0x1b0] sm:$0xff]  }
  0xbc   : > { %6527 = vmatpush3.bf16.msra.mxu0 %v7224_v61  ;;  %6542 = vmatprep.mubr.msk.bf16.mxu0 %vm7546_vm0, %v7545_v1  ;;  %v7265_v61 = vld [vmem:[%s9178_s1 + $0x160] sm:$0xff]  }
  0xbd   : > { %6519 = vmatpush3.bf16.msra.mxu1 %v7223_v63  ;;  %6528 = vmatprep.subr.bf16.mxu0 %v7545_v1  ;;  %v7267_v63 = vld [vmem:[%s9178_s1 + $0x158] sm:$0xff]  }
  0xbe   : > { %6520 = vmatprep.subr.bf16.mxu1 %v7545_v1 }
  0xc0   : > { %6529 = vmatpush3.bf16.msra.mxu0 %v7226_v2  ;;  %v7269_v2 = vld [vmem:[%s9178_s1 + $0x150] sm:$0xff]  }
  0xc1   : > { %6521 = vmatpush3.bf16.msra.mxu1 %v7225_v0  ;;  %6530 = vmatprep.subr.bf16.mxu0 %v7545_v1  ;;  %v7268_v0 = vld [vmem:[%s9178_s1 + $0x1a0] sm:$0xff]  }
  0xc2   : > { %6546 = vmatprep.subr.bf16.mxu1 %v7545_v1 }
  0xc4   : > { %6523 = vmatmul.mubr.bf16.vlgmr.msra.gmra.mxu1 %v1488_v6  ;;  %6531 = vmatpush3.bf16.msra.mxu0 %v7229_v7  ;;  %v7272_v6 = vld [vmem:[%s9178_s1 + $0x190] sm:$0xff]   ;;  %v7273_v7 = vld [vmem:[%s9178_s1 + $0x140] sm:$0xff]  }
  0xc5   : > { %6547 = vmatpush3.bf16.msra.mxu1 %v7228_v5  ;;  %6532 = vmatprep.subr.bf16.mxu0 %v7545_v1  ;;  %v5380_v5 = vld [vmem:[%s7707_s24 + $0x10] sm:$0xe] }
  0xc6   : > { %6548 = vmatprep.subr.bf16.mxu1 %v7545_v1  ;;  %6562 = vmatprep.mubr.msk.bf16.mxu1 %vm7546_vm0, %v7545_v1 }
  0xc8   : > { %6533 = vmatpush3.bf16.msra.mxu0 %v7231_v9 }
  0xc9   : > { %6549 = vmatpush3.bf16.msra.mxu1 %v7230_v8  ;;  %6534 = vmatprep.subr.bf16.mxu0 %v7545_v1  ;;  %v5397_v8 = vcombine.low %v5380_v5, %v8182_v36 }
  0xca   : > { %6550 = vmatprep.subr.bf16.mxu1 %v7545_v1 }
  0xcb   : > { %v2027_v9 = vrot.slane %v5397_v8, 1  ;;  %v7299_v8 = vld [vmem:[%s9178_s1 + $0x68] sm:$0xff]  }
  0xcc   : > { %6535 = vmatpush3.bf16.msra.mxu0 %v7233_v11  ;;  %v7276_v11 = vld [vmem:[%s9178_s1 + $0x1f8] sm:$0xff]  }
  0xcd   : > { %6551 = vmatpush3.bf16.msra.mxu1 %v7232_v10  ;;  %6536 = vmatprep.subr.bf16.mxu0 %v7545_v1  ;;  %v7275_v10 = vld [vmem:[%s9178_s1 + $0x188] sm:$0xff]  }
  0xce   : > { %6552 = vmatprep.subr.bf16.mxu1 %v7545_v1 }
  0xd0   : > { %6537 = vmatpush3.bf16.msra.mxu0 %v7235_v13  ;;  %v7277_v13 = vld [vmem:[%s9178_s1 + $0x180] sm:$0xff]  }
  0xd1   : > { %6553 = vmatpush3.bf16.msra.mxu1 %v7234_v12  ;;  %6538 = vmatprep.subr.bf16.mxu0 %v7545_v1 }
  0xd2   : > { %6554 = vmatprep.subr.bf16.mxu1 %v7545_v1 }
  0xd4   : > { %6539 = vmatpush3.bf16.msra.mxu0 %v7237_v15 }
  0xd5   : > { %6555 = vmatpush3.bf16.msra.mxu1 %v7236_v14  ;;  %6540 = vmatprep.subr.bf16.mxu0 %v7545_v1 }
  0xd6   : > { %6556 = vmatprep.subr.bf16.mxu1 %v7545_v1 }
  0xd8   : > { %6541 = vmatpush3.bf16.msra.mxu0 %v7239_v17 }
  0xd9   : > { %6557 = vmatpush3.bf16.msra.mxu1 %v7238_v16  ;;  %6566 = vmatprep.subr.bf16.mxu0 %v7545_v1  ;;  %v7278_v16 = vld [vmem:[%s9178_s1 + $0x1f0] sm:$0xff]  }
  0xda   : > { %6558 = vmatprep.subr.bf16.mxu1 %v7545_v1 }
  0xdb   : > { %6543 = vmatmul.mubr.bf16.vlgmr.msra.gmra.mxu0 %v8033_v54  ;;  %v7262_v54 = vld [vmem:[%s9178_s1 + $0x1b8] sm:$0xff]  }
  0xdc   : > { %6567 = vmatpush3.bf16.msra.mxu0 %v7241_v18  ;;  %6582 = vmatprep.mubr.msk.bf16.mxu0 %vm7546_vm0, %v7545_v1 }
  0xdd   : > { %6559 = vmatpush3.bf16.msra.mxu1 %v7240_v19  ;;  %6568 = vmatprep.subr.bf16.mxu0 %v7545_v1 }
  0xde   : > { %6560 = vmatprep.subr.bf16.mxu1 %v7545_v1 }
  0xe0   : > { %6569 = vmatpush3.bf16.msra.mxu0 %v7243_v22 }
  0xe1   : > { %6561 = vmatpush3.bf16.msra.mxu1 %v7242_v21  ;;  %6570 = vmatprep.subr.bf16.mxu0 %v7545_v1  ;;  %v5408_v21 = vld [vmem:[%s7707_s24 + $0x18] sm:$0xf] }
  0xe2   : > { %6586 = vmatprep.subr.bf16.mxu1 %v7545_v1 }
  0xe4   : > { %6563 = vmatmul.mubr.bf16.vlgmr.msra.gmra.mxu1 %v1686_v24  ;;  %6571 = vmatpush3.bf16.msra.mxu0 %v7246_v25  ;;  %v7279_v25 = vld [vmem:[%s9178_s1 + $0x238] sm:$0xff]  }
  0xe5   : > { %6587 = vmatpush3.bf16.msra.mxu1 %v7245_v26  ;;  %6572 = vmatprep.subr.bf16.mxu0 %v7545_v1 }
  0xe6   : > { %6588 = vmatprep.subr.bf16.mxu1 %v7545_v1  ;;  %6602 = vmatprep.mubr.msk.bf16.mxu1 %vm7546_vm0, %v7545_v1 }
  0xe8   : > { %6573 = vmatpush3.bf16.msra.mxu0 %v7248_v27  ;;  %v7281_v27 = vld [vmem:[%s9178_s1 + $0x230] sm:$0xff]  }
  0xe9   : > { %6589 = vmatpush3.bf16.msra.mxu1 %v7247_v28  ;;  %6574 = vmatprep.subr.bf16.mxu0 %v7545_v1  ;;  %v7282_v28 = vld [vmem:[%s9178_s1 + $0x1e0] sm:$0xff]  }
  0xea   : > { %6590 = vmatprep.subr.bf16.mxu1 %v7545_v1 }
  0xec   : > { %6575 = vmatpush3.bf16.msra.mxu0 %v7250_v30  ;;  %v7283_v30 = vld [vmem:[%s9178_s1 + $0x228] sm:$0xff]  }
  0xed   : > { %6591 = vmatpush3.bf16.msra.mxu1 %v7249_v29  ;;  %6576 = vmatprep.subr.bf16.mxu0 %v7545_v1  ;;  %v7284_v29 = vld [vmem:[%s9178_s1 + $0x1d8] sm:$0xff]  }
  0xee   : > { %6592 = vmatprep.subr.bf16.mxu1 %v7545_v1 }
  0xf0   : > { %6577 = vmatpush3.bf16.msra.mxu0 %v7252_v32  ;;  %v5434_v32 = vld [vmem:[%s7707_s24 + $0x1c] sm:$0x1] }
  0xf1   : > { %6593 = vmatpush3.bf16.msra.mxu1 %v7251_v31  ;;  %6578 = vmatprep.subr.bf16.mxu0 %v7545_v1  ;;  %v5433_v31 = vld [vmem:[%s7707_s24 + $0x18] sm:$0xf] }
  0xf2   : > { %6594 = vmatprep.subr.bf16.mxu1 %v7545_v1 }
  0xf4   : > { %6579 = vmatpush3.bf16.msra.mxu0 %v7254_v33  ;;  %v7285_v33 = vld [vmem:[%s9178_s1 + $0x220] sm:$0xff]  }
  0xf5   : > { %6595 = vmatpush3.bf16.msra.mxu1 %v7253_v35  ;;  %6580 = vmatprep.subr.bf16.mxu0 %v7545_v1  ;;  %v5451_v35 = vcombine.low %v5433_v31, %v5434_v32 }
  0xf6   : > { %6596 = vmatprep.subr.bf16.mxu1 %v7545_v1 }
  0xf7   : > { %v2254_v36 = vshll.u32 %v5451_v35, 16 }
  0xf8   : > { %6581 = vmatpush3.bf16.msra.mxu0 %v7256_v38  ;;  %v5490_v38 = vld [vmem:[%s7945_s14 + $0x7b] ss:$2 sm:$0xff] }
  0xf9   : > { %6597 = vmatpush3.bf16.msra.mxu1 %v7255_v37  ;;  %6606 = vmatprep.subr.bf16.mxu0 %v7545_v1  ;;  %v7288_v37 = vld [vmem:[%s9178_s1 + $0x1c8] sm:$0xff]   ;;  %v2483_v43 = vmax.f32 %v5490_v38, %v5491_v39  ;;  %v7314_v39 = vld [vmem:[%s9178_s1 + $0xb0] sm:$0xff]  }
  0xfa   : > { %6598 = vmatprep.subr.bf16.mxu1 %v7545_v1 }
  0xfb   : > { %v440_v44 = vpop.f32.mrf.mxu0  ;;  %6583 = vmatmul.mubr.bf16.vlgmr.msra.gmra.mxu0 %v5328_v40  ;;  %v7287_v40 = vld [vmem:[%s9178_s1 + $0x218] sm:$0xff]  }
  0xfc   : > { %v528_v45 = vpop.f32.mrf.mxu1  ;;  %6607 = vmatpush3.bf16.msra.mxu0 %v7258_v42  ;;  %6622 = vmatprep.mubr.msk.bf16.mxu0 %vm7546_vm0, %v7545_v1  ;;  %v2256_v42 = vrot.slane %v2254_v36, 1  ;;  %v7313_v36 = vld [vmem:[%s9178_s1 + $0xf8] sm:$0xff]  }
  0xfd   : > { %v529_v50 = vadd.f32 %v528_v45, %v440_v44  ;;  %6599 = vmatpush3.bf16.msra.mxu1 %v7257_v41  ;;  %v6338_v51 = vpop.f32.mrf.mxu0  ;;  %6608 = vmatprep.subr.bf16.mxu0 %v7545_v1  ;;  %v2252_v41 = vshrl.u32 %v5451_v35, 16  ;;  %v7290_v44 = vld [vmem:[%s9178_s1 + $0x1c0] sm:$0xff]  }
  0xfe   : > { %v6358_v52 = vpop.f32.mrf.mxu1  ;;  %6600 = vmatprep.subr.bf16.mxu1 %v7545_v1  ;;  %v5494_v45 = vld [vmem:[%s7945_s14 + $0x93] ss:$2 sm:$0xff]  ;;  %v7292_v51 = vld [vmem:[%s9178_s1 + $0x208] sm:$0xff]  }
  0xff   : > { %v443_v53 = vpop.f32.mrf.mxu0  ;;  %v2257_v48 = vor.u32 %v2256_v42, %v2252_v41  ;;  %v2489_v49 = vmax.f32 %v2483_v43, %v5494_v45  ;;  %v7316_v43 = vld [vmem:[%s9178_s1 + $0xa8] sm:$0xff]  }
 0x100   : > { %v531_v56 = vpop.f32.mrf.mxu1  ;;  %6609 = vmatpush3.bf16.msra.mxu0 %v7260_v47  ;;  %v2494_v47 = vld [vmem:[%s9182_s5] sm:$0x3]  ;;  %v5460_v53 = vld [vmem:[%s7707_s24 + $0x18] sm:$0xe] }
 0x101   : > { %6601 = vmatpush3.bf16.msra.mxu1 %v7259_v46  ;;  %v6339_v58 = vpop.f32.mrf.mxu0  ;;  %6610 = vmatprep.subr.bf16.mxu0 %v7545_v1  ;;  %v7289_v46 = vld [vmem:[%s9178_s1 + $0x210] sm:$0xff]   ;;  %v2499_v52 = vsel %vm1376_vm1, %v2494_v47, 0  ;;  %v7319_v47 = vld [vmem:[%s9178_s1 + $0xe0] sm:$0xff]  }
 0x102   : > { %v6359_v59 = vpop.f32.mrf.mxu1  ;;  %6626 = vmatprep.subr.bf16.mxu1 %v7545_v1 }
 0x103   : > { %v7293_v59 = vld [vmem:[%s9178_s1 + $0x200] sm:$0xff]  }
 0x104   : > { %6603 = vmatmul.mubr.bf16.vlgmr.msra.gmra.mxu1 %v1916_v57  ;;  %6611 = vmatpush3.bf16.msra.mxu0 %v7263_v55  ;;  %v5477_v57 = vcombine.low %v5460_v53, %v5434_v32 }
 0x105   : > { %6627 = vmatpush3.bf16.msra.mxu1 %v7262_v54  ;;  %6612 = vmatprep.subr.bf16.mxu0 %v7545_v1 }
 0x106   : > { %6628 = vmatprep.subr.bf16.mxu1 %v7545_v1  ;;  %6642 = vmatprep.mubr.msk.bf16.mxu1 %vm7546_vm0, %v7545_v1 }
 0x108   : > { %6613 = vmatpush3.bf16.msra.mxu0 %v7265_v61 }
 0x109   : > { %6629 = vmatpush3.bf16.msra.mxu1 %v7264_v60  ;;  %6614 = vmatprep.subr.bf16.mxu0 %v7545_v1 }
 0x10a   : > { %6630 = vmatprep.subr.bf16.mxu1 %v7545_v1 }
 0x10c   : > { %6615 = vmatpush3.bf16.msra.mxu0 %v7267_v63 }
 0x10d   : > { %6631 = vmatpush3.bf16.msra.mxu1 %v7266_v62  ;;  %6616 = vmatprep.subr.bf16.mxu0 %v7545_v1 }
 0x10e   : > { %6632 = vmatprep.subr.bf16.mxu1 %v7545_v1 }
 0x110   : > { %6617 = vmatpush3.bf16.msra.mxu0 %v7269_v2  ;;  %v7295_v2 = vld [vmem:[%s9178_s1 + $0x78] sm:$0xff]  }
 0x111   : > { %6633 = vmatpush3.bf16.msra.mxu1 %v7268_v0  ;;  %6618 = vmatprep.subr.bf16.mxu0 %v7545_v1  ;;  %v2368_v0 = vrot.slane %v5477_v57, 1  ;;  %v7325_v57 = vld [vmem:[%s9178_s1 + $0xc8] sm:$0xff]  }
 0x112   : > { %6634 = vmatprep.subr.bf16.mxu1 %v7545_v1 }
 0x114   : > { %6619 = vmatpush3.bf16.msra.mxu0 %v7271_v3 }
 0x115   : > { %6635 = vmatpush3.bf16.msra.mxu1 %v7270_v4  ;;  %6620 = vmatprep.subr.bf16.mxu0 %v7545_v1  ;;  %v7296_v4 = vld [vmem:[%s9178_s1 + $0x38] sm:$0xff]  }
 0x116   : > { %6636 = vmatprep.subr.bf16.mxu1 %v7545_v1 }
 0x118   : > { %6621 = vmatpush3.bf16.msra.mxu0 %v7273_v7  ;;  %v7298_v7 = vld [vmem:[%s9178_s1 + $0x30] sm:$0xff]  }
 0x119   : > { %6637 = vmatpush3.bf16.msra.mxu1 %v7272_v6  ;;  %6646 = vmatprep.subr.bf16.mxu0 %v7545_v1  ;;  %v7297_v6 = vld [vmem:[%s9178_s1 + $0x70] sm:$0xff]  }
 0x11a   : > { %6638 = vmatprep.subr.bf16.mxu1 %v7545_v1 }
 0x11b   : > { %v639_v12 = vpop.f32.mrf.mxu0  ;;  %6623 = vmatmul.mubr.bf16.vlgmr.msra.gmra.mxu0 %v2027_v9  ;;  %v7300_v9 = vld [vmem:[%s9178_s1 + $0x28] sm:$0xff]  }
 0x11c   : > { %v645_v14 = vadd.f32 %v639_v12, %v529_v50  ;;  %v750_v15 = vpop.f32.mrf.mxu1  ;;  %6647 = vmatpush3.bf16.msra.mxu0 %v7276_v11  ;;  %6662 = vmatprep.mubr.msk.bf16.mxu0 %vm7546_vm0, %v7545_v1  ;;  %v5495_v50 = vld [vmem:[%s7945_s14 + $0x94] ss:$2 sm:$0xff] }
 0x11d   : > { %6639 = vmatpush3.bf16.msra.mxu1 %v7275_v10  ;;  %v6378_v17 = vpop.f32.mrf.mxu0  ;;  %6648 = vmatprep.subr.bf16.mxu0 %v7545_v1  ;;  %v2492_v55 = vmax.f32 %v2489_v49, %v5495_v50  ;;  %v7301_v10 = vld [vmem:[%s9178_s1 + $0x60] sm:$0xff]   ;;  %v7303_v12 = vld [vmem:[%s9178_s1 + $0x58] sm:$0xff]  }
 0x11e   : > { %v8283_v18 = vadd.f32 %v750_v15, %v645_v14  ;;  %v6398_v19 = vpop.f32.mrf.mxu1  ;;  %6640 = vmatprep.subr.bf16.mxu1 %v7545_v1  ;;  %v7302_v11 = vld [vmem:[%s9178_s1 + $0x20] sm:$0xff]   ;;  %v8405_v14 = vld [vmem:[%s7707_s24 + $0x14] sm:$0x1]  ;;  %v7304_v15 = vld [vmem:[%s9178_s1 + $0x18] sm:$0xff]  }
 0x11f   : > { %v642_v20 = vpop.f32.mrf.mxu0  ;;  %v2493_v62 = vpack.c.bf16 %v2492_v55, %v2492_v55  ;;  %v7305_v17 = vld [vmem:[%s9178_s1 + $0x50] sm:$0xff]   ;;  %v7320_v49 = vld [vmem:[%s9178_s1 + $0x98] sm:$0xff]  }
 0x120   : > { %v753_v22 = vpop.f32.mrf.mxu1  ;;  %6649 = vmatpush3.bf16.msra.mxu0 %v7278_v16  ;;  %v7306_v19 = vld [vmem:[%s9178_s1 + $0x10] sm:$0xff]   ;;  %v7321_v50 = vld [vmem:[%s9178_s1 + $0xd8] sm:$0xff]  }
 0x121   : > { %6641 = vmatpush3.bf16.msra.mxu1 %v7277_v13  ;;  %v6379_v24 = vpop.f32.mrf.mxu0  ;;  %6650 = vmatprep.subr.bf16.mxu0 %v7545_v1  ;;  %v5502_v13 = vld [vmem:[%s7707_s24 + $0x10] sm:$0xf]  ;;  %v7308_v22 = vld [vmem:[%s9178_s1 + $0x8] sm:$0xff]  }
 0x122   : > { %v6399_v26 = vpop.f32.mrf.mxu1  ;;  %6666 = vmatprep.subr.bf16.mxu1 %v7545_v1  ;;  %v5520_v16 = vcombine.low %v5502_v13, %v8405_v14  ;;  %v5537_v55 = vld [vmem:[%s7707_s24 + $0x10] sm:$0xe] }
 0x124   : > { %6643 = vmatmul.mubr.bf16.vlgmr.msra.gmra.mxu1 %v5408_v21  ;;  %6651 = vmatpush3.bf16.msra.mxu0 %v7280_v23  ;;  %v2607_v20 = vshll.u32 %v5520_v16, 16  ;;  %v7307_v21 = vld [vmem:[%s9178_s1 + $0x48] sm:$0xff]   ;;  %v2605_v24 = vshrl.u32 %v5520_v16, 16 }
 0x125   : > { %6667 = vmatpush3.bf16.msra.mxu1 %v7279_v25  ;;  %6652 = vmatprep.subr.bf16.mxu0 %v7545_v1 }
 0x126   : > { %6668 = vmatprep.subr.bf16.mxu1 %v7545_v1  ;;  %6682 = vmatprep.mubr.msk.bf16.mxu1 %vm7546_vm0, %v7545_v1  ;;  %v2609_v25 = vrot.slane %v2607_v20, 1 }
 0x128   : > { %6653 = vmatpush3.bf16.msra.mxu0 %v7282_v28  ;;  %v2610_v32 = vor.u32 %v2609_v25, %v2605_v24  ;;  %v7335_v25 = vld [vmem:[%s9178_s1 + $0x120] sm:$0xff]  }
 0x129   : > { %6669 = vmatpush3.bf16.msra.mxu1 %v7281_v27  ;;  %6654 = vmatprep.subr.bf16.mxu0 %v7545_v1  ;;  %v7309_v27 = vld [vmem:[%s9178_s1 + $0x40] sm:$0xff]  }
 0x12a   : > { %6670 = vmatprep.subr.bf16.mxu1 %v7545_v1 }
 0x12c   : > { %6655 = vmatpush3.bf16.msra.mxu0 %v7284_v29  ;;  %v7310_v29 = vld [vmem:[%s9178_s1] sm:$0xff]  }
 0x12d   : > { %6671 = vmatpush3.bf16.msra.mxu1 %v7283_v30  ;;  %6656 = vmatprep.subr.bf16.mxu0 %v7545_v1 }
 0x12e   : > { %6672 = vmatprep.subr.bf16.mxu1 %v7545_v1 }
 0x130   : > { %6657 = vmatpush3.bf16.msra.mxu0 %v7286_v34  ;;  %v7312_v34 = vld [vmem:[%s9178_s1 + $0xb8] sm:$0xff]  }
 0x131   : > { %6673 = vmatpush3.bf16.msra.mxu1 %v7285_v33  ;;  %6658 = vmatprep.subr.bf16.mxu0 %v7545_v1 }
 0x132   : > { %6674 = vmatprep.subr.bf16.mxu1 %v7545_v1 }
 0x134   : > { %6659 = vmatpush3.bf16.msra.mxu0 %v7288_v37 }
 0x135   : > { %6675 = vmatpush3.bf16.msra.mxu1 %v7287_v40  ;;  %6660 = vmatprep.subr.bf16.mxu0 %v7545_v1  ;;  %v7315_v40 = vld [vmem:[%s9178_s1 + $0xf0] sm:$0xff]  }
 0x136   : > { %6676 = vmatprep.subr.bf16.mxu1 %v7545_v1 }
 0x138   : > { %6661 = vmatpush3.bf16.msra.mxu0 %v7290_v44  ;;  %v7317_v44 = vld [vmem:[%s9178_s1 + $0xe8] sm:$0xff]  }
 0x139   : > { %6677 = vmatpush3.bf16.msra.mxu1 %v7289_v46  ;;  %6686 = vmatprep.subr.bf16.mxu0 %v7545_v1  ;;  %v7318_v46 = vld [vmem:[%s9178_s1 + $0xa0] sm:$0xff]  }
 0x13a   : > { %6678 = vmatprep.subr.bf16.mxu1 %v7545_v1 }
 0x13b   : > { %v8353_v54 = vpop.f32.mrf.mxu0  ;;  %6663 = vmatmul.mubr.bf16.vlgmr.msra.gmra.mxu0 %v2257_v48 }
 0x13c   : > { %v8355_v56 = vpop.f32.mrf.mxu1  ;;  %6687 = vmatpush3.bf16.msra.mxu0 %v2499_v52  ;;  %6688 = vmatprep.mubr.msk.bf16.mxu0 %vm7546_vm0, %v7545_v1  ;;  %v877_v48 = vadd.f32 %v8353_v54, %v8283_v18  ;;  %v7322_v18 = vld [vmem:[%s9178_s1 + $0x90] sm:$0xff]   ;;  %v7324_v54 = vld [vmem:[%s9178_s1 + $0x88] sm:$0xff]  }
 0x13d   : > { %6679 = vmatpush3.bf16.msra.mxu1 %v7292_v51  ;;  %v6418_v58 = vpop.f32.mrf.mxu0  ;;  %6692 = vmatprep.subr.bf16.mxu0 %v7545_v1  ;;  %v7323_v52 = vld [vmem:[%s9178_s1 + $0xd0] sm:$0xff]  }
 0x13e   : > { %v6438_v60 = vpop.f32.mrf.mxu1  ;;  %6680 = vmatprep.subr.bf16.mxu1 %v7545_v1  ;;  %v989_v51 = vadd.f32 %v8355_v56, %v877_v48  ;;  %v5261_v56 = vld [vmem:[%s9183_s6] ss:$0 sm:$0xff] }
 0x13f   : > { %v874_v61 = vpop.f32.mrf.mxu0  ;;  %v8511_v60 = vld [vmem:[%s9179_s2] ss:$0 sm:$0xff] }
 0x140   : > { %v986_v63 = vpop.f32.mrf.mxu1  ;;  %v5554_v61 = vcombine.low %v5537_v55, %v8405_v14  ;;  %v7330_v14 = vld [vmem:[%s9178_s1 + $0x178] sm:$0xff]  }
 0x141   : > { %6681 = vmatpush3.bf16.msra.mxu1 %v7293_v59  ;;  %v6419_v3 = vpop.f32.mrf.mxu0 }
 0x142   : > { %v6439_v5 = vpop.f32.mrf.mxu1  ;;  %6712 = vmatprep.subr.bf16.mxu1 %v7545_v1  ;;  %v8523_v3 = vld [vmem:[%s9180_s3] ss:$0 sm:$0xff] }
 0x143   : > { %6689 = vmatmul.mubr.msk.bf16.vlgmr.msra.gmra.mxu0 %vm1372_vm2, %v2493_v62  ;;  %v7327_v5 = vld [vmem:[%s9178_s1 + $0xc0] sm:$0xff]  }
 0x144   : > { %6683 = vmatmul.mubr.bf16.vlgmr.msra.gmra.mxu1 %v2368_v0  ;;  %6693 = vmatpush3.bf16.msra.mxu0 %v7295_v2  ;;  %v7326_v0 = vld [vmem:[%s9178_s1 + $0x80] sm:$0xff]  }
 0x145   : > { %6713 = vmatpush3.bf16.msra.mxu1 %v7296_v4  ;;  %6694 = vmatprep.subr.bf16.mxu0 %v7545_v1  ;;  %v5262_v2 = vld [vmem:[%s9184_s7] ss:$0 sm:$0xff] }
 0x146   : > { %6714 = vmatprep.subr.bf16.mxu1 %v7545_v1  ;;  %6708 = vmatprep.mubr.msk.bf16.mxu0 %vm7546_vm0, %v7545_v1 }
 0x147   : > { %6728 = vmatprep.mubr.msk.bf16.mxu1 %vm7546_vm0, %v7545_v1 }
 0x148   : > { %6695 = vmatpush3.bf16.msra.mxu0 %v7297_v6 }
 0x149   : > { %6715 = vmatpush3.bf16.msra.mxu1 %v7298_v7  ;;  %6696 = vmatprep.subr.bf16.mxu0 %v7545_v1 }
 0x14a   : > { %6716 = vmatprep.subr.bf16.mxu1 %v7545_v1 }
 0x14c   : > { %6697 = vmatpush3.bf16.msra.mxu0 %v7299_v8  ;;  %v2808_v8 = vrot.slane %v5554_v61, 1  ;;  %v7353_v61 = vld [vmem:[%s9178_s1 + $0x1a0] sm:$0xff]  }
 0x14d   : > { %6717 = vmatpush3.bf16.msra.mxu1 %v7300_v9  ;;  %6698 = vmatprep.subr.bf16.mxu0 %v7545_v1 }
 0x14e   : > { %6718 = vmatprep.subr.bf16.mxu1 %v7545_v1 }
 0x150   : > { %6699 = vmatpush3.bf16.msra.mxu0 %v7301_v10 }
 0x151   : > { %6719 = vmatpush3.bf16.msra.mxu1 %v7302_v11  ;;  %6700 = vmatprep.subr.bf16.mxu0 %v7545_v1  ;;  %v7329_v11 = vld [vmem:[%s9178_s1 + $0x138] sm:$0xff]  }
 0x152   : > { %6720 = vmatprep.subr.bf16.mxu1 %v7545_v1 }
 0x154   : > { %6701 = vmatpush3.bf16.msra.mxu0 %v7303_v12 }
 0x155   : > { %6721 = vmatpush3.bf16.msra.mxu1 %v7304_v15  ;;  %6702 = vmatprep.subr.bf16.mxu0 %v7545_v1 }
 0x156   : > { %6722 = vmatprep.subr.bf16.mxu1 %v7545_v1 }
 0x158   : > { %6703 = vmatpush3.bf16.msra.mxu0 %v7305_v17  ;;  %v7331_v17 = vld [vmem:[%s9178_s1 + $0x130] sm:$0xff]  }
 0x159   : > { %6723 = vmatpush3.bf16.msra.mxu1 %v7306_v19  ;;  %6704 = vmatprep.subr.bf16.mxu0 %v7545_v1  ;;  %v7332_v19 = vld [vmem:[%s9178_s1 + $0x170] sm:$0xff]  }
 0x15a   : > { %6724 = vmatprep.subr.bf16.mxu1 %v7545_v1 }
 0x15b   : > { %v1094_v23 = vpop.f32.mrf.mxu0 }
 0x15c   : > { %v8429_v26 = vpop.f32.mrf.mxu1  ;;  %6705 = vmatpush3.bf16.msra.mxu0 %v7307_v21  ;;  %v1100_v53 = vadd.f32 %v1094_v23, %v989_v51  ;;  %v7334_v23 = vld [vmem:[%s9178_s1 + $0x168] sm:$0xff]   ;;  %v7348_v51 = vld [vmem:[%s9178_s1 + $0x1f8] sm:$0xff]  }
 0x15d   : > { %6725 = vmatpush3.bf16.msra.mxu1 %v7308_v22  ;;  %v6458_v28 = vpop.f32.mrf.mxu0  ;;  %6706 = vmatprep.subr.bf16.mxu0 %v7545_v1  ;;  %v7333_v22 = vld [vmem:[%s9178_s1 + $0x128] sm:$0xff]  }
 0x15e   : > { %v6478_v30 = vpop.f32.mrf.mxu1  ;;  %6726 = vmatprep.subr.bf16.mxu1 %v7545_v1  ;;  %v1221_v58 = vadd.f32 %v8429_v26, %v1100_v53  ;;  %v7336_v26 = vld [vmem:[%s9178_s1 + $0x160] sm:$0xff]   ;;  %v5590_v28 = vld [vmem:[%s7707_s24 + $0x18] sm:$0xf] }
 0x15f   : > { %v1097_v31 = vpop.f32.mrf.mxu0  ;;  %v7338_v30 = vld [vmem:[%s9178_s1 + $0x158] sm:$0xff]  }
 0x160   : > { %v1218_v33 = vpop.f32.mrf.mxu1  ;;  %6707 = vmatpush3.bf16.msra.mxu0 %v7309_v27  ;;  %v7337_v27 = vld [vmem:[%s9178_s1 + $0x118] sm:$0xff]  }
 0x161   : > { %6727 = vmatpush3.bf16.msra.mxu1 %v7310_v29  ;;  %v6459_v35 = vpop.f32.mrf.mxu0  ;;  %6732 = vmatprep.subr.bf16.mxu0 %v7545_v1  ;;  %v5591_v29 = vld [vmem:[%s7707_s24 + $0x1c] sm:$0x1]  ;;  %v7340_v33 = vld [vmem:[%s9178_s1 + $0x150] sm:$0xff]  }
 0x162   : > { %v6479_v37 = vpop.f32.mrf.mxu1  ;;  %6752 = vmatprep.subr.bf16.mxu1 %v7545_v1  ;;  %v5608_v31 = vcombine.low %v5590_v28, %v5591_v29  ;;  %v7341_v35 = vld [vmem:[%s9178_s1 + $0x108] sm:$0xff]  }
 0x163   : > { %6709 = vmatmul.mubr.bf16.vlgmr.msra.gmra.mxu0 %v2610_v32  ;;  %v7339_v32 = vld [vmem:[%s9178_s1 + $0x110] sm:$0xff]   ;;  %v5617_v37 = vld [vmem:[%s7707_s24 + $0x18] sm:$0xe] }
 0x164   : > { %6729 = vmatmul.mubr.bf16.vlgmr.msra.gmra.mxu1 %v5502_v13  ;;  %v1414_v38 = vpop.f32.mrf.mxu1  ;;  %6733 = vmatpush3.bf16.msra.mxu0 %v7312_v34  ;;  %v5565_v13 = vld [vmem:[%s7707_s24 + $0x18] sm:$0xf]  ;;  %v3035_v34 = vshll.u32 %v5608_v31, 16 }
 0x165   : > { %6753 = vmatpush3.bf16.msra.mxu1 %v7313_v36  ;;  %6734 = vmatprep.subr.bf16.mxu0 %v7545_v1  ;;  %v1427_v62 = vmul.f32 %v5261_v56, %v1414_v38  ;;  %v7342_v36 = vld [vmem:[%s9178_s1 + $0x148] sm:$0xff]  }
 0x166   : > { %v6504_v41 = vpop.f32.mrf.mxu1  ;;  %6754 = vmatprep.subr.bf16.mxu1 %v7545_v1  ;;  %6748 = vmatprep.mubr.msk.bf16.mxu0 %vm7546_vm0, %v7545_v1 }
 0x167   : > { %6768 = vmatprep.mubr.msk.bf16.mxu1 %vm7546_vm0, %v7545_v1  ;;  %v1435_v9 = vadd.f32 %v5262_v2, %v1427_v62  ;;  %v7354_v62 = vld [vmem:[%s9178_s1 + $0x1e0] sm:$0xff]  }
 0x168   : > { %v1417_v42 = vpop.f32.mrf.mxu1  ;;  %6735 = vmatpush3.bf16.msra.mxu0 %v7314_v39  ;;  %v3033_v39 = vshrl.u32 %v5608_v31, 16  ;;  %v5670_v2 = vld [vmem:[%s7707_s24 + $0x20] sm:$0xf] }
 0x169   : > { %6755 = vmatpush3.bf16.msra.mxu1 %v7315_v40  ;;  %6736 = vmatprep.subr.bf16.mxu0 %v7545_v1  ;;  %v3037_v40 = vrot.slane %v3035_v34, 1  ;;  %v7343_v42 = vld [vmem:[%s9178_s1 + $0x100] sm:$0xff]  }
 0x16a   : > { %v6505_v45 = vpop.f32.mrf.mxu1  ;;  %6756 = vmatprep.subr.bf16.mxu1 %v7545_v1 }
 0x16b   : > { %v7344_v45 = vld [vmem:[%s9178_s1 + $0x140] sm:$0xff]  }
 0x16c   : > { %6737 = vmatpush3.bf16.msra.mxu0 %v7316_v43  ;;  %v5634_v43 = vcombine.low %v5617_v37, %v5591_v29  ;;  %v5732_v29 = vld [vmem:[%s7945_s14 + $0xc4] ss:$2 sm:$0xff] }
 0x16d   : > { %6757 = vmatpush3.bf16.msra.mxu1 %v7317_v44  ;;  %6738 = vmatprep.subr.bf16.mxu0 %v7545_v1  ;;  %v7367_v37 = vld [vmem:[%s9178_s1 + $0x228] sm:$0xff]  }
 0x16e   : > { %6758 = vmatprep.subr.bf16.mxu1 %v7545_v1  ;;  %v3149_v48 = vrot.slane %v5634_v43, 1  ;;  %v7370_v43 = vld [vmem:[%s9178_s1 + $0x68] sm:$0xff]  }
 0x170   : > { %6739 = vmatpush3.bf16.msra.mxu0 %v7318_v46 }
 0x171   : > { %6759 = vmatpush3.bf16.msra.mxu1 %v7319_v47  ;;  %6740 = vmatprep.subr.bf16.mxu0 %v7545_v1  ;;  %v3038_v47 = vor.u32 %v3037_v40, %v3033_v39  ;;  %v7369_v40 = vld [vmem:[%s9178_s1 + $0x220] sm:$0xff]  }
 0x172   : > { %6760 = vmatprep.subr.bf16.mxu1 %v7545_v1 }
 0x174   : > { %6741 = vmatpush3.bf16.msra.mxu0 %v7320_v49  ;;  %v7347_v49 = vld [vmem:[%s9178_s1 + $0x1b8] sm:$0xff]  }
 0x175   : > { %6761 = vmatpush3.bf16.msra.mxu1 %v7321_v50  ;;  %6742 = vmatprep.subr.bf16.mxu0 %v7545_v1 }
 0x176   : > { %6762 = vmatprep.subr.bf16.mxu1 %v7545_v1 }
 0x178   : > { %6743 = vmatpush3.bf16.msra.mxu0 %v7322_v18 }
 0x179   : > { %6763 = vmatpush3.bf16.msra.mxu1 %v7323_v52  ;;  %6744 = vmatprep.subr.bf16.mxu0 %v7545_v1  ;;  %v7349_v52 = vld [vmem:[%s9178_s1 + $0x1b0] sm:$0xff]  }
 0x17a   : > { %6764 = vmatprep.subr.bf16.mxu1 %v7545_v1 }
 0x17b   : > { %v1327_v59 = vpop.f32.mrf.mxu0 }
 0x17c   : > { %v1333_v63 = vadd.f32 %v1327_v59, %v1221_v58  ;;  %6745 = vmatpush3.bf16.msra.mxu0 %v7324_v54  ;;  %v7350_v54 = vld [vmem:[%s9178_s1 + $0x1f0] sm:$0xff]   ;;  %v7352_v58 = vld [vmem:[%s9178_s1 + $0x1e8] sm:$0xff]  }
 0x17d   : > { %6765 = vmatpush3.bf16.msra.mxu1 %v7325_v57  ;;  %v6498_v4 = vpop.f32.mrf.mxu0  ;;  %6746 = vmatprep.subr.bf16.mxu0 %v7545_v1  ;;  %v7351_v57 = vld [vmem:[%s9178_s1 + $0x1a8] sm:$0xff]  }
 0x17e   : > { %v1341_v6 = vmul.f32 %v8511_v60, %v1333_v63  ;;  %6766 = vmatprep.subr.bf16.mxu1 %v7545_v1  ;;  %v7355_v63 = vld [vmem:[%s9178_s1 + $0x198] sm:$0xff]   ;;  %v8656_v4 = vld [vmem:[%s7707_s24 + $0x24] sm:$0x1] }
 0x17f   : > { %v1330_v7 = vpop.f32.mrf.mxu0 }
 0x180   : > { %v1349_v10 = vadd.f32 %v8523_v3, %v1341_v6  ;;  %6747 = vmatpush3.bf16.msra.mxu0 %v7326_v0  ;;  %v7356_v0 = vld [vmem:[%s9178_s1 + $0x1d8] sm:$0xff]   ;;  %v5688_v6 = vcombine.low %v5670_v2, %v8656_v4  ;;  %v7358_v7 = vld [vmem:[%s9178_s1 + $0x1d0] sm:$0xff]  }
 0x181   : > { %6767 = vmatpush3.bf16.msra.mxu1 %v7327_v5  ;;  %v6499_v12 = vpop.f32.mrf.mxu0  ;;  %6772 = vmatprep.subr.bf16.mxu0 %v7545_v1  ;;  %v7357_v5 = vld [vmem:[%s9178_s1 + $0x190] sm:$0xff]  }
 0x182   : > { %v1436_v15 = vadd.f32 %v1435_v9, %v1349_v10  ;;  %6792 = vmatprep.subr.bf16.mxu1 %v7545_v1  ;;  %v3376_v9 = vshll.u32 %v5688_v6, 16  ;;  %v7360_v10 = vld [vmem:[%s9178_s1 + $0x1c8] sm:$0xff]   ;;  %v7382_v2 = vld [vmem:[%s9178_s1 + $0x30] sm:$0xff]  }
 0x183   : > { %6749 = vmatmul.mubr.bf16.vlgmr.msra.gmra.mxu0 %v2808_v8  ;;  %v7359_v8 = vld [vmem:[%s9178_s1 + $0x188] sm:$0xff]  }
 0x184   : > { %1437 = vst [vmem:[%s8543_s22] sm:$0xff] %v1436_v15  ;;  %v1572_v16 = vpop.f32.mrf.mxu1  ;;  %6769 = vmatmul.mubr.bf16.vlgmr.msra.gmra.mxu1 %v5565_v13  ;;  %6773 = vmatpush3.bf16.msra.mxu0 %v7329_v11  ;;  %v5727_v11 = vld [vmem:[%s7945_s14 + $0xab] ss:$2 sm:$0xff]  ;;  %v5728_v12 = vld [vmem:[%s7945_s14 + $0xac] ss:$2 sm:$0xff]  ;;  %v3374_v15 = vshrl.u32 %v5688_v6, 16  ;;  %v7381_v6 = vld [vmem:[%s9178_s1 + $0x40] sm:$0xff]  }
 0x185   : > { %6793 = vmatpush3.bf16.msra.mxu1 %v7330_v14  ;;  %6774 = vmatprep.subr.bf16.mxu0 %v7545_v1  ;;  %v7361_v14 = vld [vmem:[%s9178_s1 + $0x180] sm:$0xff]  }
 0x186   : > { %v6524_v20 = vpop.f32.mrf.mxu1  ;;  %6794 = vmatprep.subr.bf16.mxu1 %v7545_v1  ;;  %6788 = vmatprep.mubr.msk.bf16.mxu0 %vm7546_vm0, %v7545_v1 }
 0x187   : > { %6808 = vmatprep.mubr.msk.bf16.mxu1 %vm7546_vm0, %v7545_v1  ;;  %v7362_v20 = vld [vmem:[%s9178_s1 + $0x1c0] sm:$0xff]  }
 0x188   : > { %v1575_v21 = vpop.f32.mrf.mxu1  ;;  %6775 = vmatpush3.bf16.msra.mxu0 %v7331_v17  ;;  %v3605_v17 = vmax.f32 %v5727_v11, %v5728_v12  ;;  %v7384_v11 = vld [vmem:[%s9178_s1 + $0xb8] sm:$0xff]  }
 0x189   : > { %6795 = vmatpush3.bf16.msra.mxu1 %v7332_v19  ;;  %6776 = vmatprep.subr.bf16.mxu0 %v7545_v1  ;;  %v5731_v21 = vld [vmem:[%s7945_s14 + $0xc3] ss:$2 sm:$0xff] }
 0x18a   : > { %v6525_v24 = vpop.f32.mrf.mxu1  ;;  %6796 = vmatprep.subr.bf16.mxu1 %v7545_v1 }
 0x18b   : > { %v5645_v24 = vld [vmem:[%s7707_s24 + $0x20] sm:$0xf] }
 0x18c   : > { %6777 = vmatpush3.bf16.msra.mxu0 %v7333_v22 }
 0x18d   : > { %6797 = vmatpush3.bf16.msra.mxu1 %v7334_v23  ;;  %6778 = vmatprep.subr.bf16.mxu0 %v7545_v1  ;;  %v3616_v23 = vld [vmem:[%s9182_s5] sm:$0x3] }
 0x18e   : > { %6798 = vmatprep.subr.bf16.mxu1 %v7545_v1 }
 0x190   : > { %6779 = vmatpush3.bf16.msra.mxu0 %v7335_v25 }
 0x191   : > { %6799 = vmatpush3.bf16.msra.mxu1 %v7336_v26  ;;  %6780 = vmatprep.subr.bf16.mxu0 %v7545_v1  ;;  %v7364_v26 = vld [vmem:[%s9178_s1 + $0x238] sm:$0xff]  }
 0x192   : > { %6800 = vmatprep.subr.bf16.mxu1 %v7545_v1 }
 0x194   : > { %6781 = vmatpush3.bf16.msra.mxu0 %v7337_v27  ;;  %v3611_v27 = vmax.f32 %v3605_v17, %v5731_v21  ;;  %v7388_v17 = vld [vmem:[%s9178_s1 + $0xa8] sm:$0xff]  }
 0x195   : > { %6801 = vmatpush3.bf16.msra.mxu1 %v7338_v30  ;;  %6782 = vmatprep.subr.bf16.mxu0 %v7545_v1  ;;  %v3621_v30 = vsel %vm1376_vm1, %v3616_v23, 0  ;;  %v7393_v21 = vld [vmem:[%s9178_s1 + $0x8] sm:$0xff]  }
 0x196   : > { %6802 = vmatprep.subr.bf16.mxu1 %v7545_v1 }
 0x198   : > { %6783 = vmatpush3.bf16.msra.mxu0 %v7339_v32  ;;  %v7365_v32 = vld [vmem:[%s9178_s1 + $0x230] sm:$0xff]  }
 0x199   : > { %6803 = vmatpush3.bf16.msra.mxu1 %v7340_v33  ;;  %6784 = vmatprep.subr.bf16.mxu0 %v7545_v1  ;;  %v3614_v33 = vmax.f32 %v3611_v27, %v5732_v29  ;;  %v7397_v29 = vld [vmem:[%s9178_s1 + $0xf8] sm:$0xff]  }
 0x19a   : > { %6804 = vmatprep.subr.bf16.mxu1 %v7545_v1 }
 0x19b   : > { %v1660_v38 = vpop.f32.mrf.mxu0 }
 0x19c   : > { %v1661_v41 = vadd.f32 %v1660_v38, %v1572_v16  ;;  %6785 = vmatpush3.bf16.msra.mxu0 %v7341_v35  ;;  %v3378_v16 = vrot.slane %v3376_v9, 1  ;;  %v7366_v38 = vld [vmem:[%s9178_s1 + $0x78] sm:$0xff]  }
 0x19d   : > { %6805 = vmatpush3.bf16.msra.mxu1 %v7342_v36  ;;  %v6544_v44 = vpop.f32.mrf.mxu0  ;;  %6786 = vmatprep.subr.bf16.mxu0 %v7545_v1  ;;  %v3615_v36 = vpack.c.bf16 %v3614_v33, %v3614_v33  ;;  %v8855_v33 = vld [vmem:[%s9183_s6] ss:$0 sm:$0xff] }
 0x19e   : > { %6806 = vmatprep.subr.bf16.mxu1 %v7545_v1  ;;  %v3379_v25 = vor.u32 %v3378_v16, %v3374_v15  ;;  %v7373_v44 = vld [vmem:[%s9178_s1 + $0x210] sm:$0xff]   ;;  %v7389_v16 = vld [vmem:[%s9178_s1 + $0x18] sm:$0xff]  }
 0x19f   : > { %v1663_v46 = vpop.f32.mrf.mxu0  ;;  %v7386_v15 = vld [vmem:[%s9178_s1 + $0xb0] sm:$0xff]  }
 0x1a0   : > { %6787 = vmatpush3.bf16.msra.mxu0 %v7343_v42  ;;  %v7371_v42 = vld [vmem:[%s9178_s1 + $0x218] sm:$0xff]   ;;  %v7375_v46 = vld [vmem:[%s9178_s1 + $0x208] sm:$0xff]  }
 0x1a1   : > { %6807 = vmatpush3.bf16.msra.mxu1 %v7344_v45  ;;  %v6545_v50 = vpop.f32.mrf.mxu0  ;;  %6812 = vmatprep.subr.bf16.mxu0 %v7545_v1  ;;  %v7372_v45 = vld [vmem:[%s9178_s1 + $0x60] sm:$0xff]  }
 0x1a2   : > { %6832 = vmatprep.subr.bf16.mxu1 %v7545_v1  ;;  %v8757_v50 = vld [vmem:[%s7707_s24 + $0x1c] sm:$0x1] }
 0x1a3   : > { %6789 = vmatmul.mubr.bf16.vlgmr.msra.gmra.mxu0 %v3038_v47  ;;  %v5697_v47 = vld [vmem:[%s7707_s24 + $0x20] sm:$0xe] }
 0x1a4   : > { %v1770_v18 = vpop.f32.mrf.mxu1  ;;  %6809 = vmatmul.mubr.bf16.vlgmr.msra.gmra.mxu1 %v3149_v48  ;;  %6813 = vmatpush3.bf16.msra.mxu0 %v7347_v49  ;;  %v7374_v48 = vld [vmem:[%s9178_s1 + $0x58] sm:$0xff]  }
 0x1a5   : > { %v8620_v53 = vadd.f32 %v1770_v18, %v1661_v41  ;;  %6833 = vmatpush3.bf16.msra.mxu1 %v7348_v51  ;;  %6814 = vmatprep.subr.bf16.mxu0 %v7545_v1  ;;  %v7368_v41 = vld [vmem:[%s9178_s1 + $0x70] sm:$0xff]   ;;  %v8754_v49 = vld [vmem:[%s7707_s24 + $0x18] sm:$0xf]  ;;  %v5714_v18 = vcombine.low %v5697_v47, %v8656_v4 }
 0x1a6   : > { %v6564_v55 = vpop.f32.mrf.mxu1  ;;  %6834 = vmatprep.subr.bf16.mxu1 %v7545_v1  ;;  %6828 = vmatprep.mubr.msk.bf16.mxu0 %vm7546_vm0, %v7545_v1 }
 0x1a7   : > { %6848 = vmatprep.mubr.msk.bf16.mxu1 %vm7546_vm0, %v7545_v1 }
 0x1a8   : > { %v1773_v56 = vpop.f32.mrf.mxu1  ;;  %6815 = vmatpush3.bf16.msra.mxu0 %v7349_v52  ;;  %v7377_v52 = vld [vmem:[%s9178_s1 + $0x200] sm:$0xff]  }
 0x1a9   : > { %6835 = vmatpush3.bf16.msra.mxu1 %v7350_v54  ;;  %6816 = vmatprep.subr.bf16.mxu0 %v7545_v1  ;;  %v5757_v54 = vcombine.low %v8754_v49, %v8757_v50  ;;  %v7376_v56 = vld [vmem:[%s9178_s1 + $0x50] sm:$0xff]  }
 0x1aa   : > { %v6565_v59 = vpop.f32.mrf.mxu1  ;;  %6836 = vmatprep.subr.bf16.mxu1 %v7545_v1 }
 0x1ab   : > { %v7380_v59 = vld [vmem:[%s9178_s1 + $0x38] sm:$0xff]   ;;  %v3727_v4 = vshrl.u32 %v5757_v54, 16 }
 0x1ac   : > { %6817 = vmatpush3.bf16.msra.mxu0 %v7351_v57 }
 0x1ad   : > { %6837 = vmatpush3.bf16.msra.mxu1 %v7352_v58  ;;  %6818 = vmatprep.subr.bf16.mxu0 %v7545_v1  ;;  %v3490_v58 = vrot.slane %v5714_v18, 1 }
 0x1ae   : > { %6838 = vmatprep.subr.bf16.mxu1 %v7545_v1 }
 0x1b0   : > { %6819 = vmatpush3.bf16.msra.mxu0 %v7353_v61  ;;  %v3729_v61 = vshll.u32 %v5757_v54, 16 }
 0x1b1   : > { %6839 = vmatpush3.bf16.msra.mxu1 %v7354_v62  ;;  %6820 = vmatprep.subr.bf16.mxu0 %v7545_v1 }
 0x1b2   : > { %6840 = vmatprep.subr.bf16.mxu1 %v7545_v1 }
 0x1b4   : > { %6821 = vmatpush3.bf16.msra.mxu0 %v7355_v63  ;;  %v7379_v63 = vld [vmem:[%s9178_s1 + $0x48] sm:$0xff]  }
 0x1b5   : > { %6841 = vmatpush3.bf16.msra.mxu1 %v7356_v0  ;;  %6822 = vmatprep.subr.bf16.mxu0 %v7545_v1 }
 0x1b6   : > { %6842 = vmatprep.subr.bf16.mxu1 %v7545_v1 }
 0x1b8   : > { %6823 = vmatpush3.bf16.msra.mxu0 %v7357_v5  ;;  %v3731_v5 = vrot.slane %v3729_v61, 1  ;;  %v7407_v61 = vld [vmem:[%s9178_s1 + $0x120] sm:$0xff]  }
 0x1b9   : > { %6843 = vmatpush3.bf16.msra.mxu1 %v7358_v7  ;;  %6824 = vmatprep.subr.bf16.mxu0 %v7545_v1 }
 0x1ba   : > { %6844 = vmatprep.subr.bf16.mxu1 %v7545_v1  ;;  %v3732_v9 = vor.u32 %v3731_v5, %v3727_v4  ;;  %v7412_v4 = vld [vmem:[%s9178_s1 + $0xc0] sm:$0xff]  }
 0x1bb   : > { %v8678_v13 = vpop.f32.mrf.mxu0 }
 0x1bc   : > { %6825 = vmatpush3.bf16.msra.mxu0 %v7359_v8  ;;  %v1886_v23 = vadd.f32 %v8678_v13, %v8620_v53 }
 0x1bd   : > { %6845 = vmatpush3.bf16.msra.mxu1 %v7360_v10  ;;  %v6584_v19 = vpop.f32.mrf.mxu0  ;;  %6826 = vmatprep.subr.bf16.mxu0 %v7545_v1  ;;  %v7385_v10 = vld [vmem:[%s9178_s1 + $0x28] sm:$0xff]  }
 0x1be   : > { %6846 = vmatprep.subr.bf16.mxu1 %v7545_v1  ;;  %v7391_v19 = vld [vmem:[%s9178_s1 + $0x10] sm:$0xff]  }
 0x1bf   : > { %v1883_v22 = vpop.f32.mrf.mxu0 }
 0x1c0   : > { %6827 = vmatpush3.bf16.msra.mxu0 %v7361_v14  ;;  %v7387_v14 = vld [vmem:[%s9178_s1 + $0x20] sm:$0xff]   ;;  %v7392_v22 = vld [vmem:[%s9178_s1 + $0x98] sm:$0xff]  }
 0x1c1   : > { %6847 = vmatpush3.bf16.msra.mxu1 %v7362_v20  ;;  %v6585_v28 = vpop.f32.mrf.mxu0  ;;  %6852 = vmatprep.subr.bf16.mxu0 %v7545_v1  ;;  %v7390_v20 = vld [vmem:[%s9178_s1 + $0xa0] sm:$0xff]  }
 0x1c2   : > { %6872 = vmatprep.subr.bf16.mxu1 %v7545_v1  ;;  %v7394_v28 = vld [vmem:[%s9178_s1 + $0x90] sm:$0xff]  }
 0x1c3   : > { %6829 = vmatmul.mubr.bf16.vlgmr.msra.gmra.mxu0 %v5645_v24 }
 0x1c4   : > { %v8700_v31 = vpop.f32.mrf.mxu1  ;;  %6849 = vmatmul.mubr.bf16.vlgmr.msra.gmra.mxu1 %v3379_v25  ;;  %6853 = vmatpush3.bf16.msra.mxu0 %v7364_v26  ;;  %v7395_v25 = vld [vmem:[%s9178_s1] sm:$0xff]  }
 0x1c5   : > { %6873 = vmatpush3.bf16.msra.mxu1 %v3621_v30  ;;  %6854 = vmatprep.subr.bf16.mxu0 %v7545_v1  ;;  %v2006_v26 = vadd.f32 %v8700_v31, %v1886_v23 }
 0x1c6   : > { %v6604_v34 = vpop.f32.mrf.mxu1  ;;  %6874 = vmatprep.mubr.msk.bf16.mxu1 %vm7546_vm0, %v7545_v1  ;;  %6878 = vmatprep.subr.bf16.mxu1 %v7545_v1 }
 0x1c7   : > { %6868 = vmatprep.mubr.msk.bf16.mxu0 %vm7546_vm0, %v7545_v1  ;;  %v5774_v34 = vld [vmem:[%s7707_s24 + $0x18] sm:$0xe] }
 0x1c8   : > { %v2003_v35 = vpop.f32.mrf.mxu1  ;;  %6855 = vmatpush3.bf16.msra.mxu0 %v7365_v32  ;;  %v7396_v32 = vld [vmem:[%s9178_s1 + $0x88] sm:$0xff]  }
 0x1c9   : > { %6856 = vmatprep.subr.bf16.mxu0 %v7545_v1 }
 0x1ca   : > { %v6605_v39 = vpop.f32.mrf.mxu1 }
 0x1cb   : > { %v8864_v39 = vld [vmem:[%s9184_s7] ss:$0 sm:$0xff] }
 0x1cc   : > { %6875 = vmatmul.mubr.msk.bf16.vlgmr.msra.gmra.mxu1 %vm1372_vm2, %v3615_v36  ;;  %6857 = vmatpush3.bf16.msra.mxu0 %v7367_v37 }
 0x1cd   : > { %6879 = vmatpush3.bf16.msra.mxu1 %v7366_v38  ;;  %6858 = vmatprep.subr.bf16.mxu0 %v7545_v1 }
 0x1ce   : > { %6880 = vmatprep.subr.bf16.mxu1 %v7545_v1  ;;  %6894 = vmatprep.mubr.msk.bf16.mxu1 %vm7546_vm0, %v7545_v1 }
 0x1d0   : > { %6859 = vmatpush3.bf16.msra.mxu0 %v7369_v40  ;;  %v7399_v40 = vld [vmem:[%s9178_s1 + $0xf0] sm:$0xff]  }
 0x1d1   : > { %6881 = vmatpush3.bf16.msra.mxu1 %v7368_v41  ;;  %6860 = vmatprep.subr.bf16.mxu0 %v7545_v1  ;;  %v5791_v41 = vcombine.low %v5774_v34, %v8757_v50  ;;  %v7427_v34 = vld [vmem:[%s9178_s1 + $0x148] sm:$0xff]  }
 0x1d2   : > { %6882 = vmatprep.subr.bf16.mxu1 %v7545_v1 }
 0x1d3   : > { %v3930_v50 = vrot.slane %v5791_v41, 1 }
 0x1d4   : > { %6861 = vmatpush3.bf16.msra.mxu0 %v7371_v42 }
 0x1d5   : > { %6883 = vmatpush3.bf16.msra.mxu1 %v7370_v43  ;;  %6862 = vmatprep.subr.bf16.mxu0 %v7545_v1 }
 0x1d6   : > { %6884 = vmatprep.subr.bf16.mxu1 %v7545_v1 }
 0x1d8   : > { %6863 = vmatpush3.bf16.msra.mxu0 %v7373_v44  ;;  %v7398_v44 = vld [vmem:[%s9178_s1 + $0x80] sm:$0xff]  }
 0x1d9   : > { %6885 = vmatpush3.bf16.msra.mxu1 %v7372_v45  ;;  %6864 = vmatprep.subr.bf16.mxu0 %v7545_v1 }
 0x1da   : > { %6886 = vmatprep.subr.bf16.mxu1 %v7545_v1 }
 0x1db   : > { %v8760_v51 = vpop.f32.mrf.mxu0 }
 0x1dc   : > { %6865 = vmatpush3.bf16.msra.mxu0 %v7375_v46  ;;  %v2117_v53 = vadd.f32 %v8760_v51, %v2006_v26  ;;  %v7402_v51 = vld [vmem:[%s9178_s1 + $0xe8] sm:$0xff]  }
 0x1dd   : > { %6887 = vmatpush3.bf16.msra.mxu1 %v7374_v48  ;;  %v6624_v55 = vpop.f32.mrf.mxu0  ;;  %6866 = vmatprep.subr.bf16.mxu0 %v7545_v1 }
 0x1de   : > { %6888 = vmatprep.subr.bf16.mxu1 %v7545_v1 }
 0x1df   : > { %v2114_v57 = vpop.f32.mrf.mxu0 }
 0x1e0   : > { %6867 = vmatpush3.bf16.msra.mxu0 %v7377_v52  ;;  %v7406_v57 = vld [vmem:[%s9178_s1 + $0xd8] sm:$0xff]  }
 0x1e1   : > { %6889 = vmatpush3.bf16.msra.mxu1 %v7376_v56  ;;  %v6625_v62 = vpop.f32.mrf.mxu0  ;;  %6898 = vmatprep.subr.bf16.mxu0 %v7545_v1  ;;  %v7404_v56 = vld [vmem:[%s9178_s1 + $0xe0] sm:$0xff]  }
 0x1e2   : > { %6890 = vmatprep.subr.bf16.mxu1 %v7545_v1  ;;  %v7410_v62 = vld [vmem:[%s9178_s1 + $0xc8] sm:$0xff]  }
 0x1e3   : > { %6869 = vmatmul.mubr.bf16.vlgmr.msra.gmra.mxu0 %v3490_v58  ;;  %v7405_v58 = vld [vmem:[%s9178_s1 + $0x128] sm:$0xff]  }
 0x1e4   : > { %v2221_v0 = vpop.f32.mrf.mxu1  ;;  %6899 = vmatpush3.bf16.msra.mxu0 %v7380_v59  ;;  %6914 = vmatprep.mubr.msk.bf16.mxu0 %vm7546_vm0, %v7545_v1  ;;  %v7408_v59 = vld [vmem:[%s9178_s1 + $0xd0] sm:$0xff]  }
 0x1e5   : > { %6891 = vmatpush3.bf16.msra.mxu1 %v7379_v63  ;;  %6900 = vmatprep.subr.bf16.mxu0 %v7545_v1  ;;  %v2227_v30 = vadd.f32 %v2221_v0, %v2117_v53  ;;  %v7409_v63 = vld [vmem:[%s9178_s1 + $0x118] sm:$0xff]   ;;  %v5827_v0 = vld [vmem:[%s7707_s24 + $0x20] sm:$0xf] }
 0x1e6   : > { %v6644_v7 = vpop.f32.mrf.mxu1  ;;  %6892 = vmatprep.subr.bf16.mxu1 %v7545_v1  ;;  %v7421_v53 = vld [vmem:[%s9178_s1 + $0x160] sm:$0xff]  }
 0x1e7   : > { %v5802_v7 = vld [vmem:[%s7707_s24 + $0x20] sm:$0xf] }
 0x1e8   : > { %v2224_v8 = vpop.f32.mrf.mxu1  ;;  %6901 = vmatpush3.bf16.msra.mxu0 %v7382_v2  ;;  %v8924_v2 = vld [vmem:[%s7707_s24 + $0x24] sm:$0x1] }
 0x1e9   : > { %6893 = vmatpush3.bf16.msra.mxu1 %v7381_v6  ;;  %6902 = vmatprep.subr.bf16.mxu0 %v7545_v1  ;;  %v5845_v5 = vcombine.low %v5827_v0, %v8924_v2  ;;  %v7411_v6 = vld [vmem:[%s9178_s1 + $0x110] sm:$0xff]   ;;  %v7414_v8 = vld [vmem:[%s9178_s1 + $0x178] sm:$0xff]  }
 0x1ea   : > { %v6645_v12 = vpop.f32.mrf.mxu1  ;;  %6918 = vmatprep.subr.bf16.mxu1 %v7545_v1 }
 0x1ec   : > { %6895 = vmatmul.mubr.bf16.vlgmr.msra.gmra.mxu1 %v3732_v9  ;;  %6903 = vmatpush3.bf16.msra.mxu0 %v7385_v10  ;;  %v4157_v9 = vshll.u32 %v5845_v5, 16  ;;  %v7413_v10 = vld [vmem:[%s9178_s1 + $0x108] sm:$0xff]  }
 0x1ed   : > { %6919 = vmatpush3.bf16.msra.mxu1 %v7384_v11  ;;  %6904 = vmatprep.subr.bf16.mxu0 %v7545_v1 }
 0x1ee   : > { %6920 = vmatprep.subr.bf16.mxu1 %v7545_v1  ;;  %6934 = vmatprep.mubr.msk.bf16.mxu1 %vm7546_vm0, %v7545_v1 }
 0x1f0   : > { %6905 = vmatpush3.bf16.msra.mxu0 %v7387_v14  ;;  %v7416_v14 = vld [vmem:[%s9178_s1 + $0x170] sm:$0xff]  }
 0x1f1   : > { %6921 = vmatpush3.bf16.msra.mxu1 %v7386_v15  ;;  %6906 = vmatprep.subr.bf16.mxu0 %v7545_v1  ;;  %v4155_v15 = vshrl.u32 %v5845_v5, 16 }
 0x1f2   : > { %6922 = vmatprep.subr.bf16.mxu1 %v7545_v1 }
 0x1f4   : > { %6907 = vmatpush3.bf16.msra.mxu0 %v7389_v16  ;;  %v4159_v16 = vrot.slane %v4157_v9, 1  ;;  %v7443_v9 = vld [vmem:[%s9178_s1 + $0x218] sm:$0xff]  }
 0x1f5   : > { %6923 = vmatpush3.bf16.msra.mxu1 %v7388_v17  ;;  %6908 = vmatprep.subr.bf16.mxu0 %v7545_v1 }
 0x1f6   : > { %6924 = vmatprep.subr.bf16.mxu1 %v7545_v1 }
 0x1f8   : > { %6909 = vmatpush3.bf16.msra.mxu0 %v7391_v19 }
 0x1f9   : > { %6925 = vmatpush3.bf16.msra.mxu1 %v7390_v20  ;;  %6910 = vmatprep.subr.bf16.mxu0 %v7545_v1  ;;  %v7415_v20 = vld [vmem:[%s9178_s1 + $0x100] sm:$0xff]  }
 0x1fa   : > { %6926 = vmatprep.subr.bf16.mxu1 %v7545_v1 }
 0x1fb   : > { %v2341_v24 = vpop.f32.mrf.mxu0 }
 0x1fc   : > { %6911 = vmatpush3.bf16.msra.mxu0 %v7393_v21  ;;  %v2347_v35 = vadd.f32 %v2341_v24, %v2227_v30  ;;  %v4160_v24 = vor.u32 %v4159_v16, %v4155_v15  ;;  %v7422_v30 = vld [vmem:[%s9178_s1 + $0x1a8] sm:$0xff]   ;;  %v5968_v15 = vld [vmem:[%s7945_s14 + $0xf3] ss:$2 sm:$0xff] }
 0x1fd   : > { %6927 = vmatpush3.bf16.msra.mxu1 %v7392_v22  ;;  %v6664_v27 = vpop.f32.mrf.mxu0  ;;  %6912 = vmatprep.subr.bf16.mxu0 %v7545_v1  ;;  %v7445_v16 = vld [vmem:[%s9178_s1 + $0x210] sm:$0xff]  }
 0x1fe   : > { %6928 = vmatprep.subr.bf16.mxu1 %v7545_v1  ;;  %v7418_v27 = vld [vmem:[%s9178_s1 + $0x1b8] sm:$0xff]  }
 0x1ff   : > { %v2344_v13 = vpop.f32.mrf.mxu0 }
 0x200   : > { %6913 = vmatpush3.bf16.msra.mxu0 %v7395_v25  ;;  %v7419_v25 = vld [vmem:[%s9178_s1 + $0x168] sm:$0xff]   ;;  %v7420_v13 = vld [vmem:[%s9178_s1 + $0x1b0] sm:$0xff]  }
 0x201   : > { %6929 = vmatpush3.bf16.msra.mxu1 %v7394_v28  ;;  %v6665_v31 = vpop.f32.mrf.mxu0  ;;  %6938 = vmatprep.subr.bf16.mxu0 %v7545_v1 }
 0x202   : > { %6930 = vmatprep.subr.bf16.mxu1 %v7545_v1  ;;  %v7425_v31 = vld [vmem:[%s9178_s1 + $0x150] sm:$0xff]  }
 0x203   : > { %6915 = vmatmul.mubr.bf16.vlgmr.msra.gmra.mxu0 %v8754_v49  ;;  %v2535_v36 = vpop.f32.mrf.mxu0 }
 0x204   : > { %v2452_v37 = vpop.f32.mrf.mxu1  ;;  %v2548_v38 = vmul.f32 %v8855_v33, %v2535_v36  ;;  %6939 = vmatpush3.bf16.msra.mxu0 %v7397_v29  ;;  %6954 = vmatprep.mubr.msk.bf16.mxu0 %vm7546_vm0, %v7545_v1  ;;  %v7423_v29 = vld [vmem:[%s9178_s1 + $0x158] sm:$0xff]  }
 0x205   : > { %v2458_v42 = vadd.f32 %v2452_v37, %v2347_v35  ;;  %6931 = vmatpush3.bf16.msra.mxu1 %v7396_v32  ;;  %v6690_v43 = vpop.f32.mrf.mxu0  ;;  %6940 = vmatprep.subr.bf16.mxu0 %v7545_v1  ;;  %v7424_v32 = vld [vmem:[%s9178_s1 + $0x1a0] sm:$0xff]   ;;  %v7426_v36 = vld [vmem:[%s9178_s1 + $0x198] sm:$0xff]  }
 0x206   : > { %v6684_v45 = vpop.f32.mrf.mxu1  ;;  %6932 = vmatprep.subr.bf16.mxu1 %v7545_v1  ;;  %v2556_v47 = vadd.f32 %v8864_v39, %v2548_v38  ;;  %v5854_v35 = vld [vmem:[%s7707_s24 + $0x20] sm:$0xe]  ;;  %v7431_v43 = vld [vmem:[%s9178_s1 + $0x188] sm:$0xff]  }
 0x207   : > { %v2466_v46 = vmul.f32 %v8511_v60, %v2458_v42  ;;  %v2538_v48 = vpop.f32.mrf.mxu0  ;;  %v7401_v60 = vld [vmem:[%s9178_s1 + $0x138] sm:$0xff]   ;;  %v5871_v37 = vcombine.low %v5854_v35, %v8924_v2  ;;  %v7429_v38 = vld [vmem:[%s9178_s1 + $0x140] sm:$0xff]   ;;  %v7442_v2 = vld [vmem:[%s9178_s1 + $0x1d0] sm:$0xff]  }
 0x208   : > { %v2455_v49 = vpop.f32.mrf.mxu1  ;;  %6941 = vmatpush3.bf16.msra.mxu0 %v7399_v40  ;;  %v7428_v40 = vld [vmem:[%s9178_s1 + $0x190] sm:$0xff]   ;;  %v7432_v42 = vld [vmem:[%s9178_s1 + $0x1f8] sm:$0xff]  }
 0x209   : > { %v2474_v18 = vadd.f32 %v8523_v3, %v2466_v46  ;;  %6933 = vmatpush3.bf16.msra.mxu1 %v7398_v44  ;;  %v6691_v52 = vpop.f32.mrf.mxu0  ;;  %6942 = vmatprep.subr.bf16.mxu0 %v7545_v1  ;;  %v7403_v3 = vld [vmem:[%s9178_s1 + $0x130] sm:$0xff]   ;;  %v4271_v41 = vrot.slane %v5871_v37, 1  ;;  %v7433_v49 = vld [vmem:[%s9178_s1 + $0x180] sm:$0xff]  }
 0x20a   : > { %v6685_v54 = vpop.f32.mrf.mxu1  ;;  %6958 = vmatprep.subr.bf16.mxu1 %v7545_v1 }
 0x20b   : > { %v2557_v55 = vadd.f32 %v2556_v47, %v2474_v18  ;;  %v7434_v47 = vld [vmem:[%s9178_s1 + $0x1f0] sm:$0xff]  }
 0x20c   : > { %6935 = vmatmul.mubr.bf16.vlgmr.msra.gmra.mxu1 %v3930_v50  ;;  %6943 = vmatpush3.bf16.msra.mxu0 %v7402_v51 }
 0x20d   : > { %5499 = vst [vmem:[%s8543_s22 + $0x8] sm:$0xff] %v2557_v55  ;;  %6959 = vmatpush3.bf16.msra.mxu1 %v7401_v60  ;;  %6944 = vmatprep.subr.bf16.mxu0 %v7545_v1  ;;  %v7436_v60 = vld [vmem:[%s9178_s1 + $0x1e8] sm:$0xff]  }
 0x20e   : > { %6960 = vmatprep.subr.bf16.mxu1 %v7545_v1  ;;  %6974 = vmatprep.mubr.msk.bf16.mxu1 %vm7546_vm0, %v7545_v1  ;;  %v5882_v55 = vld [vmem:[%s7707_s24 + $0x28] sm:$0xf] }
 0x210   : > { %6945 = vmatpush3.bf16.msra.mxu0 %v7404_v56  ;;  %v7435_v56 = vld [vmem:[%s9178_s1 + $0x238] sm:$0xff]  }
 0x211   : > { %6961 = vmatpush3.bf16.msra.mxu1 %v7403_v3  ;;  %6946 = vmatprep.subr.bf16.mxu0 %v7545_v1 }
 0x212   : > { %6962 = vmatprep.subr.bf16.mxu1 %v7545_v1 }
 0x214   : > { %6947 = vmatpush3.bf16.msra.mxu0 %v7406_v57  ;;  %v7438_v57 = vld [vmem:[%s9178_s1 + $0x1e0] sm:$0xff]  }
 0x215   : > { %6963 = vmatpush3.bf16.msra.mxu1 %v7405_v58  ;;  %6948 = vmatprep.subr.bf16.mxu0 %v7545_v1  ;;  %v7437_v58 = vld [vmem:[%s9178_s1 + $0x230] sm:$0xff]  }
 0x216   : > { %6964 = vmatprep.subr.bf16.mxu1 %v7545_v1 }
 0x218   : > { %6949 = vmatpush3.bf16.msra.mxu0 %v7408_v59  ;;  %v7440_v59 = vld [vmem:[%s9178_s1 + $0x1d8] sm:$0xff]  }
 0x219   : > { %6965 = vmatpush3.bf16.msra.mxu1 %v7407_v61  ;;  %6950 = vmatprep.subr.bf16.mxu0 %v7545_v1  ;;  %v5907_v61 = vld [vmem:[%s7707_s24 + $0x28] sm:$0xf] }
 0x21a   : > { %6966 = vmatprep.subr.bf16.mxu1 %v7545_v1 }
 0x21c   : > { %6951 = vmatpush3.bf16.msra.mxu0 %v7410_v62  ;;  %v5908_v62 = vld [vmem:[%s7707_s24 + $0x2c] sm:$0x1] }
 0x21d   : > { %6967 = vmatpush3.bf16.msra.mxu1 %v7409_v63  ;;  %6952 = vmatprep.subr.bf16.mxu0 %v7545_v1  ;;  %v7439_v63 = vld [vmem:[%s9178_s1 + $0x228] sm:$0xff]   ;;  %v5925_v0 = vcombine.low %v5907_v61, %v5908_v62 }
 0x21e   : > { %6968 = vmatprep.subr.bf16.mxu1 %v7545_v1 }
 0x21f   : > { %v4498_v5 = vshll.u32 %v5925_v0, 16 }
 0x220   : > { %6953 = vmatpush3.bf16.msra.mxu0 %v7412_v4  ;;  %v7441_v4 = vld [vmem:[%s9178_s1 + $0x220] sm:$0xff]  }
 0x221   : > { %6969 = vmatpush3.bf16.msra.mxu1 %v7411_v6  ;;  %6978 = vmatprep.subr.bf16.mxu0 %v7545_v1  ;;  %v7444_v6 = vld [vmem:[%s9178_s1 + $0x1c8] sm:$0xff]  }
 0x222   : > { %6970 = vmatprep.subr.bf16.mxu1 %v7545_v1 }
 0x223   : > { %v2694_v11 = vpop.f32.mrf.mxu0  ;;  %6955 = vmatmul.mubr.bf16.vlgmr.msra.gmra.mxu0 %v5802_v7  ;;  %v5964_v7 = vld [vmem:[%s7945_s14 + $0xdb] ss:$2 sm:$0xff] }
 0x224   : > { %v2782_v12 = vpop.f32.mrf.mxu1  ;;  %6979 = vmatpush3.bf16.msra.mxu0 %v7414_v8  ;;  %6994 = vmatprep.mubr.msk.bf16.mxu0 %vm7546_vm0, %v7545_v1  ;;  %v5965_v8 = vld [vmem:[%s7945_s14 + $0xdc] ss:$2 sm:$0xff] }
 0x225   : > { %v2783_v17 = vadd.f32 %v2782_v12, %v2694_v11  ;;  %6971 = vmatpush3.bf16.msra.mxu1 %v7413_v10  ;;  %v6710_v19 = vpop.f32.mrf.mxu0  ;;  %6980 = vmatprep.subr.bf16.mxu0 %v7545_v1  ;;  %v4496_v10 = vshrl.u32 %v5925_v0, 16  ;;  %v4500_v11 = vrot.slane %v4498_v5, 1  ;;  %v4727_v12 = vmax.f32 %v5964_v7, %v5965_v8 }
 0x226   : > { %v6730_v21 = vpop.f32.mrf.mxu1  ;;  %6972 = vmatprep.subr.bf16.mxu1 %v7545_v1 }
 0x227   : > { %v2697_v22 = vpop.f32.mrf.mxu0  ;;  %v4501_v19 = vor.u32 %v4500_v11, %v4496_v10  ;;  %v5969_v21 = vld [vmem:[%s7945_s14 + $0xf4] ss:$2 sm:$0xff] }
 0x228   : > { %v2785_v23 = vpop.f32.mrf.mxu1  ;;  %6981 = vmatpush3.bf16.msra.mxu0 %v7416_v14  ;;  %v7446_v14 = vld [vmem:[%s9178_s1 + $0x1c0] sm:$0xff]   ;;  %v7448_v22 = vld [vmem:[%s9178_s1 + $0x208] sm:$0xff]  }
 0x229   : > { %6973 = vmatpush3.bf16.msra.mxu1 %v7415_v20  ;;  %v6711_v26 = vpop.f32.mrf.mxu0  ;;  %6982 = vmatprep.subr.bf16.mxu0 %v7545_v1  ;;  %v4733_v20 = vmax.f32 %v4727_v12, %v5968_v15 }
 0x22a   : > { %v6731_v28 = vpop.f32.mrf.mxu1  ;;  %6998 = vmatprep.subr.bf16.mxu1 %v7545_v1 }
 0x22b   : > { %v4736_v26 = vmax.f32 %v4733_v20, %v5969_v21 }
 0x22c   : > { %6975 = vmatmul.mubr.bf16.vlgmr.msra.gmra.mxu1 %v4160_v24  ;;  %6983 = vmatpush3.bf16.msra.mxu0 %v7419_v25  ;;  %v5934_v24 = vld [vmem:[%s7707_s24 + $0x28] sm:$0xe]  ;;  %s7451_s24 = scalar_lea.vmem %s9121_s15, 512 }
 0x22d   : > { %6999 = vmatpush3.bf16.msra.mxu1 %v7418_v27  ;;  %6984 = vmatprep.subr.bf16.mxu0 %v7545_v1  ;;  %v5951_v28 = vcombine.low %v5934_v24, %v5908_v62  ;;  %p7452_p12 = scmp.ne.s32.totalorder %s9121_s15, %s7451_s24  ;;  %p7459_p2 = scmp.lt.s32.totalorder %s7457_s16, %s7451_s24 }
 0x22e   : > { %7000 = vmatprep.subr.bf16.mxu1 %v7545_v1  ;;  %7014 = vmatprep.mubr.msk.bf16.mxu1 %vm7546_vm0, %v7545_v1 }
 0x22f   : > { %p7453_p13 = pnand %p7452_p12, %p7648_p5  ;;  %p7460_p3 = por %p7459_p2, %p7458_p1 }
 0x230   : > { %6985 = vmatpush3.bf16.msra.mxu0 %v7421_v53 }
 0x231   : > { %7001 = vmatpush3.bf16.msra.mxu1 %v7420_v13  ;;  %6986 = vmatprep.subr.bf16.mxu0 %v7545_v1  ;;  %v7449_v13 = vld [vmem:[%s9178_s1 + $0x200] sm:$0xff]   ;;  %p7454_p0 = pneg %p7453_p13 }
 0x232   : > { %7002 = vmatprep.subr.bf16.mxu1 %v7545_v1 }
 0x233   : > { %p7461_p4 = pnand %p7460_p3, %p7454_p0 }
 0x234   : > { %6987 = vmatpush3.bf16.msra.mxu0 %v7423_v29 }
 0x235   : > { %7003 = vmatpush3.bf16.msra.mxu1 %v7422_v30  ;;  %6988 = vmatprep.subr.bf16.mxu0 %v7545_v1 }
 0x236   : > { %7004 = vmatprep.subr.bf16.mxu1 %v7545_v1 }
 0x238   : > { %6989 = vmatpush3.bf16.msra.mxu0 %v7425_v31  ;;  %v4737_v31 = vpack.c.bf16 %v4736_v26, %v4736_v26 }
 0x239   : > { %7005 = vmatpush3.bf16.msra.mxu1 %v7424_v32  ;;  %6990 = vmatprep.subr.bf16.mxu0 %v7545_v1 }
 0x23a   : > { %7006 = vmatprep.subr.bf16.mxu1 %v7545_v1 }
 0x23c   : > { %6991 = vmatpush3.bf16.msra.mxu0 %v7427_v34  ;;  %v4612_v34 = vrot.slane %v5951_v28, 1 }
 0x23d   : > { %7007 = vmatpush3.bf16.msra.mxu1 %v7426_v36  ;;  %6992 = vmatprep.subr.bf16.mxu0 %v7545_v1 }
 0x23e   : > { %7008 = vmatprep.subr.bf16.mxu1 %v7545_v1 }
 0x240   : > { %6993 = vmatpush3.bf16.msra.mxu0 %v7429_v38 }
 0x241   : > { %7009 = vmatpush3.bf16.msra.mxu1 %v7428_v40  ;;  %7018 = vmatprep.subr.bf16.mxu0 %v7545_v1 }
 0x242   : > { %7010 = vmatprep.subr.bf16.mxu1 %v7545_v1 }
 0x243   : > { %v2892_v44 = vpop.f32.mrf.mxu0  ;;  %6995 = vmatmul.mubr.bf16.vlgmr.msra.gmra.mxu0 %v4271_v41 }
 0x244   : > { %v2898_v45 = vadd.f32 %v2892_v44, %v2783_v17  ;;  %v3002_v46 = vpop.f32.mrf.mxu1  ;;  %7019 = vmatpush3.bf16.msra.mxu0 %v7432_v42  ;;  %7034 = vmatprep.mubr.msk.bf16.mxu0 %vm7546_vm0, %v7545_v1  ;;  %v4738_v17 = vld [vmem:[%s9182_s5] sm:$0x3] }
 0x245   : > { %7011 = vmatpush3.bf16.msra.mxu1 %v7431_v43  ;;  %v6750_v48 = vpop.f32.mrf.mxu0  ;;  %7020 = vmatprep.subr.bf16.mxu0 %v7545_v1  ;;  %v4743_v23 = vsel %vm1376_vm1, %v4738_v17, 0 }
 0x246   : > { %v9024_v50 = vadd.f32 %v3002_v46, %v2898_v45  ;;  %v6770_v51 = vpop.f32.mrf.mxu1  ;;  %7012 = vmatprep.subr.bf16.mxu1 %v7545_v1 }
 0x247   : > { %v2895_v18 = vpop.f32.mrf.mxu0 }
 0x248   : > { %v3005_v52 = vpop.f32.mrf.mxu1  ;;  %7021 = vmatpush3.bf16.msra.mxu0 %v7434_v47 }
 0x249   : > { %7013 = vmatpush3.bf16.msra.mxu1 %v7433_v49  ;;  %v6751_v54 = vpop.f32.mrf.mxu0  ;;  %7022 = vmatprep.subr.bf16.mxu0 %v7545_v1 }
 0x24a   : > { %v6771_v3 = vpop.f32.mrf.mxu1  ;;  %7038 = vmatprep.subr.bf16.mxu1 %v7545_v1  ;;  %v5723_v54 = vld [vmem:[%s9179_s2] ss:$0 sm:$0xff] }
 0x24b   : > { %v5724_v3 = vld [vmem:[%s9180_s3] ss:$0 sm:$0xff] }
 0x24c   : > { %7015 = vmatmul.mubr.bf16.vlgmr.msra.gmra.mxu1 %v5882_v55  ;;  %7023 = vmatpush3.bf16.msra.mxu0 %v7436_v60 }
 0x24d   : > { %7039 = vmatpush3.bf16.msra.mxu1 %v7435_v56  ;;  %7024 = vmatprep.subr.bf16.mxu0 %v7545_v1 }
 0x24e   : > { %7040 = vmatprep.subr.bf16.mxu1 %v7545_v1  ;;  %7054 = vmatprep.mubr.msk.bf16.mxu1 %vm7546_vm0, %v7545_v1 }
 0x250   : > { %7025 = vmatpush3.bf16.msra.mxu0 %v7438_v57 }
 0x251   : > { %7041 = vmatpush3.bf16.msra.mxu1 %v7437_v58  ;;  %7026 = vmatprep.subr.bf16.mxu0 %v7545_v1 }
 0x252   : > { %7042 = vmatprep.subr.bf16.mxu1 %v7545_v1 }
 0x254   : > { %7027 = vmatpush3.bf16.msra.mxu0 %v7440_v59 }
 0x255   : > { %7043 = vmatpush3.bf16.msra.mxu1 %v7439_v63  ;;  %7028 = vmatprep.subr.bf16.mxu0 %v7545_v1 }
 0x256   : > { %7044 = vmatprep.subr.bf16.mxu1 %v7545_v1 }
 0x258   : > { %7029 = vmatpush3.bf16.msra.mxu0 %v7442_v2 }
 0x259   : > { %7045 = vmatpush3.bf16.msra.mxu1 %v7441_v4  ;;  %7030 = vmatprep.subr.bf16.mxu0 %v7545_v1 }
 0x25a   : > { %7046 = vmatprep.subr.bf16.mxu1 %v7545_v1 }
 0x25c   : > { %7031 = vmatpush3.bf16.msra.mxu0 %v7444_v6 }
 0x25d   : > { %7047 = vmatpush3.bf16.msra.mxu1 %v7443_v9  ;;  %7032 = vmatprep.subr.bf16.mxu0 %v7545_v1 }
 0x25e   : > { %7048 = vmatprep.subr.bf16.mxu1 %v7545_v1 }
 0x260   : > { %7033 = vmatpush3.bf16.msra.mxu0 %v7446_v14 }
 0x261   : > { %7049 = vmatpush3.bf16.msra.mxu1 %v7445_v16  ;;  %7058 = vmatprep.subr.bf16.mxu0 %v7545_v1 }
 0x262   : > { %7050 = vmatprep.subr.bf16.mxu1 %v7545_v1 }
 0x263   : > { %v3122_v25 = vpop.f32.mrf.mxu0  ;;  %7035 = vmatmul.mubr.bf16.vlgmr.msra.gmra.mxu0 %v4501_v19 }
 0x264   : > { %v3233_v27 = vpop.f32.mrf.mxu1  ;;  %7059 = vmatpush3.bf16.msra.mxu0 %v4743_v23  ;;  %7060 = vmatprep.mubr.msk.bf16.mxu0 %vm7546_vm0, %v7545_v1  ;;  %v3128_v49 = vadd.f32 %v3122_v25, %v9024_v50 }
 0x265   : > { %7051 = vmatpush3.bf16.msra.mxu1 %v7448_v22  ;;  %v6790_v53 = vpop.f32.mrf.mxu0 }
 0x266   : > { %v6810_v29 = vpop.f32.mrf.mxu1  ;;  %7052 = vmatprep.subr.bf16.mxu1 %v7545_v1  ;;  %v3239_v51 = vadd.f32 %v3233_v27, %v3128_v49 }
 0x267   : > { %v3125_v30 = vpop.f32.mrf.mxu0 }
 0x268   : > { %v3236_v32 = vpop.f32.mrf.mxu1 }
 0x269   : > { %7053 = vmatpush3.bf16.msra.mxu1 %v7449_v13  ;;  %v6791_v35 = vpop.f32.mrf.mxu0 }
 0x26a   : > { %v6811_v36 = vpop.f32.mrf.mxu1 }
 0x26b   : > { %7061 = vmatmul.mubr.msk.bf16.vlgmr.msra.gmra.mxu0 %vm1372_vm2, %v4737_v31 }
 0x26c   : > { %7055 = vmatmul.mubr.bf16.vlgmr.msra.gmra.mxu1 %v4612_v34 }
 0x283   : > { %v3343_v37 = vpop.f32.mrf.mxu0 }
 0x284   : > { %v3463_v38 = vpop.f32.mrf.mxu1  ;;  %v3349_v18 = vadd.f32 %v3343_v37, %v3239_v51 }
 0x285   : > { %v6830_v40 = vpop.f32.mrf.mxu0 }
 0x286   : > { %v6850_v41 = vpop.f32.mrf.mxu1  ;;  %v3469_v52 = vadd.f32 %v3463_v38, %v3349_v18 }
 0x287   : > { %v3346_v42 = vpop.f32.mrf.mxu0 }
 0x288   : > { %v3466_v43 = vpop.f32.mrf.mxu1 }
 0x289   : > { %v6831_v44 = vpop.f32.mrf.mxu0 }
 0x28a   : > { %v6851_v45 = vpop.f32.mrf.mxu1 }
 0x28c   : > { %v3657_v46 = vpop.f32.mrf.mxu1 }
 0x28d   : > { %v3670_v55 = vmul.f32 %v8855_v33, %v3657_v46 }
 0x28e   : > { %v6876_v1 = vpop.f32.mrf.mxu1 }
 0x28f   : > { %v3678_v50 = vadd.f32 %v8864_v39, %v3670_v55 }
 0x290   : > { %v3660_v47 = vpop.f32.mrf.mxu1 }
 0x292   : > { %v6877_v48 = vpop.f32.mrf.mxu1 }
 0x2a3   : > { %v3574_v60 = vpop.f32.mrf.mxu0 }
 0x2a4   : > { %v3580_v56 = vadd.f32 %v3574_v60, %v3469_v52 }
 0x2a5   : > { %v6870_v57 = vpop.f32.mrf.mxu0 }
 0x2a6   : > { %v3588_v58 = vmul.f32 %v5723_v54, %v3580_v56 }
 0x2a7   : > { %v3577_v59 = vpop.f32.mrf.mxu0 }
 0x2a8   : > { %v3596_v61 = vadd.f32 %v5724_v3, %v3588_v58 }
 0x2a9   : > { %v6871_v62 = vpop.f32.mrf.mxu0 }
 0x2aa   : > { %v3679_v63 = vadd.f32 %v3678_v50, %v3596_v61 }
 0x2ac   : > { %5736 = vst [vmem:[%s8543_s22 + $0x10] sm:$0xff] %v3679_v63  ;;  %v3816_v0 = vpop.f32.mrf.mxu1 }
 0x2ae   : > { %v6896_v2 = vpop.f32.mrf.mxu1 }
 0x2b0   : > { %v3819_v4 = vpop.f32.mrf.mxu1 }
 0x2b2   : > { %v6897_v5 = vpop.f32.mrf.mxu1 }
 0x2c3   : > { %v3904_v6 = vpop.f32.mrf.mxu0 }
 0x2c4   : > { %v3905_v7 = vadd.f32 %v3904_v6, %v3816_v0 }
 0x2c5   : > { %v6916_v8 = vpop.f32.mrf.mxu0 }
 0x2c7   : > { %v3907_v9 = vpop.f32.mrf.mxu0 }
 0x2c9   : > { %v6917_v10 = vpop.f32.mrf.mxu0 }
 0x2cc   : > { %v4014_v11 = vpop.f32.mrf.mxu1 }
 0x2cd   : > { %v4020_v12 = vadd.f32 %v4014_v11, %v3905_v7 }
 0x2ce   : > { %v6936_v14 = vpop.f32.mrf.mxu1 }
 0x2d0   : > { %v4017_v15 = vpop.f32.mrf.mxu1 }
 0x2d2   : > { %v6937_v16 = vpop.f32.mrf.mxu1 }
 0x2e3   : > { %v4124_v17 = vpop.f32.mrf.mxu0 }
 0x2e4   : > { %v4130_v32 = vadd.f32 %v4124_v17, %v4020_v12 }
 0x2e5   : > { %v6956_v19 = vpop.f32.mrf.mxu0 }
 0x2e7   : > { %v4127_v20 = vpop.f32.mrf.mxu0 }
 0x2e9   : > { %v6957_v21 = vpop.f32.mrf.mxu0 }
 0x2ec   : > { %v4244_v22 = vpop.f32.mrf.mxu1 }
 0x2ed   : > { %v4250_v35 = vadd.f32 %v4244_v22, %v4130_v32 }
 0x2ee   : > { %v6976_v23 = vpop.f32.mrf.mxu1 }
 0x2f0   : > { %v4247_v24 = vpop.f32.mrf.mxu1 }
 0x2f2   : > { %v6977_v25 = vpop.f32.mrf.mxu1 }
 0x303   : > { %v4355_v26 = vpop.f32.mrf.mxu0 }
 0x304   : > { %v4361_v37 = vadd.f32 %v4355_v26, %v4250_v35 }
 0x305   : > { %v6996_v27 = vpop.f32.mrf.mxu0 }
 0x307   : > { %v4358_v28 = vpop.f32.mrf.mxu0 }
 0x309   : > { %v6997_v53 = vpop.f32.mrf.mxu0 }
 0x30c   : > { %v4465_v13 = vpop.f32.mrf.mxu1 }
 0x30d   : > { %v4471_v40 = vadd.f32 %v4465_v13, %v4361_v37 }
 0x30e   : > { %v7016_v29 = vpop.f32.mrf.mxu1 }
 0x310   : > { %v4468_v30 = vpop.f32.mrf.mxu1 }
 0x312   : > { %v7017_v31 = vpop.f32.mrf.mxu1 }
 0x323   : > { %v4585_v34 = vpop.f32.mrf.mxu0 }
 0x324   : > { %v4591_v42 = vadd.f32 %v4585_v34, %v4471_v40 }
 0x325   : > { %v7036_v36 = vpop.f32.mrf.mxu0 }
 0x327   : > { %v4588_v38 = vpop.f32.mrf.mxu0 }
 0x329   : > { %v7037_v41 = vpop.f32.mrf.mxu0 }
 0x32b   : > { %v4779_v43 = vpop.f32.mrf.mxu0 }
 0x32c   : > { %v4696_v44 = vpop.f32.mrf.mxu1  ;;  %v4792_v45 = vmul.f32 %v8855_v33, %v4779_v43 }
 0x32d   : > { %v4702_v46 = vadd.f32 %v4696_v44, %v4591_v42  ;;  %v7062_v1 = vpop.f32.mrf.mxu0 }
 0x32e   : > { %v7056_v47 = vpop.f32.mrf.mxu1  ;;  %v4800_v49 = vadd.f32 %v8864_v39, %v4792_v45 }
 0x32f   : > { %v4710_v48 = vmul.f32 %v5723_v54, %v4702_v46  ;;  %v4782_v51 = vpop.f32.mrf.mxu0 }
 0x330   : > { %v4699_v18 = vpop.f32.mrf.mxu1 }
 0x331   : > { %v4718_v52 = vadd.f32 %v5724_v3, %v4710_v48  ;;  %v7063_v60 = vpop.f32.mrf.mxu0 }
 0x332   : > { %v7057_v55 = vpop.f32.mrf.mxu1 }
 0x333   : > { %v4801_v33 = vadd.f32 %v4800_v49, %v4718_v52 }
 0x335   : > { %5973 = vst [vmem:[%s8543_s22 + $0x18] sm:$0xff] %v4801_v33 }
 0x336   : > { %7464 = shalt.err (!%p7461_p4)
}
 0x337   : > { %s7465_s26 = scalar_lea.hbm %s9119_s30, 512  ;;  %s7469_s18 = scalar_lea.hbm %s9185_s8, 2048 }
 0x338   : > { %p7466_p6 = scmp.ne.s32.totalorder %s9119_s30, %s7465_s26  ;;  %p7470_p10 = scmp.lt.s32.totalorder %s9119_s30, %s9185_s8 }
 0x339   : > { %p7471_p11 = scmp.lt.s32.totalorder %s7469_s18, %s7465_s26 }
 0x33a   : > { %p7467_p8 = pnand %p7466_p6, %p7648_p5 }
 0x33b   : > { %p7472_p12 = por %p7471_p11, %p7470_p10 }
 0x33c   : > { %p7468_p9 = pneg %p7467_p8 }
 0x33e   : > { %p7473_p13 = pnand %p7472_p12, %p7468_p9 }
 0x340   : > { %7476 = shalt.err (!%p7473_p13)
}
 0x341   : > { %s7548_s14 = smov 128   ;;  %s7549_s24 = smov 8  }
 0x342   : > { %7064 = dma.vmem_to_hbm [thread:$0]  (%p7648_p5), %s9121_s15, 512, %s9119_s30, %s9126_s23, %s7548_s14, %s7548_s14, %s7549_s24  }
 0x343 PF: > { %p7070_p0 = scmp.ge.s32.totalorder %s7543_s12, 2  ;;  %s4835_s0 = sand.u32 1, %s7515_s27  }
 0x344   : > { %s4836_s13 = scalar_lea.sflag [#allocation3], %s4835_s0 }
 0x345   : > { %p7067_p1 = pnand %p7070_p0, %p7654_p7 }
 0x347   : > { %p7068_p2 = pneg %p7067_p1 }
 0x349   : > { %7510 = dma.done.wait (%p7068_p2), %s4836_s13, 512  }
 0x34a   : > { %7512 = vsyncadd (%p7068_p2), %s4836_s13, 4294966784  ;;  %s21_s12 = sadd.s32 1, %s7543_s12   ;;  %s9194_s19 = sld [smem:[#allocation5_spill]] }
 0x34b   : > { %p18_p3 = scmp.ge.s32.totalorder %s21_s12, 6   ;;  %s9195_s15 = sld [smem:[#allocation6_spill]] }
 0x34c   : > { %s9196_s27 = smov %s7519_s28  ;;  %s9197_s28 = smov %s7523_s29 }
 0x34d   : > { %s9198_s29 = smov %s7664_s25  ;;  %s9199_s30 = smov %s7535_s10 }
 0x34e   : > { %s9200_s9 = smov %s7539_s11  ;;  %20 = sbr.rel (!%p18_p3) target bundleno = 7 (0x7), region = 131 }
 0x350   : > { %s9201_s10 = smov %s9194_s19 }
 0x351   : > { %s9202_s11 = smov %s9195_s15 }
 0x353   :  { %4841 = vsyncpa [#allocation3], 1 }
 0x354   :  { %4843 = vsyncpa [#allocation3 + $0x1], 1 }

</bundles_post_ra>
